<compile_context>
chip_gen: v6e
topology: v6e:2x2x1
jax: 0.10.0
libtpu: 0.0.40
codegen_flags: <defaults>
</compile_context>

<pallas_src>
import functools

import jax
import jax.numpy as jnp
import numpy as np
from jax import lax
from jax.experimental import pallas as pl
from jax.experimental.pallas import tpu as pltpu

_BF16 = jnp.bfloat16

_VMEM_LIMIT_CACHE = [None]


def _vmem_limit_bytes():
    # Generation-aware VMEM budget: ~80% of physical (≈51 MiB on v7x's 64 MiB,
    # ≈102 MiB on v5e/v6e's 128 MiB), with a conservative fallback.
    if _VMEM_LIMIT_CACHE[0] is None:
        limit = 48 * 1024 * 1024
        try:
            info = pltpu.get_tpu_info()
            cap = getattr(info, "vmem_capacity_bytes", None)
            if cap:
                limit = int(cap * 0.8)
        except Exception:
            pass
        _VMEM_LIMIT_CACHE[0] = limit
    return _VMEM_LIMIT_CACHE[0]


def _compiler_params(dims):
    return pltpu.CompilerParams(dimension_semantics=dims,
                                vmem_limit_bytes=_vmem_limit_bytes())


# ----------------------------------------------------------------------------
# Kernels
# ----------------------------------------------------------------------------
def _matmul_kernel(apply_relu, x_ref, w_ref, b_ref, o_ref):
    """(TM, Cin) @ (Cin, Cout) + shared bias (+ ReLU)."""
    y = jnp.dot(x_ref[...], w_ref[...], preferred_element_type=jnp.float32)
    y = y + b_ref[...]
    if apply_relu:
        y = jnp.maximum(y, 0.0)
    o_ref[...] = y.astype(o_ref.dtype)


def _matmul_per_image_bias_kernel(apply_relu, x_ref, w_ref, b_ref, o_ref):
    """(1, TH, Cin) tile of one image @ (Cin, Cout) + per-image bias (+ ReLU)."""
    y = jnp.dot(x_ref[0], w_ref[...], preferred_element_type=jnp.float32)
    y = y + b_ref[0]
    if apply_relu:
        y = jnp.maximum(y, 0.0)
    o_ref[0] = y.astype(o_ref.dtype)


def _conv3x3_kernel(H, W, taps, pr, pc, x_ref, w_ref, b_ref, o_ref, pad_ref):
    """3x3 conv (stride 1, padding == dilation), folded-BN bias + ReLU.

    One image per grid step.  `taps` is the static list of (row_off, col_off)
    offsets that can touch real pixels; `w_ref` holds only those taps.  All tap
    matmuls (bf16 in, f32 accumulate) are chained into one expression, so there
    is no accumulator scratch and no read-modify-write of partial sums.
    `pad_ref` is a halo-padded copy of the image: only the halo strips that a
    surviving tap can actually read are zero-filled.
    """
    Cin = x_ref.shape[-1]
    Cout = w_ref.shape[-1]
    Wp = pad_ref.shape[1]

    # Build the halo-padded image (halo strips zeroed, interior <- x).
    if pr:
        pad_ref[:pr, :, :] = jnp.zeros((pr, Wp, Cin), pad_ref.dtype)
        pad_ref[pr + H:, :, :] = jnp.zeros((pr, Wp, Cin), pad_ref.dtype)
    if pc:
        pad_ref[pr:pr + H, :pc, :] = jnp.zeros((H, pc, Cin), pad_ref.dtype)
        pad_ref[pr:pr + H, pc + W:, :] = jnp.zeros((H, pc, Cin), pad_ref.dtype)
    pad_ref[pr:pr + H, pc:pc + W, :] = x_ref[0]

    acc = None
    for i, (oh, ow) in enumerate(taps):
        patch = pad_ref[pr + oh:pr + oh + H, pc + ow:pc + ow + W, :]
        contrib = jnp.dot(patch.reshape(H * W, Cin), w_ref[i],
                          preferred_element_type=jnp.float32)
        acc = contrib if acc is None else acc + contrib

    y = jnp.maximum(acc + b_ref[...], 0.0)
    o_ref[0] = y.reshape(H, W, Cout).astype(o_ref.dtype)


# ----------------------------------------------------------------------------
# Wrappers (NHWC, bf16 activations, BN folded into weights)
# ----------------------------------------------------------------------------
def matmul_bias_act_pallas(x2d, w, bias, *, relu=True, out_dtype=_BF16):
    """Flattened 1x1 conv: (M, Cin) @ (Cin, Cout) + bias (+ ReLU)."""
    M, Cin = x2d.shape
    Cout = w.shape[1]
    TM = 256 if M >= 256 else max(8, -(-M // 8) * 8)
    Mp = -(-M // TM) * TM
    xp = x2d if Mp == M else jnp.pad(x2d, ((0, Mp - M), (0, 0)))
    out = pl.pallas_call(
        functools.partial(_matmul_kernel, relu),
        out_shape=jax.ShapeDtypeStruct((Mp, Cout), out_dtype),
        grid_spec=pltpu.PrefetchScalarGridSpec(
            num_scalar_prefetch=0,
            grid=(Mp // TM,),
            in_specs=[
                pl.BlockSpec((TM, Cin), lambda m: (m, 0)),
                pl.BlockSpec((Cin, Cout), lambda m: (0, 0)),
                pl.BlockSpec((1, Cout), lambda m: (0, 0)),
            ],
            out_specs=pl.BlockSpec((TM, Cout), lambda m: (m, 0)),
        ),
        compiler_params=_compiler_params(("parallel",)),
    )(xp.astype(_BF16), w.astype(_BF16), bias.reshape(1, Cout).astype(jnp.float32))
    return out if Mp == M else out[:M]


def conv1x1_pallas(x_nhwc, w_cin_cout, bias, *, relu=True, out_dtype=_BF16):
    N, H, W, Cin = x_nhwc.shape
    Cout = w_cin_cout.shape[1]
    out = matmul_bias_act_pallas(x_nhwc.reshape(N * H * W, Cin), w_cin_cout,
                                 bias, relu=relu, out_dtype=out_dtype)
    return out.reshape(N, H, W, Cout)


def matmul_per_image_bias_pallas(x3d, w, bias_per_image, *, relu=True,
                                 out_dtype=_BF16):
    """x3d (N, HW, Cin) @ (Cin, Cout) + per-image bias (N, Cout) (+ ReLU)."""
    N, HW, Cin = x3d.shape
    Cout = w.shape[1]
    TH = 256 if HW >= 256 else max(8, -(-HW // 8) * 8)
    HWp = -(-HW // TH) * TH
    xp = x3d if HWp == HW else jnp.pad(x3d, ((0, 0), (0, HWp - HW), (0, 0)))
    out = pl.pallas_call(
        functools.partial(_matmul_per_image_bias_kernel, relu),
        out_shape=jax.ShapeDtypeStruct((N, HWp, Cout), out_dtype),
        grid_spec=pltpu.PrefetchScalarGridSpec(
            num_scalar_prefetch=0,
            grid=(N, HWp // TH),
            in_specs=[
                pl.BlockSpec((1, TH, Cin), lambda n, t: (n, t, 0)),
                pl.BlockSpec((Cin, Cout), lambda n, t: (0, 0)),
                pl.BlockSpec((1, 1, Cout), lambda n, t: (n, 0, 0)),
            ],
            out_specs=pl.BlockSpec((1, TH, Cout), lambda n, t: (n, t, 0)),
        ),
        compiler_params=_compiler_params(("parallel", "parallel")),
    )(xp.astype(_BF16), w.astype(_BF16),
      bias_per_image.reshape(N, 1, Cout).astype(jnp.float32))
    return out if HWp == HW else out[:, :HW]


def conv3x3_bn_relu_pallas(x_nhwc, w_oihw, scale, bias, *, dilation=1,
                           out_dtype=_BF16):
    """3x3 conv (stride 1), folded BN + ReLU.

    NOTE: assumes padding == dilation (as in this module's _ASPPConv /
    _ConvBNReLU); the static tap-dropping below is only valid in that case.
    """
    N, H, W, Cin = x_nhwc.shape
    Cout = w_oihw.shape[0]
    d = int(dilation)

    # Static surviving-tap list: a tap whose offset is >= the image extent only
    # ever multiplies zero padding and is dropped at trace time.
    taps = []
    for kh in range(3):
        for kw in range(3):
            oh, ow = (kh - 1) * d, (kw - 1) * d
            if abs(oh) >= H or abs(ow) >= W:
                continue
            taps.append((kh, kw, oh, ow))

    w_t = jnp.transpose(w_oihw, (2, 3, 1, 0)) * scale[None, None, None, :]  # (3,3,Cin,Cout)

    if len(taps) == 1:
        # Degenerate (large rate on a small map): centre tap only -> 1x1 conv.
        return conv1x1_pallas(x_nhwc, w_t[1, 1], bias, relu=True,
                              out_dtype=out_dtype)

    pr = d if any(oh != 0 for (_, _, oh, _) in taps) else 0
    pc = d if any(ow != 0 for (_, _, _, ow) in taps) else 0
    w_used = jnp.stack([w_t[kh, kw] for (kh, kw, _, _) in taps],
                       axis=0).astype(_BF16)                    # (n_used,Cin,Cout)
    tap_offsets = tuple((oh, ow) for (_, _, oh, ow) in taps)
    b = bias.reshape(1, Cout).astype(jnp.float32)

    # TODO(synk): row-strip spatial tiling with d-row halos (weights resident)
    # for production feature-map sizes; whole images fit comfortably here.
    out = pl.pallas_call(
        functools.partial(_conv3x3_kernel, H, W, tap_offsets, pr, pc),
        out_shape=jax.ShapeDtypeStruct((N, H, W, Cout), out_dtype),
        grid_spec=pltpu.PrefetchScalarGridSpec(
            num_scalar_prefetch=0,
            grid=(N,),
            in_specs=[
                pl.BlockSpec((1, H, W, Cin), lambda n: (n, 0, 0, 0)),
                pl.BlockSpec((len(taps), Cin, Cout), lambda n: (0, 0, 0)),
                pl.BlockSpec((1, Cout), lambda n: (0, 0)),
            ],
            out_specs=pl.BlockSpec((1, H, W, Cout), lambda n: (n, 0, 0, 0)),
            scratch_shapes=[
                pltpu.VMEM((H + 2 * pr, W + 2 * pc, Cin), _BF16),
            ]),
        compiler_params=_compiler_params(("parallel",)),
    )(x_nhwc.astype(_BF16), w_used, b)
    return out


# ----------------------------------------------------------------------------
# Bilinear interpolation matrix (F.interpolate, mode='bilinear',
# align_corners=True), used by both the Pallas wrapper and the reference.
# ----------------------------------------------------------------------------
def _interp_matrix(n_in, n_out):
    if n_in == 1:
        return jnp.ones((n_out, 1), jnp.float32)
    if n_out == 1:
        src = jnp.zeros((1,), jnp.float32)
    else:
        src = jnp.arange(n_out, dtype=jnp.float32) * ((n_in - 1) / (n_out - 1))
    i0 = jnp.clip(jnp.floor(src).astype(jnp.int32), 0, n_in - 2)
    w = src - i0.astype(jnp.float32)
    rows = jnp.arange(n_out)
    m = jnp.zeros((n_out, n_in), jnp.float32)
    m = m.at[rows, i0].add(1.0 - w)
    m = m.at[rows, i0 + 1].add(w)
    return m


# ----------------------------------------------------------------------------
# Full _DeepLabHead forward (Pallas path).  NCHW in / NCHW out.
# ----------------------------------------------------------------------------
def deeplab_head_pallas(x_nchw, c1_nchw, params):
    x = jnp.transpose(x_nchw, (0, 2, 3, 1))        # boundary transpose only
    c1 = jnp.transpose(c1_nchw, (0, 2, 3, 1))
    N, Hx, Wx, Cx = x.shape
    _, Hc, Wc, _ = c1.shape
    ap = params["aspp"]
    OC = 256
    rates = (12, 24, 36)

    def fold(bn, eps=1e-5):
        g, b, m, v = bn
        s = g / jnp.sqrt(v + eps)
        return s, b - m * s

    def fold_w1x1(w_oihw, s):
        return jnp.transpose(w_oihw[:, :, 0, 0]) * s[None, :]   # (Cin, Cout) f32

    # ---- ASPP conv branches (b0 1x1 + b1/b2/b3 dilated 3x3) ------------------
    # Rates >= the feature-map extent degenerate to centre-tap 1x1 convs; then
    # all four branches read x once through a single (Cx -> 1024) matmul.
    degenerate = all(r >= Hx and r >= Wx for r in rates)
    s0, bb0 = fold(ap["b0_bn"])
    if degenerate:
        ws, bs = [fold_w1x1(ap["b0_w"], s0)], [bb0]
        for name in ("b1", "b2", "b3"):
            s, bb = fold(ap[name + "_bn"])
            ws.append(jnp.transpose(ap[name + "_w"][:, :, 1, 1]) * s[None, :])
            bs.append(bb)
        w_fused = jnp.concatenate(ws, axis=1)                    # (Cx, 4*OC)
        b_fused = jnp.concatenate(bs, axis=0)                    # (4*OC,)
        feats = matmul_bias_act_pallas(x.reshape(N * Hx * Wx, Cx),
                                       w_fused, b_fused, relu=True)
        feats = feats.reshape(N, Hx * Wx, 4 * OC)
    else:
        f1 = conv1x1_pallas(x, fold_w1x1(ap["b0_w"], s0), bb0, relu=True)
        s, bb = fold(ap["b1_bn"])
        f2 = conv3x3_bn_relu_pallas(x, ap["b1_w"], s, bb, dilation=rates[0])
        s, bb = fold(ap["b2_bn"])
        f3 = conv3x3_bn_relu_pallas(x, ap["b2_w"], s, bb, dilation=rates[1])
        s, bb = fold(ap["b3_bn"])
        f4 = conv3x3_bn_relu_pallas(x, ap["b3_w"], s, bb, dilation=rates[2])
        feats = jnp.concatenate([f1, f2, f3, f4],
                                axis=-1).reshape(N, Hx * Wx, 4 * OC)

    # ---- image-pooling branch (GAP -> 1x1 -> BN -> ReLU); tiny, wrapper jnp --
    sp, bp = fold(ap["pool_bn"])
    pooled = jnp.mean(x.astype(jnp.float32), axis=(1, 2))                 # (N, Cx)
    wp = fold_w1x1(ap["pool_w"], sp).astype(_BF16)
    feat5 = jnp.maximum(jnp.dot(pooled.astype(_BF16), wp,
                                preferred_element_type=jnp.float32)
                        + bp[None, :], 0.0)                               # (N, OC)

    # ---- projection: the pooled branch is spatially constant, so its term is
    # folded into a per-image bias -> the 1280-channel concat never exists -----
    spr, bpr = fold(ap["proj_bn"])
    wproj = fold_w1x1(ap["proj_w"], spr)                                  # (5*OC, OC)
    w_feats, w_pool = wproj[:4 * OC], wproj[4 * OC:]
    bias_per_image = bpr[None, :] + jnp.dot(
        feat5.astype(_BF16), w_pool.astype(_BF16),
        preferred_element_type=jnp.float32)                               # (N, OC)
    xa = matmul_per_image_bias_pallas(feats, w_feats, bias_per_image, relu=True)
    xa = xa.reshape(N, Hx, Wx, OC)
    # nn.Dropout(0.5): identity in eval.  # TODO(synk): training-mode dropout.

    # ---- bilinear upsample to c1 resolution (align_corners=True) -------------
    Rh = _interp_matrix(Hx, Hc)
    Rw = _interp_matrix(Wx, Wc)
    xu = jnp.einsum("oh,pw,nhwc->nopc", Rh, Rw, xa.astype(jnp.float32))

    # ---- c1 low-level branch: Cout padded 48 -> 128 (lane-dense stores) ------
    C1P = 128
    s, bb = fold(params["c1_bn"])
    w_c1 = jnp.zeros((C1P,) + params["c1_w"].shape[1:], jnp.float32)
    w_c1 = w_c1.at[:48].set(params["c1_w"])
    s_pad = jnp.zeros((C1P,), jnp.float32).at[:48].set(s)
    b_pad = jnp.zeros((C1P,), jnp.float32).at[:48].set(bb)
    c1f = conv3x3_bn_relu_pallas(c1, w_c1, s_pad, b_pad, dilation=1)  # (.,.,.,128)

    # ---- decoder block (concat = 256 + 128 = 384 lanes) -----------------------
    y_in = jnp.concatenate([xu.astype(_BF16), c1f], axis=-1)
    s, bb = fold(params["blk1_bn"])
    w1 = params["blk1_w"]                                   # (256, 304, 3, 3)
    w1p = jnp.zeros((OC, OC + C1P, 3, 3), jnp.float32)
    w1p = w1p.at[:, :OC].set(w1[:, :OC]).at[:, OC:OC + 48].set(w1[:, OC:OC + 48])
    y = conv3x3_bn_relu_pallas(y_in, w1p, s, bb, dilation=1)
    # nn.Dropout(0.5): identity in eval.
    s, bb = fold(params["blk2_bn"])
    y = conv3x3_bn_relu_pallas(y, params["blk2_w"], s, bb, dilation=1)
    # nn.Dropout(0.1): identity in eval.

    # ---- classifier: Cout padded to 128 for lane-dense stores, sliced after --
    nc = params["cls_w"].shape[0]
    CLSP = 128
    wcls = jnp.zeros((OC, CLSP), jnp.float32)
    wcls = wcls.at[:, :nc].set(jnp.transpose(params["cls_w"][:, :, 0, 0]))
    bcls = jnp.zeros((CLSP,), jnp.float32).at[:nc].set(params["cls_b"])
    logits = matmul_bias_act_pallas(y.reshape(N * Hc * Wc, OC), wcls, bcls,
                                    relu=False, out_dtype=jnp.float32)
    logits = logits.reshape(N, Hc, Wc, CLSP)[..., :nc]
    return jnp.transpose(logits, (0, 3, 1, 2))                            # -> NCHW


# ----------------------------------------------------------------------------
# Pure-JAX reference (faithful to the PyTorch module, eval BN/dropout).
# Conv operands are cast to bf16 with f32 accumulation to match the kernel's
# MXU precision; BN / bias math stays f32.
# ----------------------------------------------------------------------------
def deeplab_head_ref(x, c1, params):
    def conv(v, w, padding=0, dilation=1):
        return lax.conv_general_dilated(
            v.astype(jnp.bfloat16), w.astype(jnp.bfloat16),
            window_strides=(1, 1),
            padding=[(padding, padding), (padding, padding)],
            rhs_dilation=(dilation, dilation),
            dimension_numbers=("NCHW", "OIHW", "NCHW"),
            preferred_element_type=jnp.float32)

    def bn(v, p, eps=1e-5):
        g, b, m, vv = p
        s = g / jnp.sqrt(vv + eps)
        return v * s[None, :, None, None] + (b - m * s)[None, :, None, None]

    relu = jax.nn.relu
    ap = params["aspp"]
    f1 = relu(bn(conv(x, ap["b0_w"]), ap["b0_bn"]))
    f2 = relu(bn(conv(x, ap["b1_w"], 12, 12), ap["b1_bn"]))
    f3 = relu(bn(conv(x, ap["b2_w"], 24, 24), ap["b2_bn"]))
    f4 = relu(bn(conv(x, ap["b3_w"], 36, 36), ap["b3_bn"]))
    pool = jnp.mean(x, axis=(2, 3), keepdims=True)
    f5 = relu(bn(conv(pool, ap["pool_w"]), ap["pool_bn"]))
    f5 = jnp.broadcast_to(f5, f1.shape)
    xa = jnp.concatenate([f1, f2, f3, f4, f5], axis=1)
    xa = relu(bn(conv(xa, ap["proj_w"]), ap["proj_bn"]))
    Hc, Wc = c1.shape[2], c1.shape[3]
    Rh = _interp_matrix(xa.shape[2], Hc)
    Rw = _interp_matrix(xa.shape[3], Wc)
    xu = jnp.einsum("oh,pw,nchw->ncop", Rh, Rw, xa)
    c1f = relu(bn(conv(c1, params["c1_w"], 1, 1), params["c1_bn"]))
    y = jnp.concatenate([xu, c1f], axis=1)
    y = relu(bn(conv(y, params["blk1_w"], 1, 1), params["blk1_bn"]))
    y = relu(bn(conv(y, params["blk2_w"], 1, 1), params["blk2_bn"]))
    y = conv(y, params["cls_w"]) + params["cls_b"][None, :, None, None]
    return y


# ----------------------------------------------------------------------------
# Deterministic parameters + test.
# ----------------------------------------------------------------------------
def make_params(key, num_classes=6, c1_channels=256, in_channels=2048):
    keys = iter(jax.random.split(key, 64))

    def conv_w(cout, cin, k):
        fan_in = cin * k * k
        return jax.random.normal(next(keys), (cout, cin, k, k),
                                 jnp.float32) / np.sqrt(fan_in)

    def bn(c):
        return (0.5 + jax.random.uniform(next(keys), (c,), jnp.float32),
                0.1 * jax.random.normal(next(keys), (c,), jnp.float32),
                0.1 * jax.random.normal(next(keys), (c,), jnp.float32),
                0.5 + jax.random.uniform(next(keys), (c,), jnp.float32))

    oc = 256
    return {
        "aspp": {
            "b0_w": conv_w(oc, in_channels, 1), "b0_bn": bn(oc),
            "b1_w": conv_w(oc, in_channels, 3), "b1_bn": bn(oc),
            "b2_w": conv_w(oc, in_channels, 3), "b2_bn": bn(oc),
            "b3_w": conv_w(oc, in_channels, 3), "b3_bn": bn(oc),
            "pool_w": conv_w(oc, in_channels, 1), "pool_bn": bn(oc),
            "proj_w": conv_w(oc, 5 * oc, 1), "proj_bn": bn(oc),
        },
        "c1_w": conv_w(48, c1_channels, 3), "c1_bn": bn(48),
        "blk1_w": conv_w(oc, oc + 48, 3), "blk1_bn": bn(oc),
        "blk2_w": conv_w(oc, oc, 3), "blk2_bn": bn(oc),
        "cls_w": conv_w(num_classes, oc, 1),
        "cls_b": 0.1 * jax.random.normal(next(keys), (num_classes,), jnp.float32),
    }


if __name__ == "__main__":
    key = jax.random.PRNGKey(0)
    kx, kc, kp = jax.random.split(key, 3)

    N, num_classes = 2, 6
    Hx = Wx = 8        # ASPP input (backbone stride-16 features), 2048 channels
    Hc = Wc = 16       # c1 low-level features (stride-4), 256 channels

    x = jax.random.normal(kx, (N, 2048, Hx, Wx), jnp.float32)
    c1 = jax.random.normal(kc, (N, 256, Hc, Wc), jnp.float32)
    params = make_params(kp, num_classes=num_classes)

    out = jax.block_until_ready(deeplab_head_pallas(x, c1, params))
    ref = jax.block_until_ready(deeplab_head_ref(x, c1, params))

    assert out.shape == (N, num_classes, Hc, Wc)
    # Tolerance reflects bf16 MXU operands + BN scale folded into bf16 weights
    # (vs. the reference's scale-after-matmul); structural bugs would be O(1).
    np.testing.assert_allclose(np.asarray(out), np.asarray(ref),
                               atol=5e-2, rtol=5e-2)
    print("KERNEL_OK")
</pallas_src>

<mosaic_0001>
module attributes {stable_mosaic.version = 11 : i64} {
  func.func @_matmul_kernel(%arg0: i32, %arg1: memref<128x2048xbf16, #tpu.memory_space<vmem>>, %arg2: memref<2048x1024xbf16, #tpu.memory_space<vmem>>, %arg3: memref<1x1024xf32, #tpu.memory_space<vmem>>, %arg4: memref<128x1024xbf16, #tpu.memory_space<vmem>>) attributes {dimension_semantics = [#tpu.dimension_semantics<parallel>], iteration_bounds = array<i64: 1>, scalar_prefetch = 0 : i64, scratch_operands = 0 : i64, tpu.core_type = #tpu.core_type<tc>, window_params = [{transform_indices = @transform_0, window_bounds = array<i64: 128, 2048>}, {pipeline_mode = #tpu.pipeline_mode<synchronous>, transform_indices = @transform_1, window_bounds = array<i64: 2048, 1024>}, {pipeline_mode = #tpu.pipeline_mode<synchronous>, transform_indices = @transform_2, window_bounds = array<i64: 1, 1024>}, {transform_indices = @transform_3, window_bounds = array<i64: 128, 1024>}]} {
    %c0 = arith.constant 0 : index
    %c0_0 = arith.constant 0 : index
    %0 = vector.load %arg1[%c0, %c0_0] : memref<128x2048xbf16, #tpu.memory_space<vmem>>, vector<128x2048xbf16>
    %c0_1 = arith.constant 0 : index
    %c0_2 = arith.constant 0 : index
    %1 = vector.load %arg2[%c0_1, %c0_2] : memref<2048x1024xbf16, #tpu.memory_space<vmem>>, vector<2048x1024xbf16>
    %cst = arith.constant dense<0.000000e+00> : vector<128x1024xf32>
    %2 = tpu.matmul %0, %1, %cst {dimension_numbers = #tpu.dot_dimension_numbers<[1], [0], [0], [1], [0, 0, 1, 1], [], []>} : vector<128x2048xbf16>, vector<2048x1024xbf16>, vector<128x1024xf32> -> vector<128x1024xf32>
    %c0_3 = arith.constant 0 : index
    %c0_4 = arith.constant 0 : index
    %3 = vector.load %arg3[%c0_3, %c0_4] : memref<1x1024xf32, #tpu.memory_space<vmem>>, vector<1x1024xf32>
    %4 = vector.broadcast %3 : vector<1x1024xf32> to vector<128x1024xf32>
    %5 = arith.addf %2, %4 : vector<128x1024xf32>
    %cst_5 = arith.constant 0.000000e+00 : f32
    %6 = vector.broadcast %cst_5 : f32 to vector<128x1024xf32>
    %7 = arith.maximumf %5, %6 : vector<128x1024xf32>
    %8 = arith.truncf %7 : vector<128x1024xf32> to vector<128x1024xbf16>
    %c0_6 = arith.constant 0 : index
    %c0_7 = arith.constant 0 : index
    %9 = vector.load %arg4[%c0_6, %c0_7] : memref<128x1024xbf16, #tpu.memory_space<vmem>>, vector<128x1024xbf16>
    tpu.vector_store %arg4[%c0_6, %c0_7], %8 {strides = array<i32>} : memref<128x1024xbf16, #tpu.memory_space<vmem>>, vector<128x1024xbf16>,
    return
  }
  func.func @transform_0(%arg0: i32) -> (i32, i32) {
    %c0_i32 = arith.constant 0 : i32
    %c0_i32_0 = arith.constant 0 : i32
    return %arg0, %c0_i32 : i32, i32
  }
  func.func @transform_1(%arg0: i32) -> (i32, i32) {
    %c0_i32 = arith.constant 0 : i32
    %c0_i32_0 = arith.constant 0 : i32
    %c0_i32_1 = arith.constant 0 : i32
    return %c0_i32, %c0_i32_0 : i32, i32
  }
  func.func @transform_2(%arg0: i32) -> (i32, i32) {
    %c0_i32 = arith.constant 0 : i32
    %c0_i32_0 = arith.constant 0 : i32
    %c0_i32_1 = arith.constant 0 : i32
    return %c0_i32, %c0_i32_0 : i32, i32
  }
  func.func @transform_3(%arg0: i32) -> (i32, i32) {
    %c0_i32 = arith.constant 0 : i32
    %c0_i32_0 = arith.constant 0 : i32
    return %arg0, %c0_i32 : i32, i32
  }
}

</mosaic_0001>

<bundles_post_ra>
// kernel: tpu_custom_call.1
= control target key start
LH: loop header
LB: loop body
LE: loop exit
PB: predicated region body
PF: predicated region fallthrough
CT: control target
= control target key end

     0   :  { %8 = vsyncpa [#allocation3], 0  ;;  %s16339_s0 = inlined_call_operand.hbm [shape: bf16[128,2048], index: 0, kind: input, shape index: {}]   ;;  %s16340_s1 = inlined_call_operand.hbm [shape: bf16[2048,1024], index: 1, kind: input, shape index: {}]   ;;  %s16341_s2 = inlined_call_operand.hbm [shape: f32[1,1024], index: 2, kind: input, shape index: {}]   ;;  %s16342_s3 = inlined_call_operand.hbm [shape: bf16[128,1024], index: 3, kind: output, shape index: {}]  }
   0x1   :  { %9 = vsyncpa [#allocation6], 0 }
   0x2   :  { %10 = vsyncpa [#allocation4], 0  ;;  %s12595_s12 = smov [#allocation5]  }
   0x3   :  { %s28_s13 = sshll.u32 %s12595_s12, 4  ;;  %s29_s13 = int_to_ptr.vmem [resolvable:$true] %s28_s13 }
   0x4   :  { %s12517_s14 = scalar_lea.vmem %s29_s13, 131072  ;;  %p12522_p1 = scmp.lt.s32.totalorder %s29_s13, %s29_s13 }
   0x5   :  { %p12518_p0 = scmp.ne.s32.totalorder %s29_s13, %s12517_s14  ;;  %p12523_p2 = scmp.lt.s32.totalorder %s12517_s14, %s12517_s14 }
   0x7   :  { %p12524_p3 = por %p12523_p2, %p12522_p1 }
   0x9   :  { %p12525_p4 = pnand %p12524_p3, %p12518_p0 }
   0xb   :  { %12528 = shalt.err (!%p12525_p4)
}
   0xc   :  { %s12596_s15 = smov 512   ;;  %s12597_s16 = smov 32  }
   0xd   :  { %34 = dma.hbm_to_vmem [thread:$0]  %s16340_s1, 131072, %s29_s13, [#allocation6], %s12596_s15, %s12596_s15, %s12597_s16  }
   0xe   :  { %s12598_s19 = smov [#allocation2]  }
   0xf   :  { %s16_s20 = sshll.u32 %s12598_s19, 4  ;;  %s17_s20 = int_to_ptr.vmem [resolvable:$true] %s16_s20 }
  0x10   :  { %s12537_s21 = scalar_lea.vmem %s17_s20, 16384  ;;  %p12542_p6 = scmp.lt.s32.totalorder %s17_s20, %s17_s20 }
  0x11   :  { %p12538_p5 = scmp.ne.s32.totalorder %s17_s20, %s12537_s21  ;;  %p12543_p7 = scmp.lt.s32.totalorder %s12537_s21, %s12537_s21 }
  0x13   :  { %p12544_p8 = por %p12543_p7, %p12542_p6 }
  0x15   :  { %p12545_p9 = pnand %p12544_p8, %p12538_p5 }
  0x17   :  { %12548 = shalt.err (!%p12545_p9)
}
  0x18   :  { %s12599_s22 = smov 1024   ;;  %s12600_s23 = smov 64  }
  0x19   :  { %22 = dma.hbm_to_vmem [thread:$0]  %s16339_s0, 16384, %s17_s20, [#allocation3], %s12599_s22, %s12599_s22, %s12600_s23  }
  0x1a   :  { %s12601_s26 = smov [#allocation7]  }
  0x1b   :  { %s41_s27 = sshll.u32 %s12601_s26, 4  ;;  %s42_s27 = int_to_ptr.vmem [resolvable:$true] %s41_s27 }
  0x1c   :  { %s12557_s1 = scalar_lea.vmem %s42_s27, 128  ;;  %p12562_p11 = scmp.lt.s32.totalorder %s42_s27, %s42_s27 }
  0x1d   :  { %p12558_p10 = scmp.ne.s32.totalorder %s42_s27, %s12557_s1  ;;  %p12563_p12 = scmp.lt.s32.totalorder %s12557_s1, %s12557_s1 }
  0x1f   :  { %p12564_p13 = por %p12563_p12, %p12562_p11 }
  0x21   :  { %p12565_p0 = pnand %p12564_p13, %p12558_p10 }
  0x23   :  { %12568 = shalt.err (!%p12565_p0)
}
  0x24   :  { %44 = dma.hbm_to_vmem [thread:$0]  %s16341_s2, 128, %s42_s27, [#allocation6]  }
  0x25   :  { %12589 = dma.done.wait [#allocation3], 16384  }
  0x26   :  { %12590 = vsyncadd [#allocation3], 4294950912 }
  0x27   :  { %12591 = dma.done.wait [#allocation6], 131200  }
  0x28   :  { %12592 = vsyncadd [#allocation6], 4294836096  ;;  %v238_v0 = vld [vmem:[#allocation5 + $0x1c0] sm:$0xff]  ;;  %v12643_v59 = vld [vmem:[#allocation2 + $0x8] sm:$0xff]  ;;  %s12602_s0 = smov [#allocation8]  }
  0x29   :  { %v242_v1 = vld [vmem:[#allocation5 + $0x1e0] sm:$0xff]  ;;  %v12645_v60 = vld [vmem:[#allocation2 + $0x48] sm:$0xff]  ;;  %s11205_s2 = sshll.u32 %s12602_s0, 4  ;;  %s11206_s2 = int_to_ptr.vmem [resolvable:$true] %s11205_s2 }
  0x2a   :  { %v366_v2 = vld [vmem:[#allocation5 + $0x5c0] sm:$0xff]  ;;  %v11403_v3 = vcombine.high %v238_v0, %v242_v1  ;;  %v11402_v5 = vcombine.low %v238_v0, %v242_v1  ;;  %v12649_v63 = vcombine.high %v12643_v59, %v12645_v60  ;;  %s12569_s30 = scalar_lea.vmem %s11206_s2, 8192  ;;  %p12574_p2 = scmp.lt.s32.totalorder %s11206_s2, %s11206_s2 }
  0x2b   :  { %v370_v4 = vld [vmem:[#allocation5 + $0x5e0] sm:$0xff]  ;;  %p12570_p1 = scmp.ne.s32.totalorder %s11206_s2, %s12569_s30  ;;  %p12575_p3 = scmp.lt.s32.totalorder %s12569_s30, %s12569_s30 }
  0x2c   :  { %v230_v6 = vld [vmem:[#allocation5 + $0x180] sm:$0xff]  ;;  %v11531_v8 = vcombine.high %v366_v2, %v370_v4  ;;  %v11530_v9 = vcombine.low %v366_v2, %v370_v4  ;;  %7008 = vmatprep.subr.bf16.mxu0 %v11403_v3  ;;  %16605 = vst [vmem:[#allocation13_spill] sm:$0xff] %v12649_v63  ;;  %7153 = vmatprep.mubr.bf16.mxu1 %v12649_v63 }
  0x2d   :  { %v234_v7 = vld [vmem:[#allocation5 + $0x1a0] sm:$0xff]  ;;  %7009 = vmatpush1.bf16.msra.mxu0 %v11402_v5  ;;  %p12576_p4 = por %p12575_p3, %p12574_p2 }
  0x2e   :  { %v11395_v10 = vcombine.high %v230_v6, %v234_v7  ;;  %v358_v11 = vld [vmem:[#allocation5 + $0x580] sm:$0xff]  ;;  %7121 = vmatprep.subr.bf16.mxu1 %v11531_v8  ;;  %v11394_v18 = vcombine.low %v230_v6, %v234_v7 }
  0x2f   :  { %v362_v12 = vld [vmem:[#allocation5 + $0x5a0] sm:$0xff]  ;;  %7122 = vmatpush1.bf16.msra.mxu1 %v11530_v9  ;;  %p12577_p5 = pnand %p12576_p4, %p12570_p1 }
  0x30   :  { %v222_v13 = vld [vmem:[#allocation5 + $0x140] sm:$0xff]  ;;  %v11523_v14 = vcombine.high %v358_v11, %v362_v12  ;;  %7010 = vmatprep.subr.bf16.mxu0 %v11395_v10  ;;  %v11522_v19 = vcombine.low %v358_v11, %v362_v12 }
  0x31   :  { %v226_v15 = vld [vmem:[#allocation5 + $0x160] sm:$0xff]  ;;  %7011 = vmatpush1.bf16.msra.mxu0 %v11394_v18 }
  0x32   :  { %v350_v16 = vld [vmem:[#allocation5 + $0x540] sm:$0xff]  ;;  %v11387_v20 = vcombine.high %v222_v13, %v226_v15  ;;  %7123 = vmatprep.subr.bf16.mxu1 %v11523_v14  ;;  %v11386_v26 = vcombine.low %v222_v13, %v226_v15 }
  0x33   :  { %v354_v17 = vld [vmem:[#allocation5 + $0x560] sm:$0xff]  ;;  %7124 = vmatpush1.bf16.msra.mxu1 %v11522_v19 }
  0x34   :  { %v11515_v21 = vcombine.high %v350_v16, %v354_v17  ;;  %v214_v22 = vld [vmem:[#allocation5 + $0x100] sm:$0xff]  ;;  %7012 = vmatprep.subr.bf16.mxu0 %v11387_v20  ;;  %v11514_v27 = vcombine.low %v350_v16, %v354_v17 }
  0x35   :  { %v218_v23 = vld [vmem:[#allocation5 + $0x120] sm:$0xff]  ;;  %7013 = vmatpush1.bf16.msra.mxu0 %v11386_v26 }
  0x36   :  { %v342_v24 = vld [vmem:[#allocation5 + $0x500] sm:$0xff]  ;;  %v11379_v28 = vcombine.high %v214_v22, %v218_v23  ;;  %7125 = vmatprep.subr.bf16.mxu1 %v11515_v21  ;;  %v11378_v34 = vcombine.low %v214_v22, %v218_v23 }
  0x37   :  { %v346_v25 = vld [vmem:[#allocation5 + $0x520] sm:$0xff]  ;;  %7126 = vmatpush1.bf16.msra.mxu1 %v11514_v27 }
  0x38   :  { %v11507_v29 = vcombine.high %v342_v24, %v346_v25  ;;  %v206_v30 = vld [vmem:[#allocation5 + $0xc0] sm:$0xff]  ;;  %7014 = vmatprep.subr.bf16.mxu0 %v11379_v28  ;;  %v11506_v35 = vcombine.low %v342_v24, %v346_v25 }
  0x39   :  { %v210_v31 = vld [vmem:[#allocation5 + $0xe0] sm:$0xff]  ;;  %7015 = vmatpush1.bf16.msra.mxu0 %v11378_v34 }
  0x3a   :  { %v334_v32 = vld [vmem:[#allocation5 + $0x4c0] sm:$0xff]  ;;  %v11371_v36 = vcombine.high %v206_v30, %v210_v31  ;;  %7127 = vmatprep.subr.bf16.mxu1 %v11507_v29  ;;  %v11370_v42 = vcombine.low %v206_v30, %v210_v31 }
  0x3b   :  { %v338_v33 = vld [vmem:[#allocation5 + $0x4e0] sm:$0xff]  ;;  %7128 = vmatpush1.bf16.msra.mxu1 %v11506_v35 }
  0x3c   :  { %v11499_v37 = vcombine.high %v334_v32, %v338_v33  ;;  %v198_v38 = vld [vmem:[#allocation5 + $0x80] sm:$0xff]  ;;  %7016 = vmatprep.subr.bf16.mxu0 %v11371_v36  ;;  %v11498_v43 = vcombine.low %v334_v32, %v338_v33 }
  0x3d   :  { %v202_v39 = vld [vmem:[#allocation5 + $0xa0] sm:$0xff]  ;;  %7017 = vmatpush1.bf16.msra.mxu0 %v11370_v42 }
  0x3e   :  { %v326_v40 = vld [vmem:[#allocation5 + $0x480] sm:$0xff]  ;;  %v11363_v44 = vcombine.high %v198_v38, %v202_v39  ;;  %7129 = vmatprep.subr.bf16.mxu1 %v11499_v37  ;;  %v11362_v50 = vcombine.low %v198_v38, %v202_v39 }
  0x3f   :  { %v330_v41 = vld [vmem:[#allocation5 + $0x4a0] sm:$0xff]  ;;  %7130 = vmatpush1.bf16.msra.mxu1 %v11498_v43 }
  0x40   :  { %v11491_v45 = vcombine.high %v326_v40, %v330_v41  ;;  %v190_v46 = vld [vmem:[#allocation5 + $0x40] sm:$0xff]  ;;  %7018 = vmatprep.subr.bf16.mxu0 %v11363_v44  ;;  %v11490_v51 = vcombine.low %v326_v40, %v330_v41 }
  0x41   :  { %v194_v47 = vld [vmem:[#allocation5 + $0x60] sm:$0xff]  ;;  %7019 = vmatpush1.bf16.msra.mxu0 %v11362_v50 }
  0x42   :  { %v318_v48 = vld [vmem:[#allocation5 + $0x440] sm:$0xff]  ;;  %v11355_v52 = vcombine.high %v190_v46, %v194_v47  ;;  %7131 = vmatprep.subr.bf16.mxu1 %v11491_v45  ;;  %v11354_v0 = vcombine.low %v190_v46, %v194_v47 }
  0x43   :  { %v322_v49 = vld [vmem:[#allocation5 + $0x460] sm:$0xff]  ;;  %7132 = vmatpush1.bf16.msra.mxu1 %v11490_v51 }
  0x44   :  { %v182_v53 = vld [vmem:[#allocation5] sm:$0xff]  ;;  %v11483_v56 = vcombine.high %v318_v48, %v322_v49  ;;  %7020 = vmatprep.subr.bf16.mxu0 %v11355_v52  ;;  %v11482_v1 = vcombine.low %v318_v48, %v322_v49 }
  0x45   :  { %v12635_v54 = vld [vmem:[#allocation2] sm:$0xff]  ;;  %7021 = vmatpush1.bf16.msra.mxu0 %v11354_v0 }
  0x46   :  { %v12637_v55 = vld [vmem:[#allocation2 + $0x40] sm:$0xff]  ;;  %7133 = vmatprep.subr.bf16.mxu1 %v11483_v56 }
  0x47   :  { %v186_v57 = vld [vmem:[#allocation5 + $0x20] sm:$0xff]  ;;  %v12641_v58 = vcombine.high %v12635_v54, %v12637_v55  ;;  %7134 = vmatpush1.bf16.msra.mxu1 %v11482_v1 }
  0x48   :  { %v310_v61 = vld [vmem:[#allocation5 + $0x400] sm:$0xff]  ;;  %v11347_v2 = vcombine.high %v182_v53, %v186_v57  ;;  %v11346_v8 = vcombine.low %v182_v53, %v186_v57 }
  0x49   :  { %16604 = vst [vmem:[#allocation12_spill] sm:$0xff] %v12641_v58  ;;  %v314_v62 = vld [vmem:[#allocation5 + $0x420] sm:$0xff]  ;;  %7040 = vmatprep.mubr.bf16.mxu0 %v12641_v58 }
  0x4a   :  { %v11475_v3 = vcombine.high %v310_v61, %v314_v62  ;;  %v302_v4 = vld [vmem:[#allocation5 + $0x3c0] sm:$0xff]  ;;  %7022 = vmatprep.subr.bf16.mxu0 %v11347_v2  ;;  %v11474_v9 = vcombine.low %v310_v61, %v314_v62 }
  0x4b   :  { %v306_v5 = vld [vmem:[#allocation5 + $0x3e0] sm:$0xff]  ;;  %7023 = vmatpush1.bf16.msra.mxu0 %v11346_v8 }
  0x4c   :  { %v430_v6 = vld [vmem:[#allocation5 + $0x7c0] sm:$0xff]  ;;  %v11467_v10 = vcombine.high %v302_v4, %v306_v5  ;;  %7135 = vmatprep.subr.bf16.mxu1 %v11475_v3  ;;  %v11466_v16 = vcombine.low %v302_v4, %v306_v5 }
  0x4d   :  { %v434_v7 = vld [vmem:[#allocation5 + $0x7e0] sm:$0xff]  ;;  %7136 = vmatpush1.bf16.msra.mxu1 %v11474_v9 }
  0x4e   :  { %v11595_v11 = vcombine.high %v430_v6, %v434_v7  ;;  %v294_v12 = vld [vmem:[#allocation5 + $0x380] sm:$0xff]  ;;  %7024 = vmatprep.subr.bf16.mxu0 %v11467_v10  ;;  %v11594_v17 = vcombine.low %v430_v6, %v434_v7 }
  0x4f   :  { %v298_v13 = vld [vmem:[#allocation5 + $0x3a0] sm:$0xff]  ;;  %7025 = vmatpush2.bf16.msra.mxu0 %v11466_v16 }
  0x50   :  { %v422_v14 = vld [vmem:[#allocation5 + $0x780] sm:$0xff]  ;;  %v11459_v18 = vcombine.high %v294_v12, %v298_v13  ;;  %7137 = vmatprep.subr.bf16.mxu1 %v11595_v11  ;;  %v11458_v24 = vcombine.low %v294_v12, %v298_v13 }
  0x51   :  { %v426_v15 = vld [vmem:[#allocation5 + $0x7a0] sm:$0xff]  ;;  %7138 = vmatpush2.bf16.msra.mxu1 %v11594_v17 }
  0x52   :  { %v11587_v19 = vcombine.high %v422_v14, %v426_v15  ;;  %v286_v20 = vld [vmem:[#allocation5 + $0x340] sm:$0xff]  ;;  %7026 = vmatprep.subr.bf16.mxu0 %v11459_v18  ;;  %v11586_v25 = vcombine.low %v422_v14, %v426_v15 }
  0x53   :  { %v290_v21 = vld [vmem:[#allocation5 + $0x360] sm:$0xff]  ;;  %7027 = vmatpush2.bf16.msra.mxu0 %v11458_v24 }
  0x54   :  { %v414_v22 = vld [vmem:[#allocation5 + $0x740] sm:$0xff]  ;;  %v11451_v26 = vcombine.high %v286_v20, %v290_v21  ;;  %7139 = vmatprep.subr.bf16.mxu1 %v11587_v19  ;;  %v11450_v32 = vcombine.low %v286_v20, %v290_v21  ;;  %v12655_v21 = vcombine.low %v12635_v54, %v12637_v55 }
  0x55   :  { %v418_v23 = vld [vmem:[#allocation5 + $0x760] sm:$0xff]  ;;  %7140 = vmatpush2.bf16.msra.mxu1 %v11586_v25  ;;  %v12659_v25 = vcombine.low %v12643_v59, %v12645_v60 }
  0x56   :  { %v11579_v27 = vcombine.high %v414_v22, %v418_v23  ;;  %v278_v28 = vld [vmem:[#allocation5 + $0x300] sm:$0xff]  ;;  %7028 = vmatprep.subr.bf16.mxu0 %v11451_v26  ;;  %v11578_v33 = vcombine.low %v414_v22, %v418_v23  ;;  %16606 = vst [vmem:[#allocation14_spill] sm:$0xff] %v12655_v21 }
  0x57   :  { %v282_v29 = vld [vmem:[#allocation5 + $0x320] sm:$0xff]  ;;  %7029 = vmatpush2.bf16.msra.mxu0 %v11450_v32  ;;  %16607 = vst [vmem:[#allocation15_spill] sm:$0xff] %v12659_v25 }
  0x58   :  { %v406_v30 = vld [vmem:[#allocation5 + $0x700] sm:$0xff]  ;;  %v11443_v34 = vcombine.high %v278_v28, %v282_v29  ;;  %7141 = vmatprep.subr.bf16.mxu1 %v11579_v27  ;;  %v11442_v40 = vcombine.low %v278_v28, %v282_v29  ;;  %v71_v27 = vld [vmem:[#allocation2 + $0x88] sm:$0xff] }
  0x59   :  { %v410_v31 = vld [vmem:[#allocation5 + $0x720] sm:$0xff]  ;;  %7142 = vmatpush2.bf16.msra.mxu1 %v11578_v33  ;;  %v79_v28 = vld [vmem:[#allocation2 + $0xc8] sm:$0xff] }
  0x5a   :  { %v11571_v35 = vcombine.high %v406_v30, %v410_v31  ;;  %v270_v36 = vld [vmem:[#allocation5 + $0x2c0] sm:$0xff]  ;;  %7030 = vmatprep.subr.bf16.mxu0 %v11443_v34  ;;  %v11570_v41 = vcombine.low %v406_v30, %v410_v31  ;;  %v12664_v33 = vcombine.high %v71_v27, %v79_v28 }
  0x5b   :  { %v274_v37 = vld [vmem:[#allocation5 + $0x2e0] sm:$0xff]  ;;  %7031 = vmatpush2.bf16.msra.mxu0 %v11442_v40 }
  0x5c   :  { %v398_v38 = vld [vmem:[#allocation5 + $0x6c0] sm:$0xff]  ;;  %v11435_v42 = vcombine.high %v270_v36, %v274_v37  ;;  %7143 = vmatprep.subr.bf16.mxu1 %v11571_v35  ;;  %v11434_v48 = vcombine.low %v270_v36, %v274_v37  ;;  %16609 = vst [vmem:[#allocation17_spill] sm:$0xff] %v12664_v33 }
  0x5d   :  { %v402_v39 = vld [vmem:[#allocation5 + $0x6e0] sm:$0xff]  ;;  %7144 = vmatpush2.bf16.msra.mxu1 %v11570_v41 }
  0x5e   :  { %v11563_v43 = vcombine.high %v398_v38, %v402_v39  ;;  %v262_v44 = vld [vmem:[#allocation5 + $0x280] sm:$0xff]  ;;  %7032 = vmatprep.subr.bf16.mxu0 %v11435_v42  ;;  %v11562_v49 = vcombine.low %v398_v38, %v402_v39 }
  0x5f   :  { %v266_v45 = vld [vmem:[#allocation5 + $0x2a0] sm:$0xff]  ;;  %7033 = vmatpush2.bf16.msra.mxu0 %v11434_v48  ;;  %v95_v48 = vld [vmem:[#allocation2 + $0x148] sm:$0xff] }
  0x60   :  { %v390_v46 = vld [vmem:[#allocation5 + $0x680] sm:$0xff]  ;;  %v11427_v50 = vcombine.high %v262_v44, %v266_v45  ;;  %7145 = vmatprep.subr.bf16.mxu1 %v11563_v43  ;;  %v11426_v61 = vcombine.low %v262_v44, %v266_v45  ;;  %v12671_v45 = vcombine.low %v71_v27, %v79_v28 }
  0x61   :  { %v394_v47 = vld [vmem:[#allocation5 + $0x6a0] sm:$0xff]  ;;  %7146 = vmatpush2.bf16.msra.mxu1 %v11562_v49 }
  0x62   :  { %v11555_v51 = vcombine.high %v390_v46, %v394_v47  ;;  %v254_v52 = vld [vmem:[#allocation5 + $0x240] sm:$0xff]  ;;  %7034 = vmatprep.subr.bf16.mxu0 %v11427_v50  ;;  %v11554_v62 = vcombine.low %v390_v46, %v394_v47  ;;  %16611 = vst [vmem:[#allocation19_spill] sm:$0xff] %v12671_v45  ;;  %v87_v47 = vld [vmem:[#allocation2 + $0x108] sm:$0xff] }
  0x63   :  { %v258_v53 = vld [vmem:[#allocation5 + $0x260] sm:$0xff]  ;;  %7035 = vmatpush2.bf16.msra.mxu0 %v11426_v61 }
  0x64   :  { %v382_v56 = vld [vmem:[#allocation5 + $0x640] sm:$0xff]  ;;  %v11419_v0 = vcombine.high %v254_v52, %v258_v53  ;;  %7147 = vmatprep.subr.bf16.mxu1 %v11555_v51  ;;  %v11418_v6 = vcombine.low %v254_v52, %v258_v53 }
  0x65   :  { %v386_v57 = vld [vmem:[#allocation5 + $0x660] sm:$0xff]  ;;  %7148 = vmatpush2.bf16.msra.mxu1 %v11554_v62 }
  0x66   :  { %v11547_v1 = vcombine.high %v382_v56, %v386_v57  ;;  %v246_v2 = vld [vmem:[#allocation5 + $0x200] sm:$0xff]  ;;  %7036 = vmatprep.subr.bf16.mxu0 %v11419_v0  ;;  %v11546_v7 = vcombine.low %v382_v56, %v386_v57  ;;  %v12676_v57 = vcombine.high %v87_v47, %v95_v48 }
  0x67   :  { %v250_v3 = vld [vmem:[#allocation5 + $0x220] sm:$0xff]  ;;  %7037 = vmatpush2.bf16.msra.mxu0 %v11418_v6 }
  0x68   :  { %v374_v4 = vld [vmem:[#allocation5 + $0x600] sm:$0xff]  ;;  %v11411_v8 = vcombine.high %v246_v2, %v250_v3  ;;  %7149 = vmatprep.subr.bf16.mxu1 %v11547_v1  ;;  %v11410_v14 = vcombine.low %v246_v2, %v250_v3  ;;  %16613 = vst [vmem:[#allocation21_spill] sm:$0xff] %v12676_v57 }
  0x69   :  { %v378_v5 = vld [vmem:[#allocation5 + $0x620] sm:$0xff]  ;;  %7150 = vmatpush2.bf16.msra.mxu1 %v11546_v7 }
  0x6a   :  { %v11539_v9 = vcombine.high %v374_v4, %v378_v5  ;;  %v494_v10 = vld [vmem:[#allocation5 + $0x9c0] sm:$0xff]  ;;  %7038 = vmatprep.subr.bf16.mxu0 %v11411_v8  ;;  %v11538_v15 = vcombine.low %v374_v4, %v378_v5 }
  0x6b   :  { %v498_v11 = vld [vmem:[#allocation5 + $0x9e0] sm:$0xff]  ;;  %7039 = vmatpush2.bf16.msra.mxu0 %v11410_v14  ;;  %v111_v14 = vld [vmem:[#allocation2 + $0x1c8] sm:$0xff] }
  0x6c   :  { %v622_v12 = vld [vmem:[#allocation5 + $0xdc0] sm:$0xff]  ;;  %v11659_v16 = vcombine.high %v494_v10, %v498_v11  ;;  %7151 = vmatprep.subr.bf16.mxu1 %v11539_v9  ;;  %v11658_v26 = vcombine.low %v494_v10, %v498_v11  ;;  %v12683_v11 = vcombine.low %v87_v47, %v95_v48 }
  0x6d   :  { %v626_v13 = vld [vmem:[#allocation5 + $0xde0] sm:$0xff]  ;;  %7152 = vmatpush2.bf16.msra.mxu1 %v11538_v15 }
  0x6e   :  { %v11787_v17 = vcombine.high %v622_v12, %v626_v13  ;;  %v486_v18 = vld [vmem:[#allocation5 + $0x980] sm:$0xff]  ;;  %7234 = vmatprep.subr.bf16.mxu0 %v11659_v16  ;;  %v11786_v29 = vcombine.low %v622_v12, %v626_v13  ;;  %7041 = vmatmul.mubr.bf16.vlgmr.msra.gmra.mxu0 %v12655_v21  ;;  %16615 = vst [vmem:[#allocation23_spill] sm:$0xff] %v12683_v11  ;;  %v103_v13 = vld [vmem:[#allocation2 + $0x188] sm:$0xff] }
  0x6f   :  { %v490_v19 = vld [vmem:[#allocation5 + $0x9a0] sm:$0xff]  ;;  %7235 = vmatpush1.bf16.msra.mxu0 %v11658_v26 }
  0x70   :  { %v614_v20 = vld [vmem:[#allocation5 + $0xd80] sm:$0xff]  ;;  %v11651_v30 = vcombine.high %v486_v18, %v490_v19  ;;  %7347 = vmatprep.subr.bf16.mxu1 %v11787_v17  ;;  %7154 = vmatmul.mubr.bf16.vlgmr.msra.gmra.mxu1 %v12659_v25  ;;  %v11650_v60 = vcombine.low %v486_v18, %v490_v19 }
  0x71   :  { %v618_v22 = vld [vmem:[#allocation5 + $0xda0] sm:$0xff]  ;;  %7348 = vmatpush1.bf16.msra.mxu1 %v11786_v29  ;;  %7163 = vmatprep.mubr.bf16.mxu1 %v12664_v33 }
  0x72   :  { %v70_v23 = vld [vmem:[#allocation2 + $0x80] sm:$0xff]  ;;  %v11779_v31 = vcombine.high %v614_v20, %v618_v22  ;;  %7236 = vmatprep.subr.bf16.mxu0 %v11651_v30  ;;  %v11778_v35 = vcombine.low %v614_v20, %v618_v22  ;;  %v12688_v22 = vcombine.high %v103_v13, %v111_v14 }
  0x73   :  { %v78_v24 = vld [vmem:[#allocation2 + $0xc0] sm:$0xff]  ;;  %7237 = vmatpush1.bf16.msra.mxu0 %v11650_v60 }
  0x74   :  { %v12661_v32 = vcombine.high %v70_v23, %v78_v24  ;;  %v478_v54 = vld [vmem:[#allocation5 + $0x940] sm:$0xff]  ;;  %7349 = vmatprep.subr.bf16.mxu1 %v11779_v31  ;;  %v12669_v41 = vcombine.low %v70_v23, %v78_v24  ;;  %16617 = vst [vmem:[#allocation25_spill] sm:$0xff] %v12688_v22 }
  0x75   :  { %v482_v55 = vld [vmem:[#allocation5 + $0x960] sm:$0xff]  ;;  %7350 = vmatpush1.bf16.msra.mxu1 %v11778_v35  ;;  %v12695_v35 = vcombine.low %v103_v13, %v111_v14 }
  0x76   :  { %16608 = vst [vmem:[#allocation16_spill] sm:$0xff] %v12661_v32  ;;  %v606_v34 = vld [vmem:[#allocation5 + $0xd40] sm:$0xff]  ;;  %v11643_v36 = vcombine.high %v478_v54, %v482_v55  ;;  %7050 = vmatprep.mubr.bf16.mxu0 %v12661_v32  ;;  %16610 = vst [vmem:[#allocation18_spill] sm:$0xff] %v12669_v41  ;;  %v11642_v46 = vcombine.low %v478_v54, %v482_v55 }
  0x77   :  { %v610_v59 = vld [vmem:[#allocation5 + $0xd60] sm:$0xff]  ;;  %7051 = vmatmul.mubr.bf16.gmra.mxu0 %v12669_v41  ;;  %16619 = vst [vmem:[#allocation27_spill] sm:$0xff] %v12695_v35 }
  0x78   :  { %v11771_v37 = vcombine.high %v606_v34, %v610_v59  ;;  %v470_v38 = vld [vmem:[#allocation5 + $0x900] sm:$0xff]  ;;  %7238 = vmatprep.subr.bf16.mxu0 %v11643_v36  ;;  %v11770_v49 = vcombine.low %v606_v34, %v610_v59  ;;  %7164 = vmatmul.mubr.bf16.gmra.mxu1 %v12671_v45 }
  0x79   :  { %v474_v39 = vld [vmem:[#allocation5 + $0x920] sm:$0xff]  ;;  %7239 = vmatpush1.bf16.msra.mxu0 %v11642_v46  ;;  %7173 = vmatprep.mubr.bf16.mxu1 %v12676_v57 }
  0x7a   :  { %v598_v40 = vld [vmem:[#allocation5 + $0xd00] sm:$0xff]  ;;  %v11635_v50 = vcombine.high %v470_v38, %v474_v39  ;;  %7351 = vmatprep.subr.bf16.mxu1 %v11771_v37  ;;  %v11634_v0 = vcombine.low %v470_v38, %v474_v39  ;;  %v119_v37 = vld [vmem:[#allocation2 + $0x208] sm:$0xff] }
  0x7b   :  { %v602_v42 = vld [vmem:[#allocation5 + $0xd20] sm:$0xff]  ;;  %7352 = vmatpush1.bf16.msra.mxu1 %v11770_v49  ;;  %v127_v38 = vld [vmem:[#allocation2 + $0x248] sm:$0xff] }
  0x7c   :  { %v86_v43 = vld [vmem:[#allocation2 + $0x100] sm:$0xff]  ;;  %v11763_v51 = vcombine.high %v598_v40, %v602_v42  ;;  %7240 = vmatprep.subr.bf16.mxu0 %v11635_v50  ;;  %v11762_v1 = vcombine.low %v598_v40, %v602_v42  ;;  %v12700_v47 = vcombine.high %v119_v37, %v127_v38 }
  0x7d   :  { %v94_v44 = vld [vmem:[#allocation2 + $0x140] sm:$0xff]  ;;  %7241 = vmatpush1.bf16.msra.mxu0 %v11634_v0 }
  0x7e   :  { %v12673_v52 = vcombine.high %v86_v43, %v94_v44  ;;  %v462_v53 = vld [vmem:[#allocation5 + $0x8c0] sm:$0xff]  ;;  %7353 = vmatprep.subr.bf16.mxu1 %v11763_v51  ;;  %v12681_v7 = vcombine.low %v86_v43, %v94_v44  ;;  %16621 = vst [vmem:[#allocation29_spill] sm:$0xff] %v12700_v47 }
  0x7f   :  { %v466_v56 = vld [vmem:[#allocation5 + $0x8e0] sm:$0xff]  ;;  %7354 = vmatpush1.bf16.msra.mxu1 %v11762_v1 }
  0x80   :  { %16612 = vst [vmem:[#allocation20_spill] sm:$0xff] %v12673_v52  ;;  %v590_v61 = vld [vmem:[#allocation5 + $0xcc0] sm:$0xff]  ;;  %v11627_v2 = vcombine.high %v462_v53, %v466_v56  ;;  %7060 = vmatprep.mubr.bf16.mxu0 %v12673_v52  ;;  %16614 = vst [vmem:[#allocation22_spill] sm:$0xff] %v12681_v7  ;;  %v11626_v12 = vcombine.low %v462_v53, %v466_v56  ;;  %7174 = vmatmul.mubr.bf16.gmra.mxu1 %v12683_v11 }
  0x81   :  { %v594_v62 = vld [vmem:[#allocation5 + $0xce0] sm:$0xff]  ;;  %7061 = vmatmul.mubr.bf16.gmra.mxu0 %v12681_v7  ;;  %7183 = vmatprep.mubr.bf16.mxu1 %v12688_v22 }
  0x82   :  { %v11755_v3 = vcombine.high %v590_v61, %v594_v62  ;;  %v454_v4 = vld [vmem:[#allocation5 + $0x880] sm:$0xff]  ;;  %7242 = vmatprep.subr.bf16.mxu0 %v11627_v2  ;;  %v11754_v15 = vcombine.low %v590_v61, %v594_v62 }
  0x83   :  { %v458_v5 = vld [vmem:[#allocation5 + $0x8a0] sm:$0xff]  ;;  %7243 = vmatpush1.bf16.msra.mxu0 %v11626_v12 }
  0x84   :  { %v582_v6 = vld [vmem:[#allocation5 + $0xc80] sm:$0xff]  ;;  %v11619_v16 = vcombine.high %v454_v4, %v458_v5  ;;  %7355 = vmatprep.subr.bf16.mxu1 %v11755_v3  ;;  %v11618_v26 = vcombine.low %v454_v4, %v458_v5  ;;  %v12707_v5 = vcombine.low %v119_v37, %v127_v38  ;;  %v151_v37 = vld [vmem:[#allocation2 + $0x308] sm:$0xff] }
  0x85   :  { %v586_v8 = vld [vmem:[#allocation5 + $0xca0] sm:$0xff]  ;;  %7356 = vmatpush1.bf16.msra.mxu1 %v11754_v15  ;;  %v159_v38 = vld [vmem:[#allocation2 + $0x348] sm:$0xff] }
  0x86   :  { %v102_v9 = vld [vmem:[#allocation2 + $0x180] sm:$0xff]  ;;  %v11747_v17 = vcombine.high %v582_v6, %v586_v8  ;;  %7244 = vmatprep.subr.bf16.mxu0 %v11619_v16  ;;  %v11746_v27 = vcombine.low %v582_v6, %v586_v8  ;;  %16623 = vst [vmem:[#allocation31_spill] sm:$0xff] %v12707_v5  ;;  %v135_v8 = vld [vmem:[#allocation2 + $0x288] sm:$0xff] }
  0x87   :  { %v110_v10 = vld [vmem:[#allocation2 + $0x1c0] sm:$0xff]  ;;  %7245 = vmatpush1.bf16.msra.mxu0 %v11618_v26 }
  0x88   :  { %v12685_v18 = vcombine.high %v102_v9, %v110_v10  ;;  %v446_v19 = vld [vmem:[#allocation5 + $0x840] sm:$0xff]  ;;  %7357 = vmatprep.subr.bf16.mxu1 %v11747_v17  ;;  %v12693_v55 = vcombine.low %v102_v9, %v110_v10  ;;  %7184 = vmatmul.mubr.bf16.gmra.mxu1 %v12695_v35  ;;  %v143_v9 = vld [vmem:[#allocation2 + $0x2c8] sm:$0xff] }
  0x89   :  { %v450_v20 = vld [vmem:[#allocation5 + $0x860] sm:$0xff]  ;;  %7358 = vmatpush1.bf16.msra.mxu1 %v11746_v27  ;;  %7193 = vmatprep.mubr.bf16.mxu1 %v12700_v47  ;;  %v12712_v17 = vcombine.high %v135_v8, %v143_v9 }
  0x8a   :  { %16616 = vst [vmem:[#allocation24_spill] sm:$0xff] %v12685_v18  ;;  %v574_v23 = vld [vmem:[#allocation5 + $0xc40] sm:$0xff]  ;;  %v11611_v28 = vcombine.high %v446_v19, %v450_v20  ;;  %7070 = vmatprep.mubr.bf16.mxu0 %v12685_v18  ;;  %16618 = vst [vmem:[#allocation26_spill] sm:$0xff] %v12693_v55  ;;  %v11610_v36 = vcombine.low %v446_v19, %v450_v20 }
  0x8b   :  { %v578_v24 = vld [vmem:[#allocation5 + $0xc60] sm:$0xff]  ;;  %7071 = vmatmul.mubr.bf16.gmra.mxu0 %v12693_v55  ;;  %16625 = vst [vmem:[#allocation33_spill] sm:$0xff] %v12712_v17 }
  0x8c   :  { %v11739_v29 = vcombine.high %v574_v23, %v578_v24  ;;  %v438_v30 = vld [vmem:[#allocation5 + $0x800] sm:$0xff]  ;;  %7246 = vmatprep.subr.bf16.mxu0 %v11611_v28  ;;  %v11738_v39 = vcombine.low %v574_v23, %v578_v24 }
  0x8d   :  { %v442_v31 = vld [vmem:[#allocation5 + $0x820] sm:$0xff]  ;;  %7247 = vmatpush1.bf16.msra.mxu0 %v11610_v36 }
  0x8e   :  { %v566_v54 = vld [vmem:[#allocation5 + $0xc00] sm:$0xff]  ;;  %v11603_v40 = vcombine.high %v438_v30, %v442_v31  ;;  %7359 = vmatprep.subr.bf16.mxu1 %v11739_v29  ;;  %v11602_v50 = vcombine.low %v438_v30, %v442_v31 }
  0x8f   :  { %v570_v34 = vld [vmem:[#allocation5 + $0xc20] sm:$0xff]  ;;  %7360 = vmatpush1.bf16.msra.mxu1 %v11738_v39 }
  0x90   :  { %v118_v59 = vld [vmem:[#allocation2 + $0x200] sm:$0xff]  ;;  %v11731_v42 = vcombine.high %v566_v54, %v570_v34  ;;  %7248 = vmatprep.subr.bf16.mxu0 %v11603_v40  ;;  %v11730_v51 = vcombine.low %v566_v54, %v570_v34  ;;  %7194 = vmatmul.mubr.bf16.gmra.mxu1 %v12707_v5  ;;  %v149_v5 = vld [vmem:[#allocation2 + $0x2f8] sm:$0xff] }
  0x91   :  { %v126_v60 = vld [vmem:[#allocation2 + $0x240] sm:$0xff]  ;;  %7249 = vmatpush1.bf16.msra.mxu0 %v11602_v50  ;;  %7203 = vmatprep.mubr.bf16.mxu1 %v12712_v17 }
  0x92   :  { %v12697_v43 = vcombine.high %v118_v59, %v126_v60  ;;  %v558_v44 = vld [vmem:[#allocation5 + $0xbc0] sm:$0xff]  ;;  %7361 = vmatprep.subr.bf16.mxu1 %v11731_v42  ;;  %v12705_v1 = vcombine.low %v118_v59, %v126_v60  ;;  %v12719_v60 = vcombine.low %v135_v8, %v143_v9 }
  0x93   :  { %v562_v46 = vld [vmem:[#allocation5 + $0xbe0] sm:$0xff]  ;;  %7362 = vmatpush1.bf16.msra.mxu1 %v11730_v51 }
  0x94   :  { %16620 = vst [vmem:[#allocation28_spill] sm:$0xff] %v12697_v43  ;;  %v686_v48 = vld [vmem:[#allocation5 + $0xfc0] sm:$0xff]  ;;  %v11723_v53 = vcombine.high %v558_v44, %v562_v46  ;;  %7080 = vmatprep.mubr.bf16.mxu0 %v12697_v43  ;;  %16622 = vst [vmem:[#allocation30_spill] sm:$0xff] %v12705_v1  ;;  %v11722_v6 = vcombine.low %v558_v44, %v562_v46 }
  0x95   :  { %v690_v49 = vld [vmem:[#allocation5 + $0xfe0] sm:$0xff]  ;;  %7081 = vmatmul.mubr.bf16.gmra.mxu0 %v12705_v1  ;;  %16627 = vst [vmem:[#allocation35_spill] sm:$0xff] %v12719_v60 }
  0x96   :  { %v11851_v56 = vcombine.high %v686_v48, %v690_v49  ;;  %v550_v61 = vld [vmem:[#allocation5 + $0xb80] sm:$0xff]  ;;  %7250 = vmatprep.subr.bf16.mxu0 %v11723_v53  ;;  %v11850_v10 = vcombine.low %v686_v48, %v690_v49  ;;  %v12724_v49 = vcombine.high %v151_v37, %v159_v38 }
  0x97   :  { %v554_v62 = vld [vmem:[#allocation5 + $0xba0] sm:$0xff]  ;;  %7251 = vmatpush2.bf16.msra.mxu0 %v11722_v6 }
  0x98   :  { %v678_v0 = vld [vmem:[#allocation5 + $0xf80] sm:$0xff]  ;;  %v11715_v12 = vcombine.high %v550_v61, %v554_v62  ;;  %7363 = vmatprep.subr.bf16.mxu1 %v11851_v56  ;;  %v11714_v23 = vcombine.low %v550_v61, %v554_v62  ;;  %16629 = vst [vmem:[#allocation37_spill] sm:$0xff] %v12724_v49  ;;  %7204 = vmatmul.mubr.bf16.gmra.mxu1 %v12719_v60  ;;  %v133_v60 = vld [vmem:[#allocation2 + $0x278] sm:$0xff] }
  0x99   :  { %v682_v2 = vld [vmem:[#allocation5 + $0xfa0] sm:$0xff]  ;;  %7364 = vmatpush2.bf16.msra.mxu1 %v11850_v10  ;;  %7213 = vmatprep.mubr.bf16.mxu1 %v12724_v49  ;;  %v12731_v10 = vcombine.low %v151_v37, %v159_v38 }
  0x9a   :  { %v134_v3 = vld [vmem:[#allocation2 + $0x280] sm:$0xff]  ;;  %v11843_v13 = vcombine.high %v678_v0, %v682_v2  ;;  %7252 = vmatprep.subr.bf16.mxu0 %v11715_v12  ;;  %v11842_v24 = vcombine.low %v678_v0, %v682_v2 }
  0x9b   :  { %v142_v4 = vld [vmem:[#allocation2 + $0x2c0] sm:$0xff]  ;;  %7253 = vmatpush2.bf16.msra.mxu0 %v11714_v23  ;;  %16631 = vst [vmem:[#allocation39_spill] sm:$0xff] %v12731_v10 }
  0x9c   :  { %v12709_v14 = vcombine.high %v134_v3, %v142_v4  ;;  %v542_v15 = vld [vmem:[#allocation5 + $0xb40] sm:$0xff]  ;;  %7365 = vmatprep.subr.bf16.mxu1 %v11843_v13  ;;  %v12717_v31 = vcombine.low %v134_v3, %v142_v4  ;;  %v167_v13 = vld [vmem:[#allocation2 + $0x388] sm:$0xff] }
  0x9d   :  { %v546_v16 = vld [vmem:[#allocation5 + $0xb60] sm:$0xff]  ;;  %7366 = vmatpush2.bf16.msra.mxu1 %v11842_v24 }
  0x9e   :  { %16624 = vst [vmem:[#allocation32_spill] sm:$0xff] %v12709_v14  ;;  %v670_v19 = vld [vmem:[#allocation5 + $0xf40] sm:$0xff]  ;;  %v11707_v26 = vcombine.high %v542_v15, %v546_v16  ;;  %7090 = vmatprep.mubr.bf16.mxu0 %v12709_v14  ;;  %16626 = vst [vmem:[#allocation34_spill] sm:$0xff] %v12717_v31  ;;  %v11706_v36 = vcombine.low %v542_v15, %v546_v16  ;;  %v175_v15 = vld [vmem:[#allocation2 + $0x3c8] sm:$0xff] }
  0x9f   :  { %v674_v20 = vld [vmem:[#allocation5 + $0xf60] sm:$0xff]  ;;  %7091 = vmatmul.mubr.bf16.gmra.mxu0 %v12717_v31  ;;  %v141_v14 = vld [vmem:[#allocation2 + $0x2b8] sm:$0xff] }
  0xa0   :  { %v11835_v27 = vcombine.high %v670_v19, %v674_v20  ;;  %v534_v28 = vld [vmem:[#allocation5 + $0xb00] sm:$0xff]  ;;  %7254 = vmatprep.subr.bf16.mxu0 %v11707_v26  ;;  %v11834_v39 = vcombine.low %v670_v19, %v674_v20  ;;  %7214 = vmatmul.mubr.bf16.gmra.mxu1 %v12731_v10  ;;  %v117_v10 = vld [vmem:[#allocation2 + $0x1f8] sm:$0xff] }
  0xa1   :  { %v538_v29 = vld [vmem:[#allocation5 + $0xb20] sm:$0xff]  ;;  %7255 = vmatpush2.bf16.msra.mxu0 %v11706_v36 }
  0xa2   :  { %v662_v30 = vld [vmem:[#allocation5 + $0xf00] sm:$0xff]  ;;  %v11699_v40 = vcombine.high %v534_v28, %v538_v29  ;;  %7367 = vmatprep.subr.bf16.mxu1 %v11835_v27  ;;  %v11698_v53 = vcombine.low %v534_v28, %v538_v29  ;;  %v12736_v27 = vcombine.high %v167_v13, %v175_v15 }
  0xa3   :  { %v666_v54 = vld [vmem:[#allocation5 + $0xf20] sm:$0xff]  ;;  %7368 = vmatpush2.bf16.msra.mxu1 %v11834_v39 }
  0xa4   :  { %v150_v34 = vld [vmem:[#allocation2 + $0x300] sm:$0xff]  ;;  %v11827_v42 = vcombine.high %v662_v30, %v666_v54  ;;  %7256 = vmatprep.subr.bf16.mxu0 %v11699_v40  ;;  %v11826_v56 = vcombine.low %v662_v30, %v666_v54  ;;  %16633 = vst [vmem:[#allocation41_spill] sm:$0xff] %v12736_v27  ;;  %7223 = vmatprep.mubr.bf16.mxu1 %v12736_v27 }
  0xa5   :  { %v158_v59 = vld [vmem:[#allocation2 + $0x340] sm:$0xff]  ;;  %7257 = vmatpush2.bf16.msra.mxu0 %v11698_v53  ;;  %v65_v53 = vld [vmem:[#allocation2 + $0x58] sm:$0xff] }
  0xa6   :  { %v12721_v44 = vcombine.high %v150_v34, %v158_v59  ;;  %v526_v46 = vld [vmem:[#allocation5 + $0xac0] sm:$0xff]  ;;  %7369 = vmatprep.subr.bf16.mxu1 %v11827_v42  ;;  %v12729_v4 = vcombine.low %v150_v34, %v158_v59  ;;  %v56_v42 = vld [vmem:[#allocation2 + $0x10] sm:$0xff] }
  0xa7   :  { %v530_v48 = vld [vmem:[#allocation5 + $0xae0] sm:$0xff]  ;;  %7370 = vmatpush2.bf16.msra.mxu1 %v11826_v56 }
  0xa8   :  { %16628 = vst [vmem:[#allocation36_spill] sm:$0xff] %v12721_v44  ;;  %v654_v50 = vld [vmem:[#allocation5 + $0xec0] sm:$0xff]  ;;  %v11691_v61 = vcombine.high %v526_v46, %v530_v48  ;;  %7100 = vmatprep.mubr.bf16.mxu0 %v12721_v44  ;;  %16630 = vst [vmem:[#allocation38_spill] sm:$0xff] %v12729_v4  ;;  %v11690_v12 = vcombine.low %v526_v46, %v530_v48  ;;  %v64_v46 = vld [vmem:[#allocation2 + $0x50] sm:$0xff]  ;;  %v12743_v48 = vcombine.low %v167_v13, %v175_v15 }
  0xa9   :  { %v658_v51 = vld [vmem:[#allocation5 + $0xee0] sm:$0xff]  ;;  %7101 = vmatmul.mubr.bf16.gmra.mxu0 %v12729_v4  ;;  %v125_v44 = vld [vmem:[#allocation2 + $0x238] sm:$0xff] }
  0xaa   :  { %v11819_v62 = vcombine.high %v654_v50, %v658_v51  ;;  %v518_v0 = vld [vmem:[#allocation5 + $0xa80] sm:$0xff]  ;;  %7258 = vmatprep.subr.bf16.mxu0 %v11691_v61  ;;  %v11818_v16 = vcombine.low %v654_v50, %v658_v51  ;;  %16635 = vst [vmem:[#allocation43_spill] sm:$0xff] %v12743_v48  ;;  %v57_v51 = vld [vmem:[#allocation2 + $0x18] sm:$0xff]  ;;  %7224 = vmatmul.mubr.bf16.gmra.mxu1 %v12743_v48  ;;  %v12970_v48 = vld [vmem:[#allocation5 + $0x128] sm:$0xff] }
  0xab   :  { %v522_v2 = vld [vmem:[#allocation5 + $0xaa0] sm:$0xff]  ;;  %7259 = vmatpush2.bf16.msra.mxu0 %v11690_v12 }
  0xac   :  { %v646_v3 = vld [vmem:[#allocation5 + $0xe80] sm:$0xff]  ;;  %v11683_v19 = vcombine.high %v518_v0, %v522_v2  ;;  %7371 = vmatprep.subr.bf16.mxu1 %v11819_v62  ;;  %v11682_v30 = vcombine.low %v518_v0, %v522_v2  ;;  %v12745_v0 = vcombine.high %v56_v42, %v64_v46 }
  0xad   :  { %v650_v6 = vld [vmem:[#allocation5 + $0xea0] sm:$0xff]  ;;  %7372 = vmatpush2.bf16.msra.mxu1 %v11818_v16 }
  0xae   :  { %v166_v8 = vld [vmem:[#allocation2 + $0x380] sm:$0xff]  ;;  %v11811_v20 = vcombine.high %v646_v3, %v650_v6  ;;  %7260 = vmatprep.subr.bf16.mxu0 %v11683_v19  ;;  %v11810_v54 = vcombine.low %v646_v3, %v650_v6  ;;  %16636 = vst [vmem:[#allocation44_spill] sm:$0xff] %v12745_v0  ;;  %v12748_v6 = vcombine.high %v57_v51, %v65_v53 }
  0xaf   :  { %v174_v9 = vld [vmem:[#allocation2 + $0x3c0] sm:$0xff]  ;;  %7261 = vmatpush2.bf16.msra.mxu0 %v11682_v30  ;;  %v80_v30 = vld [vmem:[#allocation2 + $0xd0] sm:$0xff] }
  0xb0   :  { %v12733_v23 = vcombine.high %v166_v8, %v174_v9  ;;  %v510_v24 = vld [vmem:[#allocation5 + $0xa40] sm:$0xff]  ;;  %7373 = vmatprep.subr.bf16.mxu1 %v11811_v20  ;;  %v12741_v39 = vcombine.low %v166_v8, %v174_v9  ;;  %16637 = vst [vmem:[#allocation45_spill] sm:$0xff] %v12748_v6  ;;  %7379 = vmatprep.mubr.bf16.mxu1 %v12748_v6 }
  0xb1   :  { %v514_v26 = vld [vmem:[#allocation5 + $0xa60] sm:$0xff]  ;;  %7374 = vmatpush2.bf16.msra.mxu1 %v11810_v54  ;;  %v12755_v54 = vcombine.low %v57_v51, %v65_v53 }
  0xb2   :  { %16632 = vst [vmem:[#allocation40_spill] sm:$0xff] %v12733_v23  ;;  %v638_v28 = vld [vmem:[#allocation5 + $0xe40] sm:$0xff]  ;;  %v11675_v34 = vcombine.high %v510_v24, %v514_v26  ;;  %7110 = vmatprep.mubr.bf16.mxu0 %v12733_v23  ;;  %16634 = vst [vmem:[#allocation42_spill] sm:$0xff] %v12741_v39  ;;  %v11674_v50 = vcombine.low %v510_v24, %v514_v26  ;;  %v12752_v26 = vcombine.low %v56_v42, %v64_v46  ;;  %v109_v23 = vld [vmem:[#allocation2 + $0x1b8] sm:$0xff] }
  0xb3   :  { %v642_v29 = vld [vmem:[#allocation5 + $0xe60] sm:$0xff]  ;;  %7111 = vmatmul.mubr.bf16.gmra.mxu0 %v12741_v39  ;;  %16639 = vst [vmem:[#allocation47_spill] sm:$0xff] %v12755_v54 }
  0xb4   :  { %v11803_v59 = vcombine.high %v638_v28, %v642_v29  ;;  %v502_v36 = vld [vmem:[#allocation5 + $0xa00] sm:$0xff]  ;;  %7262 = vmatprep.subr.bf16.mxu0 %v11675_v34  ;;  %v11802_v56 = vcombine.low %v638_v28, %v642_v29  ;;  %7266 = vmatprep.mubr.bf16.mxu0 %v12745_v0  ;;  %16638 = vst [vmem:[#allocation46_spill] sm:$0xff] %v12752_v26  ;;  %v72_v29 = vld [vmem:[#allocation2 + $0x90] sm:$0xff]  ;;  %v227_v0 = vld [vmem:[#allocation5 + $0x168] sm:$0xff] }
  0xb5   :  { %v506_v37 = vld [vmem:[#allocation5 + $0xa20] sm:$0xff]  ;;  %7263 = vmatpush2.bf16.msra.mxu0 %v11674_v50  ;;  %v12757_v50 = vcombine.high %v72_v29, %v80_v30 }
  0xb6   :  { %v630_v38 = vld [vmem:[#allocation5 + $0xe00] sm:$0xff]  ;;  %v11667_v61 = vcombine.high %v502_v36, %v506_v37  ;;  %7375 = vmatprep.subr.bf16.mxu1 %v11803_v59  ;;  %v11666_v12 = vcombine.low %v502_v36, %v506_v37  ;;  %v73_v59 = vld [vmem:[#allocation2 + $0x98] sm:$0xff] }
  0xb7   :  { %v634_v40 = vld [vmem:[#allocation5 + $0xe20] sm:$0xff]  ;;  %7376 = vmatpush2.bf16.msra.mxu1 %v11802_v56  ;;  %v81_v36 = vld [vmem:[#allocation2 + $0xd8] sm:$0xff]  ;;  %16640 = vst [vmem:[#allocation48_spill] sm:$0xff] %v12757_v50 }
  0xb8   :  { %v11795_v62 = vcombine.high %v630_v38, %v634_v40  ;;  %v750_v2 = vld [vmem:[#allocation5 + $0x11c0] sm:$0xff]  ;;  %7264 = vmatprep.subr.bf16.mxu0 %v11667_v61  ;;  %v11794_v13 = vcombine.low %v630_v38, %v634_v40  ;;  %v12760_v56 = vcombine.high %v73_v59, %v81_v36 }
  0xb9   :  { %v754_v3 = vld [vmem:[#allocation5 + $0x11e0] sm:$0xff]  ;;  %7265 = vmatpush2.bf16.msra.mxu0 %v11666_v12 }
  0xba   :  { %v878_v8 = vld [vmem:[#allocation5 + $0x15c0] sm:$0xff]  ;;  %v11915_v15 = vcombine.high %v750_v2, %v754_v3  ;;  %7377 = vmatprep.subr.bf16.mxu1 %v11795_v62  ;;  %v11914_v34 = vcombine.low %v750_v2, %v754_v3  ;;  %16641 = vst [vmem:[#allocation49_spill] sm:$0xff] %v12760_v56 }
  0xbb   :  { %v882_v9 = vld [vmem:[#allocation5 + $0x15e0] sm:$0xff]  ;;  %7378 = vmatpush2.bf16.msra.mxu1 %v11794_v13  ;;  %v12765_v13 = vcombine.low %v72_v29, %v80_v30 }
  0xbc   :  { %v12043_v16 = vcombine.high %v878_v8, %v882_v9  ;;  %v742_v19 = vld [vmem:[#allocation5 + $0x1180] sm:$0xff]  ;;  %7460 = vmatprep.subr.bf16.mxu0 %v11915_v15  ;;  %v12042_v37 = vcombine.low %v878_v8, %v882_v9  ;;  %7267 = vmatmul.mubr.bf16.vlgmr.msra.gmra.mxu0 %v12752_v26  ;;  %v359_v26 = vld [vmem:[#allocation5 + $0x588] sm:$0xff] }
  0xbd   :  { %v746_v20 = vld [vmem:[#allocation5 + $0x11a0] sm:$0xff]  ;;  %7461 = vmatpush1.bf16.msra.mxu0 %v11914_v34  ;;  %7276 = vmatprep.mubr.bf16.mxu0 %v12757_v50  ;;  %16642 = vst [vmem:[#allocation50_spill] sm:$0xff] %v12765_v13  ;;  %v104_v50 = vld [vmem:[#allocation2 + $0x190] sm:$0xff] }
  0xbe   :  { %v870_v24 = vld [vmem:[#allocation5 + $0x1580] sm:$0xff]  ;;  %v11907_v38 = vcombine.high %v742_v19, %v746_v20  ;;  %7573 = vmatprep.subr.bf16.mxu1 %v12043_v16  ;;  %7380 = vmatmul.mubr.bf16.vlgmr.msra.gmra.mxu1 %v12755_v54  ;;  %v11906_v53 = vcombine.low %v742_v19, %v746_v20  ;;  %v88_v16 = vld [vmem:[#allocation2 + $0x110] sm:$0xff]  ;;  %v12767_v19 = vcombine.low %v73_v59, %v81_v36 }
  0xbf   :  { %v874_v28 = vld [vmem:[#allocation5 + $0x15a0] sm:$0xff]  ;;  %7574 = vmatpush1.bf16.msra.mxu1 %v12042_v37  ;;  %7389 = vmatprep.mubr.bf16.mxu1 %v12760_v56  ;;  %v96_v54 = vld [vmem:[#allocation2 + $0x150] sm:$0xff] }
  0xc0   :  { %v12035_v40 = vcombine.high %v870_v24, %v874_v28  ;;  %v734_v42 = vld [vmem:[#allocation5 + $0x1140] sm:$0xff]  ;;  %7462 = vmatprep.subr.bf16.mxu0 %v11907_v38  ;;  %v12034_v62 = vcombine.low %v870_v24, %v874_v28  ;;  %16643 = vst [vmem:[#allocation51_spill] sm:$0xff] %v12767_v19  ;;  %v89_v24 = vld [vmem:[#allocation2 + $0x118] sm:$0xff] }
  0xc1   :  { %v738_v46 = vld [vmem:[#allocation5 + $0x1160] sm:$0xff]  ;;  %7463 = vmatpush1.bf16.msra.mxu0 %v11906_v53  ;;  %v97_v28 = vld [vmem:[#allocation2 + $0x158] sm:$0xff] }
  0xc2   :  { %v862_v61 = vld [vmem:[#allocation5 + $0x1540] sm:$0xff]  ;;  %v11899_v2 = vcombine.high %v734_v42, %v738_v46  ;;  %7575 = vmatprep.subr.bf16.mxu1 %v12035_v40  ;;  %v11898_v20 = vcombine.low %v734_v42, %v738_v46  ;;  %v12769_v40 = vcombine.high %v88_v16, %v96_v54  ;;  %v12772_v30 = vcombine.high %v89_v24, %v97_v28 }
  0xc3   :  { %v866_v51 = vld [vmem:[#allocation5 + $0x1560] sm:$0xff]  ;;  %7576 = vmatpush1.bf16.msra.mxu1 %v12034_v62 }
  0xc4   :  { %v12027_v3 = vcombine.high %v862_v61, %v866_v51  ;;  %v726_v8 = vld [vmem:[#allocation5 + $0x1100] sm:$0xff]  ;;  %7464 = vmatprep.subr.bf16.mxu0 %v11899_v2  ;;  %v12026_v34 = vcombine.low %v862_v61, %v866_v51  ;;  %16644 = vst [vmem:[#allocation52_spill] sm:$0xff] %v12769_v40  ;;  %7277 = vmatmul.mubr.bf16.gmra.mxu0 %v12765_v13  ;;  %16645 = vst [vmem:[#allocation53_spill] sm:$0xff] %v12772_v30 }
  0xc5   :  { %v730_v9 = vld [vmem:[#allocation5 + $0x1120] sm:$0xff]  ;;  %7465 = vmatpush1.bf16.msra.mxu0 %v11898_v20  ;;  %7286 = vmatprep.mubr.bf16.mxu0 %v12769_v40  ;;  %v120_v40 = vld [vmem:[#allocation2 + $0x210] sm:$0xff] }
  0xc6   :  { %v854_v12 = vld [vmem:[#allocation5 + $0x1500] sm:$0xff]  ;;  %v11891_v37 = vcombine.high %v726_v8, %v730_v9  ;;  %7577 = vmatprep.subr.bf16.mxu1 %v12027_v3  ;;  %7390 = vmatmul.mubr.bf16.gmra.mxu1 %v12767_v19  ;;  %v11890_v36 = vcombine.low %v726_v8, %v730_v9  ;;  %v12777_v3 = vcombine.low %v88_v16, %v96_v54  ;;  %v112_v19 = vld [vmem:[#allocation2 + $0x1d0] sm:$0xff] }
  0xc7   :  { %v858_v15 = vld [vmem:[#allocation5 + $0x1520] sm:$0xff]  ;;  %7578 = vmatpush1.bf16.msra.mxu1 %v12026_v34  ;;  %7399 = vmatprep.mubr.bf16.mxu1 %v12772_v30  ;;  %v12779_v8 = vcombine.low %v89_v24, %v97_v28 }
  0xc8   :  { %v12019_v38 = vcombine.high %v854_v12, %v858_v15  ;;  %v718_v56 = vld [vmem:[#allocation5 + $0x10c0] sm:$0xff]  ;;  %7466 = vmatprep.subr.bf16.mxu0 %v11891_v37  ;;  %v12018_v42 = vcombine.low %v854_v12, %v858_v15  ;;  %16646 = vst [vmem:[#allocation54_spill] sm:$0xff] %v12777_v3  ;;  %v105_v12 = vld [vmem:[#allocation2 + $0x198] sm:$0xff] }
  0xc9   :  { %v722_v29 = vld [vmem:[#allocation5 + $0x10e0] sm:$0xff]  ;;  %7467 = vmatpush1.bf16.msra.mxu0 %v11890_v36  ;;  %16647 = vst [vmem:[#allocation55_spill] sm:$0xff] %v12779_v8  ;;  %v113_v15 = vld [vmem:[#allocation2 + $0x1d8] sm:$0xff] }
  0xca   :  { %v846_v53 = vld [vmem:[#allocation5 + $0x14c0] sm:$0xff]  ;;  %v11883_v46 = vcombine.high %v718_v56, %v722_v29  ;;  %7579 = vmatprep.subr.bf16.mxu1 %v12019_v38  ;;  %v11882_v9 = vcombine.low %v718_v56, %v722_v29  ;;  %v12781_v38 = vcombine.high %v104_v50, %v112_v19  ;;  %v12784_v16 = vcombine.high %v105_v12, %v113_v15 }
  0xcb   :  { %v850_v59 = vld [vmem:[#allocation5 + $0x14e0] sm:$0xff]  ;;  %7580 = vmatpush1.bf16.msra.mxu1 %v12018_v42 }
  0xcc   :  { %v12011_v61 = vcombine.high %v846_v53, %v850_v59  ;;  %v710_v51 = vld [vmem:[#allocation5 + $0x1080] sm:$0xff]  ;;  %7468 = vmatprep.subr.bf16.mxu0 %v11883_v46  ;;  %v12010_v20 = vcombine.low %v846_v53, %v850_v59  ;;  %16648 = vst [vmem:[#allocation56_spill] sm:$0xff] %v12781_v38  ;;  %7287 = vmatmul.mubr.bf16.gmra.mxu0 %v12777_v3  ;;  %16649 = vst [vmem:[#allocation57_spill] sm:$0xff] %v12784_v16 }
  0xcd   :  { %v714_v62 = vld [vmem:[#allocation5 + $0x10a0] sm:$0xff]  ;;  %7469 = vmatpush1.bf16.msra.mxu0 %v11882_v9  ;;  %7296 = vmatprep.mubr.bf16.mxu0 %v12781_v38  ;;  %v136_v38 = vld [vmem:[#allocation2 + $0x290] sm:$0xff] }
  0xce   :  { %v838_v2 = vld [vmem:[#allocation5 + $0x1480] sm:$0xff]  ;;  %v11875_v34 = vcombine.high %v710_v51, %v714_v62  ;;  %7581 = vmatprep.subr.bf16.mxu1 %v12011_v61  ;;  %7400 = vmatmul.mubr.bf16.gmra.mxu1 %v12779_v8  ;;  %v11874_v56 = vcombine.low %v710_v51, %v714_v62  ;;  %v12789_v61 = vcombine.low %v104_v50, %v112_v19  ;;  %v128_v8 = vld [vmem:[#allocation2 + $0x250] sm:$0xff] }
  0xcf   :  { %v842_v13 = vld [vmem:[#allocation5 + $0x14a0] sm:$0xff]  ;;  %7582 = vmatpush1.bf16.msra.mxu1 %v12010_v20  ;;  %7409 = vmatprep.mubr.bf16.mxu1 %v12784_v16  ;;  %v12791_v51 = vcombine.low %v105_v12, %v113_v15 }
  0xd0   :  { %v12003_v37 = vcombine.high %v838_v2, %v842_v13  ;;  %v702_v30 = vld [vmem:[#allocation5 + $0x1040] sm:$0xff]  ;;  %7470 = vmatprep.subr.bf16.mxu0 %v11875_v34  ;;  %v12002_v28 = vcombine.low %v838_v2, %v842_v13  ;;  %16650 = vst [vmem:[#allocation58_spill] sm:$0xff] %v12789_v61  ;;  %v121_v13 = vld [vmem:[#allocation2 + $0x218] sm:$0xff] }
  0xd1   :  { %v706_v54 = vld [vmem:[#allocation5 + $0x1060] sm:$0xff]  ;;  %7471 = vmatpush1.bf16.msra.mxu0 %v11874_v56  ;;  %16651 = vst [vmem:[#allocation59_spill] sm:$0xff] %v12791_v51  ;;  %v129_v2 = vld [vmem:[#allocation2 + $0x258] sm:$0xff] }
  0xd2   :  { %v830_v36 = vld [vmem:[#allocation5 + $0x1440] sm:$0xff]  ;;  %v11867_v29 = vcombine.high %v702_v30, %v706_v54  ;;  %7583 = vmatprep.subr.bf16.mxu1 %v12003_v37  ;;  %v11866_v62 = vcombine.low %v702_v30, %v706_v54  ;;  %v12793_v37 = vcombine.high %v120_v40, %v128_v8  ;;  %v12796_v19 = vcombine.high %v121_v13, %v129_v2 }
  0xd3   :  { %v834_v24 = vld [vmem:[#allocation5 + $0x1460] sm:$0xff]  ;;  %7584 = vmatpush1.bf16.msra.mxu1 %v12002_v28 }
  0xd4   :  { %v11995_v53 = vcombine.high %v830_v36, %v834_v24  ;;  %v694_v59 = vld [vmem:[#allocation5 + $0x1000] sm:$0xff]  ;;  %7472 = vmatprep.subr.bf16.mxu0 %v11867_v29  ;;  %v11994_v9 = vcombine.low %v830_v36, %v834_v24  ;;  %16652 = vst [vmem:[#allocation60_spill] sm:$0xff] %v12793_v37  ;;  %7297 = vmatmul.mubr.bf16.gmra.mxu0 %v12789_v61  ;;  %16653 = vst [vmem:[#allocation61_spill] sm:$0xff] %v12796_v19 }
  0xd5   :  { %v698_v42 = vld [vmem:[#allocation5 + $0x1020] sm:$0xff]  ;;  %7473 = vmatpush1.bf16.msra.mxu0 %v11866_v62  ;;  %7306 = vmatprep.mubr.bf16.mxu0 %v12793_v37  ;;  %v152_v37 = vld [vmem:[#allocation2 + $0x310] sm:$0xff] }
  0xd6   :  { %v822_v46 = vld [vmem:[#allocation5 + $0x1400] sm:$0xff]  ;;  %v11859_v20 = vcombine.high %v694_v59, %v698_v42  ;;  %7585 = vmatprep.subr.bf16.mxu1 %v11995_v53  ;;  %7410 = vmatmul.mubr.bf16.gmra.mxu1 %v12791_v51  ;;  %v11858_v30 = vcombine.low %v694_v59, %v698_v42  ;;  %v12801_v53 = vcombine.low %v120_v40, %v128_v8  ;;  %v144_v51 = vld [vmem:[#allocation2 + $0x2d0] sm:$0xff] }
  0xd7   :  { %v826_v3 = vld [vmem:[#allocation5 + $0x1420] sm:$0xff]  ;;  %7586 = vmatpush1.bf16.msra.mxu1 %v11994_v9  ;;  %7419 = vmatprep.mubr.bf16.mxu1 %v12796_v19  ;;  %v12803_v59 = vcombine.low %v121_v13, %v129_v2 }
  0xd8   :  { %v11987_v34 = vcombine.high %v822_v46, %v826_v3  ;;  %v814_v16 = vld [vmem:[#allocation5 + $0x13c0] sm:$0xff]  ;;  %7474 = vmatprep.subr.bf16.mxu0 %v11859_v20  ;;  %v11986_v15 = vcombine.low %v822_v46, %v826_v3  ;;  %16654 = vst [vmem:[#allocation62_spill] sm:$0xff] %v12801_v53  ;;  %v137_v3 = vld [vmem:[#allocation2 + $0x298] sm:$0xff] }
  0xd9   :  { %v818_v50 = vld [vmem:[#allocation5 + $0x13e0] sm:$0xff]  ;;  %7475 = vmatpush1.bf16.msra.mxu0 %v11858_v30  ;;  %16655 = vst [vmem:[#allocation63_spill] sm:$0xff] %v12803_v59  ;;  %v145_v46 = vld [vmem:[#allocation2 + $0x2d8] sm:$0xff] }
  0xda   :  { %v942_v56 = vld [vmem:[#allocation5 + $0x17c0] sm:$0xff]  ;;  %v11979_v54 = vcombine.high %v814_v16, %v818_v50  ;;  %7587 = vmatprep.subr.bf16.mxu1 %v11987_v34  ;;  %v11978_v42 = vcombine.low %v814_v16, %v818_v50  ;;  %v12805_v34 = vcombine.high %v136_v38, %v144_v51  ;;  %v12808_v8 = vcombine.high %v137_v3, %v145_v46 }
  0xdb   :  { %v946_v12 = vld [vmem:[#allocation5 + $0x17e0] sm:$0xff]  ;;  %7588 = vmatpush1.bf16.msra.mxu1 %v11986_v15 }
  0xdc   :  { %v12107_v36 = vcombine.high %v942_v56, %v946_v12  ;;  %v806_v24 = vld [vmem:[#allocation5 + $0x1380] sm:$0xff]  ;;  %7476 = vmatprep.subr.bf16.mxu0 %v11979_v54  ;;  %v12106_v62 = vcombine.low %v942_v56, %v946_v12  ;;  %16656 = vst [vmem:[#allocation64_spill] sm:$0xff] %v12805_v34  ;;  %7307 = vmatmul.mubr.bf16.gmra.mxu0 %v12801_v53  ;;  %16657 = vst [vmem:[#allocation65_spill] sm:$0xff] %v12808_v8 }
  0xdd   :  { %v810_v28 = vld [vmem:[#allocation5 + $0x13a0] sm:$0xff]  ;;  %7477 = vmatpush2.bf16.msra.mxu0 %v11978_v42  ;;  %7316 = vmatprep.mubr.bf16.mxu0 %v12805_v34  ;;  %v168_v34 = vld [vmem:[#allocation2 + $0x390] sm:$0xff] }
  0xde   :  { %v934_v29 = vld [vmem:[#allocation5 + $0x1780] sm:$0xff]  ;;  %v11971_v9 = vcombine.high %v806_v24, %v810_v28  ;;  %7589 = vmatprep.subr.bf16.mxu1 %v12107_v36  ;;  %7420 = vmatmul.mubr.bf16.gmra.mxu1 %v12803_v59  ;;  %v11970_v16 = vcombine.low %v806_v24, %v810_v28  ;;  %v12813_v36 = vcombine.low %v136_v38, %v144_v51  ;;  %v160_v59 = vld [vmem:[#allocation2 + $0x350] sm:$0xff] }
  0xdf   :  { %v938_v61 = vld [vmem:[#allocation5 + $0x17a0] sm:$0xff]  ;;  %7590 = vmatpush2.bf16.msra.mxu1 %v12106_v62  ;;  %7429 = vmatprep.mubr.bf16.mxu1 %v12808_v8  ;;  %v12815_v24 = vcombine.low %v137_v3, %v145_v46 }
  0xe0   :  { %v12099_v20 = vcombine.high %v934_v29, %v938_v61  ;;  %v798_v19 = vld [vmem:[#allocation5 + $0x1340] sm:$0xff]  ;;  %7478 = vmatprep.subr.bf16.mxu0 %v11971_v9  ;;  %v12098_v2 = vcombine.low %v934_v29, %v938_v61  ;;  %16658 = vst [vmem:[#allocation66_spill] sm:$0xff] %v12813_v36  ;;  %v153_v61 = vld [vmem:[#allocation2 + $0x318] sm:$0xff] }
  0xe1   :  { %v802_v40 = vld [vmem:[#allocation5 + $0x1360] sm:$0xff]  ;;  %7479 = vmatpush2.bf16.msra.mxu0 %v11970_v16  ;;  %16659 = vst [vmem:[#allocation67_spill] sm:$0xff] %v12815_v24  ;;  %v161_v29 = vld [vmem:[#allocation2 + $0x358] sm:$0xff] }
  0xe2   :  { %v926_v30 = vld [vmem:[#allocation5 + $0x1740] sm:$0xff]  ;;  %v11963_v50 = vcombine.high %v798_v19, %v802_v40  ;;  %7591 = vmatprep.subr.bf16.mxu1 %v12099_v20  ;;  %v11962_v28 = vcombine.low %v798_v19, %v802_v40  ;;  %v12817_v20 = vcombine.high %v152_v37, %v160_v59  ;;  %v12820_v51 = vcombine.high %v153_v61, %v161_v29 }
  0xe3   :  { %v930_v13 = vld [vmem:[#allocation5 + $0x1760] sm:$0xff]  ;;  %7592 = vmatpush2.bf16.msra.mxu1 %v12098_v2 }
  0xe4   :  { %v12091_v56 = vcombine.high %v926_v30, %v930_v13  ;;  %v790_v12 = vld [vmem:[#allocation5 + $0x1300] sm:$0xff]  ;;  %7480 = vmatprep.subr.bf16.mxu0 %v11963_v50  ;;  %v12090_v42 = vcombine.low %v926_v30, %v930_v13  ;;  %16660 = vst [vmem:[#allocation68_spill] sm:$0xff] %v12817_v20  ;;  %7317 = vmatmul.mubr.bf16.gmra.mxu0 %v12813_v36  ;;  %16661 = vst [vmem:[#allocation69_spill] sm:$0xff] %v12820_v51 }
  0xe5   :  { %v794_v15 = vld [vmem:[#allocation5 + $0x1320] sm:$0xff]  ;;  %7481 = vmatpush2.bf16.msra.mxu0 %v11962_v28  ;;  %7326 = vmatprep.mubr.bf16.mxu0 %v12817_v20 }
  0xe6   :  { %v918_v54 = vld [vmem:[#allocation5 + $0x1700] sm:$0xff]  ;;  %v11955_v62 = vcombine.high %v790_v12, %v794_v15  ;;  %7593 = vmatprep.subr.bf16.mxu1 %v12091_v56  ;;  %7430 = vmatmul.mubr.bf16.gmra.mxu1 %v12815_v24  ;;  %v11954_v19 = vcombine.low %v790_v12, %v794_v15  ;;  %v12825_v56 = vcombine.low %v152_v37, %v160_v59  ;;  %v176_v24 = vld [vmem:[#allocation2 + $0x3d0] sm:$0xff] }
  0xe7   :  { %v922_v53 = vld [vmem:[#allocation5 + $0x1720] sm:$0xff]  ;;  %7594 = vmatpush2.bf16.msra.mxu1 %v12090_v42  ;;  %7439 = vmatprep.mubr.bf16.mxu1 %v12820_v51  ;;  %v12827_v12 = vcombine.low %v153_v61, %v161_v29 }
  0xe8   :  { %v12083_v9 = vcombine.high %v918_v54, %v922_v53  ;;  %v782_v8 = vld [vmem:[#allocation5 + $0x12c0] sm:$0xff]  ;;  %7482 = vmatprep.subr.bf16.mxu0 %v11955_v62  ;;  %v12082_v46 = vcombine.low %v918_v54, %v922_v53  ;;  %16662 = vst [vmem:[#allocation70_spill] sm:$0xff] %v12825_v56  ;;  %v169_v53 = vld [vmem:[#allocation2 + $0x398] sm:$0xff] }
  0xe9   :  { %v786_v38 = vld [vmem:[#allocation5 + $0x12e0] sm:$0xff]  ;;  %7483 = vmatpush2.bf16.msra.mxu0 %v11954_v19  ;;  %16663 = vst [vmem:[#allocation71_spill] sm:$0xff] %v12827_v12  ;;  %v177_v54 = vld [vmem:[#allocation2 + $0x3d8] sm:$0xff] }
  0xea   :  { %v910_v16 = vld [vmem:[#allocation5 + $0x16c0] sm:$0xff]  ;;  %v11947_v40 = vcombine.high %v782_v8, %v786_v38  ;;  %7595 = vmatprep.subr.bf16.mxu1 %v12083_v9  ;;  %v11946_v15 = vcombine.low %v782_v8, %v786_v38  ;;  %v12829_v9 = vcombine.high %v168_v34, %v176_v24  ;;  %v12832_v59 = vcombine.high %v169_v53, %v177_v54 }
  0xeb   :  { %v914_v3 = vld [vmem:[#allocation5 + $0x16e0] sm:$0xff]  ;;  %7596 = vmatpush2.bf16.msra.mxu1 %v12082_v46 }
  0xec   :  { %v12075_v30 = vcombine.high %v910_v16, %v914_v3  ;;  %v774_v13 = vld [vmem:[#allocation5 + $0x1280] sm:$0xff]  ;;  %7484 = vmatprep.subr.bf16.mxu0 %v11947_v40  ;;  %v12074_v28 = vcombine.low %v910_v16, %v914_v3  ;;  %16664 = vst [vmem:[#allocation72_spill] sm:$0xff] %v12829_v9  ;;  %7327 = vmatmul.mubr.bf16.gmra.mxu0 %v12825_v56  ;;  %16665 = vst [vmem:[#allocation73_spill] sm:$0xff] %v12832_v59 }
  0xed   :  { %v778_v2 = vld [vmem:[#allocation5 + $0x12a0] sm:$0xff]  ;;  %7485 = vmatpush2.bf16.msra.mxu0 %v11946_v15  ;;  %7336 = vmatprep.mubr.bf16.mxu0 %v12829_v9 }
  0xee   :  { %v902_v50 = vld [vmem:[#allocation5 + $0x1680] sm:$0xff]  ;;  %v11939_v42 = vcombine.high %v774_v13, %v778_v2  ;;  %7597 = vmatprep.subr.bf16.mxu1 %v12075_v30  ;;  %7440 = vmatmul.mubr.bf16.gmra.mxu1 %v12827_v12  ;;  %v11938_v8 = vcombine.low %v774_v13, %v778_v2  ;;  %v12837_v30 = vcombine.low %v168_v34, %v176_v24 }
  0xef   :  { %v906_v36 = vld [vmem:[#allocation5 + $0x16a0] sm:$0xff]  ;;  %7598 = vmatpush2.bf16.msra.mxu1 %v12074_v28  ;;  %7449 = vmatprep.mubr.bf16.mxu1 %v12832_v59  ;;  %v12839_v13 = vcombine.low %v169_v53, %v177_v54 }
  0xf0   :  { %v12067_v62 = vcombine.high %v902_v50, %v906_v36  ;;  %v766_v51 = vld [vmem:[#allocation5 + $0x1240] sm:$0xff]  ;;  %7486 = vmatprep.subr.bf16.mxu0 %v11939_v42  ;;  %v12066_v29 = vcombine.low %v902_v50, %v906_v36  ;;  %16666 = vst [vmem:[#allocation74_spill] sm:$0xff] %v12837_v30  ;;  %v59_v36 = vld [vmem:[#allocation2 + $0x28] sm:$0xff] }
  0xf1   :  { %v770_v37 = vld [vmem:[#allocation5 + $0x1260] sm:$0xff]  ;;  %7487 = vmatpush2.bf16.msra.mxu0 %v11938_v8  ;;  %16667 = vst [vmem:[#allocation75_spill] sm:$0xff] %v12839_v13  ;;  %v67_v50 = vld [vmem:[#allocation2 + $0x68] sm:$0xff] }
  0xf2   :  { %v894_v19 = vld [vmem:[#allocation5 + $0x1640] sm:$0xff]  ;;  %v11931_v38 = vcombine.high %v766_v51, %v770_v37  ;;  %7599 = vmatprep.subr.bf16.mxu1 %v12067_v62  ;;  %v11930_v2 = vcombine.low %v766_v51, %v770_v37  ;;  %v12844_v24 = vcombine.high %v59_v36, %v67_v50 }
  0xf3   :  { %v898_v61 = vld [vmem:[#allocation5 + $0x1660] sm:$0xff]  ;;  %7600 = vmatpush2.bf16.msra.mxu1 %v12066_v29 }
  0xf4   :  { %v12059_v16 = vcombine.high %v894_v19, %v898_v61  ;;  %v758_v3 = vld [vmem:[#allocation5 + $0x1200] sm:$0xff]  ;;  %7488 = vmatprep.subr.bf16.mxu0 %v11931_v38  ;;  %v12058_v15 = vcombine.low %v894_v19, %v898_v61  ;;  %7337 = vmatmul.mubr.bf16.gmra.mxu0 %v12837_v30  ;;  %16669 = vst [vmem:[#allocation77_spill] sm:$0xff] %v12844_v24 }
  0xf5   :  { %v762_v46 = vld [vmem:[#allocation5 + $0x1220] sm:$0xff]  ;;  %7489 = vmatpush2.bf16.msra.mxu0 %v11930_v2 }
  0xf6   :  { %v886_v40 = vld [vmem:[#allocation5 + $0x1600] sm:$0xff]  ;;  %v11923_v28 = vcombine.high %v758_v3, %v762_v46  ;;  %7601 = vmatprep.subr.bf16.mxu1 %v12059_v16  ;;  %7450 = vmatmul.mubr.bf16.gmra.mxu1 %v12839_v13  ;;  %v11922_v51 = vcombine.low %v758_v3, %v762_v46  ;;  %v12851_v3 = vcombine.low %v59_v36, %v67_v50 }
  0xf7   :  { %v890_v56 = vld [vmem:[#allocation5 + $0x1620] sm:$0xff]  ;;  %7602 = vmatpush2.bf16.msra.mxu1 %v12058_v15  ;;  %7605 = vmatprep.mubr.bf16.mxu1 %v12844_v24 }
  0xf8   :  { %v58_v20 = vld [vmem:[#allocation2 + $0x20] sm:$0xff]  ;;  %v12051_v42 = vcombine.high %v886_v40, %v890_v56  ;;  %7490 = vmatprep.subr.bf16.mxu0 %v11923_v28  ;;  %v12050_v54 = vcombine.low %v886_v40, %v890_v56  ;;  %16671 = vst [vmem:[#allocation79_spill] sm:$0xff] %v12851_v3  ;;  %v75_v56 = vld [vmem:[#allocation2 + $0xa8] sm:$0xff] }
  0xf9   :  { %v66_v12 = vld [vmem:[#allocation2 + $0x60] sm:$0xff]  ;;  %7491 = vmatpush2.bf16.msra.mxu0 %v11922_v51  ;;  %v83_v40 = vld [vmem:[#allocation2 + $0xe8] sm:$0xff] }
  0xfa   :  { %v12841_v62 = vcombine.high %v58_v20, %v66_v12  ;;  %v1006_v59 = vld [vmem:[#allocation5 + $0x19c0] sm:$0xff]  ;;  %7603 = vmatprep.subr.bf16.mxu1 %v12051_v42  ;;  %v12848_v16 = vcombine.low %v58_v20, %v66_v12  ;;  %v12856_v24 = vcombine.high %v75_v56, %v83_v40 }
  0xfb   :  { %v1010_v34 = vld [vmem:[#allocation5 + $0x19e0] sm:$0xff]  ;;  %7604 = vmatpush2.bf16.msra.mxu1 %v12050_v54 }
  0xfc   :  { %16668 = vst [vmem:[#allocation76_spill] sm:$0xff] %v12841_v62  ;;  %v1134_v8 = vld [vmem:[#allocation5 + $0x1dc0] sm:$0xff]  ;;  %v12171_v37 = vcombine.high %v1006_v59, %v1010_v34  ;;  %7492 = vmatprep.mubr.bf16.mxu0 %v12841_v62  ;;  %16670 = vst [vmem:[#allocation78_spill] sm:$0xff] %v12848_v16  ;;  %v12170_v46 = vcombine.low %v1006_v59, %v1010_v34 }
  0xfd   :  { %v1138_v53 = vld [vmem:[#allocation5 + $0x1de0] sm:$0xff]  ;;  %7493 = vmatmul.mubr.bf16.vlgmr.msra.gmra.mxu0 %v12848_v16  ;;  %16673 = vst [vmem:[#allocation81_spill] sm:$0xff] %v12856_v24 }
  0xfe   :  { %v12299_v19 = vcombine.high %v1134_v8, %v1138_v53  ;;  %v998_v61 = vld [vmem:[#allocation5 + $0x1980] sm:$0xff]  ;;  %7686 = vmatprep.subr.bf16.mxu0 %v12171_v37  ;;  %v12298_v2 = vcombine.low %v1134_v8, %v1138_v53  ;;  %7606 = vmatmul.mubr.bf16.vlgmr.msra.gmra.mxu1 %v12851_v3 }
  0xff   :  { %v1002_v29 = vld [vmem:[#allocation5 + $0x19a0] sm:$0xff]  ;;  %7687 = vmatpush1.bf16.msra.mxu0 %v12170_v46  ;;  %7615 = vmatprep.mubr.bf16.mxu1 %v12856_v24 }
 0x100   :  { %v1126_v38 = vld [vmem:[#allocation5 + $0x1d80] sm:$0xff]  ;;  %v12163_v15 = vcombine.high %v998_v61, %v1002_v29  ;;  %7799 = vmatprep.subr.bf16.mxu1 %v12299_v19  ;;  %v12162_v59 = vcombine.low %v998_v61, %v1002_v29  ;;  %v12863_v61 = vcombine.low %v75_v56, %v83_v40 }
 0x101   :  { %v1130_v30 = vld [vmem:[#allocation5 + $0x1da0] sm:$0xff]  ;;  %7800 = vmatpush1.bf16.msra.mxu1 %v12298_v2 }
 0x102   :  { %v74_v9 = vld [vmem:[#allocation2 + $0xa0] sm:$0xff]  ;;  %v12291_v28 = vcombine.high %v1126_v38, %v1130_v30  ;;  %7688 = vmatprep.subr.bf16.mxu0 %v12163_v15  ;;  %v12290_v50 = vcombine.low %v1126_v38, %v1130_v30  ;;  %16675 = vst [vmem:[#allocation83_spill] sm:$0xff] %v12863_v61  ;;  %v91_v30 = vld [vmem:[#allocation2 + $0x128] sm:$0xff] }
 0x103   :  { %v82_v13 = vld [vmem:[#allocation2 + $0xe0] sm:$0xff]  ;;  %7689 = vmatpush1.bf16.msra.mxu0 %v12162_v59  ;;  %v99_v38 = vld [vmem:[#allocation2 + $0x168] sm:$0xff] }
 0x104   :  { %v12853_v42 = vcombine.high %v74_v9, %v82_v13  ;;  %v990_v20 = vld [vmem:[#allocation5 + $0x1940] sm:$0xff]  ;;  %7801 = vmatprep.subr.bf16.mxu1 %v12291_v28  ;;  %v12861_v19 = vcombine.low %v74_v9, %v82_v13  ;;  %v12868_v13 = vcombine.high %v91_v30, %v99_v38 }
 0x105   :  { %v994_v12 = vld [vmem:[#allocation5 + $0x1960] sm:$0xff]  ;;  %7802 = vmatpush1.bf16.msra.mxu1 %v12290_v50 }
 0x106   :  { %16672 = vst [vmem:[#allocation80_spill] sm:$0xff] %v12853_v42  ;;  %v1118_v51 = vld [vmem:[#allocation5 + $0x1d40] sm:$0xff]  ;;  %v12155_v34 = vcombine.high %v990_v20, %v994_v12  ;;  %7502 = vmatprep.mubr.bf16.mxu0 %v12853_v42  ;;  %16674 = vst [vmem:[#allocation82_spill] sm:$0xff] %v12861_v19  ;;  %v12154_v29 = vcombine.low %v990_v20, %v994_v12  ;;  %7616 = vmatmul.mubr.bf16.gmra.mxu1 %v12863_v61 }
 0x107   :  { %v1122_v36 = vld [vmem:[#allocation5 + $0x1d60] sm:$0xff]  ;;  %7503 = vmatmul.mubr.bf16.gmra.mxu0 %v12861_v19  ;;  %16677 = vst [vmem:[#allocation85_spill] sm:$0xff] %v12868_v13  ;;  %7625 = vmatprep.mubr.bf16.mxu1 %v12868_v13 }
 0x108   :  { %v12283_v8 = vcombine.high %v1118_v51, %v1122_v36  ;;  %v982_v53 = vld [vmem:[#allocation5 + $0x1900] sm:$0xff]  ;;  %7690 = vmatprep.subr.bf16.mxu0 %v12155_v34  ;;  %v12282_v46 = vcombine.low %v1118_v51, %v1122_v36 }
 0x109   :  { %v986_v54 = vld [vmem:[#allocation5 + $0x1920] sm:$0xff]  ;;  %7691 = vmatpush1.bf16.msra.mxu0 %v12154_v29 }
 0x10a   :  { %v1110_v37 = vld [vmem:[#allocation5 + $0x1d00] sm:$0xff]  ;;  %v12147_v2 = vcombine.high %v982_v53, %v986_v54  ;;  %7803 = vmatprep.subr.bf16.mxu1 %v12283_v8  ;;  %v12146_v40 = vcombine.low %v982_v53, %v986_v54  ;;  %v12875_v53 = vcombine.low %v91_v30, %v99_v38 }
 0x10b   :  { %v1114_v16 = vld [vmem:[#allocation5 + $0x1d20] sm:$0xff]  ;;  %7804 = vmatpush1.bf16.msra.mxu1 %v12282_v46 }
 0x10c   :  { %v90_v62 = vld [vmem:[#allocation2 + $0x120] sm:$0xff]  ;;  %v12275_v15 = vcombine.high %v1110_v37, %v1114_v16  ;;  %7692 = vmatprep.subr.bf16.mxu0 %v12147_v2  ;;  %v12274_v20 = vcombine.low %v1110_v37, %v1114_v16  ;;  %16679 = vst [vmem:[#allocation87_spill] sm:$0xff] %v12875_v53  ;;  %v107_v16 = vld [vmem:[#allocation2 + $0x1a8] sm:$0xff] }
 0x10d   :  { %v98_v3 = vld [vmem:[#allocation2 + $0x160] sm:$0xff]  ;;  %7693 = vmatpush1.bf16.msra.mxu0 %v12146_v40  ;;  %v115_v37 = vld [vmem:[#allocation2 + $0x1e8] sm:$0xff] }
 0x10e   :  { %v12865_v28 = vcombine.high %v90_v62, %v98_v3  ;;  %v974_v24 = vld [vmem:[#allocation5 + $0x18c0] sm:$0xff]  ;;  %7805 = vmatprep.subr.bf16.mxu1 %v12275_v15  ;;  %v12873_v8 = vcombine.low %v90_v62, %v98_v3  ;;  %v12880_v3 = vcombine.high %v107_v16, %v115_v37  ;;  %7626 = vmatmul.mubr.bf16.gmra.mxu1 %v12875_v53 }
 0x10f   :  { %v978_v9 = vld [vmem:[#allocation5 + $0x18e0] sm:$0xff]  ;;  %7806 = vmatpush1.bf16.msra.mxu1 %v12274_v20 }
 0x110   :  { %16676 = vst [vmem:[#allocation84_spill] sm:$0xff] %v12865_v28  ;;  %v1102_v59 = vld [vmem:[#allocation5 + $0x1cc0] sm:$0xff]  ;;  %v12139_v12 = vcombine.high %v974_v24, %v978_v9  ;;  %7512 = vmatprep.mubr.bf16.mxu0 %v12865_v28  ;;  %16678 = vst [vmem:[#allocation86_spill] sm:$0xff] %v12873_v8  ;;  %v12138_v54 = vcombine.low %v974_v24, %v978_v9  ;;  %7635 = vmatprep.mubr.bf16.mxu1 %v12880_v3 }
 0x111   :  { %v1106_v56 = vld [vmem:[#allocation5 + $0x1ce0] sm:$0xff]  ;;  %7513 = vmatmul.mubr.bf16.gmra.mxu0 %v12873_v8  ;;  %16681 = vst [vmem:[#allocation89_spill] sm:$0xff] %v12880_v3 }
 0x112   :  { %v12267_v51 = vcombine.high %v1102_v59, %v1106_v56  ;;  %v966_v36 = vld [vmem:[#allocation5 + $0x1880] sm:$0xff]  ;;  %7694 = vmatprep.subr.bf16.mxu0 %v12139_v12  ;;  %v12266_v29 = vcombine.low %v1102_v59, %v1106_v56 }
 0x113   :  { %v970_v50 = vld [vmem:[#allocation5 + $0x18a0] sm:$0xff]  ;;  %7695 = vmatpush1.bf16.msra.mxu0 %v12138_v54 }
 0x114   :  { %v1094_v34 = vld [vmem:[#allocation5 + $0x1c80] sm:$0xff]  ;;  %v12131_v46 = vcombine.high %v966_v36, %v970_v50  ;;  %7807 = vmatprep.subr.bf16.mxu1 %v12267_v51  ;;  %v12130_v24 = vcombine.low %v966_v36, %v970_v50  ;;  %v12887_v36 = vcombine.low %v107_v16, %v115_v37 }
 0x115   :  { %v1098_v19 = vld [vmem:[#allocation5 + $0x1ca0] sm:$0xff]  ;;  %7808 = vmatpush1.bf16.msra.mxu1 %v12266_v29 }
 0x116   :  { %v106_v42 = vld [vmem:[#allocation2 + $0x1a0] sm:$0xff]  ;;  %v12259_v2 = vcombine.high %v1094_v34, %v1098_v19  ;;  %7696 = vmatprep.subr.bf16.mxu0 %v12131_v46  ;;  %v12258_v38 = vcombine.low %v1094_v34, %v1098_v19  ;;  %16683 = vst [vmem:[#allocation91_spill] sm:$0xff] %v12887_v36  ;;  %v123_v19 = vld [vmem:[#allocation2 + $0x228] sm:$0xff]  ;;  %7636 = vmatmul.mubr.bf16.gmra.mxu1 %v12887_v36 }
 0x117   :  { %v114_v61 = vld [vmem:[#allocation2 + $0x1e0] sm:$0xff]  ;;  %7697 = vmatpush1.bf16.msra.mxu0 %v12130_v24  ;;  %v131_v34 = vld [vmem:[#allocation2 + $0x268] sm:$0xff] }
 0x118   :  { %v12877_v15 = vcombine.high %v106_v42, %v114_v61  ;;  %v958_v13 = vld [vmem:[#allocation5 + $0x1840] sm:$0xff]  ;;  %7809 = vmatprep.subr.bf16.mxu1 %v12259_v2  ;;  %v12885_v51 = vcombine.low %v106_v42, %v114_v61  ;;  %v12892_v61 = vcombine.high %v123_v19, %v131_v34 }
 0x119   :  { %v962_v62 = vld [vmem:[#allocation5 + $0x1860] sm:$0xff]  ;;  %7810 = vmatpush1.bf16.msra.mxu1 %v12258_v38 }
 0x11a   :  { %16680 = vst [vmem:[#allocation88_spill] sm:$0xff] %v12877_v15  ;;  %v1086_v40 = vld [vmem:[#allocation5 + $0x1c40] sm:$0xff]  ;;  %v12123_v9 = vcombine.high %v958_v13, %v962_v62  ;;  %7522 = vmatprep.mubr.bf16.mxu0 %v12877_v15  ;;  %16682 = vst [vmem:[#allocation90_spill] sm:$0xff] %v12885_v51  ;;  %v12122_v50 = vcombine.low %v958_v13, %v962_v62  ;;  %7645 = vmatprep.mubr.bf16.mxu1 %v12892_v61 }
 0x11b   :  { %v1090_v30 = vld [vmem:[#allocation5 + $0x1c60] sm:$0xff]  ;;  %7523 = vmatmul.mubr.bf16.gmra.mxu0 %v12885_v51  ;;  %16685 = vst [vmem:[#allocation93_spill] sm:$0xff] %v12892_v61 }
 0x11c   :  { %v12251_v59 = vcombine.high %v1086_v40, %v1090_v30  ;;  %v950_v56 = vld [vmem:[#allocation5 + $0x1800] sm:$0xff]  ;;  %7698 = vmatprep.subr.bf16.mxu0 %v12123_v9  ;;  %v12250_v54 = vcombine.low %v1086_v40, %v1090_v30 }
 0x11d   :  { %v954_v20 = vld [vmem:[#allocation5 + $0x1820] sm:$0xff]  ;;  %7699 = vmatpush1.bf16.msra.mxu0 %v12122_v50 }
 0x11e   :  { %v1078_v12 = vld [vmem:[#allocation5 + $0x1c00] sm:$0xff]  ;;  %v12115_v29 = vcombine.high %v950_v56, %v954_v20  ;;  %7811 = vmatprep.subr.bf16.mxu1 %v12251_v59  ;;  %v12114_v13 = vcombine.low %v950_v56, %v954_v20  ;;  %v12899_v56 = vcombine.low %v123_v19, %v131_v34 }
 0x11f   :  { %v1082_v8 = vld [vmem:[#allocation5 + $0x1c20] sm:$0xff]  ;;  %7812 = vmatpush1.bf16.msra.mxu1 %v12250_v54 }
 0x120   :  { %v122_v28 = vld [vmem:[#allocation2 + $0x220] sm:$0xff]  ;;  %v12243_v46 = vcombine.high %v1078_v12, %v1082_v8  ;;  %7700 = vmatprep.subr.bf16.mxu0 %v12115_v29  ;;  %v12242_v37 = vcombine.low %v1078_v12, %v1082_v8  ;;  %16687 = vst [vmem:[#allocation95_spill] sm:$0xff] %v12899_v56  ;;  %v139_v8 = vld [vmem:[#allocation2 + $0x2a8] sm:$0xff]  ;;  %7646 = vmatmul.mubr.bf16.gmra.mxu1 %v12899_v56 }
 0x121   :  { %v130_v53 = vld [vmem:[#allocation2 + $0x260] sm:$0xff]  ;;  %7701 = vmatpush1.bf16.msra.mxu0 %v12114_v13  ;;  %v147_v12 = vld [vmem:[#allocation2 + $0x2e8] sm:$0xff] }
 0x122   :  { %v12889_v2 = vcombine.high %v122_v28, %v130_v53  ;;  %v1070_v3 = vld [vmem:[#allocation5 + $0x1bc0] sm:$0xff]  ;;  %7813 = vmatprep.subr.bf16.mxu1 %v12243_v46  ;;  %v12897_v59 = vcombine.low %v122_v28, %v130_v53  ;;  %v12904_v53 = vcombine.high %v139_v8, %v147_v12 }
 0x123   :  { %v1074_v42 = vld [vmem:[#allocation5 + $0x1be0] sm:$0xff]  ;;  %7814 = vmatpush1.bf16.msra.mxu1 %v12242_v37 }
 0x124   :  { %16684 = vst [vmem:[#allocation92_spill] sm:$0xff] %v12889_v2  ;;  %v1198_v24 = vld [vmem:[#allocation5 + $0x1fc0] sm:$0xff]  ;;  %v12235_v62 = vcombine.high %v1070_v3, %v1074_v42  ;;  %7532 = vmatprep.mubr.bf16.mxu0 %v12889_v2  ;;  %16686 = vst [vmem:[#allocation94_spill] sm:$0xff] %v12897_v59  ;;  %v12234_v20 = vcombine.low %v1070_v3, %v1074_v42  ;;  %7655 = vmatprep.mubr.bf16.mxu1 %v12904_v53 }
 0x125   :  { %v1202_v16 = vld [vmem:[#allocation5 + $0x1fe0] sm:$0xff]  ;;  %7533 = vmatmul.mubr.bf16.gmra.mxu0 %v12897_v59  ;;  %16689 = vst [vmem:[#allocation97_spill] sm:$0xff] %v12904_v53 }
 0x126   :  { %v12363_v40 = vcombine.high %v1198_v24, %v1202_v16  ;;  %v1062_v30 = vld [vmem:[#allocation5 + $0x1b80] sm:$0xff]  ;;  %7702 = vmatprep.subr.bf16.mxu0 %v12235_v62  ;;  %v12362_v50 = vcombine.low %v1198_v24, %v1202_v16 }
 0x127   :  { %v1066_v38 = vld [vmem:[#allocation5 + $0x1ba0] sm:$0xff]  ;;  %7703 = vmatpush2.bf16.msra.mxu0 %v12234_v20 }
 0x128   :  { %v1190_v9 = vld [vmem:[#allocation5 + $0x1f80] sm:$0xff]  ;;  %v12227_v54 = vcombine.high %v1062_v30, %v1066_v38  ;;  %7815 = vmatprep.subr.bf16.mxu1 %v12363_v40  ;;  %v12226_v3 = vcombine.low %v1062_v30, %v1066_v38  ;;  %v12911_v30 = vcombine.low %v139_v8, %v147_v12 }
 0x129   :  { %v1194_v51 = vld [vmem:[#allocation5 + $0x1fa0] sm:$0xff]  ;;  %7816 = vmatpush2.bf16.msra.mxu1 %v12362_v50 }
 0x12a   :  { %v138_v15 = vld [vmem:[#allocation2 + $0x2a0] sm:$0xff]  ;;  %v12355_v29 = vcombine.high %v1190_v9, %v1194_v51  ;;  %7704 = vmatprep.subr.bf16.mxu0 %v12227_v54  ;;  %v12354_v34 = vcombine.low %v1190_v9, %v1194_v51  ;;  %16691 = vst [vmem:[#allocation99_spill] sm:$0xff] %v12911_v30  ;;  %v155_v51 = vld [vmem:[#allocation2 + $0x328] sm:$0xff]  ;;  %7656 = vmatmul.mubr.bf16.gmra.mxu1 %v12911_v30 }
 0x12b   :  { %v146_v36 = vld [vmem:[#allocation2 + $0x2e0] sm:$0xff]  ;;  %7705 = vmatpush2.bf16.msra.mxu0 %v12226_v3  ;;  %v163_v9 = vld [vmem:[#allocation2 + $0x368] sm:$0xff] }
 0x12c   :  { %v12901_v46 = vcombine.high %v138_v15, %v146_v36  ;;  %v1054_v61 = vld [vmem:[#allocation5 + $0x1b40] sm:$0xff]  ;;  %7817 = vmatprep.subr.bf16.mxu1 %v12355_v29  ;;  %v12909_v40 = vcombine.low %v138_v15, %v146_v36  ;;  %v12916_v36 = vcombine.high %v155_v51, %v163_v9 }
 0x12d   :  { %v1058_v28 = vld [vmem:[#allocation5 + $0x1b60] sm:$0xff]  ;;  %7818 = vmatpush2.bf16.msra.mxu1 %v12354_v34 }
 0x12e   :  { %16688 = vst [vmem:[#allocation96_spill] sm:$0xff] %v12901_v46  ;;  %v1182_v13 = vld [vmem:[#allocation5 + $0x1f40] sm:$0xff]  ;;  %v12219_v42 = vcombine.high %v1054_v61, %v1058_v28  ;;  %7542 = vmatprep.mubr.bf16.mxu0 %v12901_v46  ;;  %16690 = vst [vmem:[#allocation98_spill] sm:$0xff] %v12909_v40  ;;  %v12218_v38 = vcombine.low %v1054_v61, %v1058_v28  ;;  %7665 = vmatprep.mubr.bf16.mxu1 %v12916_v36 }
 0x12f   :  { %v1186_v19 = vld [vmem:[#allocation5 + $0x1f60] sm:$0xff]  ;;  %7543 = vmatmul.mubr.bf16.gmra.mxu0 %v12909_v40  ;;  %16693 = vst [vmem:[#allocation101_spill] sm:$0xff] %v12916_v36 }
 0x130   :  { %v12347_v24 = vcombine.high %v1182_v13, %v1186_v19  ;;  %v1046_v16 = vld [vmem:[#allocation5 + $0x1b00] sm:$0xff]  ;;  %7706 = vmatprep.subr.bf16.mxu0 %v12219_v42  ;;  %v12346_v20 = vcombine.low %v1182_v13, %v1186_v19 }
 0x131   :  { %v1050_v37 = vld [vmem:[#allocation5 + $0x1b20] sm:$0xff]  ;;  %7707 = vmatpush2.bf16.msra.mxu0 %v12218_v38 }
 0x132   :  { %v1174_v62 = vld [vmem:[#allocation5 + $0x1f00] sm:$0xff]  ;;  %v12211_v50 = vcombine.high %v1046_v16, %v1050_v37  ;;  %7819 = vmatprep.subr.bf16.mxu1 %v12347_v24  ;;  %v12210_v61 = vcombine.low %v1046_v16, %v1050_v37  ;;  %v12923_v16 = vcombine.low %v155_v51, %v163_v9  ;;  %v1208_v9 = vlaneseq }
 0x133   :  { %v1178_v59 = vld [vmem:[#allocation5 + $0x1f20] sm:$0xff]  ;;  %7820 = vmatpush2.bf16.msra.mxu1 %v12346_v20 }
 0x134   :  { %v154_v2 = vld [vmem:[#allocation2 + $0x320] sm:$0xff]  ;;  %v12339_v54 = vcombine.high %v1174_v62, %v1178_v59  ;;  %7708 = vmatprep.subr.bf16.mxu0 %v12211_v50  ;;  %v12338_v12 = vcombine.low %v1174_v62, %v1178_v59  ;;  %16695 = vst [vmem:[#allocation103_spill] sm:$0xff] %v12923_v16  ;;  %v171_v59 = vld [vmem:[#allocation2 + $0x3a8] sm:$0xff]  ;;  %7666 = vmatmul.mubr.bf16.gmra.mxu1 %v12923_v16  ;;  %v60_v16 = vld [vmem:[#allocation2 + $0x30] sm:$0xff] }
 0x135   :  { %v162_v56 = vld [vmem:[#allocation2 + $0x360] sm:$0xff]  ;;  %7709 = vmatpush2.bf16.msra.mxu0 %v12210_v61  ;;  %v179_v62 = vld [vmem:[#allocation2 + $0x3e8] sm:$0xff] }
 0x136   :  { %v12913_v29 = vcombine.high %v154_v2, %v162_v56  ;;  %v1038_v53 = vld [vmem:[#allocation5 + $0x1ac0] sm:$0xff]  ;;  %7821 = vmatprep.subr.bf16.mxu1 %v12339_v54  ;;  %v12921_v24 = vcombine.low %v154_v2, %v162_v56  ;;  %v12928_v56 = vcombine.high %v171_v59, %v179_v62 }
 0x137   :  { %v1042_v15 = vld [vmem:[#allocation5 + $0x1ae0] sm:$0xff]  ;;  %7822 = vmatpush2.bf16.msra.mxu1 %v12338_v12 }
 0x138   :  { %16692 = vst [vmem:[#allocation100_spill] sm:$0xff] %v12913_v29  ;;  %v1166_v3 = vld [vmem:[#allocation5 + $0x1ec0] sm:$0xff]  ;;  %v12203_v28 = vcombine.high %v1038_v53, %v1042_v15  ;;  %7552 = vmatprep.mubr.bf16.mxu0 %v12913_v29  ;;  %16694 = vst [vmem:[#allocation102_spill] sm:$0xff] %v12921_v24  ;;  %v12202_v37 = vcombine.low %v1038_v53, %v1042_v15  ;;  %7675 = vmatprep.mubr.bf16.mxu1 %v12928_v56 }
 0x139   :  { %v1170_v8 = vld [vmem:[#allocation5 + $0x1ee0] sm:$0xff]  ;;  %7553 = vmatmul.mubr.bf16.gmra.mxu0 %v12921_v24  ;;  %16697 = vst [vmem:[#allocation105_spill] sm:$0xff] %v12928_v56 }
 0x13a   :  { %v12331_v13 = vcombine.high %v1166_v3, %v1170_v8  ;;  %v1030_v19 = vld [vmem:[#allocation5 + $0x1a80] sm:$0xff]  ;;  %7710 = vmatprep.subr.bf16.mxu0 %v12203_v28  ;;  %v12330_v38 = vcombine.low %v1166_v3, %v1170_v8 }
 0x13b   :  { %v1034_v34 = vld [vmem:[#allocation5 + $0x1aa0] sm:$0xff]  ;;  %7711 = vmatpush2.bf16.msra.mxu0 %v12202_v37  ;;  %v68_v37 = vld [vmem:[#allocation2 + $0x70] sm:$0xff] }
 0x13c   :  { %v1158_v42 = vld [vmem:[#allocation5 + $0x1e80] sm:$0xff]  ;;  %v12195_v20 = vcombine.high %v1030_v19, %v1034_v34  ;;  %7823 = vmatprep.subr.bf16.mxu1 %v12331_v13  ;;  %v12194_v53 = vcombine.low %v1030_v19, %v1034_v34  ;;  %v12935_v19 = vcombine.low %v171_v59, %v179_v62  ;;  %v12939_v56 = vcombine.high %v60_v16, %v68_v37  ;;  %v367_v59 = vld [vmem:[#allocation5 + $0x5c8] sm:$0xff] }
 0x13d   :  { %v1162_v40 = vld [vmem:[#allocation5 + $0x1ea0] sm:$0xff]  ;;  %7824 = vmatpush2.bf16.msra.mxu1 %v12330_v38  ;;  %v12937_v38 = vshrl.u32 %v1208_v9, 7  ;;  %v12948_v6 = vcombine.low %v60_v16, %v68_v37 }
 0x13e   :  { %v170_v46 = vld [vmem:[#allocation2 + $0x3a0] sm:$0xff]  ;;  %v12323_v50 = vcombine.high %v1158_v42, %v1162_v40  ;;  %7712 = vmatprep.subr.bf16.mxu0 %v12195_v20  ;;  %v12322_v15 = vcombine.low %v1158_v42, %v1162_v40  ;;  %16699 = vst [vmem:[#allocation107_spill] sm:$0xff] %v12935_v19  ;;  %v61_v40 = vld [vmem:[#allocation2 + $0x38] sm:$0xff]  ;;  %16701 = vst [vmem:[#allocation109_spill] sm:$0xff] %v12939_v56  ;;  %7676 = vmatmul.mubr.bf16.gmra.mxu1 %v12935_v19 }
 0x13f   :  { %v178_v30 = vld [vmem:[#allocation2 + $0x3e0] sm:$0xff]  ;;  %7713 = vmatpush2.bf16.msra.mxu0 %v12194_v53  ;;  %v69_v42 = vld [vmem:[#allocation2 + $0x78] sm:$0xff]  ;;  %16700 = vst [vmem:[#allocation108_spill] sm:$0xff] %v12937_v38  ;;  %16703 = vst [vmem:[#allocation111_spill] sm:$0xff] %v12948_v6 }
 0x140   :  { %v12925_v54 = vcombine.high %v170_v46, %v178_v30  ;;  %v1022_v36 = vld [vmem:[#allocation5 + $0x1a40] sm:$0xff]  ;;  %7825 = vmatprep.subr.bf16.mxu1 %v12323_v50  ;;  %v12933_v24 = vcombine.low %v170_v46, %v178_v30  ;;  %v239_v46 = vld [vmem:[#allocation5 + $0x1c8] sm:$0xff]  ;;  %v12942_v53 = vcombine.high %v61_v40, %v69_v42 }
 0x141   :  { %v1026_v2 = vld [vmem:[#allocation5 + $0x1a60] sm:$0xff]  ;;  %7826 = vmatpush2.bf16.msra.mxu1 %v12322_v15  ;;  %v243_v30 = vld [vmem:[#allocation5 + $0x1e8] sm:$0xff] }
 0x142   :  { %16696 = vst [vmem:[#allocation104_spill] sm:$0xff] %v12925_v54  ;;  %v1150_v61 = vld [vmem:[#allocation5 + $0x1e40] sm:$0xff]  ;;  %v12187_v3 = vcombine.high %v1022_v36, %v1026_v2  ;;  %7562 = vmatprep.mubr.bf16.mxu0 %v12925_v54  ;;  %16698 = vst [vmem:[#allocation106_spill] sm:$0xff] %v12933_v24  ;;  %v12186_v34 = vcombine.low %v1022_v36, %v1026_v2  ;;  %v371_v36 = vld [vmem:[#allocation5 + $0x5e8] sm:$0xff]  ;;  %v1210_v2 = vsub.s32 0, %v12937_v38  ;;  %7831 = vmatprep.mubr.bf16.mxu1 %v12942_v53 }
 0x143   :  { %v1154_v51 = vld [vmem:[#allocation5 + $0x1e60] sm:$0xff]  ;;  %7563 = vmatmul.mubr.bf16.gmra.mxu0 %v12933_v24  ;;  %16702 = vst [vmem:[#allocation110_spill] sm:$0xff] %v12942_v53  ;;  %v11405_v9 = vcombine.high %v239_v46, %v243_v30  ;;  %v11533_v15 = vcombine.high %v367_v59, %v371_v36  ;;  %v235_v24 = vld [vmem:[#allocation5 + $0x1a8] sm:$0xff] }
 0x144   :  { %v12315_v8 = vcombine.high %v1150_v61, %v1154_v51  ;;  %v1014_v12 = vld [vmem:[#allocation5 + $0x1a00] sm:$0xff]  ;;  %7714 = vmatprep.subr.bf16.mxu0 %v12187_v3  ;;  %v12314_v20 = vcombine.low %v1150_v61, %v1154_v51  ;;  %7718 = vmatprep.mubr.bf16.mxu0 %v12939_v56  ;;  %v1214_v3 = vsub.s32 1, %v12937_v38  ;;  %v11532_v56 = vcombine.low %v367_v59, %v371_v36  ;;  %v223_v38 = vld [vmem:[#allocation5 + $0x148] sm:$0xff] }
 0x145   :  { %v1018_v28 = vld [vmem:[#allocation5 + $0x1a20] sm:$0xff]  ;;  %7715 = vmatpush2.bf16.msra.mxu0 %v12186_v34  ;;  %v84_v34 = vld [vmem:[#allocation2 + $0xf0] sm:$0xff] }
 0x146   :  { %v1142_v13 = vld [vmem:[#allocation5 + $0x1e00] sm:$0xff]  ;;  %v12179_v50 = vcombine.high %v1014_v12, %v1018_v28  ;;  %7827 = vmatprep.subr.bf16.mxu1 %v12315_v8  ;;  %v12178_v62 = vcombine.low %v1014_v12, %v1018_v28  ;;  %v231_v8 = vld [vmem:[#allocation5 + $0x188] sm:$0xff]  ;;  %v76_v28 = vld [vmem:[#allocation2 + $0xb0] sm:$0xff] }
 0x147   :  { %v1146_v29 = vld [vmem:[#allocation5 + $0x1e20] sm:$0xff]  ;;  %7828 = vmatpush2.bf16.msra.mxu1 %v12314_v20  ;;  %v363_v12 = vld [vmem:[#allocation5 + $0x5a8] sm:$0xff]  ;;  %v77_v20 = vld [vmem:[#allocation2 + $0xb8] sm:$0xff]  ;;  %v11397_v19 = vcombine.high %v231_v8, %v235_v24  ;;  %v12957_v53 = vcombine.high %v76_v28, %v84_v34  ;;  %v11396_v59 = vcombine.low %v231_v8, %v235_v24 }
 0x148   :  { %v12307_v54 = vcombine.high %v1142_v13, %v1146_v29  ;;  %7716 = vmatprep.subr.bf16.mxu0 %v12179_v50  ;;  %v12306_v61 = vcombine.low %v1142_v13, %v1146_v29  ;;  %v1206_v51 = vld [vmem:[#allocation7] sm:$0xff]  ;;  %v12951_v29 = vcombine.low %v61_v40, %v69_v42  ;;  %v85_v50 = vld [vmem:[#allocation2 + $0xf8] sm:$0xff]  ;;  %v11525_v37 = vcombine.high %v359_v26, %v363_v12  ;;  %v351_v42 = vld [vmem:[#allocation5 + $0x548] sm:$0xff] }
 0x149   :  { %7717 = vmatpush2.bf16.msra.mxu0 %v12178_v62  ;;  %v12953_v13 = vrot.slane %v1206_v51, %v1210_v2  ;;  %v12955_v16 = vrot.slane %v1206_v51, %v1214_v3  ;;  %16705 = vst [vmem:[#allocation113_spill] sm:$0xff] %v12957_v53  ;;  %v7042_v62 = vpop.f32.mrf.mxu0  ;;  %v12960_v40 = vcombine.high %v77_v20, %v85_v50  ;;  %v7155_v2 = vpop.f32.mrf.mxu1  ;;  %v100_v8 = vld [vmem:[#allocation2 + $0x170] sm:$0xff] }
 0x14a   :  { %7829 = vmatprep.subr.bf16.mxu1 %v12307_v54  ;;  %16704 = vst [vmem:[#allocation112_spill] sm:$0xff] %v12951_v29  ;;  %v11404_v54 = vcombine.low %v239_v46, %v243_v30  ;;  %7912 = vmatprep.subr.bf16.mxu0 %v11405_v9  ;;  %v355_v46 = vld [vmem:[#allocation5 + $0x568] sm:$0xff]  ;;  %v11389_v51 = vcombine.high %v223_v38, %v227_v0 }
 0x14b   :  { %7830 = vmatpush2.bf16.msra.mxu1 %v12306_v61  ;;  %16706 = vst [vmem:[#allocation114_spill] sm:$0xff] %v12960_v40  ;;  %v7043_v30 = vadd.f32 %v7042_v62, %v12953_v13  ;;  %v7044_v36 = vpop.f32.mrf.mxu0  ;;  %v11524_v61 = vcombine.low %v359_v26, %v363_v12  ;;  %v7157_v3 = vpop.f32.mrf.mxu1  ;;  %v12968_v62 = vld [vmem:[#allocation5 + $0x108] sm:$0xff]  ;;  %v12975_v26 = vcombine.low %v76_v28, %v84_v34 }
 0x14c   :  { %8025 = vmatprep.subr.bf16.mxu1 %v11533_v15  ;;  %7719 = vmatmul.mubr.bf16.vlgmr.msra.gmra.mxu0 %v12948_v6  ;;  %v7045_v15 = vadd.f32 %v7044_v36, %v12955_v16  ;;  %v11517_v6 = vcombine.high %v351_v42, %v355_v46  ;;  %v11388_v36 = vcombine.low %v223_v38, %v227_v0  ;;  %v12993_v0 = vld [vmem:[#allocation5 + $0xc8] sm:$0xff] }
 0x14d   :  { %7913 = vmatpush1.bf16.msra.mxu0 %v11404_v54  ;;  %v12964_v9 = vadd.f32 %v7155_v2, %v7043_v30  ;;  %7728 = vmatprep.mubr.bf16.mxu0 %v12957_v53  ;;  %v12972_v54 = vld [vmem:[#allocation5 + $0x508] sm:$0xff]  ;;  %v7046_v24 = vpop.f32.mrf.mxu0  ;;  %16707 = vst [vmem:[#allocation115_spill] sm:$0xff] %v12975_v26  ;;  %v7159_v30 = vpop.f32.mrf.mxu1  ;;  %v12982_v2 = vcombine.low %v77_v20, %v85_v50  ;;  %v93_v53 = vld [vmem:[#allocation2 + $0x138] sm:$0xff] }
 0x14e   :  { %7832 = vmatmul.mubr.bf16.vlgmr.msra.gmra.mxu1 %v12951_v29  ;;  %7914 = vmatprep.subr.bf16.mxu0 %v11397_v19  ;;  %v92_v19 = vld [vmem:[#allocation2 + $0x130] sm:$0xff]  ;;  %v12979_v12 = vadd.f32 %v7157_v3, %v7045_v15  ;;  %v101_v29 = vld [vmem:[#allocation2 + $0x178] sm:$0xff]  ;;  %v11516_v28 = vcombine.low %v351_v42, %v355_v46  ;;  %v11381_v34 = vcombine.high %v12968_v62, %v12970_v48  ;;  %v211_v38 = vld [vmem:[#allocation5 + $0xe8] sm:$0xff] }
 0x14f   :  { %8026 = vmatpush1.bf16.msra.mxu1 %v11532_v56  ;;  %7841 = vmatprep.mubr.bf16.mxu1 %v12960_v40  ;;  %v12977_v56 = vld [vmem:[#allocation5 + $0x528] sm:$0xff]  ;;  %16708 = vst [vmem:[#allocation116_spill] sm:$0xff] %v12982_v2  ;;  %v7048_v39 = vpop.f32.mrf.mxu0  ;;  %v7161_v3 = vpop.f32.mrf.mxu1  ;;  %v12991_v50 = vcombine.high %v92_v19, %v100_v8  ;;  %v12996_v42 = vcombine.high %v93_v53, %v101_v29 }
 0x150   :  { %8027 = vmatprep.subr.bf16.mxu1 %v11525_v37  ;;  %v7047_v37 = vadd.f32 %v7046_v24, %v12953_v13  ;;  %v7049_v15 = vadd.f32 %v7048_v39, %v12955_v16  ;;  %v11509_v20 = vcombine.high %v12972_v54, %v12977_v56  ;;  %v335_v46 = vld [vmem:[#allocation5 + $0x4c8] sm:$0xff]  ;;  %v11380_v24 = vcombine.low %v12968_v62, %v12970_v48 }
 0x151   :  { %7915 = vmatpush1.bf16.msra.mxu0 %v11396_v59  ;;  %16709 = vst [vmem:[#allocation117_spill] sm:$0xff] %v12991_v50  ;;  %v7052_v59 = vpop.f32.mrf.mxu0  ;;  %16710 = vst [vmem:[#allocation118_spill] sm:$0xff] %v12996_v42  ;;  %v13013_v48 = vld [vmem:[#allocation5 + $0xa8] sm:$0xff] }
 0x152   :  { %7916 = vmatprep.subr.bf16.mxu0 %v11389_v51  ;;  %v12986_v40 = vadd.f32 %v7159_v30, %v7047_v37  ;;  %v12998_v51 = vadd.f32 %v7161_v3, %v7049_v15  ;;  %v7053_v39 = vadd.f32 %v7052_v59, %v12953_v13  ;;  %v11508_v30 = vcombine.low %v12972_v54, %v12977_v56  ;;  %v13011_v59 = vld [vmem:[#allocation5 + $0x88] sm:$0xff] }
 0x153   :  { %8028 = vmatpush1.bf16.msra.mxu1 %v11524_v61  ;;  %v339_v61 = vld [vmem:[#allocation5 + $0x4e8] sm:$0xff]  ;;  %v7054_v37 = vpop.f32.mrf.mxu0  ;;  %v13018_v54 = vcombine.low %v92_v19, %v100_v8  ;;  %v11365_v8 = vcombine.high %v13011_v59, %v13013_v48 }
 0x154   :  { %8029 = vmatprep.subr.bf16.mxu1 %v11517_v6  ;;  %7729 = vmatmul.mubr.bf16.gmra.mxu0 %v12975_v26  ;;  %v7165_v6 = vpop.f32.mrf.mxu1  ;;  %v11373_v26 = vcombine.high %v12993_v0, %v211_v38  ;;  %v7055_v15 = vadd.f32 %v7054_v37, %v12955_v16  ;;  %v13015_v62 = vld [vmem:[#allocation5 + $0x488] sm:$0xff]  ;;  %v11500_v19 = vcombine.low %v335_v46, %v339_v61 }
 0x155   :  { %7917 = vmatpush1.bf16.msra.mxu0 %v11388_v36  ;;  %v13007_v27 = vadd.f32 %v7165_v6, %v7053_v39  ;;  %7738 = vmatprep.mubr.bf16.mxu0 %v12991_v50  ;;  %v11501_v36 = vcombine.high %v335_v46, %v339_v61  ;;  %16711 = vst [vmem:[#allocation119_spill] sm:$0xff] %v13018_v54  ;;  %v13020_v56 = vld [vmem:[#allocation5 + $0x4a8] sm:$0xff]  ;;  %v116_v39 = vld [vmem:[#allocation2 + $0x1f0] sm:$0xff] }
 0x156   :  { %7842 = vmatmul.mubr.bf16.gmra.mxu1 %v12982_v2  ;;  %7918 = vmatprep.subr.bf16.mxu0 %v11381_v34  ;;  %v7167_v3 = vpop.f32.mrf.mxu1  ;;  %v108_v34 = vld [vmem:[#allocation2 + $0x1b0] sm:$0xff]  ;;  %v13025_v50 = vcombine.low %v93_v53, %v101_v29  ;;  %v11372_v2 = vcombine.low %v12993_v0, %v211_v38  ;;  %v11493_v53 = vcombine.high %v13015_v62, %v13020_v56  ;;  %v13037_v0 = vld [vmem:[#allocation5 + $0x48] sm:$0xff] }
 0x157   :  { %8030 = vmatpush1.bf16.msra.mxu1 %v11516_v28  ;;  %v7056_v28 = vpop.f32.mrf.mxu0  ;;  %7851 = vmatprep.mubr.bf16.mxu1 %v12996_v42  ;;  %v13022_v6 = vadd.f32 %v7167_v3, %v7055_v15  ;;  %v13035_v29 = vcombine.high %v108_v34, %v116_v39  ;;  %v195_v38 = vld [vmem:[#allocation5 + $0x68] sm:$0xff] }
 0x158   :  { %8031 = vmatprep.subr.bf16.mxu1 %v11509_v20  ;;  %v7057_v20 = vadd.f32 %v7056_v28, %v12953_v13  ;;  %v7169_v37 = vpop.f32.mrf.mxu1  ;;  %16712 = vst [vmem:[#allocation120_spill] sm:$0xff] %v13025_v50  ;;  %v319_v46 = vld [vmem:[#allocation5 + $0x448] sm:$0xff]  ;;  %v11364_v28 = vcombine.low %v13011_v59, %v13013_v48 }
 0x159   :  { %7919 = vmatpush1.bf16.msra.mxu0 %v11380_v24  ;;  %v7058_v42 = vpop.f32.mrf.mxu0  ;;  %16713 = vst [vmem:[#allocation121_spill] sm:$0xff] %v13035_v29  ;;  %v323_v61 = vld [vmem:[#allocation5 + $0x468] sm:$0xff] }
 0x15a   :  { %7920 = vmatprep.subr.bf16.mxu0 %v11373_v26  ;;  %v13030_v4 = vadd.f32 %v7169_v37, %v7057_v20  ;;  %v7059_v15 = vadd.f32 %v7058_v42, %v12955_v16  ;;  %v7171_v3 = vpop.f32.mrf.mxu1  ;;  %v13040_v26 = vcombine.high %v109_v23, %v117_v10  ;;  %v11492_v37 = vcombine.low %v13015_v62, %v13020_v56  ;;  %v13057_v59 = vld [vmem:[#allocation5 + $0x28] sm:$0xff] }
 0x15b   :  { %8032 = vmatpush1.bf16.msra.mxu1 %v11508_v30  ;;  %v7062_v24 = vpop.f32.mrf.mxu0  ;;  %v13059_v48 = vld [vmem:[#allocation5 + $0x408] sm:$0xff]  ;;  %v13062_v62 = vcombine.low %v108_v34, %v116_v39  ;;  %v11484_v34 = vcombine.low %v319_v46, %v323_v61 }
 0x15c   :  { %8033 = vmatprep.subr.bf16.mxu1 %v11501_v36  ;;  %7739 = vmatmul.mubr.bf16.gmra.mxu0 %v13018_v54  ;;  %16714 = vst [vmem:[#allocation122_spill] sm:$0xff] %v13040_v26  ;;  %v13042_v30 = vadd.f32 %v7171_v3, %v7059_v15  ;;  %v7063_v42 = vadd.f32 %v7062_v24, %v12953_v13  ;;  %v7175_v36 = vpop.f32.mrf.mxu1  ;;  %v13055_v24 = vld [vmem:[#allocation5 + $0x8] sm:$0xff] }
 0x15d   :  { %7921 = vmatpush1.bf16.msra.mxu0 %v11372_v2  ;;  %v7064_v20 = vpop.f32.mrf.mxu0  ;;  %v11357_v54 = vcombine.high %v13037_v0, %v195_v38  ;;  %7748 = vmatprep.mubr.bf16.mxu0 %v13035_v29  ;;  %v11485_v2 = vcombine.high %v319_v46, %v323_v61  ;;  %16715 = vst [vmem:[#allocation123_spill] sm:$0xff] %v13062_v62  ;;  %v13064_v56 = vld [vmem:[#allocation5 + $0x428] sm:$0xff] }
 0x15e   :  { %7852 = vmatmul.mubr.bf16.gmra.mxu1 %v13025_v50  ;;  %7922 = vmatprep.subr.bf16.mxu0 %v11365_v8  ;;  %v13051_v49 = vadd.f32 %v7175_v36, %v7063_v42  ;;  %v7065_v15 = vadd.f32 %v7064_v20, %v12955_v16  ;;  %v7177_v3 = vpop.f32.mrf.mxu1  ;;  %v124_v8 = vld [vmem:[#allocation2 + $0x230] sm:$0xff]  ;;  %v13069_v29 = vcombine.low %v109_v23, %v117_v10  ;;  %v431_v46 = vld [vmem:[#allocation5 + $0x7c8] sm:$0xff] }
 0x15f   :  { %8034 = vmatpush1.bf16.msra.mxu1 %v11500_v19  ;;  %v7066_v19 = vpop.f32.mrf.mxu0  ;;  %7861 = vmatprep.mubr.bf16.mxu1 %v13040_v26  ;;  %v132_v42 = vld [vmem:[#allocation2 + $0x270] sm:$0xff]  ;;  %v11356_v50 = vcombine.low %v13037_v0, %v195_v38  ;;  %v11349_v39 = vcombine.high %v13055_v24, %v13057_v59  ;;  %v11477_v10 = vcombine.high %v13059_v48, %v13064_v56  ;;  %v13081_v0 = vld [vmem:[#allocation5 + $0x3c8] sm:$0xff] }
 0x160   :  { %8035 = vmatprep.subr.bf16.mxu1 %v11493_v53  ;;  %v13066_v36 = vadd.f32 %v7177_v3, %v7065_v15  ;;  %v7067_v53 = vadd.f32 %v7066_v19, %v12953_v13  ;;  %v7179_v20 = vpop.f32.mrf.mxu1  ;;  %16716 = vst [vmem:[#allocation124_spill] sm:$0xff] %v13069_v29  ;;  %v13079_v23 = vcombine.high %v124_v8, %v132_v42  ;;  %v307_v38 = vld [vmem:[#allocation5 + $0x3e8] sm:$0xff] }
 0x161   :  { %7923 = vmatpush1.bf16.msra.mxu0 %v11364_v28  ;;  %v7068_v26 = vpop.f32.mrf.mxu0  ;;  %v435_v61 = vld [vmem:[#allocation5 + $0x7e8] sm:$0xff]  ;;  %v11348_v19 = vcombine.low %v13055_v24, %v13057_v59 }
 0x162   :  { %7924 = vmatprep.subr.bf16.mxu0 %v11357_v54  ;;  %v13074_v31 = vadd.f32 %v7179_v20, %v7067_v53  ;;  %v7069_v15 = vadd.f32 %v7068_v26, %v12955_v16  ;;  %v7181_v3 = vpop.f32.mrf.mxu1  ;;  %16717 = vst [vmem:[#allocation125_spill] sm:$0xff] %v13079_v23  ;;  %v13084_v54 = vcombine.high %v125_v44, %v133_v60  ;;  %v13101_v24 = vld [vmem:[#allocation5 + $0x3a8] sm:$0xff] }
 0x163   :  { %8036 = vmatpush1.bf16.msra.mxu1 %v11492_v37  ;;  %v7072_v28 = vpop.f32.mrf.mxu0  ;;  %v11476_v20 = vcombine.low %v13059_v48, %v13064_v56  ;;  %v13103_v59 = vld [vmem:[#allocation5 + $0x788] sm:$0xff]  ;;  %v13106_v48 = vcombine.low %v124_v8, %v132_v42  ;;  %v11596_v8 = vcombine.low %v431_v46, %v435_v61 }
 0x164   :  { %8037 = vmatprep.subr.bf16.mxu1 %v11485_v2  ;;  %7749 = vmatmul.mubr.bf16.gmra.mxu0 %v13062_v62  ;;  %16718 = vst [vmem:[#allocation126_spill] sm:$0xff] %v13084_v54  ;;  %v13086_v37 = vadd.f32 %v7181_v3, %v7069_v15  ;;  %v7073_v26 = vadd.f32 %v7072_v28, %v12953_v13  ;;  %v7185_v2 = vpop.f32.mrf.mxu1  ;;  %v13099_v28 = vld [vmem:[#allocation5 + $0x388] sm:$0xff] }
 0x165   :  { %7925 = vmatpush1.bf16.msra.mxu0 %v11356_v50  ;;  %v7074_v53 = vpop.f32.mrf.mxu0  ;;  %v11469_v62 = vcombine.high %v13081_v0, %v307_v38  ;;  %7758 = vmatprep.mubr.bf16.mxu0 %v13079_v23  ;;  %v11597_v50 = vcombine.high %v431_v46, %v435_v61  ;;  %16719 = vst [vmem:[#allocation127_spill] sm:$0xff] %v13106_v48  ;;  %v13108_v56 = vld [vmem:[#allocation5 + $0x7a8] sm:$0xff] }
 0x166   :  { %7862 = vmatmul.mubr.bf16.gmra.mxu1 %v13069_v29  ;;  %7926 = vmatprep.subr.bf16.mxu0 %v11349_v39  ;;  %v13095_v17 = vadd.f32 %v7185_v2, %v7073_v26  ;;  %v7075_v15 = vadd.f32 %v7074_v53, %v12955_v16  ;;  %v7187_v3 = vpop.f32.mrf.mxu1  ;;  %v140_v39 = vld [vmem:[#allocation2 + $0x2b0] sm:$0xff]  ;;  %v13113_v23 = vcombine.low %v125_v44, %v133_v60  ;;  %v415_v46 = vld [vmem:[#allocation5 + $0x748] sm:$0xff] }
 0x167   :  { %8038 = vmatpush1.bf16.msra.mxu1 %v11484_v34  ;;  %v7076_v34 = vpop.f32.mrf.mxu0  ;;  %7871 = vmatprep.mubr.bf16.mxu1 %v13084_v54  ;;  %v148_v26 = vld [vmem:[#allocation2 + $0x2f0] sm:$0xff]  ;;  %v11468_v29 = vcombine.low %v13081_v0, %v307_v38  ;;  %v11461_v42 = vcombine.high %v13099_v28, %v13101_v24  ;;  %v11589_v60 = vcombine.high %v13103_v59, %v13108_v56  ;;  %v13125_v0 = vld [vmem:[#allocation5 + $0x348] sm:$0xff] }
 0x168   :  { %8039 = vmatprep.subr.bf16.mxu1 %v11477_v10  ;;  %v13110_v2 = vadd.f32 %v7187_v3, %v7075_v15  ;;  %v7077_v10 = vadd.f32 %v7076_v34, %v12953_v13  ;;  %v7189_v53 = vpop.f32.mrf.mxu1  ;;  %16720 = vst [vmem:[#allocation128_spill] sm:$0xff] %v13113_v23  ;;  %v13123_v44 = vcombine.high %v140_v39, %v148_v26  ;;  %v291_v38 = vld [vmem:[#allocation5 + $0x368] sm:$0xff] }
 0x169   :  { %7927 = vmatpush1.bf16.msra.mxu0 %v11348_v19  ;;  %v7078_v54 = vpop.f32.mrf.mxu0  ;;  %v419_v61 = vld [vmem:[#allocation5 + $0x768] sm:$0xff]  ;;  %v11460_v34 = vcombine.low %v13099_v28, %v13101_v24 }
 0x16a   :  { %7928 = vmatprep.subr.bf16.mxu0 %v11469_v62  ;;  %v13118_v1 = vadd.f32 %v7189_v53, %v7077_v10  ;;  %v7079_v15 = vadd.f32 %v7078_v54, %v12955_v16  ;;  %v7191_v3 = vpop.f32.mrf.mxu1  ;;  %16722 = vst [vmem:[#allocation130_spill] sm:$0xff] %v13123_v44  ;;  %v13128_v62 = vcombine.high %v141_v14, %v149_v5  ;;  %v13145_v28 = vld [vmem:[#allocation5 + $0x328] sm:$0xff] }
 0x16b   :  { %8040 = vmatpush1.bf16.msra.mxu1 %v11476_v20  ;;  %v7082_v19 = vpop.f32.mrf.mxu0  ;;  %v11588_v53 = vcombine.low %v13103_v59, %v13108_v56  ;;  %v13147_v24 = vld [vmem:[#allocation5 + $0x708] sm:$0xff]  ;;  %v13150_v59 = vcombine.low %v140_v39, %v148_v26  ;;  %v11580_v39 = vcombine.low %v415_v46, %v419_v61 }
 0x16c   :  { %16721 = vst [vmem:[#allocation129_spill] sm:$0xff] %v13118_v1  ;;  %8041 = vmatprep.subr.bf16.mxu1 %v11597_v50  ;;  %7759 = vmatmul.mubr.bf16.gmra.mxu0 %v13106_v48  ;;  %16723 = vst [vmem:[#allocation131_spill] sm:$0xff] %v13128_v62  ;;  %v13130_v20 = vadd.f32 %v7191_v3, %v7079_v15  ;;  %v7083_v54 = vadd.f32 %v7082_v19, %v12953_v13  ;;  %v7195_v50 = vpop.f32.mrf.mxu1  ;;  %v13143_v19 = vld [vmem:[#allocation5 + $0x308] sm:$0xff] }
 0x16d   :  { %7929 = vmatpush2.bf16.msra.mxu0 %v11468_v29  ;;  %v7084_v10 = vpop.f32.mrf.mxu0  ;;  %v11453_v48 = vcombine.high %v13125_v0, %v291_v38  ;;  %7768 = vmatprep.mubr.bf16.mxu0 %v13123_v44  ;;  %v11581_v29 = vcombine.high %v415_v46, %v419_v61  ;;  %16726 = vst [vmem:[#allocation134_spill] sm:$0xff] %v13150_v59  ;;  %v13152_v56 = vld [vmem:[#allocation5 + $0x728] sm:$0xff] }
 0x16e   :  { %16724 = vst [vmem:[#allocation132_spill] sm:$0xff] %v13130_v20  ;;  %7872 = vmatmul.mubr.bf16.gmra.mxu1 %v13113_v23  ;;  %7930 = vmatprep.subr.bf16.mxu0 %v11461_v42  ;;  %v13139_v1 = vadd.f32 %v7195_v50, %v7083_v54  ;;  %v7085_v15 = vadd.f32 %v7084_v10, %v12955_v16  ;;  %v7197_v3 = vpop.f32.mrf.mxu1  ;;  %v156_v42 = vld [vmem:[#allocation2 + $0x330] sm:$0xff]  ;;  %v165_v20 = vld [vmem:[#allocation2 + $0x378] sm:$0xff]  ;;  %v399_v46 = vld [vmem:[#allocation5 + $0x6c8] sm:$0xff] }
 0x16f   :  { %8042 = vmatpush2.bf16.msra.mxu1 %v11596_v8  ;;  %v7086_v8 = vpop.f32.mrf.mxu0  ;;  %7881 = vmatprep.mubr.bf16.mxu1 %v13128_v62  ;;  %v164_v54 = vld [vmem:[#allocation2 + $0x370] sm:$0xff]  ;;  %v13157_v44 = vcombine.low %v141_v14, %v149_v5  ;;  %v11452_v23 = vcombine.low %v13125_v0, %v291_v38  ;;  %v11445_v26 = vcombine.high %v13143_v19, %v13145_v28  ;;  %v13169_v0 = vld [vmem:[#allocation5 + $0x2c8] sm:$0xff] }
 0x170   :  { %16725 = vst [vmem:[#allocation133_spill] sm:$0xff] %v13139_v1  ;;  %8043 = vmatprep.subr.bf16.mxu1 %v11589_v60  ;;  %v13154_v50 = vadd.f32 %v7197_v3, %v7085_v15  ;;  %v7087_v60 = vadd.f32 %v7086_v8, %v12953_v13  ;;  %v7199_v10 = vpop.f32.mrf.mxu1  ;;  %v157_v1 = vld [vmem:[#allocation2 + $0x338] sm:$0xff]  ;;  %v11573_v5 = vcombine.high %v13147_v24, %v13152_v56  ;;  %v275_v38 = vld [vmem:[#allocation5 + $0x2e8] sm:$0xff] }
 0x171   :  { %7931 = vmatpush2.bf16.msra.mxu0 %v11460_v34  ;;  %16728 = vst [vmem:[#allocation136_spill] sm:$0xff] %v13157_v44  ;;  %v7088_v62 = vpop.f32.mrf.mxu0  ;;  %v13167_v14 = vcombine.high %v156_v42, %v164_v54  ;;  %v403_v61 = vld [vmem:[#allocation5 + $0x6e8] sm:$0xff]  ;;  %v11444_v8 = vcombine.low %v13143_v19, %v13145_v28 }
 0x172   :  { %16727 = vst [vmem:[#allocation135_spill] sm:$0xff] %v13154_v50  ;;  %7932 = vmatprep.subr.bf16.mxu0 %v11453_v48  ;;  %v13162_v47 = vadd.f32 %v7199_v10, %v7087_v60  ;;  %v7089_v15 = vadd.f32 %v7088_v62, %v12955_v16  ;;  %v7201_v3 = vpop.f32.mrf.mxu1  ;;  %v13172_v48 = vcombine.high %v157_v1, %v165_v20  ;;  %v13187_v19 = vld [vmem:[#allocation5 + $0x688] sm:$0xff] }
 0x173   :  { %8044 = vmatpush2.bf16.msra.mxu1 %v11588_v53  ;;  %16730 = vst [vmem:[#allocation138_spill] sm:$0xff] %v13167_v14  ;;  %v7092_v34 = vpop.f32.mrf.mxu0  ;;  %v11572_v10 = vcombine.low %v13147_v24, %v13152_v56  ;;  %v395_v24 = vld [vmem:[#allocation5 + $0x6a8] sm:$0xff]  ;;  %v172_v56 = vld [vmem:[#allocation2 + $0x3b0] sm:$0xff] }
 0x174   :  { %16729 = vst [vmem:[#allocation137_spill] sm:$0xff] %v13162_v47  ;;  %8045 = vmatprep.subr.bf16.mxu1 %v11581_v29  ;;  %7769 = vmatmul.mubr.bf16.gmra.mxu0 %v13150_v59  ;;  %16731 = vst [vmem:[#allocation139_spill] sm:$0xff] %v13172_v48  ;;  %v13174_v53 = vadd.f32 %v7201_v3, %v7089_v15  ;;  %v7093_v62 = vadd.f32 %v7092_v34, %v12953_v13  ;;  %v7205_v29 = vpop.f32.mrf.mxu1  ;;  %v263_v34 = vld [vmem:[#allocation5 + $0x288] sm:$0xff] }
 0x175   :  { %7933 = vmatpush2.bf16.msra.mxu0 %v11452_v23  ;;  %v7094_v60 = vpop.f32.mrf.mxu0  ;;  %v11437_v59 = vcombine.high %v13169_v0, %v275_v38  ;;  %7778 = vmatprep.mubr.bf16.mxu0 %v13167_v14  ;;  %v11565_v23 = vcombine.high %v399_v46, %v403_v61  ;;  %v11436_v14 = vcombine.low %v13169_v0, %v275_v38 }
 0x176   :  { %16732 = vst [vmem:[#allocation140_spill] sm:$0xff] %v13174_v53  ;;  %7882 = vmatmul.mubr.bf16.gmra.mxu1 %v13157_v44  ;;  %7934 = vmatprep.subr.bf16.mxu0 %v11445_v26  ;;  %v13183_v47 = vadd.f32 %v7205_v29, %v7093_v62  ;;  %v7095_v15 = vadd.f32 %v7094_v60, %v12955_v16  ;;  %v7207_v3 = vpop.f32.mrf.mxu1  ;;  %v267_v44 = vld [vmem:[#allocation5 + $0x2a8] sm:$0xff]  ;;  %v180_v26 = vld [vmem:[#allocation2 + $0x3f0] sm:$0xff]  ;;  %v181_v53 = vld [vmem:[#allocation2 + $0x3f8] sm:$0xff] }
 0x177   :  { %8046 = vmatpush2.bf16.msra.mxu1 %v11580_v39  ;;  %v7096_v28 = vpop.f32.mrf.mxu0  ;;  %7891 = vmatprep.mubr.bf16.mxu1 %v13172_v48  ;;  %v13190_v39 = vcombine.low %v156_v42, %v164_v54  ;;  %v13195_v60 = vcombine.low %v157_v1, %v165_v20  ;;  %v11564_v42 = vcombine.low %v399_v46, %v403_v61  ;;  %v255_v1 = vld [vmem:[#allocation5 + $0x248] sm:$0xff] }
 0x178   :  { %16733 = vst [vmem:[#allocation141_spill] sm:$0xff] %v13183_v47  ;;  %8047 = vmatprep.subr.bf16.mxu1 %v11573_v5  ;;  %v13192_v62 = vadd.f32 %v7207_v3, %v7095_v15  ;;  %v7097_v29 = vadd.f32 %v7096_v28, %v12953_v13  ;;  %v7209_v5 = vpop.f32.mrf.mxu1  ;;  %v173_v47 = vld [vmem:[#allocation2 + $0x3b8] sm:$0xff]  ;;  %v11429_v54 = vcombine.high %v263_v34, %v267_v44  ;;  %v259_v20 = vld [vmem:[#allocation5 + $0x268] sm:$0xff] }
 0x179   :  { %16734 = vst [vmem:[#allocation142_spill] sm:$0xff] %v13190_v39  ;;  %7935 = vmatpush2.bf16.msra.mxu0 %v11444_v8  ;;  %16736 = vst [vmem:[#allocation144_spill] sm:$0xff] %v13195_v60  ;;  %v7098_v50 = vpop.f32.mrf.mxu0  ;;  %v11557_v28 = vcombine.high %v13187_v19, %v395_v24  ;;  %v13202_v8 = vcombine.high %v172_v56, %v180_v26  ;;  %v13205_v38 = vcombine.high %v173_v47, %v181_v53  ;;  %v387_v46 = vld [vmem:[#allocation5 + $0x668] sm:$0xff] }
 0x17a   :  { %16735 = vst [vmem:[#allocation143_spill] sm:$0xff] %v13192_v62  ;;  %7936 = vmatprep.subr.bf16.mxu0 %v11437_v59  ;;  %v13198_v48 = vadd.f32 %v7209_v5, %v7097_v29  ;;  %v7099_v15 = vadd.f32 %v7098_v50, %v12955_v16  ;;  %v7211_v3 = vpop.f32.mrf.mxu1  ;;  %v383_v59 = vld [vmem:[#allocation5 + $0x648] sm:$0xff]  ;;  %v11556_v5 = vcombine.low %v13187_v19, %v395_v24 }
 0x17b   :  { %8048 = vmatpush2.bf16.msra.mxu1 %v11572_v10  ;;  %16738 = vst [vmem:[#allocation146_spill] sm:$0xff] %v13202_v8  ;;  %v7102_v0 = vpop.f32.mrf.mxu0  ;;  %16739 = vst [vmem:[#allocation147_spill] sm:$0xff] %v13205_v38 }
 0x17c   :  { %16737 = vst [vmem:[#allocation145_spill] sm:$0xff] %v13198_v48  ;;  %8049 = vmatprep.subr.bf16.mxu1 %v11565_v23  ;;  %7779 = vmatmul.mubr.bf16.gmra.mxu0 %v13190_v39  ;;  %v13207_v61 = vadd.f32 %v7211_v3, %v7099_v15  ;;  %v7103_v10 = vadd.f32 %v7102_v0, %v12953_v13  ;;  %v7215_v50 = vpop.f32.mrf.mxu1  ;;  %v247_v3 = vld [vmem:[#allocation5 + $0x208] sm:$0xff] }
 0x17d   :  { %7937 = vmatpush2.bf16.msra.mxu0 %v11436_v14  ;;  %v11428_v23 = vcombine.low %v263_v34, %v267_v44  ;;  %v7104_v29 = vpop.f32.mrf.mxu0  ;;  %v11421_v48 = vcombine.high %v255_v1, %v259_v20  ;;  %7788 = vmatprep.mubr.bf16.mxu0 %v13202_v8  ;;  %v11549_v15 = vcombine.high %v383_v59, %v387_v46  ;;  %v251_v0 = vld [vmem:[#allocation5 + $0x228] sm:$0xff] }
 0x17e   :  { %7892 = vmatmul.mubr.bf16.gmra.mxu1 %v13195_v60  ;;  %7938 = vmatprep.subr.bf16.mxu0 %v11429_v54  ;;  %v13212_v39 = vadd.f32 %v7215_v50, %v7103_v10  ;;  %v7105_v62 = vadd.f32 %v7104_v29, %v12955_v16  ;;  %v7217_v43 = vpop.f32.mrf.mxu1  ;;  %v13217_v44 = vcombine.low %v172_v56, %v180_v26  ;;  %v375_v14 = vld [vmem:[#allocation5 + $0x608] sm:$0xff] }
 0x17f   :  { %8050 = vmatpush2.bf16.msra.mxu1 %v11564_v42  ;;  %v7106_v60 = vpop.f32.mrf.mxu0  ;;  %7901 = vmatprep.mubr.bf16.mxu1 %v13205_v38  ;;  %v379_v34 = vld [vmem:[#allocation5 + $0x628] sm:$0xff]  ;;  %v13222_v54 = vcombine.low %v173_v47, %v181_v53  ;;  %v11548_v50 = vcombine.low %v383_v59, %v387_v46  ;;  %v11413_v29 = vcombine.high %v247_v3, %v251_v0 }
 0x180   :  { %8051 = vmatprep.subr.bf16.mxu1 %v11557_v28  ;;  %16740 = vst [vmem:[#allocation148_spill] sm:$0xff] %v13217_v44  ;;  %v13219_v19 = vadd.f32 %v7217_v43, %v7105_v62  ;;  %v7107_v24 = vadd.f32 %v7106_v60, %v12953_v13  ;;  %v7219_v42 = vpop.f32.mrf.mxu1  ;;  %v11420_v28 = vcombine.low %v255_v1, %v259_v20  ;;  %v495_v62 = vld [vmem:[#allocation5 + $0x9c8] sm:$0xff] }
 0x181   :  { %7939 = vmatpush2.bf16.msra.mxu0 %v11428_v23  ;;  %16741 = vst [vmem:[#allocation149_spill] sm:$0xff] %v13222_v54  ;;  %v7108_v10 = vpop.f32.mrf.mxu0  ;;  %v11541_v43 = vcombine.high %v375_v14, %v379_v34  ;;  %v499_v38 = vld [vmem:[#allocation5 + $0x9e8] sm:$0xff]  ;;  %v11412_v59 = vcombine.low %v247_v3, %v251_v0  ;;  %v11540_v23 = vcombine.low %v375_v14, %v379_v34 }
 0x182   :  { %7940 = vmatprep.subr.bf16.mxu0 %v11421_v48  ;;  %v13224_v8 = vadd.f32 %v7219_v42, %v7107_v24  ;;  %v7109_v56 = vadd.f32 %v7108_v10, %v12955_v16  ;;  %v7221_v26 = vpop.f32.mrf.mxu1  ;;  %v623_v47 = vld [vmem:[#allocation5 + $0xdc8] sm:$0xff] }
 0x183   :  { %8052 = vmatpush2.bf16.msra.mxu1 %v11556_v5  ;;  %v7112_v60 = vpop.f32.mrf.mxu0  ;;  %v627_v53 = vld [vmem:[#allocation5 + $0xde8] sm:$0xff]  ;;  %v11661_v5 = vcombine.high %v495_v62, %v499_v38 }
 0x184   :  { %8053 = vmatprep.subr.bf16.mxu1 %v11549_v15  ;;  %7789 = vmatmul.mubr.bf16.gmra.mxu0 %v13217_v44  ;;  %v13228_v1 = vadd.f32 %v7221_v26, %v7109_v56  ;;  %v7113_v48 = vadd.f32 %v7112_v60, %v12953_v13  ;;  %v7225_v20 = vpop.f32.mrf.mxu1  ;;  %v11789_v10 = vcombine.high %v623_v47, %v627_v53  ;;  %v487_v56 = vld [vmem:[#allocation5 + $0x988] sm:$0xff] }
 0x185   :  { %7941 = vmatpush2.bf16.msra.mxu0 %v11420_v28  ;;  %v7114_v46 = vpop.f32.mrf.mxu0  ;;  %7944 = vmatprep.mubr.bf16.mxu0 %v12641_v58  ;;  %v491_v26 = vld [vmem:[#allocation5 + $0x9a8] sm:$0xff] }
 0x186   :  { %7902 = vmatmul.mubr.bf16.gmra.mxu1 %v13222_v54  ;;  %7942 = vmatprep.subr.bf16.mxu0 %v11413_v29  ;;  %v13232_v15 = vadd.f32 %v7225_v20, %v7113_v48  ;;  %v7115_v24 = vadd.f32 %v7114_v46, %v12955_v16  ;;  %v7227_v42 = vpop.f32.mrf.mxu1  ;;  %v615_v3 = vld [vmem:[#allocation5 + $0xd88] sm:$0xff]  ;;  %v11653_v48 = vcombine.high %v487_v56, %v491_v26 }
 0x187   :  { %8054 = vmatpush2.bf16.msra.mxu1 %v11548_v50  ;;  %v7116_v60 = vpop.f32.mrf.mxu0  ;;  %8057 = vmatprep.mubr.bf16.mxu1 %v12649_v63  ;;  %v619_v0 = vld [vmem:[#allocation5 + $0xda8] sm:$0xff]  ;;  %v11660_v50 = vcombine.low %v495_v62, %v499_v38 }
 0x188   :  { %8055 = vmatprep.subr.bf16.mxu1 %v11541_v43  ;;  %v13237_v28 = vadd.f32 %v7227_v42, %v7115_v24  ;;  %v7117_v14 = vadd.f32 %v7116_v60, %v12953_v13  ;;  %v7229_v34 = vpop.f32.mrf.mxu1  ;;  %v11788_v43 = vcombine.low %v623_v47, %v627_v53  ;;  %v11781_v63 = vcombine.high %v615_v3, %v619_v0  ;;  %v479_v54 = vld [vmem:[#allocation5 + $0x948] sm:$0xff] }
 0x189   :  { %7943 = vmatpush2.bf16.msra.mxu0 %v11412_v59  ;;  %v7118_v29 = vpop.f32.mrf.mxu0  ;;  %v483_v24 = vld [vmem:[#allocation5 + $0x968] sm:$0xff]  ;;  %v11652_v53 = vcombine.low %v487_v56, %v491_v26 }
 0x18a   :  { %8138 = vmatprep.subr.bf16.mxu0 %v11661_v5  ;;  %v13240_v20 = vadd.f32 %v7229_v34, %v7117_v14  ;;  %v7119_v46 = vadd.f32 %v7118_v29, %v12955_v16  ;;  %v7231_v58 = vpop.f32.mrf.mxu1  ;;  %v607_v13 = vld [vmem:[#allocation5 + $0xd48] sm:$0xff]  ;;  %v11645_v5 = vcombine.high %v479_v54, %v483_v24 }
 0x18b   :  { %8056 = vmatpush2.bf16.msra.mxu1 %v11540_v23  ;;  %v7268_v42 = vpop.f32.mrf.mxu0  ;;  %v611_v59 = vld [vmem:[#allocation5 + $0xd68] sm:$0xff]  ;;  %v11780_v23 = vcombine.low %v615_v3, %v619_v0 }
 0x18c   :  { %8251 = vmatprep.subr.bf16.mxu1 %v11789_v10  ;;  %7945 = vmatmul.mubr.bf16.vlgmr.msra.gmra.mxu0 %v12655_v21  ;;  %v13244_v38 = vadd.f32 %v7231_v58, %v7119_v46  ;;  %v7269_v62 = vadd.f32 %v7268_v42, %v12964_v9  ;;  %v7381_v47 = vpop.f32.mrf.mxu1  ;;  %v11773_v58 = vcombine.high %v607_v13, %v611_v59  ;;  %v471_v9 = vld [vmem:[#allocation5 + $0x908] sm:$0xff] }
 0x18d   :  { %8139 = vmatpush1.bf16.msra.mxu0 %v11660_v50  ;;  %v7270_v16 = vpop.f32.mrf.mxu0  ;;  %7954 = vmatprep.mubr.bf16.mxu0 %v12661_v32  ;;  %v475_v34 = vld [vmem:[#allocation5 + $0x928] sm:$0xff] }
 0x18e   :  { %8058 = vmatmul.mubr.bf16.vlgmr.msra.gmra.mxu1 %v12659_v25  ;;  %8140 = vmatprep.subr.bf16.mxu0 %v11653_v48  ;;  %v13248_v10 = vadd.f32 %v7381_v47, %v7269_v62  ;;  %v7271_v60 = vadd.f32 %v7270_v16, %v12979_v12  ;;  %v7383_v14 = vpop.f32.mrf.mxu1  ;;  %v599_v56 = vld [vmem:[#allocation5 + $0xd08] sm:$0xff]  ;;  %v11637_v48 = vcombine.high %v471_v9, %v475_v34 }
 0x18f   :  { %8252 = vmatpush1.bf16.msra.mxu1 %v11788_v43  ;;  %v7272_v29 = vpop.f32.mrf.mxu0  ;;  %8067 = vmatprep.mubr.bf16.mxu1 %v12664_v33  ;;  %v603_v26 = vld [vmem:[#allocation5 + $0xd28] sm:$0xff]  ;;  %v11644_v43 = vcombine.low %v479_v54, %v483_v24 }
 0x190   :  { %8253 = vmatprep.subr.bf16.mxu1 %v11781_v63  ;;  %v13253_v50 = vadd.f32 %v7383_v14, %v7271_v60  ;;  %v7273_v3 = vadd.f32 %v7272_v29, %v12986_v40  ;;  %v7385_v0 = vpop.f32.mrf.mxu1  ;;  %v11772_v63 = vcombine.low %v607_v13, %v611_v59  ;;  %v11765_v47 = vcombine.high %v599_v56, %v603_v26  ;;  %v463_v16 = vld [vmem:[#allocation5 + $0x8c8] sm:$0xff] }
 0x191   :  { %8141 = vmatpush1.bf16.msra.mxu0 %v11652_v53  ;;  %v7274_v12 = vpop.f32.mrf.mxu0  ;;  %v467_v60 = vld [vmem:[#allocation5 + $0x8e8] sm:$0xff]  ;;  %v11636_v59 = vcombine.low %v471_v9, %v475_v34 }
 0x192   :  { %8142 = vmatprep.subr.bf16.mxu0 %v11645_v5  ;;  %v13256_v46 = vadd.f32 %v7385_v0, %v7273_v3  ;;  %v7275_v42 = vadd.f32 %v7274_v12, %v12998_v51  ;;  %v7387_v62 = vpop.f32.mrf.mxu1  ;;  %v591_v40 = vld [vmem:[#allocation5 + $0xcc8] sm:$0xff]  ;;  %v11629_v5 = vcombine.high %v463_v16, %v467_v60 }
 0x193   :  { %8254 = vmatpush1.bf16.msra.mxu1 %v11780_v23  ;;  %v7278_v14 = vpop.f32.mrf.mxu0  ;;  %v595_v53 = vld [vmem:[#allocation5 + $0xce8] sm:$0xff]  ;;  %v11764_v23 = vcombine.low %v599_v56, %v603_v26 }
 0x194   :  { %8255 = vmatprep.subr.bf16.mxu1 %v11773_v58  ;;  %7955 = vmatmul.mubr.bf16.gmra.mxu0 %v12669_v41  ;;  %v13260_v54 = vadd.f32 %v7387_v62, %v7275_v42  ;;  %v7279_v24 = vadd.f32 %v7278_v14, %v13007_v27  ;;  %v7391_v13 = vpop.f32.mrf.mxu1  ;;  %v11757_v0 = vcombine.high %v591_v40, %v595_v53  ;;  %v455_v27 = vld [vmem:[#allocation5 + $0x888] sm:$0xff]  ;;  %v16770_v41 = vld [vmem:[#allocation38_spill] sm:$0xff] }
 0x195   :  { %8143 = vmatpush1.bf16.msra.mxu0 %v11644_v43  ;;  %v7280_v51 = vpop.f32.mrf.mxu0  ;;  %7964 = vmatprep.mubr.bf16.mxu0 %v12673_v52  ;;  %v459_v12 = vld [vmem:[#allocation5 + $0x8a8] sm:$0xff] }
 0x196   :  { %8068 = vmatmul.mubr.bf16.gmra.mxu1 %v12671_v45  ;;  %8144 = vmatprep.subr.bf16.mxu0 %v11637_v48  ;;  %v13264_v58 = vadd.f32 %v7391_v13, %v7279_v24  ;;  %v7281_v29 = vadd.f32 %v7280_v51, %v13022_v6  ;;  %v7393_v3 = vpop.f32.mrf.mxu1  ;;  %v583_v9 = vld [vmem:[#allocation5 + $0xc88] sm:$0xff]  ;;  %v11756_v48 = vcombine.low %v591_v40, %v595_v53 }
 0x197   :  { %8256 = vmatpush1.bf16.msra.mxu1 %v11772_v63  ;;  %v7282_v42 = vpop.f32.mrf.mxu0  ;;  %8077 = vmatprep.mubr.bf16.mxu1 %v12676_v57  ;;  %v587_v34 = vld [vmem:[#allocation5 + $0xca8] sm:$0xff]  ;;  %v11628_v63 = vcombine.low %v463_v16, %v467_v60  ;;  %v11621_v62 = vcombine.high %v455_v27, %v459_v12  ;;  %v11620_v53 = vcombine.low %v455_v27, %v459_v12  ;;  %v16759_v57 = vld [vmem:[#allocation34_spill] sm:$0xff] }
 0x198   :  { %8257 = vmatprep.subr.bf16.mxu1 %v11765_v47  ;;  %v13269_v43 = vadd.f32 %v7393_v3, %v7281_v29  ;;  %v7283_v56 = vadd.f32 %v7282_v42, %v13030_v4  ;;  %v7395_v26 = vpop.f32.mrf.mxu1  ;;  %v11749_v13 = vcombine.high %v583_v9, %v587_v34  ;;  %v447_v51 = vld [vmem:[#allocation5 + $0x848] sm:$0xff] }
 0x199   :  { %8145 = vmatpush1.bf16.msra.mxu0 %v11636_v59  ;;  %v7284_v6 = vpop.f32.mrf.mxu0  ;;  %v451_v29 = vld [vmem:[#allocation5 + $0x868] sm:$0xff] }
 0x19a   :  { %8146 = vmatprep.subr.bf16.mxu0 %v11629_v5  ;;  %v13272_v47 = vadd.f32 %v7395_v26, %v7283_v56  ;;  %v7285_v14 = vadd.f32 %v7284_v6, %v13042_v30  ;;  %v7397_v24 = vpop.f32.mrf.mxu1  ;;  %v575_v4 = vld [vmem:[#allocation5 + $0xc48] sm:$0xff]  ;;  %v11613_v5 = vcombine.high %v447_v51, %v451_v29 }
 0x19b   :  { %8258 = vmatpush1.bf16.msra.mxu1 %v11764_v23  ;;  %v7288_v3 = vpop.f32.mrf.mxu0  ;;  %v579_v59 = vld [vmem:[#allocation5 + $0xc68] sm:$0xff]  ;;  %v11748_v23 = vcombine.low %v583_v9, %v587_v34 }
 0x19c   :  { %8259 = vmatprep.subr.bf16.mxu1 %v11757_v0  ;;  %7965 = vmatmul.mubr.bf16.gmra.mxu0 %v12681_v7  ;;  %v13276_v16 = vadd.f32 %v7397_v24, %v7285_v14  ;;  %v7289_v60 = vadd.f32 %v7288_v3, %v13051_v49  ;;  %v7401_v40 = vpop.f32.mrf.mxu1  ;;  %v11741_v26 = vcombine.high %v575_v4, %v579_v59  ;;  %v439_v49 = vld [vmem:[#allocation5 + $0x808] sm:$0xff] }
 0x19d   :  { %8147 = vmatpush1.bf16.msra.mxu0 %v11628_v63  ;;  %v7290_v30 = vpop.f32.mrf.mxu0  ;;  %7974 = vmatprep.mubr.bf16.mxu0 %v12685_v18  ;;  %v443_v6 = vld [vmem:[#allocation5 + $0x828] sm:$0xff] }
 0x19e   :  { %8078 = vmatmul.mubr.bf16.gmra.mxu1 %v12683_v11  ;;  %8148 = vmatprep.subr.bf16.mxu0 %v11621_v62  ;;  %v13280_v0 = vadd.f32 %v7401_v40, %v7289_v60  ;;  %v7291_v42 = vadd.f32 %v7290_v30, %v13066_v36  ;;  %v7403_v56 = vpop.f32.mrf.mxu1  ;;  %v567_v27 = vld [vmem:[#allocation5 + $0xc08] sm:$0xff]  ;;  %v11740_v62 = vcombine.low %v575_v4, %v579_v59 }
 0x19f   :  { %8260 = vmatpush1.bf16.msra.mxu1 %v11756_v48  ;;  %v7292_v14 = vpop.f32.mrf.mxu0  ;;  %8087 = vmatprep.mubr.bf16.mxu1 %v12688_v22  ;;  %v571_v12 = vld [vmem:[#allocation5 + $0xc28] sm:$0xff]  ;;  %v11612_v48 = vcombine.low %v447_v51, %v451_v29  ;;  %v11605_v24 = vcombine.high %v439_v49, %v443_v6  ;;  %v11604_v59 = vcombine.low %v439_v49, %v443_v6  ;;  %v16747_v22 = vld [vmem:[#allocation30_spill] sm:$0xff] }
 0x1a0   :  { %8261 = vmatprep.subr.bf16.mxu1 %v11749_v13  ;;  %v13285_v63 = vadd.f32 %v7403_v56, %v7291_v42  ;;  %v7293_v9 = vadd.f32 %v7292_v14, %v13074_v31  ;;  %v7405_v34 = vpop.f32.mrf.mxu1  ;;  %v11733_v40 = vcombine.high %v567_v27, %v571_v12  ;;  %v559_v30 = vld [vmem:[#allocation5 + $0xbc8] sm:$0xff] }
 0x1a1   :  { %8149 = vmatpush1.bf16.msra.mxu0 %v11620_v53  ;;  %v7294_v36 = vpop.f32.mrf.mxu0  ;;  %v563_v42 = vld [vmem:[#allocation5 + $0xbe8] sm:$0xff] }
 0x1a2   :  { %8150 = vmatprep.subr.bf16.mxu0 %v11613_v5  ;;  %v13288_v13 = vadd.f32 %v7405_v34, %v7293_v9  ;;  %v7295_v3 = vadd.f32 %v7294_v36, %v13086_v37  ;;  %v7407_v60 = vpop.f32.mrf.mxu1  ;;  %v687_v31 = vld [vmem:[#allocation5 + $0xfc8] sm:$0xff]  ;;  %v11725_v5 = vcombine.high %v559_v30, %v563_v42 }
 0x1a3   :  { %8262 = vmatpush1.bf16.msra.mxu1 %v11748_v23  ;;  %v7298_v56 = vpop.f32.mrf.mxu0  ;;  %v691_v53 = vld [vmem:[#allocation5 + $0xfe8] sm:$0xff]  ;;  %v11732_v23 = vcombine.low %v567_v27, %v571_v12  ;;  %v16744_v27 = vld [vmem:[#allocation129_spill] sm:$0xff] }
 0x1a4   :  { %8263 = vmatprep.subr.bf16.mxu1 %v11741_v26  ;;  %7975 = vmatmul.mubr.bf16.gmra.mxu0 %v12693_v55  ;;  %v13292_v51 = vadd.f32 %v7407_v60, %v7295_v3  ;;  %v7299_v29 = vadd.f32 %v7298_v56, %v13095_v17  ;;  %v7411_v4 = vpop.f32.mrf.mxu1  ;;  %v16742_v34 = vld [vmem:[#allocation28_spill] sm:$0xff]  ;;  %v11853_v36 = vcombine.high %v687_v31, %v691_v53  ;;  %v16743_v56 = vld [vmem:[#allocation29_spill] sm:$0xff] }
 0x1a5   :  { %8151 = vmatpush1.bf16.msra.mxu0 %v11612_v48  ;;  %v7300_v37 = vpop.f32.mrf.mxu0  ;;  %7984 = vmatprep.mubr.bf16.mxu0 %v16742_v34  ;;  %v551_v17 = vld [vmem:[#allocation5 + $0xb88] sm:$0xff] }
 0x1a6   :  { %8088 = vmatmul.mubr.bf16.gmra.mxu1 %v12695_v35  ;;  %8152 = vmatprep.subr.bf16.mxu0 %v11605_v24  ;;  %v13296_v26 = vadd.f32 %v7411_v4, %v7299_v29  ;;  %v7301_v14 = vadd.f32 %v7300_v37, %v13110_v2  ;;  %v7413_v9 = vpop.f32.mrf.mxu1  ;;  %v555_v3 = vld [vmem:[#allocation5 + $0xba8] sm:$0xff]  ;;  %v11724_v24 = vcombine.low %v559_v30, %v563_v42  ;;  %v16749_v42 = vld [vmem:[#allocation133_spill] sm:$0xff] }
 0x1a7   :  { %8264 = vmatpush1.bf16.msra.mxu1 %v11740_v62  ;;  %v7302_v60 = vpop.f32.mrf.mxu0  ;;  %8097 = vmatprep.mubr.bf16.mxu1 %v16743_v56  ;;  %v679_v49 = vld [vmem:[#allocation5 + $0xf88] sm:$0xff]  ;;  %v11717_v29 = vcombine.high %v551_v17, %v555_v3 }
 0x1a8   :  { %8265 = vmatprep.subr.bf16.mxu1 %v11733_v40  ;;  %v683_v6 = vld [vmem:[#allocation5 + $0xfa8] sm:$0xff]  ;;  %v13301_v48 = vadd.f32 %v7413_v9, %v7301_v14  ;;  %v7303_v12 = vadd.f32 %v7302_v60, %v16744_v27  ;;  %v7415_v62 = vpop.f32.mrf.mxu1  ;;  %v11852_v40 = vcombine.low %v687_v31, %v691_v53  ;;  %v16750_v53 = vld [vmem:[#allocation31_spill] sm:$0xff] }
 0x1a9   :  { %8153 = vmatpush1.bf16.msra.mxu0 %v11604_v59  ;;  %v7304_v2 = vpop.f32.mrf.mxu0  ;;  %v16746_v37 = vld [vmem:[#allocation132_spill] sm:$0xff]  ;;  %v11845_v56 = vcombine.high %v679_v49, %v683_v6 }
 0x1aa   :  { %8154 = vmatprep.subr.bf16.mxu0 %v11725_v5  ;;  %v13304_v4 = vadd.f32 %v7415_v62, %v7303_v12  ;;  %v7305_v34 = vadd.f32 %v7304_v2, %v16746_v37  ;;  %v7417_v35 = vpop.f32.mrf.mxu1  ;;  %v543_v55 = vld [vmem:[#allocation5 + $0xb48] sm:$0xff]  ;;  %v11716_v5 = vcombine.low %v551_v17, %v555_v3  ;;  %v16752_v2 = vld [vmem:[#allocation135_spill] sm:$0xff] }
 0x1ab   :  { %8266 = vmatpush1.bf16.msra.mxu1 %v11732_v23  ;;  %v547_v14 = vld [vmem:[#allocation5 + $0xb68] sm:$0xff]  ;;  %v7308_v9 = vpop.f32.mrf.mxu0 }
 0x1ac   :  { %16745 = vst [vmem:[#allocation129_spill] sm:$0xff] %v13304_v4  ;;  %8267 = vmatprep.subr.bf16.mxu1 %v11853_v36  ;;  %7985 = vmatmul.mubr.bf16.gmra.mxu0 %v16747_v22  ;;  %v671_v60 = vld [vmem:[#allocation5 + $0xf48] sm:$0xff]  ;;  %v13308_v30 = vadd.f32 %v7417_v35, %v7305_v34  ;;  %v7309_v23 = vadd.f32 %v7308_v9, %v16749_v42  ;;  %v7421_v31 = vpop.f32.mrf.mxu1  ;;  %v16805_v4 = vld [vmem:[#allocation61_spill] sm:$0xff] }
 0x1ad   :  { %v675_v59 = vld [vmem:[#allocation5 + $0xf68] sm:$0xff]  ;;  %8155 = vmatpush2.bf16.msra.mxu0 %v11724_v24  ;;  %v7310_v27 = vpop.f32.mrf.mxu0  ;;  %v11844_v36 = vcombine.low %v679_v49, %v683_v6  ;;  %v11709_v12 = vcombine.high %v543_v55, %v547_v14  ;;  %v16756_v49 = vld [vmem:[#allocation137_spill] sm:$0xff] }
 0x1ae   :  { %16748 = vst [vmem:[#allocation132_spill] sm:$0xff] %v13308_v30  ;;  %8098 = vmatmul.mubr.bf16.gmra.mxu1 %v16750_v53  ;;  %8156 = vmatprep.subr.bf16.mxu0 %v11717_v29  ;;  %v13312_v62 = vadd.f32 %v7421_v31, %v7309_v23  ;;  %v7311_v37 = vadd.f32 %v7310_v27, %v16752_v2  ;;  %v7423_v22 = vpop.f32.mrf.mxu1  ;;  %v16753_v35 = vld [vmem:[#allocation32_spill] sm:$0xff]  ;;  %v16754_v53 = vld [vmem:[#allocation33_spill] sm:$0xff] }
 0x1af   :  { %8268 = vmatpush2.bf16.msra.mxu1 %v11852_v40  ;;  %7994 = vmatprep.mubr.bf16.mxu0 %v16753_v35  ;;  %v11837_v34 = vcombine.high %v671_v60, %v675_v59  ;;  %v535_v9 = vld [vmem:[#allocation5 + $0xb08] sm:$0xff]  ;;  %v7312_v18 = vpop.f32.mrf.mxu0  ;;  %v11708_v29 = vcombine.low %v543_v55, %v547_v14  ;;  %v16761_v14 = vld [vmem:[#allocation141_spill] sm:$0xff] }
 0x1b0   :  { %16751 = vst [vmem:[#allocation133_spill] sm:$0xff] %v13312_v62  ;;  %8269 = vmatprep.subr.bf16.mxu1 %v11845_v56  ;;  %v539_v42 = vld [vmem:[#allocation5 + $0xb28] sm:$0xff]  ;;  %8107 = vmatprep.mubr.bf16.mxu1 %v16754_v53  ;;  %v13317_v24 = vadd.f32 %v7423_v22, %v7311_v37  ;;  %v7313_v6 = vadd.f32 %v7312_v18, %v16756_v49  ;;  %v7425_v40 = vpop.f32.mrf.mxu1 }
 0x1b1   :  { %v663_v17 = vld [vmem:[#allocation5 + $0xf08] sm:$0xff]  ;;  %8157 = vmatpush2.bf16.msra.mxu0 %v11716_v5  ;;  %v7314_v23 = vpop.f32.mrf.mxu0  ;;  %v11836_v56 = vcombine.low %v671_v60, %v675_v59  ;;  %v11701_v31 = vcombine.high %v535_v9, %v539_v42  ;;  %v16762_v59 = vld [vmem:[#allocation35_spill] sm:$0xff] }
 0x1b2   :  { %v667_v3 = vld [vmem:[#allocation5 + $0xf28] sm:$0xff]  ;;  %16755 = vst [vmem:[#allocation135_spill] sm:$0xff] %v13317_v24  ;;  %8158 = vmatprep.subr.bf16.mxu0 %v11709_v12  ;;  %v13320_v27 = vadd.f32 %v7425_v40, %v7313_v6  ;;  %v7427_v11 = vpop.f32.mrf.mxu1  ;;  %v11700_v12 = vcombine.low %v535_v9, %v539_v42 }
 0x1b3   :  { %8270 = vmatpush2.bf16.msra.mxu1 %v11844_v36  ;;  %v16758_v2 = vld [vmem:[#allocation140_spill] sm:$0xff]  ;;  %v11829_v53 = vcombine.high %v663_v17, %v667_v3  ;;  %v7318_v37 = vpop.f32.mrf.mxu0 }
 0x1b4   :  { %16757 = vst [vmem:[#allocation137_spill] sm:$0xff] %v13320_v27  ;;  %v7315_v35 = vadd.f32 %v7314_v23, %v16758_v2  ;;  %8271 = vmatprep.subr.bf16.mxu1 %v11837_v34  ;;  %v527_v7 = vld [vmem:[#allocation5 + $0xac8] sm:$0xff]  ;;  %7995 = vmatmul.mubr.bf16.gmra.mxu0 %v16759_v57  ;;  %v7319_v36 = vadd.f32 %v7318_v37, %v16761_v14  ;;  %v7431_v60 = vpop.f32.mrf.mxu1  ;;  %v16764_v23 = vld [vmem:[#allocation143_spill] sm:$0xff] }
 0x1b5   :  { %v531_v22 = vld [vmem:[#allocation5 + $0xae8] sm:$0xff]  ;;  %8159 = vmatpush2.bf16.msra.mxu0 %v11708_v29  ;;  %v7320_v49 = vpop.f32.mrf.mxu0  ;;  %v11828_v34 = vcombine.low %v663_v17, %v667_v3  ;;  %v16768_v17 = vld [vmem:[#allocation145_spill] sm:$0xff] }
 0x1b6   :  { %v655_v18 = vld [vmem:[#allocation5 + $0xec8] sm:$0xff]  ;;  %v13324_v55 = vadd.f32 %v7427_v11, %v7315_v35  ;;  %8108 = vmatmul.mubr.bf16.gmra.mxu1 %v16762_v59  ;;  %8160 = vmatprep.subr.bf16.mxu0 %v11701_v31  ;;  %v11693_v6 = vcombine.high %v527_v7, %v531_v22  ;;  %v13328_v40 = vadd.f32 %v7431_v60, %v7319_v36  ;;  %v7433_v57 = vpop.f32.mrf.mxu1  ;;  %v16766_v59 = vld [vmem:[#allocation37_spill] sm:$0xff] }
 0x1b7   :  { %v659_v5 = vld [vmem:[#allocation5 + $0xee8] sm:$0xff]  ;;  %8272 = vmatpush2.bf16.msra.mxu1 %v11836_v56  ;;  %v7321_v2 = vadd.f32 %v7320_v49, %v16764_v23  ;;  %v7322_v52 = vpop.f32.mrf.mxu0  ;;  %8117 = vmatprep.mubr.bf16.mxu1 %v16766_v59  ;;  %v11692_v31 = vcombine.low %v527_v7, %v531_v22 }
 0x1b8   :  { %16760 = vst [vmem:[#allocation140_spill] sm:$0xff] %v13324_v55  ;;  %16763 = vst [vmem:[#allocation141_spill] sm:$0xff] %v13328_v40  ;;  %8273 = vmatprep.subr.bf16.mxu1 %v11829_v53  ;;  %v16765_v11 = vld [vmem:[#allocation36_spill] sm:$0xff]  ;;  %v11821_v35 = vcombine.high %v655_v18, %v659_v5  ;;  %v7323_v3 = vadd.f32 %v7322_v52, %v16768_v17  ;;  %v7435_v56 = vpop.f32.mrf.mxu1  ;;  %v11820_v53 = vcombine.low %v655_v18, %v659_v5  ;;  %v16772_v5 = vld [vmem:[#allocation39_spill] sm:$0xff] }
 0x1b9   :  { %8004 = vmatprep.mubr.bf16.mxu0 %v16765_v11  ;;  %v519_v37 = vld [vmem:[#allocation5 + $0xa88] sm:$0xff]  ;;  %v13333_v29 = vadd.f32 %v7433_v57, %v7321_v2  ;;  %8161 = vmatpush2.bf16.msra.mxu0 %v11700_v12  ;;  %v7324_v36 = vpop.f32.mrf.mxu0 }
 0x1ba   :  { %v523_v14 = vld [vmem:[#allocation5 + $0xaa8] sm:$0xff]  ;;  %8162 = vmatprep.subr.bf16.mxu0 %v11693_v6  ;;  %v13336_v49 = vadd.f32 %v7435_v56, %v7323_v3  ;;  %v7325_v23 = vadd.f32 %v7324_v36, %v13207_v61  ;;  %v7437_v11 = vpop.f32.mrf.mxu1 }
 0x1bb   :  { %v647_v9 = vld [vmem:[#allocation5 + $0xe88] sm:$0xff]  ;;  %16767 = vst [vmem:[#allocation143_spill] sm:$0xff] %v13333_v29  ;;  %8274 = vmatpush2.bf16.msra.mxu1 %v11828_v34  ;;  %v11685_v60 = vcombine.high %v519_v37, %v523_v14  ;;  %v7328_v2 = vpop.f32.mrf.mxu0  ;;  %v11684_v34 = vcombine.low %v519_v37, %v523_v14 }
 0x1bc   :  { %v651_v42 = vld [vmem:[#allocation5 + $0xea8] sm:$0xff]  ;;  %16769 = vst [vmem:[#allocation145_spill] sm:$0xff] %v13336_v49  ;;  %8275 = vmatprep.subr.bf16.mxu1 %v11821_v35  ;;  %8005 = vmatmul.mubr.bf16.gmra.mxu0 %v16770_v41  ;;  %v13340_v7 = vadd.f32 %v7437_v11, %v7325_v23  ;;  %v7329_v22 = vadd.f32 %v7328_v2, %v13212_v39  ;;  %v7441_v18 = vpop.f32.mrf.mxu1  ;;  %v16778_v41 = vld [vmem:[#allocation42_spill] sm:$0xff]  ;;  %v16798_v49 = vld [vmem:[#allocation57_spill] sm:$0xff] }
 0x1bd   :  { %v11813_v59 = vcombine.high %v647_v9, %v651_v42  ;;  %v511_v45 = vld [vmem:[#allocation5 + $0xa48] sm:$0xff]  ;;  %8163 = vmatpush2.bf16.msra.mxu0 %v11692_v31  ;;  %v7330_v61 = vpop.f32.mrf.mxu0  ;;  %v11812_v6 = vcombine.low %v647_v9, %v651_v42 }
 0x1be   :  { %v515_v57 = vld [vmem:[#allocation5 + $0xa68] sm:$0xff]  ;;  %16771 = vst [vmem:[#allocation150_spill] sm:$0xff] %v13340_v7  ;;  %8118 = vmatmul.mubr.bf16.gmra.mxu1 %v16772_v5  ;;  %8164 = vmatprep.subr.bf16.mxu0 %v11685_v60  ;;  %v13344_v17 = vadd.f32 %v7441_v18, %v7329_v22  ;;  %v7331_v3 = vadd.f32 %v7330_v61, %v13219_v19  ;;  %v7443_v56 = vpop.f32.mrf.mxu1  ;;  %v16775_v5 = vld [vmem:[#allocation41_spill] sm:$0xff] }
 0x1bf   :  { %v639_v52 = vld [vmem:[#allocation5 + $0xe48] sm:$0xff]  ;;  %8276 = vmatpush2.bf16.msra.mxu1 %v11820_v53  ;;  %v11677_v35 = vcombine.high %v511_v45, %v515_v57  ;;  %v7332_v2 = vpop.f32.mrf.mxu0  ;;  %8127 = vmatprep.mubr.bf16.mxu1 %v16775_v5  ;;  %v11676_v53 = vcombine.low %v511_v45, %v515_v57 }
 0x1c0   :  { %v643_v12 = vld [vmem:[#allocation5 + $0xe68] sm:$0xff]  ;;  %16773 = vst [vmem:[#allocation151_spill] sm:$0xff] %v13344_v17  ;;  %8277 = vmatprep.subr.bf16.mxu1 %v11813_v59  ;;  %v13349_v31 = vadd.f32 %v7443_v56, %v7331_v3  ;;  %v7333_v9 = vadd.f32 %v7332_v2, %v13224_v8  ;;  %v7445_v42 = vpop.f32.mrf.mxu1 }
 0x1c1   :  { %v16774_v11 = vld [vmem:[#allocation40_spill] sm:$0xff]  ;;  %v11805_v36 = vcombine.high %v639_v52, %v643_v12  ;;  %8165 = vmatpush2.bf16.msra.mxu0 %v11684_v34  ;;  %v7334_v19 = vpop.f32.mrf.mxu0  ;;  %v11804_v59 = vcombine.low %v639_v52, %v643_v12  ;;  %v16780_v12 = vld [vmem:[#allocation43_spill] sm:$0xff] }
 0x1c2   :  { %8014 = vmatprep.mubr.bf16.mxu0 %v16774_v11  ;;  %v503_v39 = vld [vmem:[#allocation5 + $0xa08] sm:$0xff]  ;;  %16776 = vst [vmem:[#allocation152_spill] sm:$0xff] %v13349_v31  ;;  %8166 = vmatprep.subr.bf16.mxu0 %v11677_v35  ;;  %v13352_v22 = vadd.f32 %v7445_v42, %v7333_v9  ;;  %v7335_v18 = vadd.f32 %v7334_v19, %v13228_v1  ;;  %v7447_v61 = vpop.f32.mrf.mxu1 }
 0x1c3   :  { %v507_v23 = vld [vmem:[#allocation5 + $0xa28] sm:$0xff]  ;;  %8278 = vmatpush2.bf16.msra.mxu1 %v11812_v6  ;;  %v7338_v56 = vpop.f32.mrf.mxu0 }
 0x1c4   :  { %v631_v37 = vld [vmem:[#allocation5 + $0xe08] sm:$0xff]  ;;  %v11669_v60 = vcombine.high %v503_v39, %v507_v23  ;;  %16777 = vst [vmem:[#allocation153_spill] sm:$0xff] %v13352_v22  ;;  %8279 = vmatprep.subr.bf16.mxu1 %v11805_v36  ;;  %8015 = vmatmul.mubr.bf16.gmra.mxu0 %v16778_v41  ;;  %v13356_v45 = vadd.f32 %v7447_v61, %v7335_v18  ;;  %v7451_v52 = vpop.f32.mrf.mxu1 }
 0x1c5   :  { %v635_v14 = vld [vmem:[#allocation5 + $0xe28] sm:$0xff]  ;;  %v7339_v57 = vadd.f32 %v7338_v56, %v13232_v15  ;;  %8167 = vmatpush2.bf16.msra.mxu0 %v11676_v53  ;;  %v11668_v6 = vcombine.low %v503_v39, %v507_v23  ;;  %v7340_v1 = vpop.f32.mrf.mxu0 }
 0x1c6   :  { %v11797_v5 = vcombine.high %v631_v37, %v635_v14  ;;  %v751_v11 = vld [vmem:[#allocation5 + $0x11c8] sm:$0xff]  ;;  %16779 = vst [vmem:[#allocation154_spill] sm:$0xff] %v13356_v45  ;;  %8128 = vmatmul.mubr.bf16.gmra.mxu1 %v16780_v12  ;;  %8168 = vmatprep.subr.bf16.mxu0 %v11669_v60  ;;  %v11796_v35 = vcombine.low %v631_v37, %v635_v14  ;;  %v7453_v42 = vpop.f32.mrf.mxu1  ;;  %v16783_v12 = vld [vmem:[#allocation45_spill] sm:$0xff] }
 0x1c7   :  { %v755_v3 = vld [vmem:[#allocation5 + $0x11e8] sm:$0xff]  ;;  %8280 = vmatpush2.bf16.msra.mxu1 %v11804_v59  ;;  %v13360_v2 = vadd.f32 %v7451_v52, %v7339_v57  ;;  %v7341_v9 = vadd.f32 %v7340_v1, %v13237_v28  ;;  %v7342_v56 = vpop.f32.mrf.mxu0  ;;  %8283 = vmatprep.mubr.bf16.mxu1 %v16783_v12 }
 0x1c8   :  { %v879_v8 = vld [vmem:[#allocation5 + $0x15c8] sm:$0xff]  ;;  %v11917_v36 = vcombine.high %v751_v11, %v755_v3  ;;  %8281 = vmatprep.subr.bf16.mxu1 %v11797_v5  ;;  %v7343_v37 = vadd.f32 %v7342_v56, %v13240_v20  ;;  %v7455_v14 = vpop.f32.mrf.mxu1  ;;  %v11916_v59 = vcombine.low %v751_v11, %v755_v3  ;;  %v16786_v20 = vld [vmem:[#allocation46_spill] sm:$0xff] }
 0x1c9   :  { %v883_v34 = vld [vmem:[#allocation5 + $0x15e8] sm:$0xff]  ;;  %16781 = vst [vmem:[#allocation155_spill] sm:$0xff] %v13360_v2  ;;  %v13365_v53 = vadd.f32 %v7453_v42, %v7341_v9  ;;  %8169 = vmatpush2.bf16.msra.mxu0 %v11668_v6  ;;  %v7344_v28 = vpop.f32.mrf.mxu0 }
 0x1ca   :  { %v16782_v19 = vld [vmem:[#allocation44_spill] sm:$0xff]  ;;  %v12045_v18 = vcombine.high %v879_v8, %v883_v34  ;;  %8364 = vmatprep.subr.bf16.mxu0 %v11917_v36  ;;  %v12044_v5 = vcombine.low %v879_v8, %v883_v34  ;;  %v13368_v57 = vadd.f32 %v7455_v14, %v7343_v37  ;;  %v7345_v52 = vadd.f32 %v7344_v28, %v13244_v38  ;;  %v7457_v1 = vpop.f32.mrf.mxu1  ;;  %v16788_v8 = vld [vmem:[#allocation47_spill] sm:$0xff] }
 0x1cb   :  { %8170 = vmatprep.mubr.bf16.mxu0 %v16782_v19  ;;  %v743_v15 = vld [vmem:[#allocation5 + $0x1188] sm:$0xff]  ;;  %16784 = vst [vmem:[#allocation156_spill] sm:$0xff] %v13365_v53  ;;  %8282 = vmatpush2.bf16.msra.mxu1 %v11796_v35  ;;  %v13371_v42 = vpop.f32.mrf.mxu0 }
 0x1cc   :  { %v747_v61 = vld [vmem:[#allocation5 + $0x11a8] sm:$0xff]  ;;  %16785 = vst [vmem:[#allocation157_spill] sm:$0xff] %v13368_v57  ;;  %8477 = vmatprep.subr.bf16.mxu1 %v12045_v18  ;;  %8171 = vmatmul.mubr.bf16.vlgmr.msra.gmra.mxu0 %v16786_v20  ;;  %v13374_v3 = vadd.f32 %v7457_v1, %v7345_v52  ;;  %v13376_v35 = vpop.f32.mrf.mxu1  ;;  %v16790_v20 = vld [vmem:[#allocation49_spill] sm:$0xff] }
 0x1cd   :  { %v871_v39 = vld [vmem:[#allocation5 + $0x1588] sm:$0xff]  ;;  %v11909_v60 = vcombine.high %v743_v15, %v747_v61  ;;  %8365 = vmatpush1.bf16.msra.mxu0 %v11916_v59  ;;  %v11908_v34 = vcombine.low %v743_v15, %v747_v61  ;;  %v13379_v38 = vpop.f32.mrf.mxu0  ;;  %v16794_v57 = vld [vmem:[#allocation53_spill] sm:$0xff] }
 0x1ce   :  { %v875_v23 = vld [vmem:[#allocation5 + $0x15a8] sm:$0xff]  ;;  %16787 = vst [vmem:[#allocation158_spill] sm:$0xff] %v13374_v3  ;;  %8284 = vmatmul.mubr.bf16.vlgmr.msra.gmra.mxu1 %v16788_v8  ;;  %v13381_v56 = vpop.f32.mrf.mxu1 }
 0x1cf   :  { %v12037_v12 = vcombine.high %v871_v39, %v875_v23  ;;  %v735_v19 = vld [vmem:[#allocation5 + $0x1148] sm:$0xff]  ;;  %8478 = vmatpush1.bf16.msra.mxu1 %v12044_v5  ;;  %8366 = vmatprep.subr.bf16.mxu0 %v11909_v60  ;;  %v12036_v36 = vcombine.low %v871_v39, %v875_v23  ;;  %v13384_v1 = vpop.f32.mrf.mxu0 }
 0x1d0   :  { %v739_v9 = vld [vmem:[#allocation5 + $0x1168] sm:$0xff]  ;;  %8293 = vmatprep.mubr.bf16.mxu1 %v16790_v20  ;;  %v13387_v61 = vpop.f32.mrf.mxu1  ;;  %v16791_v20 = vld [vmem:[#allocation50_spill] sm:$0xff] }
 0x1d1   :  { %v863_v6 = vld [vmem:[#allocation5 + $0x1548] sm:$0xff]  ;;  %v11901_v18 = vcombine.high %v735_v19, %v739_v9  ;;  %8479 = vmatprep.subr.bf16.mxu1 %v12037_v12  ;;  %8367 = vmatpush1.bf16.msra.mxu0 %v11908_v34  ;;  %v11900_v5 = vcombine.low %v735_v19, %v739_v9  ;;  %v13389_v39 = vpop.f32.mrf.mxu0  ;;  %v16792_v19 = vld [vmem:[#allocation51_spill] sm:$0xff] }
 0x1d2   :  { %v867_v11 = vld [vmem:[#allocation5 + $0x1568] sm:$0xff]  ;;  %v13391_v60 = vpop.f32.mrf.mxu1 }
 0x1d3   :  { %v16789_v37 = vld [vmem:[#allocation48_spill] sm:$0xff]  ;;  %v12029_v14 = vcombine.high %v863_v6, %v867_v11  ;;  %8480 = vmatpush1.bf16.msra.mxu1 %v12036_v36  ;;  %8368 = vmatprep.subr.bf16.mxu0 %v11901_v18  ;;  %v12028_v12 = vcombine.low %v863_v6, %v867_v11  ;;  %v13393_v33 = vpop.f32.mrf.mxu0 }
 0x1d4   :  { %8180 = vmatprep.mubr.bf16.mxu0 %v16789_v37  ;;  %v727_v28 = vld [vmem:[#allocation5 + $0x1108] sm:$0xff]  ;;  %v13396_v34 = vpop.f32.mrf.mxu1 }
 0x1d5   :  { %v731_v52 = vld [vmem:[#allocation5 + $0x1128] sm:$0xff]  ;;  %8481 = vmatprep.subr.bf16.mxu1 %v12029_v14  ;;  %8181 = vmatmul.mubr.bf16.gmra.mxu0 %v16791_v20  ;;  %v13399_v6 = vpop.f32.mrf.mxu0 }
 0x1d6   :  { %v855_v59 = vld [vmem:[#allocation5 + $0x1508] sm:$0xff]  ;;  %v11893_v23 = vcombine.high %v727_v28, %v731_v52  ;;  %8294 = vmatmul.mubr.bf16.gmra.mxu1 %v16792_v19  ;;  %8369 = vmatpush1.bf16.msra.mxu0 %v11900_v5  ;;  %v11892_v9 = vcombine.low %v727_v28, %v731_v52  ;;  %v13401_v18 = vpop.f32.mrf.mxu1 }
 0x1d7   :  { %v859_v15 = vld [vmem:[#allocation5 + $0x1528] sm:$0xff]  ;;  %8482 = vmatpush1.bf16.msra.mxu1 %v12028_v12  ;;  %v13404_v3 = vpop.f32.mrf.mxu0  ;;  %8303 = vmatprep.mubr.bf16.mxu1 %v16794_v57  ;;  %v16795_v57 = vld [vmem:[#allocation54_spill] sm:$0xff] }
 0x1d8   :  { %v12021_v37 = vcombine.high %v855_v59, %v859_v15  ;;  %v719_v8 = vld [vmem:[#allocation5 + $0x10c8] sm:$0xff]  ;;  %8370 = vmatprep.subr.bf16.mxu0 %v11893_v23  ;;  %v12020_v11 = vcombine.low %v855_v59, %v859_v15  ;;  %v13407_v52 = vpop.f32.mrf.mxu1 }
 0x1d9   :  { %v723_v41 = vld [vmem:[#allocation5 + $0x10e8] sm:$0xff]  ;;  %v13409_v59 = vpop.f32.mrf.mxu0 }
 0x1da   :  { %v847_v32 = vld [vmem:[#allocation5 + $0x14c8] sm:$0xff]  ;;  %v11885_v36 = vcombine.high %v719_v8, %v723_v41  ;;  %8483 = vmatprep.subr.bf16.mxu1 %v12021_v37  ;;  %8371 = vmatpush1.bf16.msra.mxu0 %v11892_v9  ;;  %v11884_v12 = vcombine.low %v719_v8, %v723_v41  ;;  %v13411_v23 = vpop.f32.mrf.mxu1  ;;  %v16796_v41 = vld [vmem:[#allocation55_spill] sm:$0xff] }
 0x1db   :  { %v851_v25 = vld [vmem:[#allocation5 + $0x14e8] sm:$0xff]  ;;  %8484 = vmatpush1.bf16.msra.mxu1 %v12020_v11  ;;  %v13413_v2 = vpop.f32.mrf.mxu0 }
 0x1dc   :  { %v16793_v14 = vld [vmem:[#allocation52_spill] sm:$0xff]  ;;  %v12013_v20 = vcombine.high %v847_v32, %v851_v25  ;;  %8372 = vmatprep.subr.bf16.mxu0 %v11885_v36  ;;  %v12012_v37 = vcombine.low %v847_v32, %v851_v25  ;;  %v13416_v9 = vpop.f32.mrf.mxu1 }
 0x1dd   :  { %8190 = vmatprep.mubr.bf16.mxu0 %v16793_v14  ;;  %v711_v21 = vld [vmem:[#allocation5 + $0x1088] sm:$0xff]  ;;  %v13419_v25 = vpop.f32.mrf.mxu0 }
 0x1de   :  { %v715_v44 = vld [vmem:[#allocation5 + $0x10a8] sm:$0xff]  ;;  %8485 = vmatprep.subr.bf16.mxu1 %v12013_v20  ;;  %8191 = vmatmul.mubr.bf16.gmra.mxu0 %v16795_v57  ;;  %v13421_v11 = vpop.f32.mrf.mxu1 }
 0x1df   :  { %v839_v5 = vld [vmem:[#allocation5 + $0x1488] sm:$0xff]  ;;  %v11877_v15 = vcombine.high %v711_v21, %v715_v44  ;;  %8304 = vmatmul.mubr.bf16.gmra.mxu1 %v16796_v41  ;;  %8373 = vmatpush1.bf16.msra.mxu0 %v11884_v12  ;;  %v11876_v8 = vcombine.low %v711_v21, %v715_v44  ;;  %v13424_v7 = vpop.f32.mrf.mxu0 }
 0x1e0   :  { %v843_v28 = vld [vmem:[#allocation5 + $0x14a8] sm:$0xff]  ;;  %8486 = vmatpush1.bf16.msra.mxu1 %v12012_v37  ;;  %8313 = vmatprep.mubr.bf16.mxu1 %v16798_v49  ;;  %v13427_v44 = vpop.f32.mrf.mxu1  ;;  %v16799_v49 = vld [vmem:[#allocation58_spill] sm:$0xff] }
 0x1e1   :  { %v12005_v14 = vcombine.high %v839_v5, %v843_v28  ;;  %v703_v19 = vld [vmem:[#allocation5 + $0x1048] sm:$0xff]  ;;  %8374 = vmatprep.subr.bf16.mxu0 %v11877_v15  ;;  %v12004_v32 = vcombine.low %v839_v5, %v843_v28  ;;  %v13429_v5 = vpop.f32.mrf.mxu0 }
 0x1e2   :  { %v707_v53 = vld [vmem:[#allocation5 + $0x1068] sm:$0xff]  ;;  %v13431_v15 = vpop.f32.mrf.mxu1 }
 0x1e3   :  { %v831_v45 = vld [vmem:[#allocation5 + $0x1448] sm:$0xff]  ;;  %v11869_v20 = vcombine.high %v703_v19, %v707_v53  ;;  %8487 = vmatprep.subr.bf16.mxu1 %v12005_v14  ;;  %8375 = vmatpush1.bf16.msra.mxu0 %v11876_v8  ;;  %v11868_v37 = vcombine.low %v703_v19, %v707_v53  ;;  %v13433_v40 = vpop.f32.mrf.mxu0  ;;  %v16801_v53 = vld [vmem:[#allocation59_spill] sm:$0xff] }
 0x1e4   :  { %v835_v22 = vld [vmem:[#allocation5 + $0x1468] sm:$0xff]  ;;  %8488 = vmatpush1.bf16.msra.mxu1 %v12004_v32  ;;  %v13436_v8 = vpop.f32.mrf.mxu1 }
 0x1e5   :  { %v16797_v36 = vld [vmem:[#allocation56_spill] sm:$0xff]  ;;  %v11997_v57 = vcombine.high %v831_v45, %v835_v22  ;;  %8376 = vmatprep.subr.bf16.mxu0 %v11869_v20  ;;  %v11996_v14 = vcombine.low %v831_v45, %v835_v22  ;;  %16800 = vst [vmem:[#allocation159_spill] sm:$0xff] %v13436_v8  ;;  %v13439_v22 = vpop.f32.mrf.mxu0 }
 0x1e6   :  { %8200 = vmatprep.mubr.bf16.mxu0 %v16797_v36  ;;  %v695_v31 = vld [vmem:[#allocation5 + $0x1008] sm:$0xff]  ;;  %v13441_v32 = vpop.f32.mrf.mxu1 }
 0x1e7   :  { %v699_v17 = vld [vmem:[#allocation5 + $0x1028] sm:$0xff]  ;;  %8489 = vmatprep.subr.bf16.mxu1 %v11997_v57  ;;  %8201 = vmatmul.mubr.bf16.gmra.mxu0 %v16799_v49  ;;  %16802 = vst [vmem:[#allocation160_spill] sm:$0xff] %v13441_v32  ;;  %v13444_v30 = vpop.f32.mrf.mxu0 }
 0x1e8   :  { %v823_v12 = vld [vmem:[#allocation5 + $0x1408] sm:$0xff]  ;;  %v11861_v28 = vcombine.high %v695_v31, %v699_v17  ;;  %8314 = vmatmul.mubr.bf16.gmra.mxu1 %v16801_v53  ;;  %8377 = vmatpush1.bf16.msra.mxu0 %v11868_v37  ;;  %v11860_v19 = vcombine.low %v695_v31, %v699_v17  ;;  %16804 = vst [vmem:[#allocation161_spill] sm:$0xff] %v13444_v30  ;;  %v13447_v31 = vpop.f32.mrf.mxu1 }
 0x1e9   :  { %v827_v21 = vld [vmem:[#allocation5 + $0x1428] sm:$0xff]  ;;  %8490 = vmatpush1.bf16.msra.mxu1 %v11996_v14  ;;  %8323 = vmatprep.mubr.bf16.mxu1 %v16805_v4  ;;  %16806 = vst [vmem:[#allocation162_spill] sm:$0xff] %v13447_v31  ;;  %v16810_v4 = vld [vmem:[#allocation62_spill] sm:$0xff] }
 0x1ea   :  { %v11989_v36 = vcombine.high %v823_v12, %v827_v21  ;;  %v815_v41 = vld [vmem:[#allocation5 + $0x13c8] sm:$0xff]  ;;  %8378 = vmatprep.subr.bf16.mxu0 %v11861_v28  ;;  %v11988_v45 = vcombine.low %v823_v12, %v827_v21  ;;  %v13449_v12 = vpop.f32.mrf.mxu0  ;;  %v13451_v28 = vpop.f32.mrf.mxu1 }
 0x1eb   :  { %v819_v29 = vld [vmem:[#allocation5 + $0x13e8] sm:$0xff]  ;;  %16807 = vst [vmem:[#allocation163_spill] sm:$0xff] %v13449_v12  ;;  %16808 = vst [vmem:[#allocation164_spill] sm:$0xff] %v13451_v28 }
 0x1ec   :  { %v943_v55 = vld [vmem:[#allocation5 + $0x17c8] sm:$0xff]  ;;  %v11981_v57 = vcombine.high %v815_v41, %v819_v29  ;;  %8491 = vmatprep.subr.bf16.mxu1 %v11989_v36  ;;  %8379 = vmatpush1.bf16.msra.mxu0 %v11860_v19  ;;  %v11980_v14 = vcombine.low %v815_v41, %v819_v29  ;;  %v13453_v30 = vpop.f32.mrf.mxu0  ;;  %v13456_v19 = vpop.f32.mrf.mxu1  ;;  %v16812_v29 = vld [vmem:[#allocation63_spill] sm:$0xff] }
 0x1ed   :  { %v947_v27 = vld [vmem:[#allocation5 + $0x17e8] sm:$0xff]  ;;  %8492 = vmatpush1.bf16.msra.mxu1 %v11988_v45  ;;  %16809 = vst [vmem:[#allocation165_spill] sm:$0xff] %v13453_v30  ;;  %16811 = vst [vmem:[#allocation166_spill] sm:$0xff] %v13456_v19  ;;  %v16817_v19 = vld [vmem:[#allocation65_spill] sm:$0xff] }
 0x1ee   :  { %v16803_v20 = vld [vmem:[#allocation60_spill] sm:$0xff]  ;;  %v12109_v49 = vcombine.high %v943_v55, %v947_v27  ;;  %8380 = vmatprep.subr.bf16.mxu0 %v11981_v57  ;;  %v12108_v36 = vcombine.low %v943_v55, %v947_v27  ;;  %v13459_v27 = vpop.f32.mrf.mxu0  ;;  %v13461_v45 = vpop.f32.mrf.mxu1 }
 0x1ef   :  { %8210 = vmatprep.mubr.bf16.mxu0 %v16803_v20  ;;  %v807_v24 = vld [vmem:[#allocation5 + $0x1388] sm:$0xff]  ;;  %16813 = vst [vmem:[#allocation167_spill] sm:$0xff] %v13459_v27  ;;  %16814 = vst [vmem:[#allocation168_spill] sm:$0xff] %v13461_v45 }
 0x1f0   :  { %v811_v62 = vld [vmem:[#allocation5 + $0x13a8] sm:$0xff]  ;;  %8493 = vmatprep.subr.bf16.mxu1 %v12109_v49  ;;  %8211 = vmatmul.mubr.bf16.gmra.mxu0 %v16810_v4  ;;  %v13464_v12 = vpop.f32.mrf.mxu0 }
 0x1f1   :  { %v935_v37 = vld [vmem:[#allocation5 + $0x1788] sm:$0xff]  ;;  %v11973_v21 = vcombine.high %v807_v24, %v811_v62  ;;  %8324 = vmatmul.mubr.bf16.gmra.mxu1 %v16812_v29  ;;  %8381 = vmatpush2.bf16.msra.mxu0 %v11980_v14  ;;  %v11972_v41 = vcombine.low %v807_v24, %v811_v62  ;;  %16816 = vst [vmem:[#allocation169_spill] sm:$0xff] %v13464_v12  ;;  %v13467_v24 = vpop.f32.mrf.mxu1 }
 0x1f2   :  { %v939_v17 = vld [vmem:[#allocation5 + $0x17a8] sm:$0xff]  ;;  %8494 = vmatpush2.bf16.msra.mxu1 %v12108_v36  ;;  %8333 = vmatprep.mubr.bf16.mxu1 %v16817_v19  ;;  %16818 = vst [vmem:[#allocation170_spill] sm:$0xff] %v13467_v24  ;;  %v16822_v19 = vld [vmem:[#allocation66_spill] sm:$0xff] }
 0x1f3   :  { %v12101_v20 = vcombine.high %v935_v37, %v939_v17  ;;  %v799_v53 = vld [vmem:[#allocation5 + $0x1348] sm:$0xff]  ;;  %8382 = vmatprep.subr.bf16.mxu0 %v11973_v21  ;;  %v12100_v55 = vcombine.low %v935_v37, %v939_v17  ;;  %v13469_v37 = vpop.f32.mrf.mxu0  ;;  %v13471_v21 = vpop.f32.mrf.mxu1 }
 0x1f4   :  { %v803_v32 = vld [vmem:[#allocation5 + $0x1368] sm:$0xff]  ;;  %16819 = vst [vmem:[#allocation171_spill] sm:$0xff] %v13469_v37  ;;  %16820 = vst [vmem:[#allocation172_spill] sm:$0xff] %v13471_v21 }
 0x1f5   :  { %v927_v8 = vld [vmem:[#allocation5 + $0x1748] sm:$0xff]  ;;  %v11965_v49 = vcombine.high %v799_v53, %v803_v32  ;;  %8495 = vmatprep.subr.bf16.mxu1 %v12101_v20  ;;  %8383 = vmatpush2.bf16.msra.mxu0 %v11972_v41  ;;  %v11964_v36 = vcombine.low %v799_v53, %v803_v32  ;;  %v13473_v12 = vpop.f32.mrf.mxu0  ;;  %v13476_v41 = vpop.f32.mrf.mxu1  ;;  %v16824_v53 = vld [vmem:[#allocation67_spill] sm:$0xff] }
 0x1f6   :  { %v931_v31 = vld [vmem:[#allocation5 + $0x1768] sm:$0xff]  ;;  %8496 = vmatpush2.bf16.msra.mxu1 %v12100_v55  ;;  %16821 = vst [vmem:[#allocation173_spill] sm:$0xff] %v13473_v12  ;;  %16823 = vst [vmem:[#allocation174_spill] sm:$0xff] %v13476_v41  ;;  %v16829_v41 = vld [vmem:[#allocation69_spill] sm:$0xff] }
 0x1f7   :  { %v16815_v57 = vld [vmem:[#allocation64_spill] sm:$0xff]  ;;  %v12093_v4 = vcombine.high %v927_v8, %v931_v31  ;;  %8384 = vmatprep.subr.bf16.mxu0 %v11965_v49  ;;  %v12092_v20 = vcombine.low %v927_v8, %v931_v31  ;;  %v13479_v8 = vpop.f32.mrf.mxu0  ;;  %v13481_v55 = vpop.f32.mrf.mxu1 }
 0x1f8   :  { %8220 = vmatprep.mubr.bf16.mxu0 %v16815_v57  ;;  %v791_v28 = vld [vmem:[#allocation5 + $0x1308] sm:$0xff]  ;;  %16825 = vst [vmem:[#allocation175_spill] sm:$0xff] %v13479_v8  ;;  %16826 = vst [vmem:[#allocation176_spill] sm:$0xff] %v13481_v55 }
 0x1f9   :  { %v795_v30 = vld [vmem:[#allocation5 + $0x1328] sm:$0xff]  ;;  %8497 = vmatprep.subr.bf16.mxu1 %v12093_v4  ;;  %8221 = vmatmul.mubr.bf16.gmra.mxu0 %v16822_v19  ;;  %v13484_v37 = vpop.f32.mrf.mxu0 }
 0x1fa   :  { %v919_v14 = vld [vmem:[#allocation5 + $0x1708] sm:$0xff]  ;;  %v11957_v17 = vcombine.high %v791_v28, %v795_v30  ;;  %8334 = vmatmul.mubr.bf16.gmra.mxu1 %v16824_v53  ;;  %8385 = vmatpush2.bf16.msra.mxu0 %v11964_v36  ;;  %v11956_v32 = vcombine.low %v791_v28, %v795_v30  ;;  %16828 = vst [vmem:[#allocation177_spill] sm:$0xff] %v13484_v37  ;;  %v13487_v28 = vpop.f32.mrf.mxu1 }
 0x1fb   :  { %v923_v62 = vld [vmem:[#allocation5 + $0x1728] sm:$0xff]  ;;  %8498 = vmatpush2.bf16.msra.mxu1 %v12092_v20  ;;  %8343 = vmatprep.mubr.bf16.mxu1 %v16829_v41  ;;  %16830 = vst [vmem:[#allocation178_spill] sm:$0xff] %v13487_v28  ;;  %v16834_v41 = vld [vmem:[#allocation70_spill] sm:$0xff] }
 0x1fc   :  { %v12085_v57 = vcombine.high %v919_v14, %v923_v62  ;;  %v783_v29 = vld [vmem:[#allocation5 + $0x12c8] sm:$0xff]  ;;  %8386 = vmatprep.subr.bf16.mxu0 %v11957_v17  ;;  %v12084_v4 = vcombine.low %v919_v14, %v923_v62  ;;  %v13489_v14 = vpop.f32.mrf.mxu0  ;;  %v13491_v17 = vpop.f32.mrf.mxu1 }
 0x1fd   :  { %v787_v45 = vld [vmem:[#allocation5 + $0x12e8] sm:$0xff]  ;;  %16831 = vst [vmem:[#allocation179_spill] sm:$0xff] %v13489_v14  ;;  %16832 = vst [vmem:[#allocation180_spill] sm:$0xff] %v13491_v17 }
 0x1fe   :  { %v911_v27 = vld [vmem:[#allocation5 + $0x16c8] sm:$0xff]  ;;  %v11949_v31 = vcombine.high %v783_v29, %v787_v45  ;;  %8499 = vmatprep.subr.bf16.mxu1 %v12085_v57  ;;  %8387 = vmatpush2.bf16.msra.mxu0 %v11956_v32  ;;  %v11948_v20 = vcombine.low %v783_v29, %v787_v45  ;;  %v13493_v37 = vpop.f32.mrf.mxu0  ;;  %v13496_v32 = vpop.f32.mrf.mxu1  ;;  %v16836_v29 = vld [vmem:[#allocation71_spill] sm:$0xff] }
 0x1ff   :  { %v915_v24 = vld [vmem:[#allocation5 + $0x16e8] sm:$0xff]  ;;  %8500 = vmatpush2.bf16.msra.mxu1 %v12084_v4  ;;  %16833 = vst [vmem:[#allocation181_spill] sm:$0xff] %v13493_v37  ;;  %16835 = vst [vmem:[#allocation182_spill] sm:$0xff] %v13496_v32  ;;  %v16841_v32 = vld [vmem:[#allocation73_spill] sm:$0xff] }
 0x200   :  { %v16827_v49 = vld [vmem:[#allocation68_spill] sm:$0xff]  ;;  %v12077_v19 = vcombine.high %v911_v27, %v915_v24  ;;  %8388 = vmatprep.subr.bf16.mxu0 %v11949_v31  ;;  %v12076_v57 = vcombine.low %v911_v27, %v915_v24  ;;  %v13499_v27 = vpop.f32.mrf.mxu0  ;;  %v13501_v4 = vpop.f32.mrf.mxu1 }
 0x201   :  { %8230 = vmatprep.mubr.bf16.mxu0 %v16827_v49  ;;  %v775_v21 = vld [vmem:[#allocation5 + $0x1288] sm:$0xff]  ;;  %16837 = vst [vmem:[#allocation183_spill] sm:$0xff] %v13499_v27  ;;  %16838 = vst [vmem:[#allocation184_spill] sm:$0xff] %v13501_v4 }
 0x202   :  { %v779_v12 = vld [vmem:[#allocation5 + $0x12a8] sm:$0xff]  ;;  %8501 = vmatprep.subr.bf16.mxu1 %v12077_v19  ;;  %8231 = vmatmul.mubr.bf16.gmra.mxu0 %v16834_v41  ;;  %v13504_v14 = vpop.f32.mrf.mxu0 }
 0x203   :  { %v903_v36 = vld [vmem:[#allocation5 + $0x1688] sm:$0xff]  ;;  %v11941_v62 = vcombine.high %v775_v21, %v779_v12  ;;  %8344 = vmatmul.mubr.bf16.gmra.mxu1 %v16836_v29  ;;  %8389 = vmatpush2.bf16.msra.mxu0 %v11948_v20  ;;  %v11940_v45 = vcombine.low %v775_v21, %v779_v12  ;;  %16840 = vst [vmem:[#allocation185_spill] sm:$0xff] %v13504_v14  ;;  %v13507_v21 = vpop.f32.mrf.mxu1  ;;  %v16846_v14 = vld [vmem:[#allocation74_spill] sm:$0xff] }
 0x204   :  { %v907_v30 = vld [vmem:[#allocation5 + $0x16a8] sm:$0xff]  ;;  %8502 = vmatpush2.bf16.msra.mxu1 %v12076_v57  ;;  %8353 = vmatprep.mubr.bf16.mxu1 %v16841_v32  ;;  %16842 = vst [vmem:[#allocation186_spill] sm:$0xff] %v13507_v21 }
 0x205   :  { %v12069_v49 = vcombine.high %v903_v36, %v907_v30  ;;  %v767_v53 = vld [vmem:[#allocation5 + $0x1248] sm:$0xff]  ;;  %8390 = vmatprep.subr.bf16.mxu0 %v11941_v62  ;;  %v12068_v19 = vcombine.low %v903_v36, %v907_v30  ;;  %v13509_v36 = vpop.f32.mrf.mxu0  ;;  %v13511_v62 = vpop.f32.mrf.mxu1 }
 0x206   :  { %v771_v55 = vld [vmem:[#allocation5 + $0x1268] sm:$0xff]  ;;  %16843 = vst [vmem:[#allocation187_spill] sm:$0xff] %v13509_v36  ;;  %16844 = vst [vmem:[#allocation188_spill] sm:$0xff] %v13511_v62 }
 0x207   :  { %v895_v8 = vld [vmem:[#allocation5 + $0x1648] sm:$0xff]  ;;  %v11933_v24 = vcombine.high %v767_v53, %v771_v55  ;;  %8503 = vmatprep.subr.bf16.mxu1 %v12069_v49  ;;  %8391 = vmatpush2.bf16.msra.mxu0 %v11940_v45  ;;  %v11932_v57 = vcombine.low %v767_v53, %v771_v55  ;;  %v13517_v32 = vpop.f32.mrf.mxu0  ;;  %v13524_v55 = vpop.f32.mrf.mxu1 }
 0x208   :  { %v899_v28 = vld [vmem:[#allocation5 + $0x1668] sm:$0xff]  ;;  %8504 = vmatpush2.bf16.msra.mxu1 %v12068_v19  ;;  %16845 = vst [vmem:[#allocation189_spill] sm:$0xff] %v13517_v32  ;;  %16847 = vst [vmem:[#allocation190_spill] sm:$0xff] %v13524_v55  ;;  %v7495_v32 = vadd.f32 %v13371_v42, %v13248_v10  ;;  %v7497_v42 = vadd.f32 %v13379_v38, %v13253_v50 }
 0x209   :  { %v16839_v31 = vld [vmem:[#allocation72_spill] sm:$0xff]  ;;  %v12061_v41 = vcombine.high %v895_v8, %v899_v28  ;;  %8392 = vmatprep.subr.bf16.mxu0 %v11933_v24  ;;  %v12060_v49 = vcombine.low %v895_v8, %v899_v28  ;;  %v16848_v8 = vld [vmem:[#allocation75_spill] sm:$0xff]  ;;  %v13537_v55 = vpop.f32.mrf.mxu1 }
 0x20a   :  { %8240 = vmatprep.mubr.bf16.mxu0 %v16839_v31  ;;  %v759_v17 = vld [vmem:[#allocation5 + $0x1208] sm:$0xff]  ;;  %16850 = vst [vmem:[#allocation192_spill] sm:$0xff] %v13537_v55 }
 0x20b   :  { %v763_v37 = vld [vmem:[#allocation5 + $0x1228] sm:$0xff]  ;;  %8505 = vmatprep.subr.bf16.mxu1 %v12061_v41  ;;  %8241 = vmatmul.mubr.bf16.gmra.mxu0 %v16846_v14  ;;  %v13527_v41 = vpop.f32.mrf.mxu0 }
 0x20c   :  { %v887_v20 = vld [vmem:[#allocation5 + $0x1608] sm:$0xff]  ;;  %v11925_v30 = vcombine.high %v759_v17, %v763_v37  ;;  %8354 = vmatmul.mubr.bf16.gmra.mxu1 %v16848_v8  ;;  %8393 = vmatpush2.bf16.msra.mxu0 %v11932_v57  ;;  %v11924_v28 = vcombine.low %v759_v17, %v763_v37  ;;  %16849 = vst [vmem:[#allocation191_spill] sm:$0xff] %v13527_v41 }
 0x20d   :  { %v891_v12 = vld [vmem:[#allocation5 + $0x1628] sm:$0xff]  ;;  %8506 = vmatpush2.bf16.msra.mxu1 %v12060_v49  ;;  %v16853_v49 = vld [vmem:[#allocation77_spill] sm:$0xff] }
 0x20e   :  { %v12053_v31 = vcombine.high %v887_v20, %v891_v12  ;;  %v13513_v29 = vld [vmem:[#allocation5 + $0x19c8] sm:$0xff]  ;;  %8394 = vmatprep.subr.bf16.mxu0 %v11925_v30  ;;  %v12052_v19 = vcombine.low %v887_v20, %v891_v12  ;;  %v13546_v12 = vpop.f32.mrf.mxu0  ;;  %8509 = vmatprep.mubr.bf16.mxu1 %v16853_v49 }
 0x20f   :  { %v13515_v4 = vld [vmem:[#allocation5 + $0x19e8] sm:$0xff]  ;;  %16852 = vst [vmem:[#allocation193_spill] sm:$0xff] %v13546_v12 }
 0x210   :  { %v13520_v45 = vld [vmem:[#allocation5 + $0x1dc8] sm:$0xff]  ;;  %v12173_v24 = vcombine.high %v13513_v29, %v13515_v4  ;;  %8507 = vmatprep.subr.bf16.mxu1 %v12053_v31  ;;  %v13557_v31 = vpop.f32.mrf.mxu1  ;;  %8395 = vmatpush2.bf16.msra.mxu0 %v11924_v28  ;;  %v13571_v50 = vpop.f32.mrf.mxu0 }
 0x211   :  { %v13522_v53 = vld [vmem:[#allocation5 + $0x1de8] sm:$0xff]  ;;  %16854 = vst [vmem:[#allocation194_spill] sm:$0xff] %v13557_v31  ;;  %8508 = vmatpush2.bf16.msra.mxu1 %v12052_v19  ;;  %16855 = vst [vmem:[#allocation195_spill] sm:$0xff] %v13571_v50  ;;  %v7501_v19 = vadd.f32 %v13389_v39, %v13260_v54  ;;  %v16858_v50 = vld [vmem:[#allocation79_spill] sm:$0xff] }
 0x212   :  { %v13531_v62 = vld [vmem:[#allocation5 + $0x1988] sm:$0xff]  ;;  %v12301_v37 = vcombine.high %v13520_v45, %v13522_v53  ;;  %v12300_v55 = vcombine.low %v13520_v45, %v13522_v53  ;;  %8590 = vmatprep.subr.bf16.mxu0 %v12173_v24  ;;  %v7608_v45 = vadd.f32 %v13376_v35, %v7495_v32  ;;  %v7499_v53 = vadd.f32 %v13384_v1, %v13256_v46  ;;  %v13582_v28 = vpop.f32.mrf.mxu1  ;;  %v7720_v31 = vpop.f32.mrf.mxu0 }
 0x213   :  { %v13533_v14 = vld [vmem:[#allocation5 + $0x19a8] sm:$0xff]  ;;  %16856 = vst [vmem:[#allocation196_spill] sm:$0xff] %v13582_v28  ;;  %v7505_v32 = vadd.f32 %v13393_v33, %v13264_v58  ;;  %v7507_v58 = vadd.f32 %v13399_v6, %v13269_v43  ;;  %v16861_v43 = vld [vmem:[#allocation82_spill] sm:$0xff] }
 0x214   :  { %v16851_v57 = vld [vmem:[#allocation76_spill] sm:$0xff]  ;;  %v12165_v49 = vcombine.high %v13531_v62, %v13533_v14  ;;  %v12164_v38 = vcombine.low %v13531_v62, %v13533_v14  ;;  %8703 = vmatprep.subr.bf16.mxu1 %v12301_v37  ;;  %v7833_v28 = vpop.f32.mrf.mxu1  ;;  %8510 = vmatmul.mubr.bf16.vlgmr.msra.gmra.mxu1 %v16858_v50  ;;  %v7722_v27 = vpop.f32.mrf.mxu0  ;;  %v7612_v39 = vadd.f32 %v13387_v61, %v7499_v53 }
 0x215   :  { %8396 = vmatprep.mubr.bf16.mxu0 %v16851_v57  ;;  %v13542_v17 = vld [vmem:[#allocation5 + $0x1d88] sm:$0xff]  ;;  %v12172_v57 = vcombine.low %v13513_v29, %v13515_v4  ;;  %8704 = vmatpush1.bf16.msra.mxu1 %v12300_v55  ;;  %v7618_v54 = vadd.f32 %v13396_v34, %v7505_v32  ;;  %v7509_v61 = vadd.f32 %v13404_v3, %v13272_v47 }
 0x216   :  { %v13544_v20 = vld [vmem:[#allocation5 + $0x1da8] sm:$0xff]  ;;  %v7724_v55 = vpop.f32.mrf.mxu0  ;;  %v7511_v34 = vadd.f32 %v13409_v59, %v13276_v16 }
 0x217   :  { %v13549_v30 = vld [vmem:[#allocation5 + $0x1948] sm:$0xff]  ;;  %v12292_v29 = vcombine.low %v13542_v17, %v13544_v20  ;;  %v12293_v4 = vcombine.high %v13542_v17, %v13544_v20  ;;  %v16857_v17 = vld [vmem:[#allocation78_spill] sm:$0xff]  ;;  %v7610_v20 = vadd.f32 %v13381_v56, %v7497_v42 }
 0x218   :  { %v13551_v8 = vld [vmem:[#allocation5 + $0x1968] sm:$0xff]  ;;  %8397 = vmatmul.mubr.bf16.vlgmr.msra.gmra.mxu0 %v16857_v17  ;;  %v7721_v17 = vadd.f32 %v7720_v31, %v7608_v45  ;;  %v7835_v31 = vpop.f32.mrf.mxu1 }
 0x219   :  { %v13553_v10 = vld [vmem:[#allocation5 + $0x1d48] sm:$0xff]  ;;  %v12157_v14 = vcombine.high %v13549_v30, %v13551_v8  ;;  %8591 = vmatpush1.bf16.msra.mxu0 %v12172_v57  ;;  %v7723_v42 = vadd.f32 %v7722_v27, %v7610_v20  ;;  %8705 = vmatprep.subr.bf16.mxu1 %v12293_v4  ;;  %v7614_v4 = vadd.f32 %v13391_v60, %v7501_v19  ;;  %v7726_v27 = vpop.f32.mrf.mxu0 }
 0x21a   :  { %v13565_v12 = vld [vmem:[#allocation5 + $0x1d68] sm:$0xff]  ;;  %8592 = vmatprep.subr.bf16.mxu0 %v12165_v49  ;;  %v7834_v57 = vadd.f32 %v7833_v28, %v7721_v17  ;;  %v16860_v49 = vld [vmem:[#allocation81_spill] sm:$0xff]  ;;  %v7725_v28 = vadd.f32 %v7724_v55, %v7612_v39  ;;  %v7837_v17 = vpop.f32.mrf.mxu1  ;;  %8706 = vmatpush1.bf16.msra.mxu1 %v12292_v29  ;;  %v7620_v55 = vadd.f32 %v13401_v18, %v7507_v58 }
 0x21b   :  { %v13567_v41 = vld [vmem:[#allocation5 + $0x1908] sm:$0xff]  ;;  %v12285_v46 = vcombine.high %v13553_v10, %v13565_v12  ;;  %8519 = vmatprep.mubr.bf16.mxu1 %v16860_v49  ;;  %v7836_v53 = vadd.f32 %v7835_v31, %v7723_v42  ;;  %v7727_v42 = vadd.f32 %v7726_v27, %v7614_v4  ;;  %v7730_v32 = vpop.f32.mrf.mxu0  ;;  %v16862_v4 = vld [vmem:[#allocation83_spill] sm:$0xff]  ;;  %v16863_v16 = vcombine.low %v13549_v30, %v13551_v8 }
 0x21c   :  { %v13569_v21 = vld [vmem:[#allocation5 + $0x1928] sm:$0xff]  ;;  %v10624_v19 = vmax.f32 %v7834_v57, 0.0  ;;  %v7838_v39 = vadd.f32 %v7837_v17, %v7725_v28  ;;  %v7839_v31 = vpop.f32.mrf.mxu1  ;;  %v7731_v27 = vadd.f32 %v7730_v32, %v7618_v54  ;;  %8520 = vmatmul.mubr.bf16.gmra.mxu1 %v16862_v4  ;;  %v7515_v28 = vadd.f32 %v13413_v2, %v13280_v0 }
 0x21d   :  { %v13588_v62 = vld [vmem:[#allocation5 + $0x1d08] sm:$0xff]  ;;  %8593 = vmatpush1.bf16.msra.mxu0 %v12164_v38  ;;  %v10625_v38 = vmax.f32 %v7836_v53, 0.0  ;;  %8707 = vmatprep.subr.bf16.mxu1 %v12285_v46  ;;  %v7840_v57 = vadd.f32 %v7839_v31, %v7727_v42  ;;  %v7622_v53 = vadd.f32 %v13407_v52, %v7509_v61  ;;  %v16864_v54 = vcombine.low %v13553_v10, %v13565_v12  ;;  %v7732_v17 = vpop.f32.mrf.mxu0  ;;  %v16867_v10 = vld [vmem:[#allocation85_spill] sm:$0xff] }
 0x21e   :  { %v13590_v24 = vld [vmem:[#allocation5 + $0x1d28] sm:$0xff]  ;;  %8594 = vmatprep.subr.bf16.mxu0 %v12157_v14  ;;  %v7843_v46 = vpop.f32.mrf.mxu1  ;;  %v16865_v8 = vcombine.high %v13567_v41, %v13569_v21  ;;  %v7733_v52 = vadd.f32 %v7732_v17, %v7620_v55  ;;  %v7517_v2 = vadd.f32 %v13419_v25, %v13285_v63  ;;  %8529 = vmatprep.mubr.bf16.mxu1 %v16867_v10  ;;  %v16991_v10 = vld [vmem:[#allocation14_spill] sm:$0xff] }
 0x21f   :  { %v13601_v37 = vld [vmem:[#allocation5 + $0x18c8] sm:$0xff]  ;;  %v12277_v56 = vcombine.high %v13588_v62, %v13590_v24  ;;  %v12434_v14 = vpack.c.bf16 %v10625_v38, %v10624_v19  ;;  %8708 = vmatpush1.bf16.msra.mxu1 %v16864_v54  ;;  %v10632_v19 = vmax.f32 %v7838_v39, 0.0  ;;  %v10633_v38 = vmax.f32 %v7840_v57, 0.0  ;;  %v7734_v12 = vpop.f32.mrf.mxu0 }
 0x220   :  { %v13607_v35 = vld [vmem:[#allocation5 + $0x18e8] sm:$0xff]  ;;  %v7844_v42 = vadd.f32 %v7843_v46, %v7731_v27  ;;  %v7845_v61 = vpop.f32.mrf.mxu1  ;;  %v7624_v55 = vadd.f32 %v13411_v23, %v7511_v34  ;;  %v7735_v57 = vadd.f32 %v7734_v12, %v7622_v53  ;;  %v16868_v63 = vcombine.low %v13567_v41, %v13569_v21 }
 0x221   :  { %v13609_v36 = vld [vmem:[#allocation5 + $0x1cc8] sm:$0xff]  ;;  %8595 = vmatpush1.bf16.msra.mxu0 %v16863_v16  ;;  %11136 = vst [vmem:[#allocation8] sm:$0xff] %v12434_v14  ;;  %8709 = vmatprep.subr.bf16.mxu1 %v12277_v56  ;;  %v12438_v56 = vpack.c.bf16 %v10633_v38, %v10632_v19  ;;  %v7846_v14 = vadd.f32 %v7845_v61, %v7733_v52  ;;  %v7736_v34 = vpop.f32.mrf.mxu0  ;;  %v16872_v52 = vld [vmem:[#allocation86_spill] sm:$0xff] }
 0x222   :  { %v13611_v1 = vld [vmem:[#allocation5 + $0x1ce8] sm:$0xff]  ;;  %8596 = vmatprep.subr.bf16.mxu0 %v16865_v8  ;;  %v7847_v27 = vpop.f32.mrf.mxu1  ;;  %v7628_v16 = vadd.f32 %v13416_v9, %v7515_v28  ;;  %v7519_v54 = vadd.f32 %v13424_v7, %v13288_v13  ;;  %v16869_v23 = vcombine.low %v13588_v62, %v13590_v24  ;;  %v16870_v53 = vcombine.high %v13601_v37, %v13607_v35 }
 0x223   :  { %v16859_v45 = vld [vmem:[#allocation80_spill] sm:$0xff]  ;;  %11140 = vst [vmem:[#allocation8 + $0x20] sm:$0xff] %v12438_v56  ;;  %v10640_v41 = vmax.f32 %v7844_v42, 0.0  ;;  %v10641_v17 = vmax.f32 %v7846_v14, 0.0  ;;  %v7848_v8 = vadd.f32 %v7847_v27, %v7735_v57  ;;  %v7737_v9 = vadd.f32 %v7736_v34, %v7624_v55  ;;  %v7740_v38 = vpop.f32.mrf.mxu0  ;;  %v16873_v57 = vld [vmem:[#allocation87_spill] sm:$0xff] }
 0x224   :  { %8406 = vmatprep.mubr.bf16.mxu0 %v16859_v45  ;;  %v13621_v50 = vld [vmem:[#allocation5 + $0x1888] sm:$0xff]  ;;  %8710 = vmatpush1.bf16.msra.mxu1 %v16869_v23  ;;  %v7849_v28 = vpop.f32.mrf.mxu1  ;;  %v16871_v13 = vcombine.high %v13609_v36, %v13611_v1  ;;  %v7630_v24 = vadd.f32 %v13421_v11, %v7517_v2  ;;  %v7521_v19 = vadd.f32 %v13429_v5, %v13292_v51 }
 0x225   :  { %v13623_v33 = vld [vmem:[#allocation5 + $0x18a8] sm:$0xff]  ;;  %8407 = vmatmul.mubr.bf16.gmra.mxu0 %v16861_v43  ;;  %v12442_v12 = vpack.c.bf16 %v10641_v17, %v10640_v41  ;;  %v7850_v55 = vadd.f32 %v7849_v28, %v7737_v9  ;;  %v7741_v56 = vadd.f32 %v7740_v38, %v7628_v16  ;;  %8530 = vmatmul.mubr.bf16.gmra.mxu1 %v16873_v57  ;;  %v7742_v16 = vpop.f32.mrf.mxu0  ;;  %v16878_v38 = vld [vmem:[#allocation159_spill] sm:$0xff] }
 0x226   :  { %v13637_v6 = vld [vmem:[#allocation5 + $0x1c88] sm:$0xff]  ;;  %v12133_v60 = vcombine.high %v13621_v50, %v13623_v33  ;;  %v12132_v47 = vcombine.low %v13621_v50, %v13623_v33  ;;  %8597 = vmatpush1.bf16.msra.mxu0 %v16868_v63  ;;  %8711 = vmatprep.subr.bf16.mxu1 %v16871_v13  ;;  %v7853_v14 = vpop.f32.mrf.mxu1  ;;  %v16874_v11 = vcombine.low %v13601_v37, %v13607_v35  ;;  %v10648_v37 = vmax.f32 %v7848_v8, 0.0 }
 0x227   :  { %v13639_v20 = vld [vmem:[#allocation5 + $0x1ca8] sm:$0xff]  ;;  %8598 = vmatprep.subr.bf16.mxu0 %v16870_v53  ;;  %v7632_v2 = vadd.f32 %v13427_v44, %v7519_v54  ;;  %v7525_v27 = vadd.f32 %v13433_v40, %v13296_v26  ;;  %v16875_v63 = vcombine.low %v13609_v36, %v13611_v1  ;;  %11144 = vst [vmem:[#allocation8 + $0x40] sm:$0xff] %v12442_v12  ;;  %v10649_v23 = vmax.f32 %v7850_v55, 0.0  ;;  %v16877_v53 = vld [vmem:[#allocation89_spill] sm:$0xff] }
 0x228   :  { %v12260_v3 = vcombine.low %v13637_v6, %v13639_v20  ;;  %v13654_v29 = vld [vmem:[#allocation5 + $0x1848] sm:$0xff]  ;;  %v12261_v30 = vcombine.high %v13637_v6, %v13639_v20  ;;  %v7854_v34 = vadd.f32 %v7853_v14, %v7741_v56  ;;  %v7743_v44 = vadd.f32 %v7742_v16, %v7630_v24  ;;  %v7855_v54 = vpop.f32.mrf.mxu1  ;;  %8539 = vmatprep.mubr.bf16.mxu1 %v16877_v53  ;;  %v16879_v55 = vld [vmem:[#allocation129_spill] sm:$0xff] }
 0x229   :  { %v13660_v18 = vld [vmem:[#allocation5 + $0x1868] sm:$0xff]  ;;  %8712 = vmatpush1.bf16.msra.mxu1 %v16875_v63  ;;  %v7527_v1 = vadd.f32 %v13439_v22, %v13301_v48  ;;  %v7634_v8 = vadd.f32 %v13431_v15, %v7521_v19  ;;  %v12446_v9 = vpack.c.bf16 %v10649_v23, %v10648_v37  ;;  %v7638_v12 = vadd.f32 %v16878_v38, %v7525_v27  ;;  %v16880_v56 = vld [vmem:[#allocation161_spill] sm:$0xff]  ;;  %v16883_v27 = vld [vmem:[#allocation163_spill] sm:$0xff] }
 0x22a   :  { %v13662_v59 = vld [vmem:[#allocation5 + $0x1c48] sm:$0xff]  ;;  %v12124_v31 = vcombine.low %v13654_v29, %v13660_v18  ;;  %v12125_v32 = vcombine.high %v13654_v29, %v13660_v18  ;;  %8599 = vmatpush1.bf16.msra.mxu0 %v16874_v11  ;;  %8713 = vmatprep.subr.bf16.mxu1 %v12261_v30  ;;  %v7856_v28 = vadd.f32 %v7855_v54, %v7743_v44  ;;  %v7857_v24 = vpop.f32.mrf.mxu1  ;;  %v10656_v33 = vmax.f32 %v7854_v34, 0.0  ;;  %v16887_v38 = vld [vmem:[#allocation133_spill] sm:$0xff] }
 0x22b   :  { %v13664_v58 = vld [vmem:[#allocation5 + $0x1c68] sm:$0xff]  ;;  %8600 = vmatprep.subr.bf16.mxu0 %v12133_v60  ;;  %v7744_v60 = vpop.f32.mrf.mxu0  ;;  %v7529_v14 = vadd.f32 %v16880_v56, %v16879_v55  ;;  %11148 = vst [vmem:[#allocation8 + $0x60] sm:$0xff] %v12446_v9  ;;  %v16888_v55 = vld [vmem:[#allocation165_spill] sm:$0xff] }
 0x22c   :  { %v16866_v0 = vld [vmem:[#allocation84_spill] sm:$0xff]  ;;  %v12252_v39 = vcombine.low %v13662_v59, %v13664_v58  ;;  %v12253_v21 = vcombine.high %v13662_v59, %v13664_v58  ;;  %v7745_v13 = vadd.f32 %v7744_v60, %v7632_v2  ;;  %v7859_v2 = vpop.f32.mrf.mxu1  ;;  %v7535_v56 = vadd.f32 %v16888_v55, %v16887_v38  ;;  %v16891_v59 = vld [vmem:[#allocation167_spill] sm:$0xff]  ;;  %v16895_v38 = vld [vmem:[#allocation137_spill] sm:$0xff] }
 0x22d   :  { %8416 = vmatprep.mubr.bf16.mxu0 %v16866_v0  ;;  %v13691_v25 = vld [vmem:[#allocation5 + $0x1808] sm:$0xff]  ;;  %8714 = vmatpush1.bf16.msra.mxu1 %v12260_v3  ;;  %v7746_v15 = vpop.f32.mrf.mxu0  ;;  %v16896_v55 = vld [vmem:[#allocation169_spill] sm:$0xff] }
 0x22e   :  { %v13693_v46 = vld [vmem:[#allocation5 + $0x1828] sm:$0xff]  ;;  %8417 = vmatmul.mubr.bf16.gmra.mxu0 %v16872_v52  ;;  %v7858_v19 = vadd.f32 %v7857_v24, %v7745_v13  ;;  %v7747_v11 = vadd.f32 %v7746_v15, %v7634_v8  ;;  %8715 = vmatprep.subr.bf16.mxu1 %v12253_v21  ;;  %v7863_v21 = vpop.f32.mrf.mxu1  ;;  %v16885_v8 = vld [vmem:[#allocation91_spill] sm:$0xff]  ;;  %v16886_v13 = vld [vmem:[#allocation162_spill] sm:$0xff] }
 0x22f   :  { %v13709_v7 = vld [vmem:[#allocation5 + $0x1c08] sm:$0xff]  ;;  %v12116_v42 = vcombine.low %v13691_v25, %v13693_v46  ;;  %v12117_v61 = vcombine.high %v13691_v25, %v13693_v46  ;;  %8601 = vmatpush1.bf16.msra.mxu0 %v12132_v47  ;;  %v10657_v47 = vmax.f32 %v7856_v28, 0.0  ;;  %v7750_v16 = vpop.f32.mrf.mxu0  ;;  %8540 = vmatmul.mubr.bf16.gmra.mxu1 %v16885_v8  ;;  %v7642_v24 = vadd.f32 %v16886_v13, %v7529_v14  ;;  %v480_v52 = vld [vmem:[#allocation5 + $0x950] sm:$0xff] }
 0x230   :  { %v13711_v62 = vld [vmem:[#allocation5 + $0x1c28] sm:$0xff]  ;;  %8602 = vmatprep.subr.bf16.mxu0 %v12125_v32  ;;  %v16884_v32 = vld [vmem:[#allocation90_spill] sm:$0xff]  ;;  %v7860_v54 = vadd.f32 %v7859_v2, %v7747_v11  ;;  %v7751_v60 = vadd.f32 %v7750_v16, %v7638_v12  ;;  %v10664_v18 = vmax.f32 %v7858_v19, 0.0  ;;  %v16890_v11 = vld [vmem:[#allocation135_spill] sm:$0xff] }
 0x231   :  { %v13725_v51 = vld [vmem:[#allocation5 + $0x1bc8] sm:$0xff]  ;;  %v12244_v35 = vcombine.low %v13709_v7, %v13711_v62  ;;  %v12245_v41 = vcombine.high %v13709_v7, %v13711_v62  ;;  %v12450_v44 = vpack.c.bf16 %v10657_v47, %v10656_v33  ;;  %8716 = vmatpush1.bf16.msra.mxu1 %v12252_v39  ;;  %v7752_v12 = vpop.f32.mrf.mxu0  ;;  %v7865_v33 = vpop.f32.mrf.mxu1  ;;  %v7537_v58 = vadd.f32 %v16891_v59, %v16890_v11  ;;  %v16892_v2 = vld [vmem:[#allocation93_spill] sm:$0xff]  ;;  %v16900_v59 = vld [vmem:[#allocation94_spill] sm:$0xff] }
 0x232   :  { %v13727_v5 = vld [vmem:[#allocation5 + $0x1be8] sm:$0xff]  ;;  %v7864_v15 = vadd.f32 %v7863_v21, %v7751_v60  ;;  %8549 = vmatprep.mubr.bf16.mxu1 %v16892_v2  ;;  %v16894_v21 = vld [vmem:[#allocation166_spill] sm:$0xff] }
 0x233   :  { %v16876_v26 = vld [vmem:[#allocation88_spill] sm:$0xff]  ;;  %v12236_v17 = vcombine.low %v13725_v51, %v13727_v5  ;;  %v12237_v30 = vcombine.high %v13725_v51, %v13727_v5  ;;  %8603 = vmatpush1.bf16.msra.mxu0 %v12124_v31  ;;  %11152 = vst [vmem:[#allocation8 + $0x80] sm:$0xff] %v12450_v44  ;;  %v10665_v31 = vmax.f32 %v7860_v54, 0.0  ;;  %8717 = vmatprep.subr.bf16.mxu1 %v12245_v41  ;;  %v7754_v39 = vpop.f32.mrf.mxu0  ;;  %v7867_v44 = vpop.f32.mrf.mxu1  ;;  %v16983_v2 = vld [vmem:[#allocation142_spill] sm:$0xff] }
 0x234   :  { %8426 = vmatprep.mubr.bf16.mxu0 %v16876_v26  ;;  %v13744_v40 = vld [vmem:[#allocation5 + $0x1fc8] sm:$0xff]  ;;  %8604 = vmatprep.subr.bf16.mxu0 %v12117_v61  ;;  %v7755_v16 = vadd.f32 %v7754_v39, %v7642_v24  ;;  %v7648_v13 = vadd.f32 %v16894_v21, %v7535_v56  ;;  %v10672_v46 = vmax.f32 %v7864_v15, 0.0  ;;  %v492_v26 = vld [vmem:[#allocation5 + $0x9b0] sm:$0xff] }
 0x235   :  { %v13746_v36 = vld [vmem:[#allocation5 + $0x1fe8] sm:$0xff]  ;;  %v12454_v41 = vpack.c.bf16 %v10665_v31, %v10664_v18  ;;  %8718 = vmatpush1.bf16.msra.mxu1 %v12244_v35  ;;  %v7869_v18 = vpop.f32.mrf.mxu1 }
 0x236   :  { %v13761_v48 = vld [vmem:[#allocation5 + $0x1b88] sm:$0xff]  ;;  %v12364_v50 = vcombine.low %v13744_v40, %v13746_v36  ;;  %8427 = vmatmul.mubr.bf16.gmra.mxu0 %v16884_v32  ;;  %v12365_v37 = vcombine.high %v13744_v40, %v13746_v36  ;;  %v7868_v24 = vadd.f32 %v7867_v44, %v7755_v16  ;;  %v16902_v44 = vld [vmem:[#allocation170_spill] sm:$0xff]  ;;  %v16906_v36 = vld [vmem:[#allocation143_spill] sm:$0xff] }
 0x237   :  { %v13763_v22 = vld [vmem:[#allocation5 + $0x1ba8] sm:$0xff]  ;;  %8605 = vmatpush1.bf16.msra.mxu0 %v12116_v42  ;;  %11156 = vst [vmem:[#allocation8 + $0xa0] sm:$0xff] %v12454_v41  ;;  %v7873_v41 = vpop.f32.mrf.mxu1  ;;  %v496_v32 = vld [vmem:[#allocation5 + $0x9d0] sm:$0xff] }
 0x238   :  { %v16881_v6 = vld [vmem:[#allocation160_spill] sm:$0xff]  ;;  %v12229_v23 = vcombine.high %v13761_v48, %v13763_v22  ;;  %v12228_v29 = vcombine.low %v13761_v48, %v13763_v22  ;;  %8606 = vmatprep.subr.bf16.mxu0 %v12237_v30  ;;  %8719 = vmatprep.subr.bf16.mxu1 %v12365_v37  ;;  %v10680_v5 = vmax.f32 %v7868_v24, 0.0 }
 0x239   :  { %v7640_v20 = vadd.f32 %v16881_v6, %v7527_v1  ;;  %v16882_v3 = vld [vmem:[#allocation132_spill] sm:$0xff]  ;;  %8720 = vmatpush2.bf16.msra.mxu1 %v12364_v50  ;;  %v16907_v50 = vld [vmem:[#allocation175_spill] sm:$0xff] }
 0x23a   :  { %v7531_v63 = vadd.f32 %v16883_v27, %v16882_v3  ;;  %v13787_v34 = vld [vmem:[#allocation5 + $0x1f88] sm:$0xff] }
 0x23b   :  { %v13793_v1 = vld [vmem:[#allocation5 + $0x1fa8] sm:$0xff]  ;;  %v7753_v14 = vadd.f32 %v7752_v12, %v7640_v20  ;;  %v7539_v12 = vadd.f32 %v16896_v55, %v16895_v38  ;;  %8607 = vmatpush2.bf16.msra.mxu0 %v12236_v17  ;;  %v16903_v38 = vld [vmem:[#allocation141_spill] sm:$0xff] }
 0x23c   :  { %v13795_v9 = vld [vmem:[#allocation5 + $0x1b48] sm:$0xff]  ;;  %v12356_v61 = vcombine.low %v13787_v34, %v13793_v1  ;;  %v12357_v6 = vcombine.high %v13787_v34, %v13793_v1  ;;  %v16904_v55 = vld [vmem:[#allocation173_spill] sm:$0xff]  ;;  %8608 = vmatprep.subr.bf16.mxu0 %v12229_v23  ;;  %v16915_v34 = vld [vmem:[#allocation179_spill] sm:$0xff] }
 0x23d   :  { %v13797_v28 = vld [vmem:[#allocation5 + $0x1b68] sm:$0xff]  ;;  %v7866_v27 = vadd.f32 %v7865_v33, %v7753_v14  ;;  %v16899_v33 = vld [vmem:[#allocation171_spill] sm:$0xff]  ;;  %v7652_v21 = vadd.f32 %v16902_v44, %v7539_v12 }
 0x23e   :  { %v16889_v47 = vld [vmem:[#allocation92_spill] sm:$0xff]  ;;  %v12221_v19 = vcombine.high %v13795_v9, %v13797_v28  ;;  %v12220_v25 = vcombine.low %v13795_v9, %v13797_v28  ;;  %8721 = vmatprep.subr.bf16.mxu1 %v12357_v6 }
 0x23f   :  { %8436 = vmatprep.mubr.bf16.mxu0 %v16889_v47  ;;  %v16893_v20 = vld [vmem:[#allocation164_spill] sm:$0xff]  ;;  %v10673_v42 = vmax.f32 %v7866_v27, 0.0  ;;  %v16901_v27 = vld [vmem:[#allocation95_spill] sm:$0xff]  ;;  %8609 = vmatpush2.bf16.msra.mxu0 %v12228_v29  ;;  %v252_v47 = vld [vmem:[#allocation5 + $0x230] sm:$0xff] }
 0x240   :  { %v7644_v3 = vadd.f32 %v16893_v20, %v7531_v63  ;;  %v13824_v54 = vld [vmem:[#allocation5 + $0x1f48] sm:$0xff]  ;;  %v7756_v63 = vpop.f32.mrf.mxu0  ;;  %8437 = vmatmul.mubr.bf16.gmra.mxu0 %v16900_v59  ;;  %8550 = vmatmul.mubr.bf16.gmra.mxu1 %v16901_v27  ;;  %v256_v59 = vld [vmem:[#allocation5 + $0x250] sm:$0xff] }
 0x241   :  { %v13826_v60 = vld [vmem:[#allocation5 + $0x1f68] sm:$0xff]  ;;  %v12458_v20 = vpack.c.bf16 %v10673_v42, %v10672_v46  ;;  %v7875_v42 = vpop.f32.mrf.mxu1  ;;  %8722 = vmatpush2.bf16.msra.mxu1 %v12356_v61  ;;  %8610 = vmatprep.subr.bf16.mxu0 %v12221_v19 }
 0x242   :  { %v7757_v56 = vadd.f32 %v7756_v63, %v7644_v3  ;;  %v13839_v31 = vld [vmem:[#allocation5 + $0x1b08] sm:$0xff]  ;;  %v7760_v30 = vpop.f32.mrf.mxu0  ;;  %v12348_v15 = vcombine.low %v13824_v54, %v13826_v60  ;;  %v12349_v39 = vcombine.high %v13824_v54, %v13826_v60  ;;  %v7545_v63 = vadd.f32 %v16904_v55, %v16903_v38  ;;  %v16910_v55 = vld [vmem:[#allocation174_spill] sm:$0xff]  ;;  %v16924_v54 = vld [vmem:[#allocation101_spill] sm:$0xff] }
 0x243   :  { %v13841_v14 = vld [vmem:[#allocation5 + $0x1b28] sm:$0xff]  ;;  %v7761_v3 = vadd.f32 %v7760_v30, %v7648_v13  ;;  %11160 = vst [vmem:[#allocation8 + $0xc0] sm:$0xff] %v12458_v20  ;;  %8611 = vmatpush2.bf16.msra.mxu0 %v12220_v25 }
 0x244   :  { %v16897_v7 = vld [vmem:[#allocation168_spill] sm:$0xff]  ;;  %v7870_v37 = vadd.f32 %v7869_v18, %v7757_v56  ;;  %v7762_v13 = vpop.f32.mrf.mxu0  ;;  %v12213_v51 = vcombine.high %v13839_v31, %v13841_v14  ;;  %v12212_v24 = vcombine.low %v13839_v31, %v13841_v14  ;;  %8723 = vmatprep.subr.bf16.mxu1 %v12349_v39 }
 0x245   :  { %v7650_v62 = vadd.f32 %v16897_v7, %v7537_v58  ;;  %v16898_v35 = vld [vmem:[#allocation140_spill] sm:$0xff]  ;;  %v7874_v46 = vadd.f32 %v7873_v41, %v7761_v3  ;;  %v7547_v7 = vadd.f32 %v16907_v50, %v16906_v36  ;;  %v7877_v41 = vpop.f32.mrf.mxu1  ;;  %v16911_v36 = vld [vmem:[#allocation145_spill] sm:$0xff]  ;;  %8724 = vmatpush2.bf16.msra.mxu1 %v12348_v15 }
 0x246   :  { %v7541_v11 = vadd.f32 %v16899_v33, %v16898_v35  ;;  %v13855_v58 = vld [vmem:[#allocation5 + $0x1f08] sm:$0xff]  ;;  %v10681_v17 = vmax.f32 %v7870_v37, 0.0  ;;  %v7764_v23 = vpop.f32.mrf.mxu0  ;;  %v16908_v35 = vld [vmem:[#allocation97_spill] sm:$0xff]  ;;  %8612 = vmatprep.subr.bf16.mxu0 %v12213_v51 }
 0x247   :  { %v13857_v16 = vld [vmem:[#allocation5 + $0x1f28] sm:$0xff]  ;;  %v7763_v12 = vadd.f32 %v7762_v13, %v7650_v62  ;;  %8559 = vmatprep.mubr.bf16.mxu1 %v16908_v35  ;;  %v7765_v3 = vadd.f32 %v7764_v23, %v7652_v21  ;;  %v7658_v13 = vadd.f32 %v16910_v55, %v7545_v63  ;;  %v16912_v50 = vld [vmem:[#allocation177_spill] sm:$0xff]  ;;  %v10688_v22 = vmax.f32 %v7874_v46, 0.0  ;;  %v16916_v23 = vld [vmem:[#allocation98_spill] sm:$0xff]  ;;  %8613 = vmatpush2.bf16.msra.mxu0 %v12212_v24 }
 0x248   :  { %v16905_v56 = vld [vmem:[#allocation96_spill] sm:$0xff]  ;;  %v12341_v6 = vcombine.high %v13855_v58, %v13857_v16  ;;  %v12462_v20 = vpack.c.bf16 %v10681_v17, %v10680_v5  ;;  %v7549_v62 = vadd.f32 %v16912_v50, %v16911_v36  ;;  %v7879_v5 = vpop.f32.mrf.mxu1  ;;  %v16918_v36 = vld [vmem:[#allocation178_spill] sm:$0xff] }
 0x249   :  { %8446 = vmatprep.mubr.bf16.mxu0 %v16905_v56  ;;  %v13871_v18 = vld [vmem:[#allocation5 + $0x1ac8] sm:$0xff]  ;;  %v7876_v37 = vadd.f32 %v7875_v42, %v7763_v12  ;;  %v7878_v21 = vadd.f32 %v7877_v41, %v7765_v3  ;;  %v16914_v42 = vld [vmem:[#allocation150_spill] sm:$0xff]  ;;  %v16917_v3 = vld [vmem:[#allocation99_spill] sm:$0xff] }
 0x24a   :  { %v13873_v40 = vld [vmem:[#allocation5 + $0x1ae8] sm:$0xff]  ;;  %11164 = vst [vmem:[#allocation8 + $0xe0] sm:$0xff] %v12462_v20  ;;  %v7551_v1 = vadd.f32 %v16915_v34, %v16914_v42  ;;  %8447 = vmatmul.mubr.bf16.gmra.mxu0 %v16916_v23  ;;  %v7883_v39 = vpop.f32.mrf.mxu1  ;;  %8560 = vmatmul.mubr.bf16.gmra.mxu1 %v16917_v3  ;;  %v7662_v50 = vadd.f32 %v16918_v36, %v7549_v62  ;;  %v16923_v34 = vld [vmem:[#allocation183_spill] sm:$0xff]  ;;  %v272_v23 = vld [vmem:[#allocation5 + $0x2d0] sm:$0xff] }
 0x24b   :  { %v16909_v33 = vld [vmem:[#allocation172_spill] sm:$0xff]  ;;  %v12205_v48 = vcombine.high %v13871_v18, %v13873_v40  ;;  %v10689_v29 = vmax.f32 %v7876_v37, 0.0  ;;  %v12204_v19 = vcombine.low %v13871_v18, %v13873_v40  ;;  %v10696_v28 = vmax.f32 %v7878_v21, 0.0  ;;  %8725 = vmatprep.subr.bf16.mxu1 %v12341_v6  ;;  %8569 = vmatprep.mubr.bf16.mxu1 %v16924_v54  ;;  %v16975_v54 = vld [vmem:[#allocation127_spill] sm:$0xff]  ;;  %v16979_v35 = vld [vmem:[#allocation134_spill] sm:$0xff] }
 0x24c   :  { %v7654_v30 = vadd.f32 %v16909_v33, %v7541_v11  ;;  %v13888_v44 = vld [vmem:[#allocation5 + $0x1ec8] sm:$0xff]  ;;  %v7766_v11 = vpop.f32.mrf.mxu0  ;;  %v268_v56 = vld [vmem:[#allocation5 + $0x2b0] sm:$0xff] }
 0x24d   :  { %v13890_v38 = vld [vmem:[#allocation5 + $0x1ee8] sm:$0xff]  ;;  %v12466_v20 = vpack.c.bf16 %v10689_v29, %v10688_v22  ;;  %8614 = vmatprep.subr.bf16.mxu0 %v12205_v48 }
 0x24e   :  { %v7767_v63 = vadd.f32 %v7766_v11, %v7654_v30  ;;  %v16913_v17 = vld [vmem:[#allocation176_spill] sm:$0xff]  ;;  %v7770_v61 = vpop.f32.mrf.mxu0  ;;  %v12332_v33 = vcombine.low %v13888_v44, %v13890_v38  ;;  %v16919_v11 = vld [vmem:[#allocation151_spill] sm:$0xff]  ;;  %v12333_v9 = vcombine.high %v13888_v44, %v13890_v38  ;;  %8615 = vmatpush2.bf16.msra.mxu0 %v12204_v19 }
 0x24f   :  { %v7660_v12 = vadd.f32 %v16913_v17, %v7547_v7  ;;  %v13911_v46 = vld [vmem:[#allocation5 + $0x1a88] sm:$0xff]  ;;  %v7771_v37 = vadd.f32 %v7770_v61, %v7658_v13  ;;  %v16920_v17 = vld [vmem:[#allocation181_spill] sm:$0xff]  ;;  %11168 = vst [vmem:[#allocation8 + $0x100] sm:$0xff] %v12466_v20  ;;  %v16940_v38 = vld [vmem:[#allocation191_spill] sm:$0xff] }
 0x250   :  { %v7880_v30 = vadd.f32 %v7879_v5, %v7767_v63  ;;  %v13917_v7 = vld [vmem:[#allocation5 + $0x1aa8] sm:$0xff]  ;;  %v7555_v22 = vadd.f32 %v16920_v17, %v16919_v11  ;;  %v7772_v13 = vpop.f32.mrf.mxu0  ;;  %v7885_v5 = vpop.f32.mrf.mxu1  ;;  %v16926_v17 = vld [vmem:[#allocation182_spill] sm:$0xff] }
 0x251   :  { %v13919_v41 = vld [vmem:[#allocation5 + $0x1e88] sm:$0xff]  ;;  %v7884_v29 = vadd.f32 %v7883_v39, %v7771_v37  ;;  %v7773_v63 = vadd.f32 %v7772_v13, %v7660_v12  ;;  %v12197_v15 = vcombine.high %v13911_v46, %v13917_v7 }
 0x252   :  { %v13921_v55 = vld [vmem:[#allocation5 + $0x1ea8] sm:$0xff]  ;;  %v10697_v25 = vmax.f32 %v7880_v30, 0.0  ;;  %v7774_v36 = vpop.f32.mrf.mxu0  ;;  %v7887_v37 = vpop.f32.mrf.mxu1  ;;  %v7668_v13 = vadd.f32 %v16926_v17, %v7555_v22 }
 0x253   :  { %v16921_v62 = vld [vmem:[#allocation100_spill] sm:$0xff]  ;;  %v12324_v51 = vcombine.low %v13919_v41, %v13921_v55  ;;  %v7886_v20 = vadd.f32 %v7885_v5, %v7773_v63  ;;  %v7775_v30 = vadd.f32 %v7774_v36, %v7662_v50  ;;  %v12325_v50 = vcombine.high %v13919_v41, %v13921_v55  ;;  %8616 = vmatprep.subr.bf16.mxu0 %v12197_v15  ;;  %v14017_v41 = vld [vmem:[#allocation5 + $0x5f0] sm:$0xff] }
 0x254   :  { %8456 = vmatprep.mubr.bf16.mxu0 %v16921_v62  ;;  %v16922_v42 = vld [vmem:[#allocation152_spill] sm:$0xff]  ;;  %v12470_v6 = vpack.c.bf16 %v10697_v25, %v10696_v28  ;;  %v7776_v28 = vpop.f32.mrf.mxu0  ;;  %v10704_v31 = vmax.f32 %v7884_v29, 0.0  ;;  %v7889_v63 = vpop.f32.mrf.mxu1  ;;  %v16945_v29 = vld [vmem:[#allocation157_spill] sm:$0xff] }
 0x255   :  { %v7557_v61 = vadd.f32 %v16923_v34, %v16922_v42  ;;  %v16925_v21 = vld [vmem:[#allocation180_spill] sm:$0xff]  ;;  %v16927_v42 = vld [vmem:[#allocation153_spill] sm:$0xff]  ;;  %v10705_v14 = vmax.f32 %v7886_v20, 0.0  ;;  %v7888_v24 = vadd.f32 %v7887_v37, %v7775_v30  ;;  %v16934_v37 = vld [vmem:[#allocation103_spill] sm:$0xff] }
 0x256   :  { %v7664_v12 = vadd.f32 %v16925_v21, %v7551_v1  ;;  %v13945_v39 = vld [vmem:[#allocation5 + $0x1a48] sm:$0xff]  ;;  %v16928_v34 = vld [vmem:[#allocation185_spill] sm:$0xff]  ;;  %v16929_v1 = vcombine.low %v13855_v58, %v13857_v16  ;;  %11172 = vst [vmem:[#allocation8 + $0x120] sm:$0xff] %v12470_v6  ;;  %v16931_v58 = vld [vmem:[#allocation154_spill] sm:$0xff]  ;;  %v7780_v48 = vpop.f32.mrf.mxu0  ;;  %v7893_v30 = vpop.f32.mrf.mxu1  ;;  %8570 = vmatmul.mubr.bf16.gmra.mxu1 %v16934_v37 }
 0x257   :  { %v13947_v11 = vld [vmem:[#allocation5 + $0x1a68] sm:$0xff]  ;;  %v7559_v60 = vadd.f32 %v16928_v34, %v16927_v42  ;;  %v16932_v16 = vld [vmem:[#allocation187_spill] sm:$0xff]  ;;  %v16933_v42 = vld [vmem:[#allocation102_spill] sm:$0xff]  ;;  %v12474_v6 = vpack.c.bf16 %v10705_v14, %v10704_v31  ;;  %v7781_v20 = vadd.f32 %v7780_v48, %v7668_v13  ;;  %v10712_v18 = vmax.f32 %v7888_v24, 0.0 }
 0x258   :  { %8726 = vmatpush2.bf16.msra.mxu1 %v16929_v1  ;;  %v7777_v25 = vadd.f32 %v7776_v28, %v7664_v12  ;;  %v13957_v22 = vld [vmem:[#allocation5 + $0x1e48] sm:$0xff]  ;;  %v7561_v17 = vadd.f32 %v16932_v16, %v16931_v58  ;;  %8457 = vmatmul.mubr.bf16.gmra.mxu0 %v16933_v42  ;;  %v12189_v12 = vcombine.high %v13945_v39, %v13947_v11  ;;  %v16935_v1 = vld [vmem:[#allocation186_spill] sm:$0xff]  ;;  %v16937_v58 = vld [vmem:[#allocation189_spill] sm:$0xff]  ;;  %v7782_v13 = vpop.f32.mrf.mxu0 }
 0x259   :  { %8727 = vmatprep.subr.bf16.mxu1 %v12333_v9  ;;  %v13959_v5 = vld [vmem:[#allocation5 + $0x1e68] sm:$0xff]  ;;  %v7672_v28 = vadd.f32 %v16935_v1, %v7559_v60  ;;  %11176 = vst [vmem:[#allocation8 + $0x140] sm:$0xff] %v12474_v6  ;;  %v7894_v19 = vadd.f32 %v7893_v30, %v7781_v20  ;;  %v16941_v1 = vld [vmem:[#allocation105_spill] sm:$0xff] }
 0x25a   :  { %v16930_v36 = vld [vmem:[#allocation184_spill] sm:$0xff]  ;;  %v7890_v9 = vadd.f32 %v7889_v63, %v7777_v25  ;;  %v12317_v31 = vcombine.high %v13957_v22, %v13959_v5  ;;  %v7895_v25 = vpop.f32.mrf.mxu1  ;;  %v7784_v15 = vpop.f32.mrf.mxu0  ;;  %8579 = vmatprep.mubr.bf16.mxu1 %v16941_v1  ;;  %v12316_v24 = vcombine.low %v13957_v22, %v13959_v5  ;;  %v16946_v22 = vld [vmem:[#allocation193_spill] sm:$0xff]  ;;  %v16971_v1 = vld [vmem:[#allocation123_spill] sm:$0xff] }
 0x25b   :  { %v7670_v21 = vadd.f32 %v16930_v36, %v7557_v61  ;;  %v13973_v61 = vld [vmem:[#allocation5 + $0x1a08] sm:$0xff]  ;;  %v16936_v36 = vld [vmem:[#allocation155_spill] sm:$0xff]  ;;  %v7569_v5 = vadd.f32 %v16946_v22, %v16945_v29  ;;  %v14015_v29 = vld [vmem:[#allocation5 + $0x5d0] sm:$0xff] }
 0x25c   :  { %v13975_v34 = vld [vmem:[#allocation5 + $0x1a28] sm:$0xff]  ;;  %v7565_v16 = vadd.f32 %v16937_v58, %v16936_v36  ;;  %8728 = vmatpush2.bf16.msra.mxu1 %v12332_v33  ;;  %v10713_v40 = vmax.f32 %v7890_v9, 0.0  ;;  %v7785_v36 = vadd.f32 %v7784_v15, %v7672_v28  ;;  %v7897_v58 = vpop.f32.mrf.mxu1  ;;  %v14011_v28 = vld [vmem:[#allocation5 + $0x1d0] sm:$0xff] }
 0x25d   :  { %v7783_v14 = vadd.f32 %v7782_v13, %v7670_v21  ;;  %8729 = vmatprep.subr.bf16.mxu1 %v12325_v50  ;;  %v16938_v60 = vld [vmem:[#allocation104_spill] sm:$0xff]  ;;  %v12181_v50 = vcombine.high %v13973_v61, %v13975_v34  ;;  %v16943_v13 = vcombine.low %v13911_v46, %v13917_v7  ;;  %v7786_v21 = vpop.f32.mrf.mxu0  ;;  %v288_v42 = vld [vmem:[#allocation5 + $0x350] sm:$0xff] }
 0x25e   :  { %8466 = vmatprep.mubr.bf16.mxu0 %v16938_v60  ;;  %v13986_v63 = vld [vmem:[#allocation5 + $0x1e08] sm:$0xff]  ;;  %v12478_v20 = vpack.c.bf16 %v10713_v40, %v10712_v18  ;;  %v10720_v18 = vmax.f32 %v7894_v19, 0.0  ;;  %v7898_v7 = vadd.f32 %v7897_v58, %v7785_v36  ;;  %v16952_v58 = vld [vmem:[#allocation107_spill] sm:$0xff]  ;;  %v300_v60 = vld [vmem:[#allocation5 + $0x3b0] sm:$0xff] }
 0x25f   :  { %v13988_v48 = vld [vmem:[#allocation5 + $0x1e28] sm:$0xff]  ;;  %v7896_v30 = vadd.f32 %v7895_v25, %v7783_v14  ;;  %8617 = vmatpush2.bf16.msra.mxu0 %v16943_v13  ;;  %v14013_v14 = vld [vmem:[#allocation5 + $0x1f0] sm:$0xff]  ;;  %v16949_v25 = vld [vmem:[#allocation195_spill] sm:$0xff]  ;;  %8580 = vmatmul.mubr.bf16.gmra.mxu1 %v16952_v58 }
 0x260   :  { %v16939_v44 = vld [vmem:[#allocation156_spill] sm:$0xff]  ;;  %8730 = vmatpush2.bf16.msra.mxu1 %v12324_v51  ;;  %8618 = vmatprep.subr.bf16.mxu0 %v12189_v12  ;;  %11180 = vst [vmem:[#allocation8 + $0x160] sm:$0xff] %v12478_v20  ;;  %v16948_v12 = vld [vmem:[#allocation158_spill] sm:$0xff]  ;;  %v12308_v19 = vcombine.low %v13986_v63, %v13988_v48  ;;  %v188_v58 = vld [vmem:[#allocation5 + $0x30] sm:$0xff] }
 0x261   :  { %v7567_v33 = vadd.f32 %v16940_v38, %v16939_v44  ;;  %v16942_v6 = vld [vmem:[#allocation188_spill] sm:$0xff]  ;;  %v16944_v44 = vld [vmem:[#allocation190_spill] sm:$0xff]  ;;  %v10721_v46 = vmax.f32 %v7896_v30, 0.0  ;;  %8731 = vmatprep.subr.bf16.mxu1 %v12317_v31  ;;  %v7571_v15 = vadd.f32 %v16949_v25, %v16948_v12  ;;  %v14043_v12 = vld [vmem:[#allocation5 + $0x5b0] sm:$0xff] }
 0x262   :  { %v7674_v9 = vadd.f32 %v16942_v6, %v7561_v17  ;;  %v7678_v38 = vadd.f32 %v16944_v44, %v7565_v16  ;;  %v12309_v17 = vcombine.high %v13986_v63, %v13988_v48  ;;  %v7899_v16 = vpop.f32.mrf.mxu1  ;;  %v16947_v55 = vld [vmem:[#allocation192_spill] sm:$0xff]  ;;  %v7790_v6 = vpop.f32.mrf.mxu0  ;;  %v16950_v13 = vld [vmem:[#allocation106_spill] sm:$0xff]  ;;  %v11407_v63 = vcombine.high %v14011_v28, %v14013_v14  ;;  %v284_v62 = vld [vmem:[#allocation5 + $0x330] sm:$0xff] }
 0x263   :  { %v7680_v51 = vadd.f32 %v16947_v55, %v7567_v33  ;;  %8467 = vmatmul.mubr.bf16.gmra.mxu0 %v16950_v13  ;;  %v12482_v31 = vpack.c.bf16 %v10721_v46, %v10720_v18  ;;  %v16953_v33 = vcombine.low %v13945_v39, %v13947_v11  ;;  %v16954_v44 = vld [vmem:[#allocation194_spill] sm:$0xff]  ;;  %v11535_v48 = vcombine.high %v14015_v29, %v14017_v41  ;;  %v14036_v18 = vld [vmem:[#allocation5 + $0x190] sm:$0xff]  ;;  %v16987_v53 = vld [vmem:[#allocation148_spill] sm:$0xff] }
 0x264   :  { %v7787_v40 = vadd.f32 %v7786_v21, %v7674_v9  ;;  %v16951_v21 = vld [vmem:[#allocation108_spill] sm:$0xff]  ;;  %v7791_v30 = vadd.f32 %v7790_v6, %v7678_v38  ;;  %v7903_v36 = vpop.f32.mrf.mxu1  ;;  %v7682_v22 = vadd.f32 %v16954_v44, %v7569_v5  ;;  %8732 = vmatpush2.bf16.msra.mxu1 %v12316_v24  ;;  %v7792_v55 = vpop.f32.mrf.mxu0  ;;  %v10728_v46 = vmax.f32 %v7898_v7, 0.0  ;;  %v16955_v24 = vld [vmem:[#allocation109_spill] sm:$0xff]  ;;  %v16956_v6 = vld [vmem:[#allocation110_spill] sm:$0xff] }
 0x265   :  { %v1218_v9 = vsub.s32 2, %v16951_v21  ;;  %8619 = vmatpush2.bf16.msra.mxu0 %v16953_v33  ;;  %v1222_v38 = vsub.s32 3, %v16951_v21  ;;  %11184 = vst [vmem:[#allocation8 + $0x180] sm:$0xff] %v12482_v31  ;;  %v7793_v11 = vadd.f32 %v7792_v55, %v7680_v51  ;;  %8733 = vmatprep.subr.bf16.mxu1 %v12309_v17  ;;  %v14041_v5 = vld [vmem:[#allocation5 + $0x590] sm:$0xff]  ;;  %v12506_v33 = vld [vmem:[#allocation7] sm:$0xff]  ;;  %v11406_v7 = vcombine.low %v14011_v28, %v14013_v14  ;;  %v16957_v51 = vld [vmem:[#allocation196_spill] sm:$0xff] }
 0x266   :  { %v7900_v20 = vadd.f32 %v7899_v16, %v7787_v40  ;;  %8620 = vmatprep.subr.bf16.mxu0 %v12181_v50  ;;  %v7904_v39 = vadd.f32 %v7903_v36, %v7791_v30  ;;  %v7905_v16 = vpop.f32.mrf.mxu1  ;;  %8622 = vmatprep.mubr.bf16.mxu0 %v16955_v24  ;;  %v14039_v50 = vld [vmem:[#allocation5 + $0x1b0] sm:$0xff]  ;;  %v7794_v25 = vpop.f32.mrf.mxu0  ;;  %v11534_v17 = vcombine.low %v14015_v29, %v14017_v41 }
 0x267   :  { %8735 = vmatprep.mubr.bf16.mxu1 %v16956_v6  ;;  %v14046_v44 = vrot.slane %v12506_v33, %v1218_v9  ;;  %v7684_v31 = vadd.f32 %v16957_v51, %v7571_v15  ;;  %v7906_v30 = vadd.f32 %v7905_v16, %v7793_v11  ;;  %v7795_v36 = vadd.f32 %v7794_v25, %v7682_v22  ;;  %v14062_v29 = vld [vmem:[#allocation5 + $0x150] sm:$0xff] }
 0x268   :  { %v10729_v40 = vmax.f32 %v7900_v20, 0.0  ;;  %v7907_v55 = vpop.f32.mrf.mxu1  ;;  %v16958_v24 = vcombine.low %v13973_v61, %v13975_v34  ;;  %8734 = vmatpush2.bf16.msra.mxu1 %v12308_v19  ;;  %v7796_v6 = vpop.f32.mrf.mxu0  ;;  %v14056_v9 = vrot.slane %v12506_v33, %v1222_v38  ;;  %v11399_v28 = vcombine.high %v14036_v18, %v14039_v50  ;;  %v228_v34 = vld [vmem:[#allocation5 + $0x170] sm:$0xff] }
 0x269   :  { %v11527_v14 = vcombine.high %v14041_v5, %v14043_v12  ;;  %v10736_v41 = vmax.f32 %v7904_v39, 0.0  ;;  %v10737_v15 = vmax.f32 %v7906_v30, 0.0  ;;  %v7908_v22 = vadd.f32 %v7907_v55, %v7795_v36  ;;  %8929 = vmatprep.subr.bf16.mxu1 %v11535_v48  ;;  %v352_v19 = vld [vmem:[#allocation5 + $0x550] sm:$0xff]  ;;  %v16960_v39 = vld [vmem:[#allocation112_spill] sm:$0xff] }
 0x26a   :  { %v12486_v20 = vpack.c.bf16 %v10729_v40, %v10728_v46  ;;  %8621 = vmatpush2.bf16.msra.mxu0 %v16958_v24  ;;  %v7797_v46 = vadd.f32 %v7796_v6, %v7684_v31  ;;  %v7909_v61 = vpop.f32.mrf.mxu1  ;;  %v7946_v38 = vpop.f32.mrf.mxu0  ;;  %v16959_v40 = vld [vmem:[#allocation111_spill] sm:$0xff]  ;;  %v11398_v11 = vcombine.low %v14036_v18, %v14039_v50  ;;  %v11526_v48 = vcombine.low %v14041_v5, %v14043_v12  ;;  %v16961_v55 = vld [vmem:[#allocation113_spill] sm:$0xff] }
 0x26b   :  { %8816 = vmatprep.subr.bf16.mxu0 %v11407_v63  ;;  %v356_v63 = vld [vmem:[#allocation5 + $0x570] sm:$0xff]  ;;  %v12490_v16 = vpack.c.bf16 %v10737_v15, %v10736_v41  ;;  %v7947_v25 = vadd.f32 %v7946_v38, %v14046_v44  ;;  %8736 = vmatmul.mubr.bf16.vlgmr.msra.gmra.mxu1 %v16960_v39  ;;  %v11391_v51 = vcombine.high %v14062_v29, %v228_v34  ;;  %v16962_v41 = vld [vmem:[#allocation114_spill] sm:$0xff] }
 0x26c   :  { %11188 = vst [vmem:[#allocation8 + $0x1a0] sm:$0xff] %v12486_v20  ;;  %v7910_v24 = vadd.f32 %v7909_v61, %v7797_v46  ;;  %v8059_v33 = vpop.f32.mrf.mxu1  ;;  %8930 = vmatpush1.bf16.msra.mxu1 %v11534_v17  ;;  %v7948_v6 = vpop.f32.mrf.mxu0  ;;  %v11519_v31 = vcombine.high %v352_v19, %v356_v63  ;;  %v10744_v20 = vmax.f32 %v7908_v22, 0.0  ;;  %v220_v17 = vld [vmem:[#allocation5 + $0x130] sm:$0xff]  ;;  %8745 = vmatprep.mubr.bf16.mxu1 %v16962_v41 }
 0x26d   :  { %8623 = vmatmul.mubr.bf16.vlgmr.msra.gmra.mxu0 %v16959_v40  ;;  %11192 = vst [vmem:[#allocation8 + $0x1c0] sm:$0xff] %v12490_v16  ;;  %v14072_v50 = vadd.f32 %v8059_v33, %v7947_v25  ;;  %v7949_v30 = vadd.f32 %v7948_v6, %v14056_v9  ;;  %8931 = vmatprep.subr.bf16.mxu1 %v11527_v14  ;;  %v344_v5 = vld [vmem:[#allocation5 + $0x510] sm:$0xff]  ;;  %v16967_v40 = vld [vmem:[#allocation119_spill] sm:$0xff] }
 0x26e   :  { %8817 = vmatpush1.bf16.msra.mxu0 %v11406_v7  ;;  %v10745_v18 = vmax.f32 %v7910_v24, 0.0  ;;  %v8061_v36 = vpop.f32.mrf.mxu1  ;;  %8632 = vmatprep.mubr.bf16.mxu0 %v16961_v55  ;;  %v216_v7 = vld [vmem:[#allocation5 + $0x110] sm:$0xff]  ;;  %v11390_v38 = vcombine.low %v14062_v29, %v228_v34  ;;  %v11518_v16 = vcombine.low %v352_v19, %v356_v63 }
 0x26f   :  { %8818 = vmatprep.subr.bf16.mxu0 %v11399_v28  ;;  %v7950_v28 = vpop.f32.mrf.mxu0  ;;  %v348_v12 = vld [vmem:[#allocation5 + $0x530] sm:$0xff]  ;;  %v14077_v46 = vadd.f32 %v8061_v36, %v7949_v30  ;;  %v11383_v24 = vcombine.high %v216_v7, %v220_v17 }
 0x270   :  { %v12494_v15 = vpack.c.bf16 %v10745_v18, %v10744_v20  ;;  %v7951_v22 = vadd.f32 %v7950_v28, %v14046_v44  ;;  %v8063_v61 = vpop.f32.mrf.mxu1  ;;  %8932 = vmatpush1.bf16.msra.mxu1 %v11526_v48  ;;  %v11511_v20 = vcombine.high %v344_v5, %v348_v12  ;;  %v208_v18 = vld [vmem:[#allocation5 + $0xd0] sm:$0xff]  ;;  %v16963_v28 = vld [vmem:[#allocation115_spill] sm:$0xff]  ;;  %v16964_v48 = vld [vmem:[#allocation116_spill] sm:$0xff] }
 0x271   :  { %v7952_v14 = vpop.f32.mrf.mxu0  ;;  %8933 = vmatprep.subr.bf16.mxu1 %v11519_v31  ;;  %v212_v30 = vld [vmem:[#allocation5 + $0xf0] sm:$0xff]  ;;  %v11510_v31 = vcombine.low %v344_v5, %v348_v12 }
 0x272   :  { %8819 = vmatpush1.bf16.msra.mxu0 %v11398_v11  ;;  %11196 = vst [vmem:[#allocation8 + $0x1e0] sm:$0xff] %v12494_v15  ;;  %v14081_v25 = vadd.f32 %v8063_v61, %v7951_v22  ;;  %v7953_v33 = vadd.f32 %v7952_v14, %v14056_v9  ;;  %v8065_v6 = vpop.f32.mrf.mxu1  ;;  %v336_v11 = vld [vmem:[#allocation5 + $0x4d0] sm:$0xff]  ;;  %v11375_v22 = vcombine.high %v208_v18, %v212_v30 }
 0x273   :  { %8820 = vmatprep.subr.bf16.mxu0 %v11391_v51  ;;  %v7956_v36 = vpop.f32.mrf.mxu0  ;;  %v340_v29 = vld [vmem:[#allocation5 + $0x4f0] sm:$0xff]  ;;  %8746 = vmatmul.mubr.bf16.gmra.mxu1 %v16964_v48  ;;  %v11382_v51 = vcombine.low %v216_v7, %v220_v17  ;;  %v16966_v48 = vld [vmem:[#allocation118_spill] sm:$0xff] }
 0x274   :  { %v14085_v34 = vadd.f32 %v8065_v6, %v7953_v33  ;;  %v7957_v19 = vadd.f32 %v7956_v36, %v14046_v44  ;;  %v8069_v63 = vpop.f32.mrf.mxu1  ;;  %8934 = vmatpush1.bf16.msra.mxu1 %v11518_v16  ;;  %v16965_v33 = vld [vmem:[#allocation117_spill] sm:$0xff]  ;;  %v11503_v6 = vcombine.high %v336_v11, %v340_v29  ;;  %8755 = vmatprep.mubr.bf16.mxu1 %v16966_v48 }
 0x275   :  { %8633 = vmatmul.mubr.bf16.gmra.mxu0 %v16963_v28  ;;  %v7958_v15 = vpop.f32.mrf.mxu0  ;;  %8935 = vmatprep.subr.bf16.mxu1 %v11511_v20  ;;  %v200_v36 = vld [vmem:[#allocation5 + $0x90] sm:$0xff]  ;;  %v11374_v16 = vcombine.low %v208_v18, %v212_v30  ;;  %v11502_v20 = vcombine.low %v336_v11, %v340_v29  ;;  %v16968_v29 = vld [vmem:[#allocation120_spill] sm:$0xff] }
 0x276   :  { %8821 = vmatpush1.bf16.msra.mxu0 %v11390_v38  ;;  %v14089_v61 = vadd.f32 %v8069_v63, %v7957_v19  ;;  %v7959_v14 = vadd.f32 %v7958_v15, %v14056_v9  ;;  %v8071_v28 = vpop.f32.mrf.mxu1  ;;  %8642 = vmatprep.mubr.bf16.mxu0 %v16965_v33  ;;  %v204_v41 = vld [vmem:[#allocation5 + $0xb0] sm:$0xff] }
 0x277   :  { %8822 = vmatprep.subr.bf16.mxu0 %v11383_v24  ;;  %v7960_v55 = vpop.f32.mrf.mxu0  ;;  %v328_v7 = vld [vmem:[#allocation5 + $0x490] sm:$0xff]  ;;  %v11367_v19 = vcombine.high %v200_v36, %v204_v41 }
 0x278   :  { %v332_v17 = vld [vmem:[#allocation5 + $0x4b0] sm:$0xff]  ;;  %v14094_v38 = vadd.f32 %v8071_v28, %v7959_v14  ;;  %v7961_v5 = vadd.f32 %v7960_v55, %v14046_v44  ;;  %v8073_v12 = vpop.f32.mrf.mxu1  ;;  %8936 = vmatpush1.bf16.msra.mxu1 %v11510_v31  ;;  %v11366_v31 = vcombine.low %v200_v36, %v204_v41 }
 0x279   :  { %v7962_v24 = vpop.f32.mrf.mxu0  ;;  %8937 = vmatprep.subr.bf16.mxu1 %v11503_v6  ;;  %v11495_v48 = vcombine.high %v328_v7, %v332_v17  ;;  %v192_v39 = vld [vmem:[#allocation5 + $0x50] sm:$0xff]  ;;  %v11494_v6 = vcombine.low %v328_v7, %v332_v17 }
 0x27a   :  { %8823 = vmatpush1.bf16.msra.mxu0 %v11382_v51  ;;  %v14097_v63 = vadd.f32 %v8073_v12, %v7961_v5  ;;  %v7963_v15 = vadd.f32 %v7962_v24, %v14056_v9  ;;  %v8075_v33 = vpop.f32.mrf.mxu1  ;;  %v196_v28 = vld [vmem:[#allocation5 + $0x70] sm:$0xff] }
 0x27b   :  { %8824 = vmatprep.subr.bf16.mxu0 %v11375_v22  ;;  %v7966_v14 = vpop.f32.mrf.mxu0  ;;  %v320_v55 = vld [vmem:[#allocation5 + $0x450] sm:$0xff]  ;;  %8756 = vmatmul.mubr.bf16.gmra.mxu1 %v16968_v29  ;;  %v11359_v5 = vcombine.high %v192_v39, %v196_v28  ;;  %v16970_v29 = vld [vmem:[#allocation122_spill] sm:$0xff] }
 0x27c   :  { %v324_v51 = vld [vmem:[#allocation5 + $0x470] sm:$0xff]  ;;  %v14101_v18 = vadd.f32 %v8075_v33, %v7963_v15  ;;  %v7967_v30 = vadd.f32 %v7966_v14, %v14046_v44  ;;  %v8079_v11 = vpop.f32.mrf.mxu1  ;;  %8938 = vmatpush1.bf16.msra.mxu1 %v11502_v20  ;;  %8765 = vmatprep.mubr.bf16.mxu1 %v16970_v29  ;;  %v11358_v20 = vcombine.low %v192_v39, %v196_v28 }
 0x27d   :  { %8643 = vmatmul.mubr.bf16.gmra.mxu0 %v16967_v40  ;;  %v7968_v22 = vpop.f32.mrf.mxu0  ;;  %8939 = vmatprep.subr.bf16.mxu1 %v11495_v48  ;;  %v16969_v33 = vld [vmem:[#allocation121_spill] sm:$0xff]  ;;  %v11487_v15 = vcombine.high %v320_v55, %v324_v51  ;;  %v11486_v48 = vcombine.low %v320_v55, %v324_v51  ;;  %v16972_v51 = vld [vmem:[#allocation124_spill] sm:$0xff] }
 0x27e   :  { %8825 = vmatpush1.bf16.msra.mxu0 %v11374_v16  ;;  %v14105_v12 = vadd.f32 %v8079_v11, %v7967_v30  ;;  %v7969_v24 = vadd.f32 %v7968_v22, %v14056_v9  ;;  %v8081_v40 = vpop.f32.mrf.mxu1  ;;  %8652 = vmatprep.mubr.bf16.mxu0 %v16969_v33  ;;  %v184_v14 = vld [vmem:[#allocation5 + $0x10] sm:$0xff] }
 0x27f   :  { %8826 = vmatprep.subr.bf16.mxu0 %v11367_v19  ;;  %v7970_v21 = vpop.f32.mrf.mxu0  ;;  %v312_v41 = vld [vmem:[#allocation5 + $0x410] sm:$0xff]  ;;  %v11351_v30 = vcombine.high %v184_v14, %v188_v58 }
 0x280   :  { %v316_v36 = vld [vmem:[#allocation5 + $0x430] sm:$0xff]  ;;  %v14110_v16 = vadd.f32 %v8081_v40, %v7969_v24  ;;  %v7971_v7 = vadd.f32 %v7970_v21, %v14046_v44  ;;  %v8083_v17 = vpop.f32.mrf.mxu1  ;;  %8940 = vmatpush1.bf16.msra.mxu1 %v11494_v6  ;;  %v11350_v6 = vcombine.low %v184_v14, %v188_v58 }
 0x281   :  { %v7972_v19 = vpop.f32.mrf.mxu0  ;;  %8941 = vmatprep.subr.bf16.mxu1 %v11487_v15  ;;  %v11479_v29 = vcombine.high %v312_v41, %v316_v36  ;;  %v304_v13 = vld [vmem:[#allocation5 + $0x3d0] sm:$0xff]  ;;  %v11478_v15 = vcombine.low %v312_v41, %v316_v36 }
 0x282   :  { %8827 = vmatpush1.bf16.msra.mxu0 %v11366_v31  ;;  %v14113_v11 = vadd.f32 %v8083_v17, %v7971_v7  ;;  %v7973_v22 = vadd.f32 %v7972_v19, %v14056_v9  ;;  %v8085_v33 = vpop.f32.mrf.mxu1  ;;  %v308_v40 = vld [vmem:[#allocation5 + $0x3f0] sm:$0xff] }
 0x283   :  { %8828 = vmatprep.subr.bf16.mxu0 %v11359_v5  ;;  %v7976_v24 = vpop.f32.mrf.mxu0  ;;  %v432_v21 = vld [vmem:[#allocation5 + $0x7d0] sm:$0xff]  ;;  %8766 = vmatmul.mubr.bf16.gmra.mxu1 %v16972_v51  ;;  %v11471_v7 = vcombine.high %v304_v13, %v308_v40  ;;  %v16974_v51 = vld [vmem:[#allocation126_spill] sm:$0xff] }
 0x284   :  { %v436_v31 = vld [vmem:[#allocation5 + $0x7f0] sm:$0xff]  ;;  %v14117_v39 = vadd.f32 %v8085_v33, %v7973_v22  ;;  %v7977_v28 = vadd.f32 %v7976_v24, %v14046_v44  ;;  %v8089_v55 = vpop.f32.mrf.mxu1  ;;  %8942 = vmatpush1.bf16.msra.mxu1 %v11486_v48  ;;  %8775 = vmatprep.mubr.bf16.mxu1 %v16974_v51  ;;  %v11470_v48 = vcombine.low %v304_v13, %v308_v40 }
 0x285   :  { %8653 = vmatmul.mubr.bf16.gmra.mxu0 %v16971_v1  ;;  %v7978_v5 = vpop.f32.mrf.mxu0  ;;  %8943 = vmatprep.subr.bf16.mxu1 %v11479_v29  ;;  %v16973_v33 = vld [vmem:[#allocation125_spill] sm:$0xff]  ;;  %v11599_v22 = vcombine.high %v432_v21, %v436_v31  ;;  %v11598_v29 = vcombine.low %v432_v21, %v436_v31  ;;  %v16976_v31 = vld [vmem:[#allocation128_spill] sm:$0xff] }
 0x286   :  { %8829 = vmatpush1.bf16.msra.mxu0 %v11358_v20  ;;  %v14121_v17 = vadd.f32 %v8089_v55, %v7977_v28  ;;  %v7979_v19 = vadd.f32 %v7978_v5, %v14056_v9  ;;  %v8091_v1 = vpop.f32.mrf.mxu1  ;;  %8662 = vmatprep.mubr.bf16.mxu0 %v16973_v33  ;;  %v296_v24 = vld [vmem:[#allocation5 + $0x390] sm:$0xff] }
 0x287   :  { %8830 = vmatprep.subr.bf16.mxu0 %v11351_v30  ;;  %v7980_v37 = vpop.f32.mrf.mxu0  ;;  %v424_v58 = vld [vmem:[#allocation5 + $0x790] sm:$0xff]  ;;  %v11463_v28 = vcombine.high %v296_v24, %v300_v60 }
 0x288   :  { %v428_v14 = vld [vmem:[#allocation5 + $0x7b0] sm:$0xff]  ;;  %v14126_v20 = vadd.f32 %v8091_v1, %v7979_v19  ;;  %v7981_v41 = vadd.f32 %v7980_v37, %v14046_v44  ;;  %v8093_v36 = vpop.f32.mrf.mxu1  ;;  %8944 = vmatpush1.bf16.msra.mxu1 %v11478_v15  ;;  %v11462_v15 = vcombine.low %v296_v24, %v300_v60 }
 0x289   :  { %v7982_v30 = vpop.f32.mrf.mxu0  ;;  %8945 = vmatprep.subr.bf16.mxu1 %v11599_v22  ;;  %v11591_v51 = vcombine.high %v424_v58, %v428_v14  ;;  %v292_v1 = vld [vmem:[#allocation5 + $0x370] sm:$0xff]  ;;  %v11590_v22 = vcombine.low %v424_v58, %v428_v14 }
 0x28a   :  { %8831 = vmatpush1.bf16.msra.mxu0 %v11350_v6  ;;  %v14129_v55 = vadd.f32 %v8093_v36, %v7981_v41  ;;  %v7983_v5 = vadd.f32 %v7982_v30, %v14056_v9  ;;  %v8095_v33 = vpop.f32.mrf.mxu1  ;;  %v416_v37 = vld [vmem:[#allocation5 + $0x750] sm:$0xff]  ;;  %v11455_v41 = vcombine.high %v288_v42, %v292_v1 }
 0x28b   :  { %8832 = vmatprep.subr.bf16.mxu0 %v11471_v7  ;;  %v7986_v19 = vpop.f32.mrf.mxu0  ;;  %v420_v6 = vld [vmem:[#allocation5 + $0x770] sm:$0xff]  ;;  %8776 = vmatmul.mubr.bf16.gmra.mxu1 %v16976_v31  ;;  %v16978_v31 = vld [vmem:[#allocation131_spill] sm:$0xff] }
 0x28c   :  { %v14133_v13 = vadd.f32 %v8095_v33, %v7983_v5  ;;  %v7987_v40 = vadd.f32 %v7986_v19, %v14046_v44  ;;  %v8099_v21 = vpop.f32.mrf.mxu1  ;;  %8946 = vmatpush2.bf16.msra.mxu1 %v11598_v29  ;;  %v16977_v33 = vld [vmem:[#allocation130_spill] sm:$0xff]  ;;  %v11583_v5 = vcombine.high %v416_v37, %v420_v6  ;;  %v280_v19 = vld [vmem:[#allocation5 + $0x310] sm:$0xff]  ;;  %8785 = vmatprep.mubr.bf16.mxu1 %v16978_v31 }
 0x28d   :  { %8663 = vmatmul.mubr.bf16.gmra.mxu0 %v16975_v54  ;;  %v7988_v7 = vpop.f32.mrf.mxu0  ;;  %8947 = vmatprep.subr.bf16.mxu1 %v11591_v51  ;;  %v408_v60 = vld [vmem:[#allocation5 + $0x710] sm:$0xff]  ;;  %v11454_v29 = vcombine.low %v288_v42, %v292_v1  ;;  %v11582_v51 = vcombine.low %v416_v37, %v420_v6  ;;  %v16980_v6 = vld [vmem:[#allocation136_spill] sm:$0xff] }
 0x28e   :  { %8833 = vmatpush2.bf16.msra.mxu0 %v11470_v48  ;;  %v14137_v36 = vadd.f32 %v8099_v21, %v7987_v40  ;;  %v7989_v30 = vadd.f32 %v7988_v7, %v14056_v9  ;;  %v8101_v54 = vpop.f32.mrf.mxu1  ;;  %8672 = vmatprep.mubr.bf16.mxu0 %v16977_v33  ;;  %v412_v24 = vld [vmem:[#allocation5 + $0x730] sm:$0xff]  ;;  %v11447_v40 = vcombine.high %v280_v19, %v284_v62 }
 0x28f   :  { %8834 = vmatprep.subr.bf16.mxu0 %v11463_v28  ;;  %v7990_v3 = vpop.f32.mrf.mxu0  ;;  %v11575_v31 = vcombine.high %v408_v60, %v412_v24 }
 0x290   :  { %v14142_v48 = vadd.f32 %v8101_v54, %v7989_v30  ;;  %v7991_v58 = vadd.f32 %v7990_v3, %v14046_v44  ;;  %v8103_v14 = vpop.f32.mrf.mxu1  ;;  %8948 = vmatpush2.bf16.msra.mxu1 %v11590_v22  ;;  %v276_v54 = vld [vmem:[#allocation5 + $0x2f0] sm:$0xff]  ;;  %v11446_v22 = vcombine.low %v280_v19, %v284_v62 }
 0x291   :  { %v7992_v28 = vpop.f32.mrf.mxu0  ;;  %8949 = vmatprep.subr.bf16.mxu1 %v11583_v5  ;;  %v400_v3 = vld [vmem:[#allocation5 + $0x6d0] sm:$0xff]  ;;  %v11574_v5 = vcombine.low %v408_v60, %v412_v24 }
 0x292   :  { %8835 = vmatpush2.bf16.msra.mxu0 %v11462_v15  ;;  %v14145_v21 = vadd.f32 %v8103_v14, %v7991_v58  ;;  %v7993_v7 = vadd.f32 %v7992_v28, %v14056_v9  ;;  %v8105_v33 = vpop.f32.mrf.mxu1  ;;  %v404_v15 = vld [vmem:[#allocation5 + $0x6f0] sm:$0xff]  ;;  %v11439_v58 = vcombine.high %v272_v23, %v276_v54 }
 0x293   :  { %8836 = vmatprep.subr.bf16.mxu0 %v11455_v41  ;;  %v7996_v30 = vpop.f32.mrf.mxu0  ;;  %8786 = vmatmul.mubr.bf16.gmra.mxu1 %v16980_v6  ;;  %v16982_v6 = vld [vmem:[#allocation139_spill] sm:$0xff]  ;;  %v392_v62 = vld [vmem:[#allocation5 + $0x690] sm:$0xff] }
 0x294   :  { %v14149_v42 = vadd.f32 %v8105_v33, %v7993_v7  ;;  %v7997_v1 = vadd.f32 %v7996_v30, %v14046_v44  ;;  %v8109_v37 = vpop.f32.mrf.mxu1  ;;  %8950 = vmatpush2.bf16.msra.mxu1 %v11582_v51  ;;  %v16981_v33 = vld [vmem:[#allocation138_spill] sm:$0xff]  ;;  %v11567_v7 = vcombine.high %v400_v3, %v404_v15  ;;  %v264_v30 = vld [vmem:[#allocation5 + $0x290] sm:$0xff]  ;;  %8795 = vmatprep.mubr.bf16.mxu1 %v16982_v6 }
 0x295   :  { %8673 = vmatmul.mubr.bf16.gmra.mxu0 %v16979_v35  ;;  %v7998_v41 = vpop.f32.mrf.mxu0  ;;  %8951 = vmatprep.subr.bf16.mxu1 %v11575_v31  ;;  %v396_v19 = vld [vmem:[#allocation5 + $0x6b0] sm:$0xff]  ;;  %v11438_v51 = vcombine.low %v272_v23, %v276_v54  ;;  %v11566_v31 = vcombine.low %v400_v3, %v404_v15  ;;  %v16984_v15 = vld [vmem:[#allocation144_spill] sm:$0xff] }
 0x296   :  { %8837 = vmatpush2.bf16.msra.mxu0 %v11454_v29  ;;  %v14153_v14 = vadd.f32 %v8109_v37, %v7997_v1  ;;  %v7999_v28 = vadd.f32 %v7998_v41, %v14056_v9  ;;  %v8111_v35 = vpop.f32.mrf.mxu1  ;;  %8682 = vmatprep.mubr.bf16.mxu0 %v16981_v33  ;;  %v11431_v1 = vcombine.high %v264_v30, %v268_v56 }
 0x297   :  { %8838 = vmatprep.subr.bf16.mxu0 %v11447_v40  ;;  %v8000_v27 = vpop.f32.mrf.mxu0  ;;  %v11559_v6 = vcombine.high %v392_v62, %v396_v19 }
 0x298   :  { %v14158_v29 = vadd.f32 %v8111_v35, %v7999_v28  ;;  %v8001_v60 = vadd.f32 %v8000_v27, %v14046_v44  ;;  %v8113_v24 = vpop.f32.mrf.mxu1  ;;  %8952 = vmatpush2.bf16.msra.mxu1 %v11574_v5  ;;  %v260_v35 = vld [vmem:[#allocation5 + $0x270] sm:$0xff]  ;;  %v11430_v5 = vcombine.low %v264_v30, %v268_v56 }
 0x299   :  { %v8002_v40 = vpop.f32.mrf.mxu0  ;;  %8953 = vmatprep.subr.bf16.mxu1 %v11567_v7  ;;  %v384_v27 = vld [vmem:[#allocation5 + $0x650] sm:$0xff]  ;;  %v11558_v7 = vcombine.low %v392_v62, %v396_v19 }
 0x29a   :  { %8839 = vmatpush2.bf16.msra.mxu0 %v11446_v22  ;;  %v14161_v37 = vadd.f32 %v8113_v24, %v8001_v60  ;;  %v8003_v41 = vadd.f32 %v8002_v40, %v14056_v9  ;;  %v8115_v33 = vpop.f32.mrf.mxu1  ;;  %v388_v22 = vld [vmem:[#allocation5 + $0x670] sm:$0xff]  ;;  %v11423_v60 = vcombine.high %v256_v59, %v260_v35 }
 0x29b   :  { %8840 = vmatprep.subr.bf16.mxu0 %v11439_v58  ;;  %v8006_v28 = vpop.f32.mrf.mxu0  ;;  %8796 = vmatmul.mubr.bf16.gmra.mxu1 %v16984_v15  ;;  %v16986_v15 = vld [vmem:[#allocation147_spill] sm:$0xff]  ;;  %v376_v56 = vld [vmem:[#allocation5 + $0x610] sm:$0xff] }
 0x29c   :  { %v14165_v23 = vadd.f32 %v8115_v33, %v8003_v41  ;;  %v8007_v54 = vadd.f32 %v8006_v28, %v14046_v44  ;;  %v8119_v3 = vpop.f32.mrf.mxu1  ;;  %8954 = vmatpush2.bf16.msra.mxu1 %v11566_v31  ;;  %v16985_v33 = vld [vmem:[#allocation146_spill] sm:$0xff]  ;;  %v11551_v41 = vcombine.high %v384_v27, %v388_v22  ;;  %v248_v28 = vld [vmem:[#allocation5 + $0x210] sm:$0xff]  ;;  %8805 = vmatprep.mubr.bf16.mxu1 %v16986_v15 }
 0x29d   :  { %8683 = vmatmul.mubr.bf16.gmra.mxu0 %v16983_v2  ;;  %v8008_v58 = vpop.f32.mrf.mxu0  ;;  %8955 = vmatprep.subr.bf16.mxu1 %v11559_v6  ;;  %v380_v30 = vld [vmem:[#allocation5 + $0x630] sm:$0xff]  ;;  %v11422_v31 = vcombine.low %v256_v59, %v260_v35  ;;  %v11550_v6 = vcombine.low %v384_v27, %v388_v22 }
 0x29e   :  { %8841 = vmatpush2.bf16.msra.mxu0 %v11438_v51  ;;  %v14169_v24 = vadd.f32 %v8119_v3, %v8007_v54  ;;  %v8009_v40 = vadd.f32 %v8008_v58, %v14056_v9  ;;  %v8121_v2 = vpop.f32.mrf.mxu1  ;;  %8692 = vmatprep.mubr.bf16.mxu0 %v16985_v33  ;;  %v11415_v54 = vcombine.high %v248_v28, %v252_v47  ;;  %v16988_v22 = vld [vmem:[#allocation149_spill] sm:$0xff] }
 0x29f   :  { %8842 = vmatprep.subr.bf16.mxu0 %v11431_v1  ;;  %v8010_v8 = vpop.f32.mrf.mxu0  ;;  %v11543_v15 = vcombine.high %v376_v56, %v380_v30 }
 0x2a0   :  { %v14174_v51 = vadd.f32 %v8121_v2, %v8009_v40  ;;  %v8011_v62 = vadd.f32 %v8010_v8, %v14046_v44  ;;  %v8123_v19 = vpop.f32.mrf.mxu1  ;;  %8956 = vmatpush2.bf16.msra.mxu1 %v11558_v7  ;;  %v500_v2 = vld [vmem:[#allocation5 + $0x9f0] sm:$0xff]  ;;  %v11414_v7 = vcombine.low %v248_v28, %v252_v47 }
 0x2a1   :  { %v8012_v1 = vpop.f32.mrf.mxu0  ;;  %8957 = vmatprep.subr.bf16.mxu1 %v11551_v41  ;;  %v624_v8 = vld [vmem:[#allocation5 + $0xdd0] sm:$0xff]  ;;  %v11542_v41 = vcombine.low %v376_v56, %v380_v30 }
 0x2a2   :  { %8843 = vmatpush2.bf16.msra.mxu0 %v11430_v5  ;;  %v14177_v3 = vadd.f32 %v8123_v19, %v8011_v62  ;;  %v8013_v58 = vadd.f32 %v8012_v1, %v14056_v9  ;;  %v8125_v33 = vpop.f32.mrf.mxu1  ;;  %v628_v5 = vld [vmem:[#allocation5 + $0xdf0] sm:$0xff]  ;;  %v11663_v62 = vcombine.high %v496_v32, %v500_v2 }
 0x2a3   :  { %8844 = vmatprep.subr.bf16.mxu0 %v11423_v60  ;;  %v8016_v40 = vpop.f32.mrf.mxu0  ;;  %8806 = vmatmul.mubr.bf16.gmra.mxu1 %v16988_v22  ;;  %v16990_v22 = vld [vmem:[#allocation13_spill] sm:$0xff] }
 0x2a4   :  { %v14181_v59 = vadd.f32 %v8125_v33, %v8013_v58  ;;  %v8017_v35 = vadd.f32 %v8016_v40, %v14046_v44  ;;  %v8129_v27 = vpop.f32.mrf.mxu1  ;;  %8958 = vmatpush2.bf16.msra.mxu1 %v11550_v6  ;;  %v16989_v33 = vld [vmem:[#allocation12_spill] sm:$0xff]  ;;  %v11791_v58 = vcombine.high %v624_v8, %v628_v5  ;;  %v488_v40 = vld [vmem:[#allocation5 + $0x990] sm:$0xff]  ;;  %8961 = vmatprep.mubr.bf16.mxu1 %v16990_v22 }
 0x2a5   :  { %8693 = vmatmul.mubr.bf16.gmra.mxu0 %v16987_v53  ;;  %v8018_v60 = vpop.f32.mrf.mxu0  ;;  %8959 = vmatprep.subr.bf16.mxu1 %v11543_v15  ;;  %v616_v47 = vld [vmem:[#allocation5 + $0xd90] sm:$0xff]  ;;  %v11662_v6 = vcombine.low %v496_v32, %v500_v2  ;;  %v11790_v15 = vcombine.low %v624_v8, %v628_v5  ;;  %v16992_v5 = vld [vmem:[#allocation15_spill] sm:$0xff] }
 0x2a6   :  { %8845 = vmatpush2.bf16.msra.mxu0 %v11422_v31  ;;  %v14185_v19 = vadd.f32 %v8129_v27, %v8017_v35  ;;  %v8019_v1 = vadd.f32 %v8018_v60, %v14056_v9  ;;  %v8131_v53 = vpop.f32.mrf.mxu1  ;;  %8848 = vmatprep.mubr.bf16.mxu0 %v16989_v33  ;;  %v620_v28 = vld [vmem:[#allocation5 + $0xdb0] sm:$0xff]  ;;  %v11655_v35 = vcombine.high %v488_v40, %v492_v26 }
 0x2a7   :  { %8846 = vmatprep.subr.bf16.mxu0 %v11415_v54  ;;  %v8020_v57 = vpop.f32.mrf.mxu0  ;;  %v11783_v22 = vcombine.high %v616_v47, %v620_v28 }
 0x2a8   :  { %v14190_v31 = vadd.f32 %v8131_v53, %v8019_v1  ;;  %v8021_v56 = vadd.f32 %v8020_v57, %v14046_v44  ;;  %v8133_v30 = vpop.f32.mrf.mxu1  ;;  %8960 = vmatpush2.bf16.msra.mxu1 %v11542_v41  ;;  %v484_v53 = vld [vmem:[#allocation5 + $0x970] sm:$0xff]  ;;  %v11782_v41 = vcombine.low %v616_v47, %v620_v28 }
 0x2a9   :  { %v8022_v54 = vpop.f32.mrf.mxu0  ;;  %9155 = vmatprep.subr.bf16.mxu1 %v11791_v58  ;;  %v608_v57 = vld [vmem:[#allocation5 + $0xd50] sm:$0xff] }
 0x2aa   :  { %8847 = vmatpush2.bf16.msra.mxu0 %v11414_v7  ;;  %v14193_v27 = vadd.f32 %v8133_v30, %v8021_v56  ;;  %v8023_v60 = vadd.f32 %v8022_v54, %v14056_v9  ;;  %v8135_v33 = vpop.f32.mrf.mxu1  ;;  %v612_v44 = vld [vmem:[#allocation5 + $0xd70] sm:$0xff]  ;;  %v11654_v7 = vcombine.low %v488_v40, %v492_v26 }
 0x2ab   :  { %9042 = vmatprep.subr.bf16.mxu0 %v11663_v62  ;;  %v8172_v1 = vpop.f32.mrf.mxu0  ;;  %8962 = vmatmul.mubr.bf16.vlgmr.msra.gmra.mxu1 %v16992_v5  ;;  %v11647_v62 = vcombine.high %v480_v52, %v484_v53  ;;  %v11775_v54 = vcombine.high %v608_v57, %v612_v44  ;;  %v16994_v5 = vld [vmem:[#allocation17_spill] sm:$0xff] }
 0x2ac   :  { %v14197_v32 = vadd.f32 %v8135_v33, %v8023_v60  ;;  %v8173_v2 = vadd.f32 %v8172_v1, %v14072_v50  ;;  %v8285_v8 = vpop.f32.mrf.mxu1  ;;  %9156 = vmatpush1.bf16.msra.mxu1 %v11790_v15  ;;  %v16993_v33 = vld [vmem:[#allocation16_spill] sm:$0xff]  ;;  %v472_v50 = vld [vmem:[#allocation5 + $0x910] sm:$0xff]  ;;  %8971 = vmatprep.mubr.bf16.mxu1 %v16994_v5  ;;  %v11646_v15 = vcombine.low %v480_v52, %v484_v53 }
 0x2ad   :  { %8849 = vmatmul.mubr.bf16.vlgmr.msra.gmra.mxu0 %v16991_v10  ;;  %v8174_v9 = vpop.f32.mrf.mxu0  ;;  %9157 = vmatprep.subr.bf16.mxu1 %v11783_v22  ;;  %v476_v60 = vld [vmem:[#allocation5 + $0x930] sm:$0xff]  ;;  %v11774_v22 = vcombine.low %v608_v57, %v612_v44  ;;  %v16995_v10 = vld [vmem:[#allocation18_spill] sm:$0xff]  ;;  %v16996_v44 = vld [vmem:[#allocation19_spill] sm:$0xff] }
 0x2ae   :  { %9043 = vmatpush1.bf16.msra.mxu0 %v11662_v6  ;;  %v14201_v58 = vadd.f32 %v8285_v8, %v8173_v2  ;;  %v8175_v56 = vadd.f32 %v8174_v9, %v14077_v46  ;;  %v8287_v30 = vpop.f32.mrf.mxu1  ;;  %8858 = vmatprep.mubr.bf16.mxu0 %v16993_v33  ;;  %v600_v26 = vld [vmem:[#allocation5 + $0xd10] sm:$0xff] }
 0x2af   :  { %9044 = vmatprep.subr.bf16.mxu0 %v11655_v35  ;;  %v8176_v1 = vpop.f32.mrf.mxu0  ;;  %v604_v40 = vld [vmem:[#allocation5 + $0xd30] sm:$0xff]  ;;  %v11639_v35 = vcombine.high %v472_v50, %v476_v60 }
 0x2b0   :  { %v14206_v6 = vadd.f32 %v8287_v30, %v8175_v56  ;;  %v8177_v47 = vadd.f32 %v8176_v1, %v14081_v25  ;;  %v8289_v28 = vpop.f32.mrf.mxu1  ;;  %9158 = vmatpush1.bf16.msra.mxu1 %v11782_v41  ;;  %v11767_v5 = vcombine.high %v600_v26, %v604_v40  ;;  %v464_v33 = vld [vmem:[#allocation5 + $0x8d0] sm:$0xff]  ;;  %v11638_v41 = vcombine.low %v472_v50, %v476_v60 }
 0x2b1   :  { %v8178_v46 = vpop.f32.mrf.mxu0  ;;  %9159 = vmatprep.subr.bf16.mxu1 %v11775_v54  ;;  %v468_v56 = vld [vmem:[#allocation5 + $0x8f0] sm:$0xff] }
 0x2b2   :  { %9045 = vmatpush1.bf16.msra.mxu0 %v11654_v7  ;;  %v14209_v2 = vadd.f32 %v8289_v28, %v8177_v47  ;;  %v8179_v8 = vadd.f32 %v8178_v46, %v14085_v34  ;;  %v8291_v9 = vpop.f32.mrf.mxu1  ;;  %v592_v25 = vld [vmem:[#allocation5 + $0xcd0] sm:$0xff]  ;;  %v11631_v54 = vcombine.high %v464_v33, %v468_v56  ;;  %v16997_v46 = vld [vmem:[#allocation20_spill] sm:$0xff] }
 0x2b3   :  { %9046 = vmatprep.subr.bf16.mxu0 %v11647_v62  ;;  %v8182_v30 = vpop.f32.mrf.mxu0  ;;  %v596_v7 = vld [vmem:[#allocation5 + $0xcf0] sm:$0xff]  ;;  %8972 = vmatmul.mubr.bf16.gmra.mxu1 %v16996_v44  ;;  %v11766_v62 = vcombine.low %v600_v26, %v604_v40 }
 0x2b4   :  { %v14213_v52 = vadd.f32 %v8291_v9, %v8179_v8  ;;  %v8183_v53 = vadd.f32 %v8182_v30, %v14089_v61  ;;  %v8295_v57 = vpop.f32.mrf.mxu1  ;;  %9160 = vmatpush1.bf16.msra.mxu1 %v11774_v22  ;;  %v11759_v8 = vcombine.high %v592_v25, %v596_v7  ;;  %v456_v61 = vld [vmem:[#allocation5 + $0x890] sm:$0xff]  ;;  %v11630_v22 = vcombine.low %v464_v33, %v468_v56 }
 0x2b5   :  { %8859 = vmatmul.mubr.bf16.gmra.mxu0 %v16995_v10  ;;  %v8184_v34 = vpop.f32.mrf.mxu0  ;;  %9161 = vmatprep.subr.bf16.mxu1 %v11767_v5  ;;  %v460_v9 = vld [vmem:[#allocation5 + $0x8b0] sm:$0xff]  ;;  %v11758_v5 = vcombine.low %v592_v25, %v596_v7  ;;  %v16999_v10 = vld [vmem:[#allocation22_spill] sm:$0xff]  ;;  %v17000_v7 = vld [vmem:[#allocation23_spill] sm:$0xff] }
 0x2b6   :  { %9047 = vmatpush1.bf16.msra.mxu0 %v11646_v15  ;;  %v14217_v1 = vadd.f32 %v8295_v57, %v8183_v53  ;;  %v8185_v47 = vadd.f32 %v8184_v34, %v14094_v38  ;;  %v8297_v28 = vpop.f32.mrf.mxu1  ;;  %8868 = vmatprep.mubr.bf16.mxu0 %v16997_v46  ;;  %v16998_v44 = vld [vmem:[#allocation21_spill] sm:$0xff] }
 0x2b7   :  { %9048 = vmatprep.subr.bf16.mxu0 %v11639_v35  ;;  %v8186_v30 = vpop.f32.mrf.mxu0  ;;  %8981 = vmatprep.mubr.bf16.mxu1 %v16998_v44  ;;  %v584_v50 = vld [vmem:[#allocation5 + $0xc90] sm:$0xff]  ;;  %v11623_v35 = vcombine.high %v456_v61, %v460_v9 }
 0x2b8   :  { %v588_v60 = vld [vmem:[#allocation5 + $0xcb0] sm:$0xff]  ;;  %v14222_v15 = vadd.f32 %v8297_v28, %v8185_v47  ;;  %v8187_v26 = vadd.f32 %v8186_v30, %v14097_v63  ;;  %v8299_v40 = vpop.f32.mrf.mxu1  ;;  %9162 = vmatpush1.bf16.msra.mxu1 %v11766_v62  ;;  %v11622_v62 = vcombine.low %v456_v61, %v460_v9 }
 0x2b9   :  { %v8188_v38 = vpop.f32.mrf.mxu0  ;;  %9163 = vmatprep.subr.bf16.mxu1 %v11759_v8  ;;  %v11751_v44 = vcombine.high %v584_v50, %v588_v60  ;;  %v448_v46 = vld [vmem:[#allocation5 + $0x850] sm:$0xff] }
 0x2ba   :  { %9049 = vmatpush1.bf16.msra.mxu0 %v11638_v41  ;;  %v14225_v53 = vadd.f32 %v8299_v40, %v8187_v26  ;;  %v8189_v57 = vadd.f32 %v8188_v38, %v14101_v18  ;;  %v8301_v34 = vpop.f32.mrf.mxu1  ;;  %v452_v47 = vld [vmem:[#allocation5 + $0x870] sm:$0xff]  ;;  %v17001_v38 = vld [vmem:[#allocation24_spill] sm:$0xff] }
 0x2bb   :  { %9050 = vmatprep.subr.bf16.mxu0 %v11631_v54  ;;  %v8192_v28 = vpop.f32.mrf.mxu0  ;;  %v576_v63 = vld [vmem:[#allocation5 + $0xc50] sm:$0xff]  ;;  %8982 = vmatmul.mubr.bf16.gmra.mxu1 %v17000_v7  ;;  %v11750_v54 = vcombine.low %v584_v50, %v588_v60  ;;  %v11615_v8 = vcombine.high %v448_v46, %v452_v47 }
 0x2bc   :  { %v580_v41 = vld [vmem:[#allocation5 + $0xc70] sm:$0xff]  ;;  %v14229_v33 = vadd.f32 %v8301_v34, %v8189_v57  ;;  %v8193_v56 = vadd.f32 %v8192_v28, %v14105_v12  ;;  %v8305_v25 = vpop.f32.mrf.mxu1  ;;  %9164 = vmatpush1.bf16.msra.mxu1 %v11758_v5  ;;  %v11614_v5 = vcombine.low %v448_v46, %v452_v47 }
 0x2bd   :  { %8869 = vmatmul.mubr.bf16.gmra.mxu0 %v16999_v10  ;;  %v8194_v18 = vpop.f32.mrf.mxu0  ;;  %9165 = vmatprep.subr.bf16.mxu1 %v11751_v44  ;;  %v11743_v57 = vcombine.high %v576_v63, %v580_v41  ;;  %v440_v12 = vld [vmem:[#allocation5 + $0x810] sm:$0xff]  ;;  %v11742_v44 = vcombine.low %v576_v63, %v580_v41  ;;  %v17003_v10 = vld [vmem:[#allocation26_spill] sm:$0xff]  ;;  %v17004_v41 = vld [vmem:[#allocation27_spill] sm:$0xff] }
 0x2be   :  { %9051 = vmatpush1.bf16.msra.mxu0 %v11630_v22  ;;  %v14233_v30 = vadd.f32 %v8305_v25, %v8193_v56  ;;  %v8195_v26 = vadd.f32 %v8194_v18, %v14110_v16  ;;  %v8307_v40 = vpop.f32.mrf.mxu1  ;;  %8878 = vmatprep.mubr.bf16.mxu0 %v17001_v38  ;;  %v444_v34 = vld [vmem:[#allocation5 + $0x830] sm:$0xff] }
 0x2bf   :  { %9052 = vmatprep.subr.bf16.mxu0 %v11623_v35  ;;  %v8196_v28 = vpop.f32.mrf.mxu0  ;;  %v17002_v7 = vld [vmem:[#allocation25_spill] sm:$0xff]  ;;  %v11607_v35 = vcombine.high %v440_v12, %v444_v34 }
 0x2c0   :  { %8991 = vmatprep.mubr.bf16.mxu1 %v17002_v7  ;;  %v568_v61 = vld [vmem:[#allocation5 + $0xc10] sm:$0xff]  ;;  %v14238_v22 = vadd.f32 %v8307_v40, %v8195_v26  ;;  %v8197_v50 = vadd.f32 %v8196_v28, %v14113_v11  ;;  %v8309_v60 = vpop.f32.mrf.mxu1  ;;  %9166 = vmatpush1.bf16.msra.mxu1 %v11750_v54  ;;  %v11606_v54 = vcombine.low %v440_v12, %v444_v34 }
 0x2c1   :  { %v572_v9 = vld [vmem:[#allocation5 + $0xc30] sm:$0xff]  ;;  %v8198_v16 = vpop.f32.mrf.mxu0  ;;  %9167 = vmatprep.subr.bf16.mxu1 %v11743_v57 }
 0x2c2   :  { %9053 = vmatpush1.bf16.msra.mxu0 %v11622_v62  ;;  %v14241_v56 = vadd.f32 %v8309_v60, %v8197_v50  ;;  %v8199_v25 = vadd.f32 %v8198_v16, %v14117_v39  ;;  %v8311_v18 = vpop.f32.mrf.mxu1  ;;  %v11735_v7 = vcombine.high %v568_v61, %v572_v9  ;;  %v560_v38 = vld [vmem:[#allocation5 + $0xbd0] sm:$0xff]  ;;  %v17006_v16 = vld [vmem:[#allocation28_spill] sm:$0xff] }
 0x2c3   :  { %9054 = vmatprep.subr.bf16.mxu0 %v11615_v8  ;;  %v564_v26 = vld [vmem:[#allocation5 + $0xbf0] sm:$0xff]  ;;  %v8202_v40 = vpop.f32.mrf.mxu0  ;;  %8992 = vmatmul.mubr.bf16.gmra.mxu1 %v17004_v41  ;;  %v11734_v8 = vcombine.low %v568_v61, %v572_v9 }
 0x2c4   :  { %v688_v11 = vld [vmem:[#allocation5 + $0xfd0] sm:$0xff]  ;;  %v14245_v46 = vadd.f32 %v8311_v18, %v8199_v25  ;;  %v8203_v47 = vadd.f32 %v8202_v40, %v14121_v17  ;;  %v8315_v63 = vpop.f32.mrf.mxu1  ;;  %9168 = vmatpush1.bf16.msra.mxu1 %v11742_v44  ;;  %v11727_v57 = vcombine.high %v560_v38, %v564_v26  ;;  %v11726_v44 = vcombine.low %v560_v38, %v564_v26 }
 0x2c5   :  { %8879 = vmatmul.mubr.bf16.gmra.mxu0 %v17003_v10  ;;  %v692_v62 = vld [vmem:[#allocation5 + $0xff0] sm:$0xff]  ;;  %v8204_v39 = vpop.f32.mrf.mxu0  ;;  %9169 = vmatprep.subr.bf16.mxu1 %v11735_v7  ;;  %v17010_v10 = vld [vmem:[#allocation30_spill] sm:$0xff] }
 0x2c6   :  { %9055 = vmatpush1.bf16.msra.mxu0 %v11614_v5  ;;  %v14249_v28 = vadd.f32 %v8315_v63, %v8203_v47  ;;  %v8205_v50 = vadd.f32 %v8204_v39, %v14126_v20  ;;  %v8317_v60 = vpop.f32.mrf.mxu1  ;;  %8888 = vmatprep.mubr.bf16.mxu0 %v17006_v16  ;;  %v11855_v25 = vcombine.high %v688_v11, %v692_v62  ;;  %v552_v17 = vld [vmem:[#allocation5 + $0xb90] sm:$0xff] }
 0x2c7   :  { %9056 = vmatprep.subr.bf16.mxu0 %v11607_v35  ;;  %v556_v18 = vld [vmem:[#allocation5 + $0xbb0] sm:$0xff]  ;;  %v8206_v40 = vpop.f32.mrf.mxu0  ;;  %v11854_v7 = vcombine.low %v688_v11, %v692_v62  ;;  %v17012_v62 = vld [vmem:[#allocation31_spill] sm:$0xff] }
 0x2c8   :  { %17005 = vst [vmem:[#allocation80_spill] sm:$0xff] %v14249_v28  ;;  %v17007_v41 = vld [vmem:[#allocation29_spill] sm:$0xff]  ;;  %v14254_v5 = vadd.f32 %v8317_v60, %v8205_v50  ;;  %v8207_v61 = vadd.f32 %v8206_v40, %v14129_v55  ;;  %v8319_v9 = vpop.f32.mrf.mxu1  ;;  %9170 = vmatpush1.bf16.msra.mxu1 %v11734_v8  ;;  %v11719_v35 = vcombine.high %v552_v17, %v556_v18 }
 0x2c9   :  { %9001 = vmatprep.mubr.bf16.mxu1 %v17007_v41  ;;  %v680_v12 = vld [vmem:[#allocation5 + $0xf90] sm:$0xff]  ;;  %v8208_v20 = vpop.f32.mrf.mxu0  ;;  %9171 = vmatprep.subr.bf16.mxu1 %v11855_v25  ;;  %v11718_v8 = vcombine.low %v552_v17, %v556_v18 }
 0x2ca   :  { %v684_v34 = vld [vmem:[#allocation5 + $0xfb0] sm:$0xff]  ;;  %17008 = vst [vmem:[#allocation81_spill] sm:$0xff] %v14254_v5  ;;  %9057 = vmatpush1.bf16.msra.mxu0 %v11606_v54  ;;  %v14257_v47 = vadd.f32 %v8319_v9, %v8207_v61  ;;  %v8209_v63 = vadd.f32 %v8208_v20, %v14133_v13  ;;  %v8321_v39 = vpop.f32.mrf.mxu1  ;;  %v17014_v20 = vld [vmem:[#allocation32_spill] sm:$0xff] }
 0x2cb   :  { %9058 = vmatprep.subr.bf16.mxu0 %v11727_v57  ;;  %v11847_v41 = vcombine.high %v680_v12, %v684_v34  ;;  %v544_v16 = vld [vmem:[#allocation5 + $0xb50] sm:$0xff]  ;;  %v8212_v60 = vpop.f32.mrf.mxu0  ;;  %9002 = vmatmul.mubr.bf16.gmra.mxu1 %v17012_v62  ;;  %v11846_v57 = vcombine.low %v680_v12, %v684_v34 }
 0x2cc   :  { %17009 = vst [vmem:[#allocation82_spill] sm:$0xff] %v14257_v47  ;;  %v548_v50 = vld [vmem:[#allocation5 + $0xb70] sm:$0xff]  ;;  %v14261_v38 = vadd.f32 %v8321_v39, %v8209_v63  ;;  %v8213_v26 = vadd.f32 %v8212_v60, %v14137_v36  ;;  %v8325_v11 = vpop.f32.mrf.mxu1  ;;  %9172 = vmatpush2.bf16.msra.mxu1 %v11854_v7 }
 0x2cd   :  { %8889 = vmatmul.mubr.bf16.gmra.mxu0 %v17010_v10  ;;  %v672_v55 = vld [vmem:[#allocation5 + $0xf50] sm:$0xff]  ;;  %v8214_v13 = vpop.f32.mrf.mxu0  ;;  %v11711_v25 = vcombine.high %v544_v16, %v548_v50  ;;  %9173 = vmatprep.subr.bf16.mxu1 %v11847_v41  ;;  %v11710_v7 = vcombine.low %v544_v16, %v548_v50  ;;  %v17018_v10 = vld [vmem:[#allocation34_spill] sm:$0xff] }
 0x2ce   :  { %v676_v54 = vld [vmem:[#allocation5 + $0xf70] sm:$0xff]  ;;  %17011 = vst [vmem:[#allocation83_spill] sm:$0xff] %v14261_v38  ;;  %9059 = vmatpush2.bf16.msra.mxu0 %v11726_v44  ;;  %v14265_v40 = vadd.f32 %v8325_v11, %v8213_v26  ;;  %v8215_v61 = vadd.f32 %v8214_v13, %v14142_v48  ;;  %v8327_v9 = vpop.f32.mrf.mxu1  ;;  %8898 = vmatprep.mubr.bf16.mxu0 %v17014_v20 }
 0x2cf   :  { %9060 = vmatprep.subr.bf16.mxu0 %v11719_v35  ;;  %v11839_v63 = vcombine.high %v672_v55, %v676_v54  ;;  %v536_v36 = vld [vmem:[#allocation5 + $0xb10] sm:$0xff]  ;;  %v8216_v60 = vpop.f32.mrf.mxu0  ;;  %v11838_v41 = vcombine.low %v672_v55, %v676_v54  ;;  %v17020_v54 = vld [vmem:[#allocation35_spill] sm:$0xff] }
 0x2d0   :  { %17013 = vst [vmem:[#allocation159_spill] sm:$0xff] %v14265_v40  ;;  %v540_v39 = vld [vmem:[#allocation5 + $0xb30] sm:$0xff]  ;;  %v14270_v44 = vadd.f32 %v8327_v9, %v8215_v61  ;;  %v8217_v12 = vadd.f32 %v8216_v60, %v14145_v21  ;;  %v8329_v34 = vpop.f32.mrf.mxu1  ;;  %9174 = vmatpush2.bf16.msra.mxu1 %v11846_v57 }
 0x2d1   :  { %v17015_v62 = vld [vmem:[#allocation33_spill] sm:$0xff]  ;;  %v8218_v48 = vpop.f32.mrf.mxu0  ;;  %v11703_v35 = vcombine.high %v536_v36, %v540_v39  ;;  %9175 = vmatprep.subr.bf16.mxu1 %v11839_v63  ;;  %v11702_v57 = vcombine.low %v536_v36, %v540_v39 }
 0x2d2   :  { %9011 = vmatprep.mubr.bf16.mxu1 %v17015_v62  ;;  %v664_v17 = vld [vmem:[#allocation5 + $0xf10] sm:$0xff]  ;;  %17016 = vst [vmem:[#allocation129_spill] sm:$0xff] %v14270_v44  ;;  %9061 = vmatpush2.bf16.msra.mxu0 %v11718_v8  ;;  %v14273_v26 = vadd.f32 %v8329_v34, %v8217_v12  ;;  %v8219_v11 = vadd.f32 %v8218_v48, %v14149_v42  ;;  %v8331_v13 = vpop.f32.mrf.mxu1  ;;  %v17022_v48 = vld [vmem:[#allocation36_spill] sm:$0xff] }
 0x2d3   :  { %v668_v18 = vld [vmem:[#allocation5 + $0xf30] sm:$0xff]  ;;  %9062 = vmatprep.subr.bf16.mxu0 %v11711_v25  ;;  %v8222_v9 = vpop.f32.mrf.mxu0  ;;  %9012 = vmatmul.mubr.bf16.gmra.mxu1 %v17020_v54 }
 0x2d4   :  { %17017 = vst [vmem:[#allocation161_spill] sm:$0xff] %v14273_v26  ;;  %v11831_v62 = vcombine.high %v664_v17, %v668_v18  ;;  %v528_v20 = vld [vmem:[#allocation5 + $0xad0] sm:$0xff]  ;;  %v14277_v16 = vadd.f32 %v8331_v13, %v8219_v11  ;;  %v8223_v50 = vadd.f32 %v8222_v9, %v14153_v14  ;;  %v8335_v55 = vpop.f32.mrf.mxu1  ;;  %9176 = vmatpush2.bf16.msra.mxu1 %v11838_v41 }
 0x2d5   :  { %v532_v61 = vld [vmem:[#allocation5 + $0xaf0] sm:$0xff]  ;;  %8899 = vmatmul.mubr.bf16.gmra.mxu0 %v17018_v10  ;;  %v8224_v42 = vpop.f32.mrf.mxu0  ;;  %v11830_v25 = vcombine.low %v664_v17, %v668_v18  ;;  %v17026_v10 = vld [vmem:[#allocation38_spill] sm:$0xff] }
 0x2d6   :  { %v656_v21 = vld [vmem:[#allocation5 + $0xed0] sm:$0xff]  ;;  %17019 = vst [vmem:[#allocation160_spill] sm:$0xff] %v14277_v16  ;;  %9063 = vmatpush2.bf16.msra.mxu0 %v11710_v7  ;;  %v11695_v63 = vcombine.high %v528_v20, %v532_v61  ;;  %v14281_v60 = vadd.f32 %v8335_v55, %v8223_v50  ;;  %v8225_v12 = vadd.f32 %v8224_v42, %v14158_v29  ;;  %v8337_v34 = vpop.f32.mrf.mxu1 }
 0x2d7   :  { %v660_v8 = vld [vmem:[#allocation5 + $0xef0] sm:$0xff]  ;;  %9064 = vmatprep.subr.bf16.mxu0 %v11703_v35  ;;  %9177 = vmatprep.subr.bf16.mxu1 %v11831_v62  ;;  %v8226_v9 = vpop.f32.mrf.mxu0  ;;  %v11694_v41 = vcombine.low %v528_v20, %v532_v61 }
 0x2d8   :  { %17021 = vst [vmem:[#allocation132_spill] sm:$0xff] %v14281_v60  ;;  %8908 = vmatprep.mubr.bf16.mxu0 %v17022_v48  ;;  %v11823_v11 = vcombine.high %v656_v21, %v660_v8  ;;  %v520_v14 = vld [vmem:[#allocation5 + $0xa90] sm:$0xff]  ;;  %v14286_v7 = vadd.f32 %v8337_v34, %v8225_v12  ;;  %v8227_v17 = vadd.f32 %v8226_v9, %v14161_v37  ;;  %v8339_v18 = vpop.f32.mrf.mxu1 }
 0x2d9   :  { %v524_v13 = vld [vmem:[#allocation5 + $0xab0] sm:$0xff]  ;;  %9178 = vmatpush2.bf16.msra.mxu1 %v11830_v25  ;;  %v8228_v29 = vpop.f32.mrf.mxu0  ;;  %v11822_v62 = vcombine.low %v656_v21, %v660_v8  ;;  %v17028_v8 = vld [vmem:[#allocation39_spill] sm:$0xff] }
 0x2da   :  { %v17023_v54 = vld [vmem:[#allocation37_spill] sm:$0xff]  ;;  %17024 = vst [vmem:[#allocation163_spill] sm:$0xff] %v14286_v7  ;;  %9065 = vmatpush2.bf16.msra.mxu0 %v11702_v57  ;;  %v11687_v35 = vcombine.high %v520_v14, %v524_v13  ;;  %v14289_v50 = vadd.f32 %v8339_v18, %v8227_v17  ;;  %v8229_v55 = vadd.f32 %v8228_v29, %v14165_v23  ;;  %v8341_v42 = vpop.f32.mrf.mxu1  ;;  %v17030_v29 = vld [vmem:[#allocation40_spill] sm:$0xff] }
 0x2db   :  { %9021 = vmatprep.mubr.bf16.mxu1 %v17023_v54  ;;  %v648_v36 = vld [vmem:[#allocation5 + $0xe90] sm:$0xff]  ;;  %9066 = vmatprep.subr.bf16.mxu0 %v11695_v63  ;;  %v8232_v34 = vpop.f32.mrf.mxu0  ;;  %v11686_v25 = vcombine.low %v520_v14, %v524_v13 }
 0x2dc   :  { %v652_v39 = vld [vmem:[#allocation5 + $0xeb0] sm:$0xff]  ;;  %17025 = vst [vmem:[#allocation162_spill] sm:$0xff] %v14289_v50  ;;  %9179 = vmatprep.subr.bf16.mxu1 %v11823_v11  ;;  %v14293_v20 = vadd.f32 %v8341_v42, %v8229_v55  ;;  %v8233_v61 = vadd.f32 %v8232_v34, %v14169_v24  ;;  %v8345_v21 = vpop.f32.mrf.mxu1  ;;  %9022 = vmatmul.mubr.bf16.gmra.mxu1 %v17028_v8 }
 0x2dd   :  { %v11815_v54 = vcombine.high %v648_v36, %v652_v39  ;;  %v512_v48 = vld [vmem:[#allocation5 + $0xa50] sm:$0xff]  ;;  %8909 = vmatmul.mubr.bf16.gmra.mxu0 %v17026_v10  ;;  %9180 = vmatpush2.bf16.msra.mxu1 %v11822_v62  ;;  %v8234_v23 = vpop.f32.mrf.mxu0  ;;  %v11814_v63 = vcombine.low %v648_v36, %v652_v39  ;;  %v17034_v10 = vld [vmem:[#allocation42_spill] sm:$0xff] }
 0x2de   :  { %v516_v12 = vld [vmem:[#allocation5 + $0xa70] sm:$0xff]  ;;  %17027 = vst [vmem:[#allocation133_spill] sm:$0xff] %v14293_v20  ;;  %9067 = vmatpush2.bf16.msra.mxu0 %v11694_v41  ;;  %v14297_v9 = vadd.f32 %v8345_v21, %v8233_v61  ;;  %v8235_v17 = vadd.f32 %v8234_v23, %v14174_v51  ;;  %v8347_v18 = vpop.f32.mrf.mxu1  ;;  %8918 = vmatprep.mubr.bf16.mxu0 %v17030_v29 }
 0x2df   :  { %v640_v37 = vld [vmem:[#allocation5 + $0xe50] sm:$0xff]  ;;  %9068 = vmatprep.subr.bf16.mxu0 %v11687_v35  ;;  %v11679_v11 = vcombine.high %v512_v48, %v516_v12  ;;  %9181 = vmatprep.subr.bf16.mxu1 %v11815_v54  ;;  %v8236_v34 = vpop.f32.mrf.mxu0  ;;  %v11678_v62 = vcombine.low %v512_v48, %v516_v12 }
 0x2e0   :  { %v644_v57 = vld [vmem:[#allocation5 + $0xe70] sm:$0xff]  ;;  %17029 = vst [vmem:[#allocation165_spill] sm:$0xff] %v14297_v9  ;;  %v14302_v41 = vadd.f32 %v8347_v18, %v8235_v17  ;;  %v8237_v36 = vadd.f32 %v8236_v34, %v14177_v3  ;;  %v8349_v39 = vpop.f32.mrf.mxu1 }
 0x2e1   :  { %v11807_v55 = vcombine.high %v640_v37, %v644_v57  ;;  %v504_v24 = vld [vmem:[#allocation5 + $0xa10] sm:$0xff]  ;;  %9182 = vmatpush2.bf16.msra.mxu1 %v11814_v63  ;;  %v8238_v51 = vpop.f32.mrf.mxu0  ;;  %v11806_v54 = vcombine.low %v640_v37, %v644_v57  ;;  %v17036_v57 = vld [vmem:[#allocation43_spill] sm:$0xff] }
 0x2e2   :  { %v508_v42 = vld [vmem:[#allocation5 + $0xa30] sm:$0xff]  ;;  %17032 = vst [vmem:[#allocation135_spill] sm:$0xff] %v14302_v41  ;;  %9069 = vmatpush2.bf16.msra.mxu0 %v11686_v25  ;;  %v14305_v61 = vadd.f32 %v8349_v39, %v8237_v36  ;;  %v8239_v21 = vadd.f32 %v8238_v51, %v14181_v59  ;;  %v8351_v23 = vpop.f32.mrf.mxu1  ;;  %v17038_v51 = vld [vmem:[#allocation44_spill] sm:$0xff] }
 0x2e3   :  { %v17031_v8 = vld [vmem:[#allocation41_spill] sm:$0xff]  ;;  %9070 = vmatprep.subr.bf16.mxu0 %v11679_v11  ;;  %v11671_v35 = vcombine.high %v504_v24, %v508_v42  ;;  %9183 = vmatprep.subr.bf16.mxu1 %v11807_v55  ;;  %v8242_v18 = vpop.f32.mrf.mxu0  ;;  %v11670_v63 = vcombine.low %v504_v24, %v508_v42 }
 0x2e4   :  { %9031 = vmatprep.mubr.bf16.mxu1 %v17031_v8  ;;  %v632_v14 = vld [vmem:[#allocation5 + $0xe10] sm:$0xff]  ;;  %17033 = vst [vmem:[#allocation167_spill] sm:$0xff] %v14305_v61  ;;  %v14309_v48 = vadd.f32 %v8351_v23, %v8239_v21  ;;  %v8243_v12 = vadd.f32 %v8242_v18, %v14185_v19  ;;  %v8355_v37 = vpop.f32.mrf.mxu1 }
 0x2e5   :  { %v636_v13 = vld [vmem:[#allocation5 + $0xe30] sm:$0xff]  ;;  %8919 = vmatmul.mubr.bf16.gmra.mxu0 %v17034_v10  ;;  %9032 = vmatmul.mubr.bf16.gmra.mxu1 %v17036_v57  ;;  %v8244_v59 = vpop.f32.mrf.mxu0 }
 0x2e6   :  { %v11799_v8 = vcombine.high %v632_v14, %v636_v13  ;;  %v752_v29 = vld [vmem:[#allocation5 + $0x11d0] sm:$0xff]  ;;  %17035 = vst [vmem:[#allocation164_spill] sm:$0xff] %v14309_v48  ;;  %9071 = vmatpush2.bf16.msra.mxu0 %v11678_v62  ;;  %9184 = vmatpush2.bf16.msra.mxu1 %v11806_v54  ;;  %v11798_v11 = vcombine.low %v632_v14, %v636_v13  ;;  %v8357_v39 = vpop.f32.mrf.mxu1 }
 0x2e7   :  { %v756_v17 = vld [vmem:[#allocation5 + $0x11f0] sm:$0xff]  ;;  %9072 = vmatprep.subr.bf16.mxu0 %v11671_v35  ;;  %v14313_v34 = vadd.f32 %v8355_v37, %v8243_v12  ;;  %v8245_v36 = vadd.f32 %v8244_v59, %v14190_v31  ;;  %9074 = vmatprep.mubr.bf16.mxu0 %v17038_v51  ;;  %v8246_v18 = vpop.f32.mrf.mxu0 }
 0x2e8   :  { %v880_v3 = vld [vmem:[#allocation5 + $0x15d0] sm:$0xff]  ;;  %v11919_v55 = vcombine.high %v752_v29, %v756_v17  ;;  %9185 = vmatprep.subr.bf16.mxu1 %v11799_v8  ;;  %v8247_v14 = vadd.f32 %v8246_v18, %v14193_v27  ;;  %v8359_v13 = vpop.f32.mrf.mxu1  ;;  %v11918_v54 = vcombine.low %v752_v29, %v756_v17  ;;  %v17042_v27 = vld [vmem:[#allocation46_spill] sm:$0xff] }
 0x2e9   :  { %v884_v25 = vld [vmem:[#allocation5 + $0x15f0] sm:$0xff]  ;;  %17037 = vst [vmem:[#allocation166_spill] sm:$0xff] %v14313_v34  ;;  %v14318_v62 = vadd.f32 %v8357_v39, %v8245_v36  ;;  %v8248_v31 = vpop.f32.mrf.mxu0 }
 0x2ea   :  { %v12047_v21 = vcombine.high %v880_v3, %v884_v25  ;;  %v744_v19 = vld [vmem:[#allocation5 + $0x1190] sm:$0xff]  ;;  %9073 = vmatpush2.bf16.msra.mxu0 %v11670_v63  ;;  %9186 = vmatpush2.bf16.msra.mxu1 %v11798_v11  ;;  %v12046_v8 = vcombine.low %v880_v3, %v884_v25  ;;  %v14321_v12 = vadd.f32 %v8359_v13, %v8247_v14  ;;  %v8361_v59 = vpop.f32.mrf.mxu1  ;;  %v17044_v3 = vld [vmem:[#allocation47_spill] sm:$0xff]  ;;  %v17045_v14 = vld [vmem:[#allocation48_spill] sm:$0xff] }
 0x2eb   :  { %v748_v23 = vld [vmem:[#allocation5 + $0x11b0] sm:$0xff]  ;;  %17040 = vst [vmem:[#allocation137_spill] sm:$0xff] %v14318_v62  ;;  %9268 = vmatprep.subr.bf16.mxu0 %v11919_v55  ;;  %v8249_v37 = vadd.f32 %v8248_v31, %v14197_v32  ;;  %v14324_v39 = vpop.f32.mrf.mxu0 }
 0x2ec   :  { %v17039_v57 = vld [vmem:[#allocation45_spill] sm:$0xff]  ;;  %v11911_v35 = vcombine.high %v744_v19, %v748_v23  ;;  %17041 = vst [vmem:[#allocation169_spill] sm:$0xff] %v14321_v12  ;;  %9381 = vmatprep.subr.bf16.mxu1 %v12047_v21  ;;  %v14329_v11 = vpop.f32.mrf.mxu1  ;;  %v11910_v25 = vcombine.low %v744_v19, %v748_v23 }
 0x2ed   :  { %9187 = vmatprep.mubr.bf16.mxu1 %v17039_v57  ;;  %v872_v24 = vld [vmem:[#allocation5 + $0x1590] sm:$0xff]  ;;  %9075 = vmatmul.mubr.bf16.vlgmr.msra.gmra.mxu0 %v17042_v27  ;;  %v14327_v17 = vadd.f32 %v8361_v59, %v8249_v37  ;;  %v14332_v32 = vpop.f32.mrf.mxu0 }
 0x2ee   :  { %v876_v42 = vld [vmem:[#allocation5 + $0x15b0] sm:$0xff]  ;;  %9188 = vmatmul.mubr.bf16.vlgmr.msra.gmra.mxu1 %v17044_v3  ;;  %9269 = vmatpush1.bf16.msra.mxu0 %v11918_v54  ;;  %v14334_v18 = vpop.f32.mrf.mxu1 }
 0x2ef   :  { %v12039_v57 = vcombine.high %v872_v24, %v876_v42  ;;  %v736_v51 = vld [vmem:[#allocation5 + $0x1150] sm:$0xff]  ;;  %17043 = vst [vmem:[#allocation168_spill] sm:$0xff] %v14327_v17  ;;  %9382 = vmatpush1.bf16.msra.mxu1 %v12046_v8  ;;  %9270 = vmatprep.subr.bf16.mxu0 %v11911_v35  ;;  %v12038_v55 = vcombine.low %v872_v24, %v876_v42  ;;  %v14337_v59 = vpop.f32.mrf.mxu0 }
 0x2f0   :  { %v740_v36 = vld [vmem:[#allocation5 + $0x1170] sm:$0xff]  ;;  %9084 = vmatprep.mubr.bf16.mxu0 %v17045_v14  ;;  %v14340_v23 = vpop.f32.mrf.mxu1 }
 0x2f1   :  { %v864_v63 = vld [vmem:[#allocation5 + $0x1550] sm:$0xff]  ;;  %v11903_v21 = vcombine.high %v736_v51, %v740_v36  ;;  %9383 = vmatprep.subr.bf16.mxu1 %v12039_v57  ;;  %v11902_v8 = vcombine.low %v736_v51, %v740_v36  ;;  %v14342_v24 = vpop.f32.mrf.mxu0  ;;  %v17048_v51 = vld [vmem:[#allocation51_spill] sm:$0xff] }
 0x2f2   :  { %v868_v29 = vld [vmem:[#allocation5 + $0x1570] sm:$0xff]  ;;  %9271 = vmatpush1.bf16.msra.mxu0 %v11910_v25  ;;  %v14344_v35 = vpop.f32.mrf.mxu1 }
 0x2f3   :  { %v12031_v13 = vcombine.high %v864_v63, %v868_v29  ;;  %v728_v31 = vld [vmem:[#allocation5 + $0x1110] sm:$0xff]  ;;  %9384 = vmatpush1.bf16.msra.mxu1 %v12038_v55  ;;  %9272 = vmatprep.subr.bf16.mxu0 %v11903_v21  ;;  %v12030_v57 = vcombine.low %v864_v63, %v868_v29  ;;  %v14346_v17 = vpop.f32.mrf.mxu0 }
 0x2f4   :  { %v732_v37 = vld [vmem:[#allocation5 + $0x1130] sm:$0xff]  ;;  %v14349_v25 = vpop.f32.mrf.mxu1 }
 0x2f5   :  { %v17046_v27 = vld [vmem:[#allocation49_spill] sm:$0xff]  ;;  %v11895_v42 = vcombine.high %v728_v31, %v732_v37  ;;  %9385 = vmatprep.subr.bf16.mxu1 %v12031_v13  ;;  %v11894_v36 = vcombine.low %v728_v31, %v732_v37  ;;  %v14352_v63 = vpop.f32.mrf.mxu0  ;;  %v17049_v13 = vld [vmem:[#allocation52_spill] sm:$0xff] }
 0x2f6   :  { %9197 = vmatprep.mubr.bf16.mxu1 %v17046_v27  ;;  %v856_v54 = vld [vmem:[#allocation5 + $0x1510] sm:$0xff]  ;;  %v17047_v27 = vld [vmem:[#allocation50_spill] sm:$0xff]  ;;  %9273 = vmatpush1.bf16.msra.mxu0 %v11902_v8  ;;  %v14354_v21 = vpop.f32.mrf.mxu1 }
 0x2f7   :  { %v860_v19 = vld [vmem:[#allocation5 + $0x1530] sm:$0xff]  ;;  %9085 = vmatmul.mubr.bf16.gmra.mxu0 %v17047_v27  ;;  %9198 = vmatmul.mubr.bf16.gmra.mxu1 %v17048_v51  ;;  %v14357_v61 = vpop.f32.mrf.mxu0 }
 0x2f8   :  { %v12023_v14 = vcombine.high %v856_v54, %v860_v19  ;;  %v720_v3 = vld [vmem:[#allocation5 + $0x10d0] sm:$0xff]  ;;  %9386 = vmatpush1.bf16.msra.mxu1 %v12030_v57  ;;  %9274 = vmatprep.subr.bf16.mxu0 %v11895_v42  ;;  %v12022_v29 = vcombine.low %v856_v54, %v860_v19  ;;  %v14360_v37 = vpop.f32.mrf.mxu1 }
 0x2f9   :  { %v724_v10 = vld [vmem:[#allocation5 + $0x10f0] sm:$0xff]  ;;  %9094 = vmatprep.mubr.bf16.mxu0 %v17049_v13  ;;  %v14362_v54 = vpop.f32.mrf.mxu0 }
 0x2fa   :  { %v848_v12 = vld [vmem:[#allocation5 + $0x14d0] sm:$0xff]  ;;  %v11887_v55 = vcombine.high %v720_v3, %v724_v10  ;;  %9387 = vmatprep.subr.bf16.mxu1 %v12023_v14  ;;  %9275 = vmatpush1.bf16.msra.mxu0 %v11894_v36  ;;  %v11886_v57 = vcombine.low %v720_v3, %v724_v10  ;;  %v14364_v42 = vpop.f32.mrf.mxu1  ;;  %v17052_v10 = vld [vmem:[#allocation55_spill] sm:$0xff] }
 0x2fb   :  { %v852_v62 = vld [vmem:[#allocation5 + $0x14f0] sm:$0xff]  ;;  %v14366_v20 = vpop.f32.mrf.mxu0 }
 0x2fc   :  { %v12015_v27 = vcombine.high %v848_v12, %v852_v62  ;;  %v712_v34 = vld [vmem:[#allocation5 + $0x1090] sm:$0xff]  ;;  %9388 = vmatpush1.bf16.msra.mxu1 %v12022_v29  ;;  %9276 = vmatprep.subr.bf16.mxu0 %v11887_v55  ;;  %v12014_v14 = vcombine.low %v848_v12, %v852_v62  ;;  %v14369_v36 = vpop.f32.mrf.mxu1  ;;  %v17053_v55 = vld [vmem:[#allocation56_spill] sm:$0xff] }
 0x2fd   :  { %v716_v48 = vld [vmem:[#allocation5 + $0x10b0] sm:$0xff]  ;;  %v14372_v62 = vpop.f32.mrf.mxu0 }
 0x2fe   :  { %v17050_v41 = vld [vmem:[#allocation53_spill] sm:$0xff]  ;;  %v11879_v19 = vcombine.high %v712_v34, %v716_v48  ;;  %9389 = vmatprep.subr.bf16.mxu1 %v12015_v27  ;;  %9277 = vmatpush1.bf16.msra.mxu0 %v11886_v57  ;;  %v11878_v3 = vcombine.low %v712_v34, %v716_v48  ;;  %v14374_v29 = vpop.f32.mrf.mxu1 }
 0x2ff   :  { %9207 = vmatprep.mubr.bf16.mxu1 %v17050_v41  ;;  %v840_v8 = vld [vmem:[#allocation5 + $0x1490] sm:$0xff]  ;;  %v17051_v41 = vld [vmem:[#allocation54_spill] sm:$0xff]  ;;  %v14377_v26 = vpop.f32.mrf.mxu0 }
 0x300   :  { %v844_v31 = vld [vmem:[#allocation5 + $0x14b0] sm:$0xff]  ;;  %9095 = vmatmul.mubr.bf16.gmra.mxu0 %v17051_v41  ;;  %9208 = vmatmul.mubr.bf16.gmra.mxu1 %v17052_v10  ;;  %v14380_v34 = vpop.f32.mrf.mxu1 }
 0x301   :  { %v12007_v13 = vcombine.high %v840_v8, %v844_v31  ;;  %v704_v51 = vld [vmem:[#allocation5 + $0x1050] sm:$0xff]  ;;  %9390 = vmatpush1.bf16.msra.mxu1 %v12014_v14  ;;  %9278 = vmatprep.subr.bf16.mxu0 %v11879_v19  ;;  %v12006_v12 = vcombine.low %v840_v8, %v844_v31  ;;  %v14382_v8 = vpop.f32.mrf.mxu0 }
 0x302   :  { %v708_v9 = vld [vmem:[#allocation5 + $0x1070] sm:$0xff]  ;;  %9104 = vmatprep.mubr.bf16.mxu0 %v17053_v55  ;;  %9279 = vmatpush1.bf16.msra.mxu0 %v11878_v3  ;;  %v14384_v19 = vpop.f32.mrf.mxu1 }
 0x303   :  { %v832_v50 = vld [vmem:[#allocation5 + $0x1450] sm:$0xff]  ;;  %v11871_v27 = vcombine.high %v704_v51, %v708_v9  ;;  %9391 = vmatprep.subr.bf16.mxu1 %v12007_v13  ;;  %v11870_v14 = vcombine.low %v704_v51, %v708_v9  ;;  %17055 = vst [vmem:[#allocation140_spill] sm:$0xff] %v14384_v19  ;;  %v14386_v38 = vpop.f32.mrf.mxu0  ;;  %v17059_v9 = vld [vmem:[#allocation59_spill] sm:$0xff] }
 0x304   :  { %v836_v7 = vld [vmem:[#allocation5 + $0x1470] sm:$0xff]  ;;  %17056 = vst [vmem:[#allocation171_spill] sm:$0xff] %v14386_v38  ;;  %v14389_v3 = vpop.f32.mrf.mxu1 }
 0x305   :  { %v11999_v41 = vcombine.high %v832_v50, %v836_v7  ;;  %v696_v60 = vld [vmem:[#allocation5 + $0x1010] sm:$0xff]  ;;  %9392 = vmatpush1.bf16.msra.mxu1 %v12006_v12  ;;  %9280 = vmatprep.subr.bf16.mxu0 %v11871_v27  ;;  %v11998_v13 = vcombine.low %v832_v50, %v836_v7  ;;  %17058 = vst [vmem:[#allocation170_spill] sm:$0xff] %v14389_v3  ;;  %v14392_v7 = vpop.f32.mrf.mxu0  ;;  %v17062_v27 = vld [vmem:[#allocation60_spill] sm:$0xff] }
 0x306   :  { %v700_v16 = vld [vmem:[#allocation5 + $0x1030] sm:$0xff]  ;;  %9281 = vmatpush1.bf16.msra.mxu0 %v11870_v14  ;;  %17060 = vst [vmem:[#allocation141_spill] sm:$0xff] %v14392_v7  ;;  %v14394_v12 = vpop.f32.mrf.mxu1 }
 0x307   :  { %v17054_v44 = vld [vmem:[#allocation57_spill] sm:$0xff]  ;;  %v11863_v31 = vcombine.high %v696_v60, %v700_v16  ;;  %9393 = vmatprep.subr.bf16.mxu1 %v11999_v41  ;;  %v11862_v51 = vcombine.low %v696_v60, %v700_v16  ;;  %17061 = vst [vmem:[#allocation173_spill] sm:$0xff] %v14394_v12  ;;  %v14397_v28 = vpop.f32.mrf.mxu0 }
 0x308   :  { %9217 = vmatprep.mubr.bf16.mxu1 %v17054_v44  ;;  %v824_v57 = vld [vmem:[#allocation5 + $0x1410] sm:$0xff]  ;;  %v17057_v44 = vld [vmem:[#allocation58_spill] sm:$0xff]  ;;  %17063 = vst [vmem:[#allocation143_spill] sm:$0xff] %v14397_v28  ;;  %v14400_v60 = vpop.f32.mrf.mxu1 }
 0x309   :  { %v828_v48 = vld [vmem:[#allocation5 + $0x1430] sm:$0xff]  ;;  %9105 = vmatmul.mubr.bf16.gmra.mxu0 %v17057_v44  ;;  %9218 = vmatmul.mubr.bf16.gmra.mxu1 %v17059_v9  ;;  %17065 = vst [vmem:[#allocation175_spill] sm:$0xff] %v14400_v60 }
 0x30a   :  { %v11991_v55 = vcombine.high %v824_v57, %v828_v48  ;;  %v816_v10 = vld [vmem:[#allocation5 + $0x13d0] sm:$0xff]  ;;  %9394 = vmatpush1.bf16.msra.mxu1 %v11998_v13  ;;  %9282 = vmatprep.subr.bf16.mxu0 %v11863_v31  ;;  %v11990_v50 = vcombine.low %v824_v57, %v828_v48  ;;  %v14402_v57 = vpop.f32.mrf.mxu0  ;;  %v14404_v31 = vpop.f32.mrf.mxu1 }
 0x30b   :  { %v820_v40 = vld [vmem:[#allocation5 + $0x13f0] sm:$0xff]  ;;  %9114 = vmatprep.mubr.bf16.mxu0 %v17062_v27  ;;  %9283 = vmatpush1.bf16.msra.mxu0 %v11862_v51  ;;  %17066 = vst [vmem:[#allocation172_spill] sm:$0xff] %v14402_v57  ;;  %17067 = vst [vmem:[#allocation174_spill] sm:$0xff] %v14404_v31 }
 0x30c   :  { %v944_v47 = vld [vmem:[#allocation5 + $0x17d0] sm:$0xff]  ;;  %v11983_v41 = vcombine.high %v816_v10, %v820_v40  ;;  %9395 = vmatprep.subr.bf16.mxu1 %v11991_v55  ;;  %v11982_v13 = vcombine.low %v816_v10, %v820_v40  ;;  %v14406_v28 = vpop.f32.mrf.mxu0  ;;  %v14409_v51 = vpop.f32.mrf.mxu1  ;;  %v17071_v40 = vld [vmem:[#allocation63_spill] sm:$0xff] }
 0x30d   :  { %v948_v5 = vld [vmem:[#allocation5 + $0x17f0] sm:$0xff]  ;;  %17068 = vst [vmem:[#allocation145_spill] sm:$0xff] %v14406_v28  ;;  %17070 = vst [vmem:[#allocation177_spill] sm:$0xff] %v14409_v51 }
 0x30e   :  { %v12111_v44 = vcombine.high %v944_v47, %v948_v5  ;;  %v808_v19 = vld [vmem:[#allocation5 + $0x1390] sm:$0xff]  ;;  %9396 = vmatpush1.bf16.msra.mxu1 %v11990_v50  ;;  %9284 = vmatprep.subr.bf16.mxu0 %v11983_v41  ;;  %v12110_v55 = vcombine.low %v944_v47, %v948_v5  ;;  %v14412_v5 = vpop.f32.mrf.mxu0  ;;  %v14414_v50 = vpop.f32.mrf.mxu1  ;;  %v17074_v41 = vld [vmem:[#allocation64_spill] sm:$0xff] }
 0x30f   :  { %v812_v38 = vld [vmem:[#allocation5 + $0x13b0] sm:$0xff]  ;;  %9285 = vmatpush2.bf16.msra.mxu0 %v11982_v13  ;;  %17072 = vst [vmem:[#allocation176_spill] sm:$0xff] %v14412_v5  ;;  %17073 = vst [vmem:[#allocation150_spill] sm:$0xff] %v14414_v50 }
 0x310   :  { %v17064_v3 = vld [vmem:[#allocation61_spill] sm:$0xff]  ;;  %v11975_v48 = vcombine.high %v808_v19, %v812_v38  ;;  %9397 = vmatprep.subr.bf16.mxu1 %v12111_v44  ;;  %v11974_v10 = vcombine.low %v808_v19, %v812_v38  ;;  %v14417_v57 = vpop.f32.mrf.mxu0  ;;  %v14420_v19 = vpop.f32.mrf.mxu1 }
 0x311   :  { %9227 = vmatprep.mubr.bf16.mxu1 %v17064_v3  ;;  %v936_v14 = vld [vmem:[#allocation5 + $0x1790] sm:$0xff]  ;;  %v17069_v3 = vld [vmem:[#allocation62_spill] sm:$0xff]  ;;  %17075 = vst [vmem:[#allocation179_spill] sm:$0xff] %v14417_v57  ;;  %17077 = vst [vmem:[#allocation178_spill] sm:$0xff] %v14420_v19 }
 0x312   :  { %v940_v16 = vld [vmem:[#allocation5 + $0x17b0] sm:$0xff]  ;;  %9115 = vmatmul.mubr.bf16.gmra.mxu0 %v17069_v3  ;;  %9228 = vmatmul.mubr.bf16.gmra.mxu1 %v17071_v40 }
 0x313   :  { %v12103_v27 = vcombine.high %v936_v14, %v940_v16  ;;  %v800_v9 = vld [vmem:[#allocation5 + $0x1350] sm:$0xff]  ;;  %9398 = vmatpush2.bf16.msra.mxu1 %v12110_v55  ;;  %9286 = vmatprep.subr.bf16.mxu0 %v11975_v48  ;;  %v12102_v47 = vcombine.low %v936_v14, %v940_v16  ;;  %v14422_v14 = vpop.f32.mrf.mxu0  ;;  %v14424_v48 = vpop.f32.mrf.mxu1 }
 0x314   :  { %v804_v12 = vld [vmem:[#allocation5 + $0x1370] sm:$0xff]  ;;  %9124 = vmatprep.mubr.bf16.mxu0 %v17074_v41  ;;  %9287 = vmatpush2.bf16.msra.mxu0 %v11974_v10  ;;  %17078 = vst [vmem:[#allocation151_spill] sm:$0xff] %v14422_v14  ;;  %17079 = vst [vmem:[#allocation181_spill] sm:$0xff] %v14424_v48 }
 0x315   :  { %v928_v7 = vld [vmem:[#allocation5 + $0x1750] sm:$0xff]  ;;  %v11967_v44 = vcombine.high %v800_v9, %v804_v12  ;;  %9399 = vmatprep.subr.bf16.mxu1 %v12103_v27  ;;  %v11966_v55 = vcombine.low %v800_v9, %v804_v12  ;;  %v14426_v57 = vpop.f32.mrf.mxu0  ;;  %v14429_v10 = vpop.f32.mrf.mxu1  ;;  %v17083_v9 = vld [vmem:[#allocation67_spill] sm:$0xff] }
 0x316   :  { %v932_v60 = vld [vmem:[#allocation5 + $0x1770] sm:$0xff]  ;;  %17080 = vst [vmem:[#allocation152_spill] sm:$0xff] %v14426_v57  ;;  %17082 = vst [vmem:[#allocation183_spill] sm:$0xff] %v14429_v10 }
 0x317   :  { %v12095_v3 = vcombine.high %v928_v7, %v932_v60  ;;  %v792_v31 = vld [vmem:[#allocation5 + $0x1310] sm:$0xff]  ;;  %9400 = vmatpush2.bf16.msra.mxu1 %v12102_v47  ;;  %9288 = vmatprep.subr.bf16.mxu0 %v11967_v44  ;;  %v12094_v27 = vcombine.low %v928_v7, %v932_v60  ;;  %v14432_v7 = vpop.f32.mrf.mxu0  ;;  %v14434_v47 = vpop.f32.mrf.mxu1  ;;  %v17086_v44 = vld [vmem:[#allocation68_spill] sm:$0xff] }
 0x318   :  { %v796_v28 = vld [vmem:[#allocation5 + $0x1330] sm:$0xff]  ;;  %9289 = vmatpush2.bf16.msra.mxu0 %v11966_v55  ;;  %17084 = vst [vmem:[#allocation180_spill] sm:$0xff] %v14432_v7  ;;  %17085 = vst [vmem:[#allocation182_spill] sm:$0xff] %v14434_v47 }
 0x319   :  { %v17076_v51 = vld [vmem:[#allocation65_spill] sm:$0xff]  ;;  %v11959_v16 = vcombine.high %v792_v31, %v796_v28  ;;  %9401 = vmatprep.subr.bf16.mxu1 %v12095_v3  ;;  %v11958_v12 = vcombine.low %v792_v31, %v796_v28  ;;  %v14437_v14 = vpop.f32.mrf.mxu0  ;;  %v14440_v31 = vpop.f32.mrf.mxu1 }
 0x31a   :  { %9237 = vmatprep.mubr.bf16.mxu1 %v17076_v51  ;;  %v920_v13 = vld [vmem:[#allocation5 + $0x1710] sm:$0xff]  ;;  %v17081_v51 = vld [vmem:[#allocation66_spill] sm:$0xff]  ;;  %17087 = vst [vmem:[#allocation153_spill] sm:$0xff] %v14437_v14  ;;  %17089 = vst [vmem:[#allocation185_spill] sm:$0xff] %v14440_v31 }
 0x31b   :  { %v924_v38 = vld [vmem:[#allocation5 + $0x1730] sm:$0xff]  ;;  %9125 = vmatmul.mubr.bf16.gmra.mxu0 %v17081_v51  ;;  %9238 = vmatmul.mubr.bf16.gmra.mxu1 %v17083_v9 }
 0x31c   :  { %v12087_v41 = vcombine.high %v920_v13, %v924_v38  ;;  %v784_v40 = vld [vmem:[#allocation5 + $0x12d0] sm:$0xff]  ;;  %9402 = vmatpush2.bf16.msra.mxu1 %v12094_v27  ;;  %9290 = vmatprep.subr.bf16.mxu0 %v11959_v16  ;;  %v12086_v3 = vcombine.low %v920_v13, %v924_v38  ;;  %v14442_v13 = vpop.f32.mrf.mxu0  ;;  %v14444_v16 = vpop.f32.mrf.mxu1 }
 0x31d   :  { %v788_v50 = vld [vmem:[#allocation5 + $0x12f0] sm:$0xff]  ;;  %9134 = vmatprep.mubr.bf16.mxu0 %v17086_v44  ;;  %9291 = vmatpush2.bf16.msra.mxu0 %v11958_v12  ;;  %17090 = vst [vmem:[#allocation184_spill] sm:$0xff] %v14442_v13  ;;  %17091 = vst [vmem:[#allocation154_spill] sm:$0xff] %v14444_v16 }
 0x31e   :  { %v912_v5 = vld [vmem:[#allocation5 + $0x16d0] sm:$0xff]  ;;  %v11951_v60 = vcombine.high %v784_v40, %v788_v50  ;;  %9403 = vmatprep.subr.bf16.mxu1 %v12087_v41  ;;  %v11950_v27 = vcombine.low %v784_v40, %v788_v50  ;;  %v14446_v14 = vpop.f32.mrf.mxu0  ;;  %v14449_v12 = vpop.f32.mrf.mxu1  ;;  %v17095_v40 = vld [vmem:[#allocation71_spill] sm:$0xff] }
 0x31f   :  { %v916_v19 = vld [vmem:[#allocation5 + $0x16f0] sm:$0xff]  ;;  %17092 = vst [vmem:[#allocation187_spill] sm:$0xff] %v14446_v14  ;;  %17094 = vst [vmem:[#allocation186_spill] sm:$0xff] %v14449_v12 }
 0x320   :  { %v12079_v51 = vcombine.high %v912_v5, %v916_v19  ;;  %v776_v48 = vld [vmem:[#allocation5 + $0x1290] sm:$0xff]  ;;  %9404 = vmatpush2.bf16.msra.mxu1 %v12086_v3  ;;  %9292 = vmatprep.subr.bf16.mxu0 %v11951_v60  ;;  %v12078_v41 = vcombine.low %v912_v5, %v916_v19  ;;  %v14452_v5 = vpop.f32.mrf.mxu0  ;;  %v14454_v3 = vpop.f32.mrf.mxu1  ;;  %v17098_v60 = vld [vmem:[#allocation72_spill] sm:$0xff] }
 0x321   :  { %v780_v57 = vld [vmem:[#allocation5 + $0x12b0] sm:$0xff]  ;;  %9293 = vmatpush2.bf16.msra.mxu0 %v11950_v27  ;;  %17096 = vst [vmem:[#allocation155_spill] sm:$0xff] %v14452_v5  ;;  %17097 = vst [vmem:[#allocation189_spill] sm:$0xff] %v14454_v3 }
 0x322   :  { %v17088_v10 = vld [vmem:[#allocation69_spill] sm:$0xff]  ;;  %v11943_v38 = vcombine.high %v776_v48, %v780_v57  ;;  %9405 = vmatprep.subr.bf16.mxu1 %v12079_v51  ;;  %v11942_v50 = vcombine.low %v776_v48, %v780_v57  ;;  %v14457_v13 = vpop.f32.mrf.mxu0  ;;  %v14460_v48 = vpop.f32.mrf.mxu1 }
 0x323   :  { %9247 = vmatprep.mubr.bf16.mxu1 %v17088_v10  ;;  %v904_v55 = vld [vmem:[#allocation5 + $0x1690] sm:$0xff]  ;;  %v17093_v10 = vld [vmem:[#allocation70_spill] sm:$0xff]  ;;  %17099 = vst [vmem:[#allocation156_spill] sm:$0xff] %v14457_v13  ;;  %17101 = vst [vmem:[#allocation191_spill] sm:$0xff] %v14460_v48 }
 0x324   :  { %v908_v28 = vld [vmem:[#allocation5 + $0x16b0] sm:$0xff]  ;;  %9135 = vmatmul.mubr.bf16.gmra.mxu0 %v17093_v10  ;;  %9248 = vmatmul.mubr.bf16.gmra.mxu1 %v17095_v40  ;;  %v17105_v13 = vld [vmem:[#allocation74_spill] sm:$0xff] }
 0x325   :  { %v12071_v44 = vcombine.high %v904_v55, %v908_v28  ;;  %v768_v9 = vld [vmem:[#allocation5 + $0x1250] sm:$0xff]  ;;  %9406 = vmatpush2.bf16.msra.mxu1 %v12078_v41  ;;  %9294 = vmatprep.subr.bf16.mxu0 %v11943_v38  ;;  %v12070_v51 = vcombine.low %v904_v55, %v908_v28  ;;  %v14462_v55 = vpop.f32.mrf.mxu0  ;;  %v14464_v38 = vpop.f32.mrf.mxu1 }
 0x326   :  { %v772_v47 = vld [vmem:[#allocation5 + $0x1270] sm:$0xff]  ;;  %9144 = vmatprep.mubr.bf16.mxu0 %v17098_v60  ;;  %9295 = vmatpush2.bf16.msra.mxu0 %v11942_v50  ;;  %17102 = vst [vmem:[#allocation188_spill] sm:$0xff] %v14462_v55  ;;  %17103 = vst [vmem:[#allocation190_spill] sm:$0xff] %v14464_v38 }
 0x327   :  { %v896_v7 = vld [vmem:[#allocation5 + $0x1650] sm:$0xff]  ;;  %v11935_v19 = vcombine.high %v768_v9, %v772_v47  ;;  %9407 = vmatprep.subr.bf16.mxu1 %v12071_v44  ;;  %v11934_v41 = vcombine.low %v768_v9, %v772_v47  ;;  %v14477_v47 = vpop.f32.mrf.mxu1 }
 0x328   :  { %v900_v31 = vld [vmem:[#allocation5 + $0x1670] sm:$0xff]  ;;  %17106 = vst [vmem:[#allocation193_spill] sm:$0xff] %v14477_v47 }
 0x329   :  { %v12063_v10 = vcombine.high %v896_v7, %v900_v31  ;;  %v760_v16 = vld [vmem:[#allocation5 + $0x1210] sm:$0xff]  ;;  %9408 = vmatpush2.bf16.msra.mxu1 %v12070_v51  ;;  %9296 = vmatprep.subr.bf16.mxu0 %v11935_v19  ;;  %v12062_v44 = vcombine.low %v896_v7, %v900_v31  ;;  %v17107_v7 = vld [vmem:[#allocation75_spill] sm:$0xff]  ;;  %v14490_v47 = vpop.f32.mrf.mxu1 }
 0x32a   :  { %v764_v14 = vld [vmem:[#allocation5 + $0x1230] sm:$0xff]  ;;  %9297 = vmatpush2.bf16.msra.mxu0 %v11934_v41  ;;  %17109 = vst [vmem:[#allocation158_spill] sm:$0xff] %v14490_v47  ;;  %v17110_v41 = vld [vmem:[#allocation76_spill] sm:$0xff] }
 0x32b   :  { %v17100_v12 = vld [vmem:[#allocation73_spill] sm:$0xff]  ;;  %v11927_v28 = vcombine.high %v760_v16, %v764_v14  ;;  %9409 = vmatprep.subr.bf16.mxu1 %v12063_v10  ;;  %v11926_v31 = vcombine.low %v760_v16, %v764_v14 }
 0x32c   :  { %9257 = vmatprep.mubr.bf16.mxu1 %v17100_v12  ;;  %v888_v27 = vld [vmem:[#allocation5 + $0x1610] sm:$0xff]  ;;  %v14470_v12 = vpop.f32.mrf.mxu0  ;;  %9145 = vmatmul.mubr.bf16.gmra.mxu0 %v17105_v13 }
 0x32d   :  { %v892_v57 = vld [vmem:[#allocation5 + $0x1630] sm:$0xff]  ;;  %17104 = vst [vmem:[#allocation157_spill] sm:$0xff] %v14470_v12  ;;  %9258 = vmatmul.mubr.bf16.gmra.mxu1 %v17107_v7  ;;  %9298 = vmatprep.subr.bf16.mxu0 %v11927_v28  ;;  %v8399_v12 = vadd.f32 %v14324_v39, %v14201_v58  ;;  %v8401_v39 = vadd.f32 %v14332_v32, %v14206_v6 }
 0x32e   :  { %v12055_v60 = vcombine.high %v888_v27, %v892_v57  ;;  %v14466_v40 = vld [vmem:[#allocation5 + $0x19d0] sm:$0xff]  ;;  %9410 = vmatpush2.bf16.msra.mxu1 %v12062_v44  ;;  %v14480_v10 = vpop.f32.mrf.mxu0  ;;  %v12054_v51 = vcombine.low %v888_v27, %v892_v57  ;;  %9300 = vmatprep.mubr.bf16.mxu0 %v17110_v41 }
 0x32f   :  { %v14468_v3 = vld [vmem:[#allocation5 + $0x19f0] sm:$0xff]  ;;  %17108 = vst [vmem:[#allocation192_spill] sm:$0xff] %v14480_v10  ;;  %9299 = vmatpush2.bf16.msra.mxu0 %v11926_v31 }
 0x330   :  { %v14473_v50 = vld [vmem:[#allocation5 + $0x1dd0] sm:$0xff]  ;;  %v12175_v19 = vcombine.high %v14466_v40, %v14468_v3  ;;  %9411 = vmatprep.subr.bf16.mxu1 %v12055_v60  ;;  %v14499_v57 = vpop.f32.mrf.mxu0  ;;  %v14510_v60 = vpop.f32.mrf.mxu1  ;;  %v12174_v41 = vcombine.low %v14466_v40, %v14468_v3 }
 0x331   :  { %v14475_v9 = vld [vmem:[#allocation5 + $0x1df0] sm:$0xff]  ;;  %17111 = vst [vmem:[#allocation195_spill] sm:$0xff] %v14499_v57  ;;  %17113 = vst [vmem:[#allocation194_spill] sm:$0xff] %v14510_v60 }
 0x332   :  { %v14484_v38 = vld [vmem:[#allocation5 + $0x1990] sm:$0xff]  ;;  %v12303_v14 = vcombine.high %v14473_v50, %v14475_v9  ;;  %v12302_v47 = vcombine.low %v14473_v50, %v14475_v9  ;;  %9412 = vmatpush2.bf16.msra.mxu1 %v12054_v51  ;;  %v14524_v6 = vpop.f32.mrf.mxu0  ;;  %9494 = vmatprep.subr.bf16.mxu0 %v12175_v19  ;;  %v8512_v50 = vadd.f32 %v14329_v11, %v8399_v12  ;;  %v14535_v31 = vpop.f32.mrf.mxu1 }
 0x333   :  { %v14486_v13 = vld [vmem:[#allocation5 + $0x19b0] sm:$0xff]  ;;  %17114 = vst [vmem:[#allocation196_spill] sm:$0xff] %v14524_v6  ;;  %v8403_v9 = vadd.f32 %v14337_v59, %v14209_v2  ;;  %17115 = vst [vmem:[#allocation197_spill] sm:$0xff] %v14535_v31  ;;  %v8405_v51 = vadd.f32 %v14342_v24, %v14213_v52  ;;  %v17117_v6 = vld [vmem:[#allocation79_spill] sm:$0xff]  ;;  %v8409_v12 = vadd.f32 %v14346_v17, %v14217_v1 }
 0x334   :  { %v14495_v16 = vld [vmem:[#allocation5 + $0x1d90] sm:$0xff]  ;;  %v12166_v32 = vcombine.low %v14484_v38, %v14486_v13  ;;  %9607 = vmatprep.subr.bf16.mxu1 %v12303_v14  ;;  %v8624_v60 = vpop.f32.mrf.mxu0  ;;  %v8737_v31 = vpop.f32.mrf.mxu1  ;;  %v8411_v17 = vadd.f32 %v14352_v63, %v14222_v15 }
 0x335   :  { %v14497_v27 = vld [vmem:[#allocation5 + $0x1db0] sm:$0xff]  ;;  %v8516_v24 = vadd.f32 %v14340_v23, %v8403_v9  ;;  %v8413_v23 = vadd.f32 %v14357_v61, %v14225_v53 }
 0x336   :  { %v17112_v44 = vld [vmem:[#allocation77_spill] sm:$0xff]  ;;  %v12294_v40 = vcombine.low %v14495_v16, %v14497_v27  ;;  %v12295_v3 = vcombine.high %v14495_v16, %v14497_v27  ;;  %v17116_v16 = vld [vmem:[#allocation78_spill] sm:$0xff]  ;;  %v8514_v27 = vadd.f32 %v14334_v18, %v8401_v39  ;;  %v8626_v5 = vpop.f32.mrf.mxu0 }
 0x337   :  { %9413 = vmatprep.mubr.bf16.mxu1 %v17112_v44  ;;  %v14502_v28 = vld [vmem:[#allocation5 + $0x1950] sm:$0xff]  ;;  %v12167_v44 = vcombine.high %v14484_v38, %v14486_v13  ;;  %9301 = vmatmul.mubr.bf16.vlgmr.msra.gmra.mxu0 %v17116_v16  ;;  %v8625_v16 = vadd.f32 %v8624_v60, %v8512_v50  ;;  %v8739_v60 = vpop.f32.mrf.mxu1 }
 0x338   :  { %v14504_v7 = vld [vmem:[#allocation5 + $0x1970] sm:$0xff]  ;;  %9414 = vmatmul.mubr.bf16.vlgmr.msra.gmra.mxu1 %v17117_v6  ;;  %9495 = vmatpush1.bf16.msra.mxu0 %v12174_v41  ;;  %v8627_v39 = vadd.f32 %v8626_v5, %v8514_v27 }
 0x339   :  { %v14506_v58 = vld [vmem:[#allocation5 + $0x1d50] sm:$0xff]  ;;  %v12159_v13 = vcombine.high %v14502_v28, %v14504_v7  ;;  %9608 = vmatpush1.bf16.msra.mxu1 %v12302_v47  ;;  %9496 = vmatprep.subr.bf16.mxu0 %v12167_v44  ;;  %v8738_v41 = vadd.f32 %v8737_v31, %v8625_v16  ;;  %v8628_v47 = vpop.f32.mrf.mxu0  ;;  %v8741_v16 = vpop.f32.mrf.mxu1  ;;  %v8522_v44 = vadd.f32 %v14349_v25, %v8409_v12 }
 0x33a   :  { %v14518_v57 = vld [vmem:[#allocation5 + $0x1d70] sm:$0xff]  ;;  %9609 = vmatprep.subr.bf16.mxu1 %v12295_v3  ;;  %9310 = vmatprep.mubr.bf16.mxu0 %v16859_v45  ;;  %v8518_v3 = vadd.f32 %v14344_v35, %v8405_v51  ;;  %v8740_v9 = vadd.f32 %v8739_v60, %v8627_v39  ;;  %v8629_v31 = vadd.f32 %v8628_v47, %v8516_v24 }
 0x33b   :  { %v14520_v10 = vld [vmem:[#allocation5 + $0x1910] sm:$0xff]  ;;  %v12287_v2 = vcombine.high %v14506_v58, %v14518_v57  ;;  %9423 = vmatprep.mubr.bf16.mxu1 %v16860_v49  ;;  %v8630_v5 = vpop.f32.mrf.mxu0  ;;  %v10626_v51 = vmax.f32 %v8738_v41, 0.0  ;;  %v8743_v60 = vpop.f32.mrf.mxu1  ;;  %v8524_v47 = vadd.f32 %v14354_v21, %v8411_v17  ;;  %v8415_v25 = vadd.f32 %v14362_v54, %v14229_v33 }
 0x33c   :  { %v14522_v48 = vld [vmem:[#allocation5 + $0x1930] sm:$0xff]  ;;  %9497 = vmatpush1.bf16.msra.mxu0 %v12166_v32  ;;  %v10627_v32 = vmax.f32 %v8740_v9, 0.0  ;;  %v8742_v24 = vadd.f32 %v8741_v16, %v8629_v31  ;;  %v8631_v39 = vadd.f32 %v8630_v5, %v8518_v3  ;;  %v17118_v33 = vcombine.low %v14502_v28, %v14504_v7 }
 0x33d   :  { %v14541_v38 = vld [vmem:[#allocation5 + $0x1d10] sm:$0xff]  ;;  %9610 = vmatpush1.bf16.msra.mxu1 %v12294_v40  ;;  %9498 = vmatprep.subr.bf16.mxu0 %v12159_v13  ;;  %v8634_v12 = vpop.f32.mrf.mxu0  ;;  %v8526_v3 = vadd.f32 %v14360_v37, %v8413_v23  ;;  %v8419_v9 = vadd.f32 %v14366_v20, %v14233_v30  ;;  %v17120_v7 = vcombine.high %v14520_v10, %v14522_v48 }
 0x33e   :  { %v14543_v19 = vld [vmem:[#allocation5 + $0x1d30] sm:$0xff]  ;;  %9611 = vmatprep.subr.bf16.mxu1 %v12287_v2  ;;  %v12435_v13 = vpack.c.bf16 %v10627_v32, %v10626_v51  ;;  %v8744_v41 = vadd.f32 %v8743_v60, %v8631_v39  ;;  %v8635_v5 = vadd.f32 %v8634_v12, %v8522_v44  ;;  %v8747_v2 = vpop.f32.mrf.mxu1  ;;  %v17119_v44 = vcombine.low %v14506_v58, %v14518_v57 }
 0x33f   :  { %v14554_v14 = vld [vmem:[#allocation5 + $0x18d0] sm:$0xff]  ;;  %v12278_v52 = vcombine.low %v14541_v38, %v14543_v19  ;;  %v12279_v18 = vcombine.high %v14541_v38, %v14543_v19  ;;  %9311 = vmatmul.mubr.bf16.gmra.mxu0 %v16861_v43  ;;  %v8636_v31 = vpop.f32.mrf.mxu0  ;;  %v10634_v16 = vmax.f32 %v8742_v24, 0.0  ;;  %v8421_v30 = vadd.f32 %v14372_v62, %v14238_v22 }
 0x340   :  { %v14560_v11 = vld [vmem:[#allocation5 + $0x18f0] sm:$0xff]  ;;  %9424 = vmatmul.mubr.bf16.gmra.mxu1 %v16862_v4  ;;  %9499 = vmatpush1.bf16.msra.mxu0 %v17118_v33  ;;  %11137 = vst [vmem:[#allocation8 + $0x8] sm:$0xff] %v12435_v13  ;;  %v10635_v51 = vmax.f32 %v8744_v41, 0.0  ;;  %v8748_v32 = vadd.f32 %v8747_v2, %v8635_v5  ;;  %v8637_v37 = vadd.f32 %v8636_v31, %v8524_v47  ;;  %v8749_v23 = vpop.f32.mrf.mxu1 }
 0x341   :  { %v14562_v55 = vld [vmem:[#allocation5 + $0x1cd0] sm:$0xff]  ;;  %9612 = vmatpush1.bf16.msra.mxu1 %v17119_v44  ;;  %9500 = vmatprep.subr.bf16.mxu0 %v17120_v7  ;;  %v8638_v20 = vpop.f32.mrf.mxu0  ;;  %v8528_v60 = vadd.f32 %v14364_v42, %v8415_v25  ;;  %v17122_v22 = vcombine.low %v14520_v10, %v14522_v48  ;;  %v8532_v5 = vadd.f32 %v14369_v36, %v8419_v9  ;;  %v17124_v44 = vld [vmem:[#allocation86_spill] sm:$0xff] }
 0x342   :  { %v14564_v59 = vld [vmem:[#allocation5 + $0x1cf0] sm:$0xff]  ;;  %9613 = vmatprep.subr.bf16.mxu1 %v12279_v18  ;;  %9320 = vmatprep.mubr.bf16.mxu0 %v16866_v0  ;;  %v12439_v18 = vpack.c.bf16 %v10635_v51, %v10634_v16  ;;  %v8750_v47 = vadd.f32 %v8749_v23, %v8637_v37  ;;  %v8639_v12 = vadd.f32 %v8638_v20, %v8526_v3  ;;  %v8751_v13 = vpop.f32.mrf.mxu1  ;;  %v10642_v10 = vmax.f32 %v8748_v32, 0.0  ;;  %v17125_v37 = vld [vmem:[#allocation87_spill] sm:$0xff]  ;;  %v17251_v0 = vld [vmem:[#allocation14_spill] sm:$0xff] }
 0x343   :  { %v14574_v50 = vld [vmem:[#allocation5 + $0x1890] sm:$0xff]  ;;  %v12271_v15 = vcombine.high %v14562_v55, %v14564_v59  ;;  %v8423_v2 = vadd.f32 %v14377_v26, %v14241_v56  ;;  %v8640_v42 = vpop.f32.mrf.mxu0  ;;  %v17123_v25 = vcombine.high %v14554_v14, %v14560_v11  ;;  %v8534_v38 = vadd.f32 %v14374_v29, %v8421_v30  ;;  %v17127_v30 = vld [vmem:[#allocation80_spill] sm:$0xff]  ;;  %v17128_v20 = vld [vmem:[#allocation171_spill] sm:$0xff] }
 0x344   :  { %v14576_v1 = vld [vmem:[#allocation5 + $0x18b0] sm:$0xff]  ;;  %9501 = vmatpush1.bf16.msra.mxu0 %v17122_v22  ;;  %11141 = vst [vmem:[#allocation8 + $0x28] sm:$0xff] %v12439_v18  ;;  %v10643_v33 = vmax.f32 %v8750_v47, 0.0  ;;  %v8752_v3 = vadd.f32 %v8751_v13, %v8639_v12  ;;  %v8641_v36 = vadd.f32 %v8640_v42, %v8528_v60  ;;  %v8753_v9 = vpop.f32.mrf.mxu1  ;;  %v8425_v19 = vadd.f32 %v14382_v8, %v14245_v46 }
 0x345   :  { %v14590_v63 = vld [vmem:[#allocation5 + $0x1c90] sm:$0xff]  ;;  %v12135_v35 = vcombine.high %v14574_v50, %v14576_v1  ;;  %v12134_v53 = vcombine.low %v14574_v50, %v14576_v1  ;;  %9614 = vmatpush1.bf16.msra.mxu1 %v12278_v52  ;;  %9502 = vmatprep.subr.bf16.mxu0 %v17123_v25  ;;  %v8644_v52 = vpop.f32.mrf.mxu0  ;;  %v17126_v29 = vcombine.low %v14554_v14, %v14560_v11 }
 0x346   :  { %v14592_v27 = vld [vmem:[#allocation5 + $0x1cb0] sm:$0xff]  ;;  %9615 = vmatprep.subr.bf16.mxu1 %v12271_v15  ;;  %v12443_v16 = vpack.c.bf16 %v10643_v33, %v10642_v10  ;;  %v8754_v15 = vadd.f32 %v8753_v9, %v8641_v36  ;;  %v8645_v51 = vadd.f32 %v8644_v52, %v8532_v5  ;;  %v8757_v32 = vpop.f32.mrf.mxu1  ;;  %v8536_v23 = vadd.f32 %v14380_v34, %v8423_v2  ;;  %v17134_v36 = vld [vmem:[#allocation140_spill] sm:$0xff] }
 0x347   :  { %v12262_v61 = vcombine.low %v14590_v63, %v14592_v27  ;;  %v14607_v40 = vld [vmem:[#allocation5 + $0x1850] sm:$0xff]  ;;  %v12263_v28 = vcombine.high %v14590_v63, %v14592_v27  ;;  %9321 = vmatmul.mubr.bf16.gmra.mxu0 %v17124_v44  ;;  %v8429_v60 = vadd.f32 %v17128_v20, %v17127_v30  ;;  %v17129_v18 = vcombine.low %v14562_v55, %v14564_v59  ;;  %v8646_v47 = vpop.f32.mrf.mxu0  ;;  %v17130_v55 = vld [vmem:[#allocation88_spill] sm:$0xff]  ;;  %v17136_v20 = vld [vmem:[#allocation82_spill] sm:$0xff] }
 0x348   :  { %v14613_v21 = vld [vmem:[#allocation5 + $0x1870] sm:$0xff]  ;;  %9503 = vmatpush1.bf16.msra.mxu0 %v17126_v29  ;;  %11145 = vst [vmem:[#allocation8 + $0x48] sm:$0xff] %v12443_v16  ;;  %v10650_v14 = vmax.f32 %v8752_v3, 0.0  ;;  %v10651_v12 = vmax.f32 %v8754_v15, 0.0  ;;  %v8758_v13 = vadd.f32 %v8757_v32, %v8645_v51  ;;  %v8647_v34 = vadd.f32 %v8646_v47, %v8534_v38  ;;  %v8759_v22 = vpop.f32.mrf.mxu1  ;;  %9330 = vmatprep.mubr.bf16.mxu0 %v17130_v55  ;;  %v17135_v29 = vld [vmem:[#allocation170_spill] sm:$0xff]  ;;  %v17247_v55 = vld [vmem:[#allocation148_spill] sm:$0xff] }
 0x349   :  { %v14615_v54 = vld [vmem:[#allocation5 + $0x1c50] sm:$0xff]  ;;  %v12126_v58 = vcombine.low %v14607_v40, %v14613_v21  ;;  %v12127_v39 = vcombine.high %v14607_v40, %v14613_v21  ;;  %9616 = vmatpush1.bf16.msra.mxu1 %v17129_v18  ;;  %9504 = vmatprep.subr.bf16.mxu0 %v12135_v35  ;;  %v8648_v25 = vpop.f32.mrf.mxu0  ;;  %v8538_v9 = vadd.f32 %v17134_v36, %v8425_v19  ;;  %v17137_v18 = vld [vmem:[#allocation143_spill] sm:$0xff] }
 0x34a   :  { %v14617_v17 = vld [vmem:[#allocation5 + $0x1c70] sm:$0xff]  ;;  %9617 = vmatprep.subr.bf16.mxu1 %v12263_v28  ;;  %v12447_v38 = vpack.c.bf16 %v10651_v12, %v10650_v14  ;;  %v8760_v52 = vadd.f32 %v8759_v22, %v8647_v34  ;;  %v8649_v16 = vadd.f32 %v8648_v25, %v8536_v23  ;;  %v8761_v15 = vpop.f32.mrf.mxu1  ;;  %v8542_v30 = vadd.f32 %v17135_v29, %v8429_v60  ;;  %v17140_v12 = vld [vmem:[#allocation172_spill] sm:$0xff] }
 0x34b   :  { %v17121_v57 = vld [vmem:[#allocation85_spill] sm:$0xff]  ;;  %v12254_v24 = vcombine.low %v14615_v54, %v14617_v17  ;;  %v12255_v48 = vcombine.high %v14615_v54, %v14617_v17  ;;  %v8433_v47 = vadd.f32 %v17137_v18, %v17136_v20  ;;  %v8650_v19 = vpop.f32.mrf.mxu0  ;;  %v10658_v1 = vmax.f32 %v8758_v13, 0.0  ;;  %v17144_v20 = vld [vmem:[#allocation159_spill] sm:$0xff]  ;;  %v17148_v54 = vld [vmem:[#allocation176_spill] sm:$0xff] }
 0x34c   :  { %9433 = vmatprep.mubr.bf16.mxu1 %v17121_v57  ;;  %v14644_v62 = vld [vmem:[#allocation5 + $0x1810] sm:$0xff]  ;;  %9505 = vmatpush1.bf16.msra.mxu0 %v12134_v53  ;;  %11149 = vst [vmem:[#allocation8 + $0x68] sm:$0xff] %v12447_v38  ;;  %v10659_v53 = vmax.f32 %v8760_v52, 0.0  ;;  %v8762_v23 = vadd.f32 %v8761_v15, %v8649_v16  ;;  %v8651_v60 = vadd.f32 %v8650_v19, %v8538_v9  ;;  %v8763_v14 = vpop.f32.mrf.mxu1  ;;  %v17142_v38 = vld [vmem:[#allocation91_spill] sm:$0xff]  ;;  %v481_v57 = vld [vmem:[#allocation5 + $0x958] sm:$0xff] }
 0x34d   :  { %v14646_v41 = vld [vmem:[#allocation5 + $0x1830] sm:$0xff]  ;;  %9434 = vmatmul.mubr.bf16.gmra.mxu1 %v17125_v37  ;;  %9506 = vmatprep.subr.bf16.mxu0 %v12127_v39  ;;  %v8654_v22 = vpop.f32.mrf.mxu0  ;;  %v17141_v39 = vld [vmem:[#allocation90_spill] sm:$0xff]  ;;  %v17143_v15 = vld [vmem:[#allocation175_spill] sm:$0xff] }
 0x34e   :  { %v14662_v56 = vld [vmem:[#allocation5 + $0x1c10] sm:$0xff]  ;;  %v12118_v31 = vcombine.low %v14644_v62, %v14646_v41  ;;  %v12119_v7 = vcombine.high %v14644_v62, %v14646_v41  ;;  %9618 = vmatpush1.bf16.msra.mxu1 %v12262_v61  ;;  %v17139_v61 = vld [vmem:[#allocation83_spill] sm:$0xff]  ;;  %v12451_v25 = vpack.c.bf16 %v10659_v53, %v10658_v1  ;;  %v8764_v36 = vadd.f32 %v8763_v14, %v8651_v60  ;;  %v17146_v60 = vld [vmem:[#allocation92_spill] sm:$0xff] }
 0x34f   :  { %v14664_v26 = vld [vmem:[#allocation5 + $0x1c30] sm:$0xff]  ;;  %9619 = vmatprep.subr.bf16.mxu1 %v12255_v48  ;;  %v8435_v34 = vadd.f32 %v17140_v12, %v17139_v61  ;;  %9331 = vmatmul.mubr.bf16.gmra.mxu0 %v17141_v39  ;;  %v8655_v9 = vadd.f32 %v8654_v22, %v8542_v30  ;;  %v8767_v48 = vpop.f32.mrf.mxu1  ;;  %v8546_v29 = vadd.f32 %v17143_v15, %v8433_v47  ;;  %v8656_v30 = vpop.f32.mrf.mxu0  ;;  %v10666_v21 = vmax.f32 %v8762_v23, 0.0  ;;  %v493_v37 = vld [vmem:[#allocation5 + $0x9b8] sm:$0xff] }
 0x350   :  { %v14678_v46 = vld [vmem:[#allocation5 + $0x1bd0] sm:$0xff]  ;;  %v12246_v11 = vcombine.low %v14662_v56, %v14664_v26  ;;  %v12247_v33 = vcombine.high %v14662_v56, %v14664_v26  ;;  %9507 = vmatpush1.bf16.msra.mxu0 %v12126_v58  ;;  %11153 = vst [vmem:[#allocation8 + $0x88] sm:$0xff] %v12451_v25  ;;  %v10667_v58 = vmax.f32 %v8764_v36, 0.0  ;;  %9340 = vmatprep.mubr.bf16.mxu0 %v17146_v60  ;;  %v17154_v56 = vld [vmem:[#allocation150_spill] sm:$0xff] }
 0x351   :  { %v14680_v8 = vld [vmem:[#allocation5 + $0x1bf0] sm:$0xff]  ;;  %9508 = vmatprep.subr.bf16.mxu0 %v12119_v7  ;;  %v8768_v1 = vadd.f32 %v8767_v48, %v8655_v9  ;;  %v8769_v53 = vpop.f32.mrf.mxu1  ;;  %v17243_v60 = vld [vmem:[#allocation142_spill] sm:$0xff] }
 0x352   :  { %v14697_v59 = vld [vmem:[#allocation5 + $0x1fd0] sm:$0xff]  ;;  %v12238_v3 = vcombine.low %v14678_v46, %v14680_v8  ;;  %v12239_v28 = vcombine.high %v14678_v46, %v14680_v8  ;;  %9620 = vmatpush1.bf16.msra.mxu1 %v12254_v24  ;;  %v8658_v24 = vpop.f32.mrf.mxu0 }
 0x353   :  { %v14699_v5 = vld [vmem:[#allocation5 + $0x1ff0] sm:$0xff]  ;;  %9621 = vmatprep.subr.bf16.mxu1 %v12247_v33  ;;  %v12455_v33 = vpack.c.bf16 %v10667_v58, %v10666_v21  ;;  %v8659_v25 = vadd.f32 %v8658_v24, %v8546_v29  ;;  %v8771_v36 = vpop.f32.mrf.mxu1  ;;  %v10674_v41 = vmax.f32 %v8768_v1, 0.0  ;;  %v17157_v24 = vld [vmem:[#allocation94_spill] sm:$0xff] }
 0x354   :  { %v17131_v35 = vld [vmem:[#allocation81_spill] sm:$0xff]  ;;  %v12366_v50 = vcombine.low %v14697_v59, %v14699_v5  ;;  %9509 = vmatpush1.bf16.msra.mxu0 %v12118_v31 }
 0x355   :  { %v17132_v2 = vld [vmem:[#allocation141_spill] sm:$0xff]  ;;  %9510 = vmatprep.subr.bf16.mxu0 %v12239_v28  ;;  %11157 = vst [vmem:[#allocation8 + $0xa8] sm:$0xff] %v12455_v33  ;;  %v8772_v29 = vadd.f32 %v8771_v36, %v8659_v25  ;;  %v8773_v21 = vpop.f32.mrf.mxu1  ;;  %v17158_v25 = vld [vmem:[#allocation95_spill] sm:$0xff] }
 0x356   :  { %v8431_v42 = vadd.f32 %v17132_v2, %v17131_v35  ;;  %v17133_v10 = vld [vmem:[#allocation89_spill] sm:$0xff]  ;;  %v12367_v35 = vcombine.high %v14697_v59, %v14699_v5  ;;  %9622 = vmatpush1.bf16.msra.mxu1 %v12246_v11  ;;  %v17155_v11 = vld [vmem:[#allocation160_spill] sm:$0xff]  ;;  %v17163_v5 = vld [vmem:[#allocation163_spill] sm:$0xff] }
 0x357   :  { %9443 = vmatprep.mubr.bf16.mxu1 %v17133_v10  ;;  %v14714_v51 = vld [vmem:[#allocation5 + $0x1b90] sm:$0xff]  ;;  %9341 = vmatmul.mubr.bf16.gmra.mxu0 %v17157_v24  ;;  %v10682_v8 = vmax.f32 %v8772_v29, 0.0  ;;  %v497_v10 = vld [vmem:[#allocation5 + $0x9d8] sm:$0xff] }
 0x358   :  { %v14716_v32 = vld [vmem:[#allocation5 + $0x1bb0] sm:$0xff]  ;;  %9444 = vmatmul.mubr.bf16.gmra.mxu1 %v17142_v38  ;;  %9623 = vmatprep.subr.bf16.mxu1 %v12367_v35  ;;  %v253_v38 = vld [vmem:[#allocation5 + $0x238] sm:$0xff] }
 0x359   :  { %v17138_v63 = vld [vmem:[#allocation173_spill] sm:$0xff]  ;;  %v12231_v13 = vcombine.high %v14714_v51, %v14716_v32  ;;  %v12230_v40 = vcombine.low %v14714_v51, %v14716_v32  ;;  %9511 = vmatpush2.bf16.msra.mxu0 %v12238_v3 }
 0x35a   :  { %v8544_v27 = vadd.f32 %v17138_v63, %v8431_v42  ;;  %v14740_v2 = vld [vmem:[#allocation5 + $0x1f90] sm:$0xff]  ;;  %9624 = vmatpush2.bf16.msra.mxu1 %v12366_v50  ;;  %v17164_v50 = vld [vmem:[#allocation180_spill] sm:$0xff] }
 0x35b   :  { %v14746_v42 = vld [vmem:[#allocation5 + $0x1fb0] sm:$0xff]  ;;  %9512 = vmatprep.subr.bf16.mxu0 %v12231_v13 }
 0x35c   :  { %v14748_v52 = vld [vmem:[#allocation5 + $0x1b50] sm:$0xff]  ;;  %v8657_v47 = vadd.f32 %v8656_v30, %v8544_v27  ;;  %v12358_v7 = vcombine.low %v14740_v2, %v14746_v42  ;;  %v12359_v61 = vcombine.high %v14740_v2, %v14746_v42  ;;  %v17150_v27 = vld [vmem:[#allocation174_spill] sm:$0xff]  ;;  %v17153_v30 = vld [vmem:[#allocation179_spill] sm:$0xff] }
 0x35d   :  { %v14750_v16 = vld [vmem:[#allocation5 + $0x1b70] sm:$0xff]  ;;  %v8548_v12 = vadd.f32 %v17150_v27, %v8435_v34  ;;  %v8660_v34 = vpop.f32.mrf.mxu0  ;;  %9513 = vmatpush2.bf16.msra.mxu0 %v12230_v40  ;;  %v17172_v2 = vld [vmem:[#allocation184_spill] sm:$0xff] }
 0x35e   :  { %v17145_v18 = vld [vmem:[#allocation145_spill] sm:$0xff]  ;;  %v12223_v23 = vcombine.high %v14748_v52, %v14750_v16  ;;  %v8770_v22 = vadd.f32 %v8769_v53, %v8657_v47  ;;  %v12222_v62 = vcombine.low %v14748_v52, %v14750_v16  ;;  %v17156_v53 = vld [vmem:[#allocation151_spill] sm:$0xff]  ;;  %9625 = vmatprep.subr.bf16.mxu1 %v12359_v61 }
 0x35f   :  { %v8439_v19 = vadd.f32 %v17145_v18, %v17144_v20  ;;  %v17147_v14 = vld [vmem:[#allocation129_spill] sm:$0xff]  ;;  %v8664_v28 = vpop.f32.mrf.mxu0  ;;  %9626 = vmatpush2.bf16.msra.mxu1 %v12358_v7 }
 0x360   :  { %v8441_v17 = vadd.f32 %v17148_v54, %v17147_v14  ;;  %v17149_v63 = vld [vmem:[#allocation93_spill] sm:$0xff]  ;;  %v10675_v31 = vmax.f32 %v8770_v22, 0.0  ;;  %v8445_v54 = vadd.f32 %v17156_v53, %v17155_v11  ;;  %v8777_v22 = vpop.f32.mrf.mxu1  ;;  %v8451_v11 = vadd.f32 %v17164_v50, %v17163_v5  ;;  %v17168_v50 = vld [vmem:[#allocation162_spill] sm:$0xff]  ;;  %9514 = vmatprep.subr.bf16.mxu0 %v12223_v23 }
 0x361   :  { %9453 = vmatprep.mubr.bf16.mxu1 %v17149_v63  ;;  %v14777_v9 = vld [vmem:[#allocation5 + $0x1f50] sm:$0xff]  ;;  %9515 = vmatpush2.bf16.msra.mxu0 %v12222_v62  ;;  %v257_v63 = vld [vmem:[#allocation5 + $0x258] sm:$0xff] }
 0x362   :  { %v14779_v48 = vld [vmem:[#allocation5 + $0x1f70] sm:$0xff]  ;;  %v8554_v26 = vadd.f32 %v17154_v56, %v8441_v17  ;;  %9454 = vmatmul.mubr.bf16.gmra.mxu1 %v17158_v25  ;;  %v269_v25 = vld [vmem:[#allocation5 + $0x2b8] sm:$0xff] }
 0x363   :  { %v17151_v15 = vld [vmem:[#allocation177_spill] sm:$0xff]  ;;  %v12350_v1 = vcombine.low %v14777_v9, %v14779_v48  ;;  %v12351_v27 = vcombine.high %v14777_v9, %v14779_v48  ;;  %v17186_v48 = vld [vmem:[#allocation156_spill] sm:$0xff] }
 0x364   :  { %v8552_v20 = vadd.f32 %v17151_v15, %v8439_v19  ;;  %v17152_v18 = vld [vmem:[#allocation161_spill] sm:$0xff]  ;;  %v8661_v19 = vadd.f32 %v8660_v34, %v8548_v12  ;;  %v12459_v12 = vpack.c.bf16 %v10675_v31, %v10674_v41  ;;  %v17159_v15 = vld [vmem:[#allocation178_spill] sm:$0xff]  ;;  %v17161_v34 = vld [vmem:[#allocation152_spill] sm:$0xff]  ;;  %v8779_v31 = vpop.f32.mrf.mxu1 }
 0x365   :  { %v8443_v14 = vadd.f32 %v17153_v30, %v17152_v18  ;;  %v14792_v58 = vld [vmem:[#allocation5 + $0x1b10] sm:$0xff]  ;;  %v17160_v30 = vld [vmem:[#allocation132_spill] sm:$0xff]  ;;  %9627 = vmatprep.subr.bf16.mxu1 %v12351_v27 }
 0x366   :  { %v14794_v47 = vld [vmem:[#allocation5 + $0x1b30] sm:$0xff]  ;;  %v8774_v35 = vadd.f32 %v8773_v21, %v8661_v19  ;;  %v8665_v33 = vadd.f32 %v8664_v28, %v8552_v20  ;;  %v8449_v56 = vadd.f32 %v17161_v34, %v17160_v30  ;;  %v8666_v20 = vpop.f32.mrf.mxu0  ;;  %11161 = vst [vmem:[#allocation8 + $0xc8] sm:$0xff] %v12459_v12  ;;  %v17162_v19 = vld [vmem:[#allocation96_spill] sm:$0xff]  ;;  %9628 = vmatpush2.bf16.msra.mxu1 %v12350_v1 }
 0x367   :  { %v14808_v17 = vld [vmem:[#allocation5 + $0x1f10] sm:$0xff]  ;;  %v8556_v18 = vadd.f32 %v17159_v15, %v8443_v14  ;;  %v12215_v46 = vcombine.high %v14792_v58, %v14794_v47  ;;  %v8667_v14 = vadd.f32 %v8666_v20, %v8554_v26  ;;  %9350 = vmatprep.mubr.bf16.mxu0 %v17162_v19  ;;  %v8781_v15 = vpop.f32.mrf.mxu1  ;;  %v17167_v20 = vld [vmem:[#allocation183_spill] sm:$0xff]  ;;  %v17239_v19 = vld [vmem:[#allocation134_spill] sm:$0xff] }
 0x368   :  { %v14810_v36 = vld [vmem:[#allocation5 + $0x1f30] sm:$0xff]  ;;  %v10683_v3 = vmax.f32 %v8774_v35, 0.0  ;;  %v8778_v41 = vadd.f32 %v8777_v22, %v8665_v33  ;;  %v8668_v13 = vpop.f32.mrf.mxu0  ;;  %v8562_v5 = vadd.f32 %v17167_v20, %v8449_v56 }
 0x369   :  { %v14824_v21 = vld [vmem:[#allocation5 + $0x1ad0] sm:$0xff]  ;;  %v12343_v61 = vcombine.high %v14808_v17, %v14810_v36  ;;  %v8780_v33 = vadd.f32 %v8779_v31, %v8667_v14  ;;  %v8669_v22 = vadd.f32 %v8668_v13, %v8556_v18  ;;  %v17173_v13 = vld [vmem:[#allocation98_spill] sm:$0xff]  ;;  %9516 = vmatprep.subr.bf16.mxu0 %v12215_v46 }
 0x36a   :  { %v14826_v59 = vld [vmem:[#allocation5 + $0x1af0] sm:$0xff]  ;;  %v12463_v35 = vpack.c.bf16 %v10683_v3, %v10682_v8  ;;  %v10690_v32 = vmax.f32 %v8778_v41, 0.0  ;;  %v8783_v8 = vpop.f32.mrf.mxu1  ;;  %v17170_v3 = vld [vmem:[#allocation182_spill] sm:$0xff]  ;;  %9351 = vmatmul.mubr.bf16.gmra.mxu0 %v17173_v13 }
 0x36b   :  { %v17165_v53 = vld [vmem:[#allocation97_spill] sm:$0xff]  ;;  %v12207_v51 = vcombine.high %v14824_v21, %v14826_v59  ;;  %v10691_v40 = vmax.f32 %v8780_v33, 0.0  ;;  %v8782_v18 = vadd.f32 %v8781_v15, %v8669_v22  ;;  %v8564_v14 = vadd.f32 %v17170_v3, %v8451_v11  ;;  %v17174_v33 = vld [vmem:[#allocation99_spill] sm:$0xff]  ;;  %9629 = vmatprep.subr.bf16.mxu1 %v12343_v61 }
 0x36c   :  { %9463 = vmatprep.mubr.bf16.mxu1 %v17165_v53  ;;  %v17166_v28 = vld [vmem:[#allocation181_spill] sm:$0xff]  ;;  %11165 = vst [vmem:[#allocation8 + $0xe8] sm:$0xff] %v12463_v35  ;;  %v12206_v23 = vcombine.low %v14824_v21, %v14826_v59  ;;  %v8787_v27 = vpop.f32.mrf.mxu1  ;;  %v17177_v3 = vld [vmem:[#allocation187_spill] sm:$0xff]  ;;  %v273_v53 = vld [vmem:[#allocation5 + $0x2d8] sm:$0xff] }
 0x36d   :  { %v8558_v12 = vadd.f32 %v17166_v28, %v8445_v54  ;;  %v14841_v30 = vld [vmem:[#allocation5 + $0x1ed0] sm:$0xff]  ;;  %v8670_v54 = vpop.f32.mrf.mxu0  ;;  %v12467_v28 = vpack.c.bf16 %v10691_v40, %v10690_v32  ;;  %9464 = vmatmul.mubr.bf16.gmra.mxu1 %v17174_v33  ;;  %v10698_v16 = vmax.f32 %v8782_v18, 0.0  ;;  %v17182_v18 = vld [vmem:[#allocation154_spill] sm:$0xff] }
 0x36e   :  { %v14843_v34 = vld [vmem:[#allocation5 + $0x1ef0] sm:$0xff]  ;;  %v285_v33 = vld [vmem:[#allocation5 + $0x338] sm:$0xff] }
 0x36f   :  { %v17169_v26 = vld [vmem:[#allocation153_spill] sm:$0xff]  ;;  %v8671_v56 = vadd.f32 %v8670_v54, %v8558_v12  ;;  %v8674_v7 = vpop.f32.mrf.mxu0  ;;  %v12335_v52 = vcombine.high %v14841_v30, %v14843_v34  ;;  %11169 = vst [vmem:[#allocation8 + $0x108] sm:$0xff] %v12467_v28 }
 0x370   :  { %v8453_v29 = vadd.f32 %v17169_v26, %v17168_v50  ;;  %v17171_v31 = vld [vmem:[#allocation133_spill] sm:$0xff]  ;;  %v8675_v35 = vadd.f32 %v8674_v7, %v8562_v5 }
 0x371   :  { %v8455_v42 = vadd.f32 %v17172_v2, %v17171_v31  ;;  %v14864_v41 = vld [vmem:[#allocation5 + $0x1a90] sm:$0xff]  ;;  %v8784_v12 = vadd.f32 %v8783_v8, %v8671_v56  ;;  %v8676_v5 = vpop.f32.mrf.mxu0  ;;  %v8789_v8 = vpop.f32.mrf.mxu1  ;;  %v17179_v31 = vld [vmem:[#allocation135_spill] sm:$0xff] }
 0x372   :  { %v14870_v11 = vld [vmem:[#allocation5 + $0x1ab0] sm:$0xff]  ;;  %v8788_v40 = vadd.f32 %v8787_v27, %v8675_v35  ;;  %v8677_v56 = vadd.f32 %v8676_v5, %v8564_v14  ;;  %v17180_v2 = vld [vmem:[#allocation155_spill] sm:$0xff]  ;;  %v17183_v27 = vcombine.low %v14792_v58, %v14794_v47  ;;  %v17184_v5 = vld [vmem:[#allocation186_spill] sm:$0xff] }
 0x373   :  { %v14872_v22 = vld [vmem:[#allocation5 + $0x1e90] sm:$0xff]  ;;  %v10699_v62 = vmax.f32 %v8784_v12, 0.0  ;;  %v8461_v7 = vadd.f32 %v17180_v2, %v17179_v31  ;;  %v12199_v1 = vcombine.high %v14864_v41, %v14870_v11  ;;  %v8568_v14 = vadd.f32 %v17182_v18, %v8455_v42  ;;  %v8791_v35 = vpop.f32.mrf.mxu1  ;;  %v17185_v2 = vld [vmem:[#allocation167_spill] sm:$0xff] }
 0x374   :  { %v14874_v15 = vld [vmem:[#allocation5 + $0x1eb0] sm:$0xff]  ;;  %v8790_v28 = vadd.f32 %v8789_v8, %v8677_v56  ;;  %9517 = vmatpush2.bf16.msra.mxu0 %v17183_v27  ;;  %v8463_v26 = vadd.f32 %v17186_v48, %v17185_v2  ;;  %v17187_v42 = vcombine.low %v14808_v17, %v14810_v36  ;;  %v10706_v58 = vmax.f32 %v8788_v40, 0.0  ;;  %v17189_v17 = vld [vmem:[#allocation164_spill] sm:$0xff] }
 0x375   :  { %v17175_v20 = vld [vmem:[#allocation185_spill] sm:$0xff]  ;;  %v12471_v61 = vpack.c.bf16 %v10699_v62, %v10698_v16  ;;  %9518 = vmatprep.subr.bf16.mxu0 %v12207_v51  ;;  %v8793_v8 = vpop.f32.mrf.mxu1  ;;  %v17190_v36 = vld [vmem:[#allocation188_spill] sm:$0xff] }
 0x376   :  { %v8566_v50 = vadd.f32 %v17175_v20, %v8453_v29  ;;  %v17176_v54 = vld [vmem:[#allocation165_spill] sm:$0xff]  ;;  %v17178_v29 = vld [vmem:[#allocation100_spill] sm:$0xff]  ;;  %v8678_v20 = vpop.f32.mrf.mxu0  ;;  %9630 = vmatpush2.bf16.msra.mxu1 %v17187_v42  ;;  %v10707_v47 = vmax.f32 %v8790_v28, 0.0  ;;  %v8465_v27 = vadd.f32 %v17190_v36, %v17189_v17  ;;  %v17193_v42 = vld [vmem:[#allocation191_spill] sm:$0xff] }
 0x377   :  { %v8459_v32 = vadd.f32 %v17177_v3, %v17176_v54  ;;  %9360 = vmatprep.mubr.bf16.mxu0 %v17178_v29  ;;  %v17181_v9 = vld [vmem:[#allocation101_spill] sm:$0xff]  ;;  %11173 = vst [vmem:[#allocation8 + $0x128] sm:$0xff] %v12471_v61  ;;  %9631 = vmatprep.subr.bf16.mxu1 %v12335_v52  ;;  %v17235_v29 = vld [vmem:[#allocation127_spill] sm:$0xff] }
 0x378   :  { %9473 = vmatprep.mubr.bf16.mxu1 %v17181_v9  ;;  %v8679_v12 = vadd.f32 %v8678_v20, %v8566_v50  ;;  %v14898_v54 = vld [vmem:[#allocation5 + $0x1a50] sm:$0xff]  ;;  %v8680_v16 = vpop.f32.mrf.mxu0  ;;  %v12327_v50 = vcombine.high %v14872_v22, %v14874_v15  ;;  %v12475_v61 = vpack.c.bf16 %v10707_v47, %v10706_v58  ;;  %9519 = vmatpush2.bf16.msra.mxu0 %v12206_v23  ;;  %v289_v9 = vld [vmem:[#allocation5 + $0x358] sm:$0xff] }
 0x379   :  { %v14900_v3 = vld [vmem:[#allocation5 + $0x1a70] sm:$0xff]  ;;  %v8572_v31 = vadd.f32 %v17184_v5, %v8459_v32  ;;  %v8681_v56 = vadd.f32 %v8680_v16, %v8568_v14  ;;  %v17191_v5 = vld [vmem:[#allocation102_spill] sm:$0xff]  ;;  %v8576_v16 = vadd.f32 %v17193_v42, %v8463_v26  ;;  %v17196_v58 = vcombine.low %v14841_v30, %v14843_v34  ;;  %9520 = vmatprep.subr.bf16.mxu0 %v12199_v1  ;;  %v17197_v26 = vld [vmem:[#allocation104_spill] sm:$0xff] }
 0x37a   :  { %v8792_v62 = vadd.f32 %v8791_v35, %v8679_v12  ;;  %v14910_v32 = vld [vmem:[#allocation5 + $0x1e50] sm:$0xff]  ;;  %v8684_v51 = vpop.f32.mrf.mxu0  ;;  %9361 = vmatmul.mubr.bf16.gmra.mxu0 %v17191_v5  ;;  %v12191_v14 = vcombine.high %v14898_v54, %v14900_v3  ;;  %v8797_v12 = vpop.f32.mrf.mxu1  ;;  %v17192_v35 = vld [vmem:[#allocation103_spill] sm:$0xff]  ;;  %11177 = vst [vmem:[#allocation8 + $0x148] sm:$0xff] %v12475_v61  ;;  %v17199_v34 = vld [vmem:[#allocation192_spill] sm:$0xff] }
 0x37b   :  { %v14912_v20 = vld [vmem:[#allocation5 + $0x1e70] sm:$0xff]  ;;  %v8794_v52 = vadd.f32 %v8793_v8, %v8681_v56  ;;  %v8685_v28 = vadd.f32 %v8684_v51, %v8572_v31  ;;  %9474 = vmatmul.mubr.bf16.gmra.mxu1 %v17192_v35  ;;  %9370 = vmatprep.mubr.bf16.mxu0 %v17197_v26  ;;  %v17201_v61 = vld [vmem:[#allocation190_spill] sm:$0xff]  ;;  %v17231_v26 = vld [vmem:[#allocation123_spill] sm:$0xff] }
 0x37c   :  { %v17188_v48 = vld [vmem:[#allocation189_spill] sm:$0xff]  ;;  %9632 = vmatpush2.bf16.msra.mxu1 %v17196_v58  ;;  %v8686_v31 = vpop.f32.mrf.mxu0  ;;  %v12319_v47 = vcombine.high %v14910_v32, %v14912_v20  ;;  %v10714_v21 = vmax.f32 %v8792_v62, 0.0  ;;  %v8799_v8 = vpop.f32.mrf.mxu1  ;;  %v12318_v62 = vcombine.low %v14910_v32, %v14912_v20  ;;  %v17205_v32 = vld [vmem:[#allocation195_spill] sm:$0xff]  ;;  %v301_v35 = vld [vmem:[#allocation5 + $0x3b8] sm:$0xff] }
 0x37d   :  { %v8574_v18 = vadd.f32 %v17188_v48, %v8461_v7  ;;  %v14926_v7 = vld [vmem:[#allocation5 + $0x1a10] sm:$0xff]  ;;  %v17194_v48 = vld [vmem:[#allocation166_spill] sm:$0xff]  ;;  %v10715_v59 = vmax.f32 %v8794_v52, 0.0  ;;  %v8798_v23 = vadd.f32 %v8797_v12, %v8685_v28  ;;  %9633 = vmatprep.subr.bf16.mxu1 %v12327_v50  ;;  %v8578_v52 = vadd.f32 %v17201_v61, %v8465_v27 }
 0x37e   :  { %v14928_v2 = vld [vmem:[#allocation5 + $0x1a30] sm:$0xff]  ;;  %v8688_v1 = vpop.f32.mrf.mxu0 }
 0x37f   :  { %v17195_v17 = vld [vmem:[#allocation157_spill] sm:$0xff]  ;;  %v8687_v56 = vadd.f32 %v8686_v31, %v8574_v18  ;;  %v12183_v50 = vcombine.high %v14926_v7, %v14928_v2  ;;  %v12479_v28 = vpack.c.bf16 %v10715_v59, %v10714_v21  ;;  %v8689_v58 = vadd.f32 %v8688_v1, %v8576_v16  ;;  %v8801_v31 = vpop.f32.mrf.mxu1  ;;  %v14964_v16 = vld [vmem:[#allocation5 + $0x1d8] sm:$0xff]  ;;  %v17209_v1 = vld [vmem:[#allocation196_spill] sm:$0xff] }
 0x380   :  { %v8469_v36 = vadd.f32 %v17195_v17, %v17194_v48  ;;  %v14939_v51 = vld [vmem:[#allocation5 + $0x1e10] sm:$0xff]  ;;  %v17206_v18 = vcombine.low %v14872_v22, %v14874_v15  ;;  %v10722_v21 = vmax.f32 %v8798_v23, 0.0  ;;  %v14970_v22 = vld [vmem:[#allocation5 + $0x5f8] sm:$0xff] }
 0x381   :  { %v14941_v42 = vld [vmem:[#allocation5 + $0x1e30] sm:$0xff]  ;;  %v8800_v12 = vadd.f32 %v8799_v8, %v8687_v56  ;;  %11181 = vst [vmem:[#allocation8 + $0x168] sm:$0xff] %v12479_v28  ;;  %v14966_v56 = vld [vmem:[#allocation5 + $0x1f8] sm:$0xff]  ;;  %v17208_v8 = vld [vmem:[#allocation168_spill] sm:$0xff] }
 0x382   :  { %v17198_v30 = vld [vmem:[#allocation137_spill] sm:$0xff]  ;;  %9634 = vmatpush2.bf16.msra.mxu1 %v17206_v18  ;;  %v12311_v27 = vcombine.high %v14939_v51, %v14941_v42  ;;  %v17207_v15 = vld [vmem:[#allocation158_spill] sm:$0xff]  ;;  %v8475_v18 = vadd.f32 %v17209_v1, %v17208_v8  ;;  %v12310_v23 = vcombine.low %v14939_v51, %v14941_v42  ;;  %v11409_v51 = vcombine.high %v14964_v16, %v14966_v56 }
 0x383   :  { %v8471_v48 = vadd.f32 %v17199_v34, %v17198_v30  ;;  %v17200_v17 = vld [vmem:[#allocation105_spill] sm:$0xff]  ;;  %v17202_v30 = vcombine.low %v14864_v41, %v14870_v11  ;;  %v10723_v41 = vmax.f32 %v8800_v12, 0.0  ;;  %v8802_v11 = vadd.f32 %v8801_v31, %v8689_v58  ;;  %9635 = vmatprep.subr.bf16.mxu1 %v12319_v47  ;;  %v17212_v31 = vld [vmem:[#allocation107_spill] sm:$0xff]  ;;  %v14996_v8 = vld [vmem:[#allocation5 + $0x5b8] sm:$0xff] }
 0x384   :  { %9483 = vmatprep.mubr.bf16.mxu1 %v17200_v17  ;;  %v17203_v34 = vld [vmem:[#allocation193_spill] sm:$0xff]  ;;  %v8690_v17 = vpop.f32.mrf.mxu0 }
 0x385   :  { %9521 = vmatpush2.bf16.msra.mxu0 %v17202_v30  ;;  %v8582_v40 = vadd.f32 %v17203_v34, %v8469_v36  ;;  %v17204_v46 = vld [vmem:[#allocation169_spill] sm:$0xff]  ;;  %v8691_v59 = vadd.f32 %v8690_v17, %v8578_v52  ;;  %v8803_v36 = vpop.f32.mrf.mxu1  ;;  %v17210_v30 = vld [vmem:[#allocation106_spill] sm:$0xff]  ;;  %v17211_v17 = vld [vmem:[#allocation108_spill] sm:$0xff]  ;;  %v12483_v47 = vpack.c.bf16 %v10723_v41, %v10722_v21  ;;  %9484 = vmatmul.mubr.bf16.gmra.mxu1 %v17212_v31  ;;  %v10730_v41 = vmax.f32 %v8802_v11, 0.0 }
 0x386   :  { %v8473_v20 = vadd.f32 %v17205_v32, %v17204_v46  ;;  %9522 = vmatprep.subr.bf16.mxu0 %v12191_v14  ;;  %v14968_v46 = vld [vmem:[#allocation5 + $0x5d8] sm:$0xff]  ;;  %v8584_v14 = vadd.f32 %v17207_v15, %v8471_v48  ;;  %v8694_v61 = vpop.f32.mrf.mxu0  ;;  %9371 = vmatmul.mubr.bf16.gmra.mxu0 %v17210_v30  ;;  %v1226_v52 = vsub.s32 4, %v17211_v17  ;;  %v17213_v48 = vcombine.low %v14898_v54, %v14900_v3 }
 0x387   :  { %v8804_v28 = vadd.f32 %v8803_v36, %v8691_v59  ;;  %v8695_v12 = vadd.f32 %v8694_v61, %v8582_v40  ;;  %v8807_v58 = vpop.f32.mrf.mxu1  ;;  %v17214_v34 = vld [vmem:[#allocation194_spill] sm:$0xff]  ;;  %9636 = vmatpush2.bf16.msra.mxu1 %v12318_v62  ;;  %v11537_v42 = vcombine.high %v14968_v46, %v14970_v22  ;;  %v1230_v40 = vsub.s32 5, %v17211_v17  ;;  %11185 = vst [vmem:[#allocation8 + $0x188] sm:$0xff] %v12483_v47  ;;  %v17215_v62 = vld [vmem:[#allocation109_spill] sm:$0xff] }
 0x388   :  { %v8586_v32 = vadd.f32 %v17214_v34, %v8473_v20  ;;  %v8696_v15 = vpop.f32.mrf.mxu0  ;;  %v14989_v21 = vld [vmem:[#allocation5 + $0x198] sm:$0xff]  ;;  %9637 = vmatprep.subr.bf16.mxu1 %v12311_v27  ;;  %9526 = vmatprep.mubr.bf16.mxu0 %v17215_v62  ;;  %v11408_v11 = vcombine.low %v14964_v16, %v14966_v56  ;;  %v11536_v27 = vcombine.low %v14968_v46, %v14970_v22 }
 0x389   :  { %9523 = vmatpush2.bf16.msra.mxu0 %v17213_v48  ;;  %v10731_v59 = vmax.f32 %v8804_v28, 0.0  ;;  %v8808_v54 = vadd.f32 %v8807_v58, %v8695_v12  ;;  %v8697_v3 = vadd.f32 %v8696_v15, %v8584_v14  ;;  %v8809_v36 = vpop.f32.mrf.mxu1  ;;  %v14994_v20 = vld [vmem:[#allocation5 + $0x598] sm:$0xff]  ;;  %v12507_v48 = vld [vmem:[#allocation7] sm:$0xff]  ;;  %v17217_v14 = vld [vmem:[#allocation197_spill] sm:$0xff]  ;;  %v17218_v62 = vcombine.low %v14926_v7, %v14928_v2 }
 0x38a   :  { %9524 = vmatprep.subr.bf16.mxu0 %v12183_v50  ;;  %v14992_v50 = vld [vmem:[#allocation5 + $0x1b8] sm:$0xff]  ;;  %v8698_v1 = vpop.f32.mrf.mxu0  ;;  %v14999_v34 = vrot.slane %v12507_v48, %v1226_v52  ;;  %v8588_v47 = vadd.f32 %v17217_v14, %v8475_v18  ;;  %v15009_v52 = vrot.slane %v12507_v48, %v1230_v40  ;;  %v11529_v56 = vcombine.high %v14994_v20, %v14996_v8 }
 0x38b   :  { %v17216_v61 = vld [vmem:[#allocation110_spill] sm:$0xff]  ;;  %v12487_v28 = vpack.c.bf16 %v10731_v59, %v10730_v41  ;;  %v8810_v12 = vadd.f32 %v8809_v36, %v8697_v3  ;;  %v8699_v58 = vadd.f32 %v8698_v1, %v8586_v32  ;;  %v8811_v15 = vpop.f32.mrf.mxu1  ;;  %9638 = vmatpush2.bf16.msra.mxu1 %v12310_v23  ;;  %v11401_v16 = vcombine.high %v14989_v21, %v14992_v50  ;;  %v17219_v59 = vld [vmem:[#allocation111_spill] sm:$0xff] }
 0x38c   :  { %9639 = vmatprep.mubr.bf16.mxu1 %v17216_v61  ;;  %v8700_v61 = vpop.f32.mrf.mxu0  ;;  %v15015_v46 = vld [vmem:[#allocation5 + $0x158] sm:$0xff]  ;;  %v10738_v22 = vmax.f32 %v8808_v54, 0.0  ;;  %9833 = vmatprep.subr.bf16.mxu1 %v11537_v42  ;;  %v11400_v3 = vcombine.low %v14989_v21, %v14992_v50  ;;  %v17220_v54 = vld [vmem:[#allocation112_spill] sm:$0xff]  ;;  %v11528_v42 = vcombine.low %v14994_v20, %v14996_v8 }
 0x38d   :  { %9525 = vmatpush2.bf16.msra.mxu0 %v17218_v62  ;;  %11189 = vst [vmem:[#allocation8 + $0x1a8] sm:$0xff] %v12487_v28  ;;  %v10739_v18 = vmax.f32 %v8810_v12, 0.0  ;;  %v8812_v32 = vadd.f32 %v8811_v15, %v8699_v58  ;;  %v8701_v41 = vadd.f32 %v8700_v61, %v8588_v47  ;;  %v8813_v7 = vpop.f32.mrf.mxu1  ;;  %v229_v2 = vld [vmem:[#allocation5 + $0x178] sm:$0xff]  ;;  %v17221_v15 = vld [vmem:[#allocation113_spill] sm:$0xff] }
 0x38e   :  { %9720 = vmatprep.subr.bf16.mxu0 %v11409_v51  ;;  %v353_v23 = vld [vmem:[#allocation5 + $0x558] sm:$0xff]  ;;  %v8850_v40 = vpop.f32.mrf.mxu0  ;;  %9640 = vmatmul.mubr.bf16.vlgmr.msra.gmra.mxu1 %v17220_v54  ;;  %v11393_v14 = vcombine.high %v15015_v46, %v229_v2 }
 0x38f   :  { %v357_v51 = vld [vmem:[#allocation5 + $0x578] sm:$0xff]  ;;  %v12491_v36 = vpack.c.bf16 %v10739_v18, %v10738_v22  ;;  %v8814_v62 = vadd.f32 %v8813_v7, %v8701_v41  ;;  %v8851_v1 = vadd.f32 %v8850_v40, %v14999_v34  ;;  %v8963_v48 = vpop.f32.mrf.mxu1  ;;  %9834 = vmatpush1.bf16.msra.mxu1 %v11536_v27  ;;  %v10746_v28 = vmax.f32 %v8812_v32, 0.0 }
 0x390   :  { %9527 = vmatmul.mubr.bf16.vlgmr.msra.gmra.mxu0 %v17219_v59  ;;  %v8852_v61 = vpop.f32.mrf.mxu0  ;;  %v11521_v47 = vcombine.high %v353_v23, %v357_v51  ;;  %9835 = vmatprep.subr.bf16.mxu1 %v11529_v56  ;;  %v221_v27 = vld [vmem:[#allocation5 + $0x138] sm:$0xff]  ;;  %v11392_v40 = vcombine.low %v15015_v46, %v229_v2  ;;  %v17227_v59 = vld [vmem:[#allocation119_spill] sm:$0xff] }
 0x391   :  { %9721 = vmatpush1.bf16.msra.mxu0 %v11408_v11  ;;  %11193 = vst [vmem:[#allocation8 + $0x1c8] sm:$0xff] %v12491_v36  ;;  %v10747_v21 = vmax.f32 %v8814_v62, 0.0  ;;  %v15025_v50 = vadd.f32 %v8963_v48, %v8851_v1  ;;  %v8853_v12 = vadd.f32 %v8852_v61, %v15009_v52  ;;  %v8965_v58 = vpop.f32.mrf.mxu1  ;;  %9536 = vmatprep.mubr.bf16.mxu0 %v17221_v15  ;;  %v217_v11 = vld [vmem:[#allocation5 + $0x118] sm:$0xff] }
 0x392   :  { %9722 = vmatprep.subr.bf16.mxu0 %v11401_v16  ;;  %v8854_v16 = vpop.f32.mrf.mxu0  ;;  %v17222_v22 = vld [vmem:[#allocation114_spill] sm:$0xff]  ;;  %v11520_v36 = vcombine.low %v353_v23, %v357_v51  ;;  %v11385_v62 = vcombine.high %v217_v11, %v221_v27 }
 0x393   :  { %9649 = vmatprep.mubr.bf16.mxu1 %v17222_v22  ;;  %v345_v20 = vld [vmem:[#allocation5 + $0x518] sm:$0xff]  ;;  %v12495_v18 = vpack.c.bf16 %v10747_v21, %v10746_v28  ;;  %v15030_v41 = vadd.f32 %v8965_v58, %v8853_v12  ;;  %v8855_v32 = vadd.f32 %v8854_v16, %v14999_v34  ;;  %v8967_v7 = vpop.f32.mrf.mxu1  ;;  %9836 = vmatpush1.bf16.msra.mxu1 %v11528_v42  ;;  %v17223_v16 = vld [vmem:[#allocation115_spill] sm:$0xff]  ;;  %v17224_v42 = vld [vmem:[#allocation116_spill] sm:$0xff] }
 0x394   :  { %v349_v8 = vld [vmem:[#allocation5 + $0x538] sm:$0xff]  ;;  %v8856_v56 = vpop.f32.mrf.mxu0  ;;  %9837 = vmatprep.subr.bf16.mxu1 %v11521_v47 }
 0x395   :  { %9723 = vmatpush1.bf16.msra.mxu0 %v11400_v3  ;;  %11197 = vst [vmem:[#allocation8 + $0x1e8] sm:$0xff] %v12495_v18  ;;  %v15034_v1 = vadd.f32 %v8967_v7, %v8855_v32  ;;  %v8857_v48 = vadd.f32 %v8856_v56, %v15009_v52  ;;  %v8969_v61 = vpop.f32.mrf.mxu1  ;;  %v11513_v28 = vcombine.high %v345_v20, %v349_v8  ;;  %v209_v21 = vld [vmem:[#allocation5 + $0xd8] sm:$0xff] }
 0x396   :  { %9724 = vmatprep.subr.bf16.mxu0 %v11393_v14  ;;  %v213_v12 = vld [vmem:[#allocation5 + $0xf8] sm:$0xff]  ;;  %v8860_v58 = vpop.f32.mrf.mxu0  ;;  %9650 = vmatmul.mubr.bf16.gmra.mxu1 %v17224_v42  ;;  %v11384_v14 = vcombine.low %v217_v11, %v221_v27  ;;  %v11512_v47 = vcombine.low %v345_v20, %v349_v8 }
 0x397   :  { %v337_v3 = vld [vmem:[#allocation5 + $0x4d8] sm:$0xff]  ;;  %v15038_v2 = vadd.f32 %v8969_v61, %v8857_v48  ;;  %v8861_v23 = vadd.f32 %v8860_v58, %v14999_v34  ;;  %v8973_v51 = vpop.f32.mrf.mxu1  ;;  %9838 = vmatpush1.bf16.msra.mxu1 %v11520_v36  ;;  %v11377_v32 = vcombine.high %v209_v21, %v213_v12  ;;  %v17225_v48 = vld [vmem:[#allocation117_spill] sm:$0xff]  ;;  %v11376_v36 = vcombine.low %v209_v21, %v213_v12 }
 0x398   :  { %9537 = vmatmul.mubr.bf16.gmra.mxu0 %v17223_v16  ;;  %v341_v46 = vld [vmem:[#allocation5 + $0x4f8] sm:$0xff]  ;;  %v8862_v18 = vpop.f32.mrf.mxu0  ;;  %9839 = vmatprep.subr.bf16.mxu1 %v11513_v28 }
 0x399   :  { %9725 = vmatpush1.bf16.msra.mxu0 %v11392_v40  ;;  %v15042_v7 = vadd.f32 %v8973_v51, %v8861_v23  ;;  %v8863_v56 = vadd.f32 %v8862_v18, %v15009_v52  ;;  %v8975_v16 = vpop.f32.mrf.mxu1  ;;  %9546 = vmatprep.mubr.bf16.mxu0 %v17225_v48  ;;  %v11505_v61 = vcombine.high %v337_v3, %v341_v46  ;;  %v201_v58 = vld [vmem:[#allocation5 + $0x98] sm:$0xff] }
 0x39a   :  { %9726 = vmatprep.subr.bf16.mxu0 %v11385_v62  ;;  %v205_v22 = vld [vmem:[#allocation5 + $0xb8] sm:$0xff]  ;;  %v8864_v15 = vpop.f32.mrf.mxu0  ;;  %v11504_v28 = vcombine.low %v337_v3, %v341_v46  ;;  %v17228_v46 = vld [vmem:[#allocation120_spill] sm:$0xff] }
 0x39b   :  { %v17226_v42 = vld [vmem:[#allocation118_spill] sm:$0xff]  ;;  %v15047_v40 = vadd.f32 %v8975_v16, %v8863_v56  ;;  %v8865_v20 = vadd.f32 %v8864_v15, %v14999_v34  ;;  %v8977_v8 = vpop.f32.mrf.mxu1  ;;  %9840 = vmatpush1.bf16.msra.mxu1 %v11512_v47  ;;  %v11369_v23 = vcombine.high %v201_v58, %v205_v22  ;;  %v11368_v47 = vcombine.low %v201_v58, %v205_v22 }
 0x39c   :  { %9659 = vmatprep.mubr.bf16.mxu1 %v17226_v42  ;;  %v329_v11 = vld [vmem:[#allocation5 + $0x498] sm:$0xff]  ;;  %v8866_v62 = vpop.f32.mrf.mxu0  ;;  %9841 = vmatprep.subr.bf16.mxu1 %v11505_v61 }
 0x39d   :  { %v333_v27 = vld [vmem:[#allocation5 + $0x4b8] sm:$0xff]  ;;  %9727 = vmatpush1.bf16.msra.mxu0 %v11384_v14  ;;  %v15050_v51 = vadd.f32 %v8977_v8, %v8865_v20  ;;  %v8867_v18 = vadd.f32 %v8866_v62, %v15009_v52  ;;  %v8979_v48 = vpop.f32.mrf.mxu1 }
 0x39e   :  { %9728 = vmatprep.subr.bf16.mxu0 %v11377_v32  ;;  %v11497_v42 = vcombine.high %v329_v11, %v333_v27  ;;  %v193_v54 = vld [vmem:[#allocation5 + $0x58] sm:$0xff]  ;;  %v8870_v56 = vpop.f32.mrf.mxu0  ;;  %9660 = vmatmul.mubr.bf16.gmra.mxu1 %v17228_v46  ;;  %v11496_v61 = vcombine.low %v329_v11, %v333_v27 }
 0x39f   :  { %v197_v16 = vld [vmem:[#allocation5 + $0x78] sm:$0xff]  ;;  %v15054_v21 = vadd.f32 %v8979_v48, %v8867_v18  ;;  %v8871_v12 = vadd.f32 %v8870_v56, %v14999_v34  ;;  %v8983_v3 = vpop.f32.mrf.mxu1  ;;  %9842 = vmatpush1.bf16.msra.mxu1 %v11504_v28  ;;  %v17229_v48 = vld [vmem:[#allocation121_spill] sm:$0xff] }
 0x3a0   :  { %9547 = vmatmul.mubr.bf16.gmra.mxu0 %v17227_v59  ;;  %v321_v15 = vld [vmem:[#allocation5 + $0x458] sm:$0xff]  ;;  %v8872_v32 = vpop.f32.mrf.mxu0  ;;  %v11361_v20 = vcombine.high %v193_v54, %v197_v16  ;;  %9843 = vmatprep.subr.bf16.mxu1 %v11497_v42  ;;  %v11360_v28 = vcombine.low %v193_v54, %v197_v16 }
 0x3a1   :  { %v325_v14 = vld [vmem:[#allocation5 + $0x478] sm:$0xff]  ;;  %9729 = vmatpush1.bf16.msra.mxu0 %v11376_v36  ;;  %v15058_v8 = vadd.f32 %v8983_v3, %v8871_v12  ;;  %v8873_v62 = vadd.f32 %v8872_v32, %v15009_v52  ;;  %v8985_v59 = vpop.f32.mrf.mxu1  ;;  %9556 = vmatprep.mubr.bf16.mxu0 %v17229_v48 }
 0x3a2   :  { %9730 = vmatprep.subr.bf16.mxu0 %v11369_v23  ;;  %v11489_v18 = vcombine.high %v321_v15, %v325_v14  ;;  %v185_v56 = vld [vmem:[#allocation5 + $0x18] sm:$0xff]  ;;  %v8874_v17 = vpop.f32.mrf.mxu0  ;;  %v11488_v42 = vcombine.low %v321_v15, %v325_v14  ;;  %v17232_v14 = vld [vmem:[#allocation124_spill] sm:$0xff] }
 0x3a3   :  { %v189_v31 = vld [vmem:[#allocation5 + $0x38] sm:$0xff]  ;;  %v15063_v36 = vadd.f32 %v8985_v59, %v8873_v62  ;;  %v8875_v11 = vadd.f32 %v8874_v17, %v14999_v34  ;;  %v8987_v27 = vpop.f32.mrf.mxu1  ;;  %9844 = vmatpush1.bf16.msra.mxu1 %v11496_v61 }
 0x3a4   :  { %v17230_v46 = vld [vmem:[#allocation122_spill] sm:$0xff]  ;;  %v8876_v23 = vpop.f32.mrf.mxu0  ;;  %v11353_v12 = vcombine.high %v185_v56, %v189_v31  ;;  %9845 = vmatprep.subr.bf16.mxu1 %v11489_v18  ;;  %v11352_v61 = vcombine.low %v185_v56, %v189_v31 }
 0x3a5   :  { %9669 = vmatprep.mubr.bf16.mxu1 %v17230_v46  ;;  %v313_v22 = vld [vmem:[#allocation5 + $0x418] sm:$0xff]  ;;  %9731 = vmatpush1.bf16.msra.mxu0 %v11368_v47  ;;  %v15066_v3 = vadd.f32 %v8987_v27, %v8875_v11  ;;  %v8877_v32 = vadd.f32 %v8876_v23, %v15009_v52  ;;  %v8989_v48 = vpop.f32.mrf.mxu1 }
 0x3a6   :  { %v317_v58 = vld [vmem:[#allocation5 + $0x438] sm:$0xff]  ;;  %9732 = vmatprep.subr.bf16.mxu0 %v11361_v20  ;;  %v8880_v62 = vpop.f32.mrf.mxu0  ;;  %9670 = vmatmul.mubr.bf16.gmra.mxu1 %v17232_v14 }
 0x3a7   :  { %v11481_v46 = vcombine.high %v313_v22, %v317_v58  ;;  %v305_v30 = vld [vmem:[#allocation5 + $0x3d8] sm:$0xff]  ;;  %v15070_v54 = vadd.f32 %v8989_v48, %v8877_v32  ;;  %v8881_v16 = vadd.f32 %v8880_v62, %v14999_v34  ;;  %v8993_v15 = vpop.f32.mrf.mxu1  ;;  %9846 = vmatpush1.bf16.msra.mxu1 %v11488_v42  ;;  %v11480_v18 = vcombine.low %v313_v22, %v317_v58  ;;  %v17233_v48 = vld [vmem:[#allocation125_spill] sm:$0xff] }
 0x3a8   :  { %v309_v59 = vld [vmem:[#allocation5 + $0x3f8] sm:$0xff]  ;;  %9557 = vmatmul.mubr.bf16.gmra.mxu0 %v17231_v26  ;;  %v8882_v20 = vpop.f32.mrf.mxu0 }
 0x3a9   :  { %v433_v17 = vld [vmem:[#allocation5 + $0x7d8] sm:$0xff]  ;;  %9733 = vmatpush1.bf16.msra.mxu0 %v11360_v28  ;;  %v11473_v11 = vcombine.high %v305_v30, %v309_v59  ;;  %v15074_v27 = vadd.f32 %v8993_v15, %v8881_v16  ;;  %v8883_v23 = vadd.f32 %v8882_v20, %v15009_v52  ;;  %v8995_v26 = vpop.f32.mrf.mxu1  ;;  %9847 = vmatprep.subr.bf16.mxu1 %v11481_v46 }
 0x3aa   :  { %v437_v47 = vld [vmem:[#allocation5 + $0x7f8] sm:$0xff]  ;;  %9734 = vmatprep.subr.bf16.mxu0 %v11353_v12  ;;  %9566 = vmatprep.mubr.bf16.mxu0 %v17233_v48  ;;  %v8884_v5 = vpop.f32.mrf.mxu0  ;;  %v11472_v42 = vcombine.low %v305_v30, %v309_v59 }
 0x3ab   :  { %v11601_v32 = vcombine.high %v433_v17, %v437_v47  ;;  %v297_v62 = vld [vmem:[#allocation5 + $0x398] sm:$0xff]  ;;  %v15079_v28 = vadd.f32 %v8995_v26, %v8883_v23  ;;  %v8885_v22 = vadd.f32 %v8884_v5, %v14999_v34  ;;  %v8997_v58 = vpop.f32.mrf.mxu1  ;;  %9848 = vmatpush1.bf16.msra.mxu1 %v11480_v18  ;;  %v11600_v46 = vcombine.low %v433_v17, %v437_v47  ;;  %v17236_v47 = vld [vmem:[#allocation128_spill] sm:$0xff] }
 0x3ac   :  { %v17234_v14 = vld [vmem:[#allocation126_spill] sm:$0xff]  ;;  %v8886_v12 = vpop.f32.mrf.mxu0  ;;  %v11465_v16 = vcombine.high %v297_v62, %v301_v35  ;;  %v11464_v18 = vcombine.low %v297_v62, %v301_v35 }
 0x3ad   :  { %9679 = vmatprep.mubr.bf16.mxu1 %v17234_v14  ;;  %v425_v31 = vld [vmem:[#allocation5 + $0x798] sm:$0xff]  ;;  %9735 = vmatpush1.bf16.msra.mxu0 %v11352_v61  ;;  %v15082_v15 = vadd.f32 %v8997_v58, %v8885_v22  ;;  %v8887_v20 = vadd.f32 %v8886_v12, %v15009_v52  ;;  %v8999_v48 = vpop.f32.mrf.mxu1 }
 0x3ae   :  { %v429_v56 = vld [vmem:[#allocation5 + $0x7b8] sm:$0xff]  ;;  %9736 = vmatprep.subr.bf16.mxu0 %v11473_v11  ;;  %9849 = vmatprep.subr.bf16.mxu1 %v11601_v32  ;;  %v8890_v23 = vpop.f32.mrf.mxu0 }
 0x3af   :  { %v11593_v14 = vcombine.high %v425_v31, %v429_v56  ;;  %v293_v26 = vld [vmem:[#allocation5 + $0x378] sm:$0xff]  ;;  %v15086_v30 = vadd.f32 %v8999_v48, %v8887_v20  ;;  %v8891_v59 = vadd.f32 %v8890_v23, %v14999_v34  ;;  %v9003_v17 = vpop.f32.mrf.mxu1  ;;  %9680 = vmatmul.mubr.bf16.gmra.mxu1 %v17236_v47  ;;  %v11592_v32 = vcombine.low %v425_v31, %v429_v56  ;;  %v17238_v47 = vld [vmem:[#allocation131_spill] sm:$0xff] }
 0x3b0   :  { %9567 = vmatmul.mubr.bf16.gmra.mxu0 %v17235_v29  ;;  %v417_v5 = vld [vmem:[#allocation5 + $0x758] sm:$0xff]  ;;  %9850 = vmatpush2.bf16.msra.mxu1 %v11600_v46  ;;  %v8892_v11 = vpop.f32.mrf.mxu0  ;;  %v11457_v22 = vcombine.high %v289_v9, %v293_v26  ;;  %v11456_v46 = vcombine.low %v289_v9, %v293_v26 }
 0x3b1   :  { %v421_v61 = vld [vmem:[#allocation5 + $0x778] sm:$0xff]  ;;  %9737 = vmatpush2.bf16.msra.mxu0 %v11472_v42  ;;  %v15090_v58 = vadd.f32 %v9003_v17, %v8891_v59  ;;  %v8893_v12 = vadd.f32 %v8892_v11, %v15009_v52  ;;  %v9005_v29 = vpop.f32.mrf.mxu1  ;;  %9851 = vmatprep.subr.bf16.mxu1 %v11593_v14 }
 0x3b2   :  { %9738 = vmatprep.subr.bf16.mxu0 %v11465_v16  ;;  %v17237_v48 = vld [vmem:[#allocation130_spill] sm:$0xff]  ;;  %v11585_v20 = vcombine.high %v417_v5, %v421_v61  ;;  %v8894_v13 = vpop.f32.mrf.mxu0  ;;  %9689 = vmatprep.mubr.bf16.mxu1 %v17238_v47  ;;  %v11584_v14 = vcombine.low %v417_v5, %v421_v61  ;;  %v17240_v61 = vld [vmem:[#allocation136_spill] sm:$0xff] }
 0x3b3   :  { %9576 = vmatprep.mubr.bf16.mxu0 %v17237_v48  ;;  %v281_v23 = vld [vmem:[#allocation5 + $0x318] sm:$0xff]  ;;  %v15095_v42 = vadd.f32 %v9005_v29, %v8893_v12  ;;  %v8895_v31 = vadd.f32 %v8894_v13, %v14999_v34  ;;  %v9007_v56 = vpop.f32.mrf.mxu1 }
 0x3b4   :  { %v409_v35 = vld [vmem:[#allocation5 + $0x718] sm:$0xff]  ;;  %9852 = vmatpush2.bf16.msra.mxu1 %v11592_v32  ;;  %v8896_v16 = vpop.f32.mrf.mxu0  ;;  %v11449_v59 = vcombine.high %v281_v23, %v285_v33  ;;  %v11448_v32 = vcombine.low %v281_v23, %v285_v33 }
 0x3b5   :  { %v413_v62 = vld [vmem:[#allocation5 + $0x738] sm:$0xff]  ;;  %9739 = vmatpush2.bf16.msra.mxu0 %v11464_v18  ;;  %v15098_v17 = vadd.f32 %v9007_v56, %v8895_v31  ;;  %v8897_v11 = vadd.f32 %v8896_v16, %v15009_v52  ;;  %v9009_v48 = vpop.f32.mrf.mxu1  ;;  %9853 = vmatprep.subr.bf16.mxu1 %v11585_v20 }
 0x3b6   :  { %9740 = vmatprep.subr.bf16.mxu0 %v11457_v22  ;;  %v11577_v47 = vcombine.high %v409_v35, %v413_v62  ;;  %v277_v29 = vld [vmem:[#allocation5 + $0x2f8] sm:$0xff]  ;;  %v8900_v12 = vpop.f32.mrf.mxu0  ;;  %v11576_v20 = vcombine.low %v409_v35, %v413_v62 }
 0x3b7   :  { %v401_v13 = vld [vmem:[#allocation5 + $0x6d8] sm:$0xff]  ;;  %v15102_v9 = vadd.f32 %v9009_v48, %v8897_v11  ;;  %v8901_v26 = vadd.f32 %v8900_v12, %v14999_v34  ;;  %v9013_v5 = vpop.f32.mrf.mxu1  ;;  %9690 = vmatmul.mubr.bf16.gmra.mxu1 %v17240_v61  ;;  %v11441_v31 = vcombine.high %v273_v53, %v277_v29  ;;  %v17242_v61 = vld [vmem:[#allocation139_spill] sm:$0xff] }
 0x3b8   :  { %9577 = vmatmul.mubr.bf16.gmra.mxu0 %v17239_v19  ;;  %v405_v18 = vld [vmem:[#allocation5 + $0x6f8] sm:$0xff]  ;;  %9854 = vmatpush2.bf16.msra.mxu1 %v11584_v14  ;;  %v8902_v22 = vpop.f32.mrf.mxu0  ;;  %v11440_v14 = vcombine.low %v273_v53, %v277_v29 }
 0x3b9   :  { %9741 = vmatpush2.bf16.msra.mxu0 %v11456_v46  ;;  %v15106_v56 = vadd.f32 %v9013_v5, %v8901_v26  ;;  %v8903_v16 = vadd.f32 %v8902_v22, %v15009_v52  ;;  %v9015_v19 = vpop.f32.mrf.mxu1  ;;  %9855 = vmatprep.subr.bf16.mxu1 %v11577_v47  ;;  %v17241_v48 = vld [vmem:[#allocation138_spill] sm:$0xff]  ;;  %v11569_v11 = vcombine.high %v401_v13, %v405_v18 }
 0x3ba   :  { %9742 = vmatprep.subr.bf16.mxu0 %v11449_v59  ;;  %9586 = vmatprep.mubr.bf16.mxu0 %v17241_v48  ;;  %v265_v12 = vld [vmem:[#allocation5 + $0x298] sm:$0xff]  ;;  %v8904_v24 = vpop.f32.mrf.mxu0  ;;  %v11568_v47 = vcombine.low %v401_v13, %v405_v18  ;;  %v17244_v18 = vld [vmem:[#allocation144_spill] sm:$0xff] }
 0x3bb   :  { %9699 = vmatprep.mubr.bf16.mxu1 %v17242_v61  ;;  %v393_v33 = vld [vmem:[#allocation5 + $0x698] sm:$0xff]  ;;  %v15111_v46 = vadd.f32 %v9015_v19, %v8903_v16  ;;  %v8905_v35 = vadd.f32 %v8904_v24, %v14999_v34  ;;  %v9017_v62 = vpop.f32.mrf.mxu1  ;;  %v11433_v26 = vcombine.high %v265_v12, %v269_v25 }
 0x3bc   :  { %v397_v23 = vld [vmem:[#allocation5 + $0x6b8] sm:$0xff]  ;;  %9856 = vmatpush2.bf16.msra.mxu1 %v11576_v20  ;;  %v8906_v59 = vpop.f32.mrf.mxu0  ;;  %v11432_v20 = vcombine.low %v265_v12, %v269_v25 }
 0x3bd   :  { %9743 = vmatpush2.bf16.msra.mxu0 %v11448_v32  ;;  %v15114_v5 = vadd.f32 %v9017_v62, %v8905_v35  ;;  %v8907_v22 = vadd.f32 %v8906_v59, %v15009_v52  ;;  %v9019_v48 = vpop.f32.mrf.mxu1  ;;  %9857 = vmatprep.subr.bf16.mxu1 %v11569_v11  ;;  %v11561_v61 = vcombine.high %v393_v33, %v397_v23  ;;  %v261_v19 = vld [vmem:[#allocation5 + $0x278] sm:$0xff] }
 0x3be   :  { %9744 = vmatprep.subr.bf16.mxu0 %v11441_v31  ;;  %v8910_v16 = vpop.f32.mrf.mxu0  ;;  %v385_v24 = vld [vmem:[#allocation5 + $0x658] sm:$0xff]  ;;  %v11560_v11 = vcombine.low %v393_v33, %v397_v23  ;;  %v11425_v35 = vcombine.high %v257_v63, %v261_v19 }
 0x3bf   :  { %v389_v32 = vld [vmem:[#allocation5 + $0x678] sm:$0xff]  ;;  %v15118_v53 = vadd.f32 %v9019_v48, %v8907_v22  ;;  %v8911_v29 = vadd.f32 %v8910_v16, %v14999_v34  ;;  %v9023_v13 = vpop.f32.mrf.mxu1  ;;  %9700 = vmatmul.mubr.bf16.gmra.mxu1 %v17244_v18  ;;  %v17246_v18 = vld [vmem:[#allocation147_spill] sm:$0xff] }
 0x3c0   :  { %9587 = vmatmul.mubr.bf16.gmra.mxu0 %v17243_v60  ;;  %9858 = vmatpush2.bf16.msra.mxu1 %v11568_v47  ;;  %v8912_v31 = vpop.f32.mrf.mxu0  ;;  %v17245_v48 = vld [vmem:[#allocation146_spill] sm:$0xff]  ;;  %v11553_v22 = vcombine.high %v385_v24, %v389_v32  ;;  %v11424_v47 = vcombine.low %v257_v63, %v261_v19 }
 0x3c1   :  { %9745 = vmatpush2.bf16.msra.mxu0 %v11440_v14  ;;  %v15122_v62 = vadd.f32 %v9023_v13, %v8911_v29  ;;  %v8913_v59 = vadd.f32 %v8912_v31, %v15009_v52  ;;  %v9025_v60 = vpop.f32.mrf.mxu1  ;;  %9859 = vmatprep.subr.bf16.mxu1 %v11561_v61  ;;  %v249_v16 = vld [vmem:[#allocation5 + $0x218] sm:$0xff]  ;;  %v11552_v61 = vcombine.low %v385_v24, %v389_v32  ;;  %v17248_v32 = vld [vmem:[#allocation149_spill] sm:$0xff] }
 0x3c2   :  { %9746 = vmatprep.subr.bf16.mxu0 %v11433_v26  ;;  %9596 = vmatprep.mubr.bf16.mxu0 %v17245_v48  ;;  %v8914_v39 = vpop.f32.mrf.mxu0  ;;  %v377_v25 = vld [vmem:[#allocation5 + $0x618] sm:$0xff]  ;;  %v11417_v29 = vcombine.high %v249_v16, %v253_v38 }
 0x3c3   :  { %9709 = vmatprep.mubr.bf16.mxu1 %v17246_v18  ;;  %v381_v12 = vld [vmem:[#allocation5 + $0x638] sm:$0xff]  ;;  %v15127_v14 = vadd.f32 %v9025_v60, %v8913_v59  ;;  %v8915_v33 = vadd.f32 %v8914_v39, %v14999_v34  ;;  %v9027_v23 = vpop.f32.mrf.mxu1 }
 0x3c4   :  { %9860 = vmatpush2.bf16.msra.mxu1 %v11560_v11  ;;  %v8916_v26 = vpop.f32.mrf.mxu0  ;;  %v11545_v18 = vcombine.high %v377_v25, %v381_v12  ;;  %v501_v60 = vld [vmem:[#allocation5 + $0x9f8] sm:$0xff]  ;;  %v11416_v11 = vcombine.low %v249_v16, %v253_v38 }
 0x3c5   :  { %9747 = vmatpush2.bf16.msra.mxu0 %v11432_v20  ;;  %v15130_v13 = vadd.f32 %v9027_v23, %v8915_v33  ;;  %v8917_v31 = vadd.f32 %v8916_v26, %v15009_v52  ;;  %v9029_v48 = vpop.f32.mrf.mxu1  ;;  %9861 = vmatprep.subr.bf16.mxu1 %v11553_v22  ;;  %v625_v39 = vld [vmem:[#allocation5 + $0xdd8] sm:$0xff]  ;;  %v11544_v22 = vcombine.low %v377_v25, %v381_v12 }
 0x3c6   :  { %9748 = vmatprep.subr.bf16.mxu0 %v11425_v35  ;;  %v8920_v59 = vpop.f32.mrf.mxu0  ;;  %v629_v20 = vld [vmem:[#allocation5 + $0xdf8] sm:$0xff]  ;;  %v11665_v33 = vcombine.high %v497_v10, %v501_v60 }
 0x3c7   :  { %v15134_v63 = vadd.f32 %v9029_v48, %v8917_v31  ;;  %v8921_v19 = vadd.f32 %v8920_v59, %v14999_v34  ;;  %v9033_v24 = vpop.f32.mrf.mxu1  ;;  %9710 = vmatmul.mubr.bf16.gmra.mxu1 %v17248_v32  ;;  %v17249_v48 = vld [vmem:[#allocation12_spill] sm:$0xff]  ;;  %v11793_v31 = vcombine.high %v625_v39, %v629_v20  ;;  %v489_v59 = vld [vmem:[#allocation5 + $0x998] sm:$0xff]  ;;  %v17250_v32 = vld [vmem:[#allocation13_spill] sm:$0xff] }
 0x3c8   :  { %9597 = vmatmul.mubr.bf16.gmra.mxu0 %v17247_v55  ;;  %9862 = vmatpush2.bf16.msra.mxu1 %v11552_v61  ;;  %v8922_v35 = vpop.f32.mrf.mxu0  ;;  %v617_v38 = vld [vmem:[#allocation5 + $0xd98] sm:$0xff]  ;;  %v11664_v61 = vcombine.low %v497_v10, %v501_v60 }
 0x3c9   :  { %9749 = vmatpush2.bf16.msra.mxu0 %v11424_v47  ;;  %v15138_v23 = vadd.f32 %v9033_v24, %v8921_v19  ;;  %v8923_v26 = vadd.f32 %v8922_v35, %v15009_v52  ;;  %v9035_v55 = vpop.f32.mrf.mxu1  ;;  %9863 = vmatprep.subr.bf16.mxu1 %v11545_v18  ;;  %v621_v16 = vld [vmem:[#allocation5 + $0xdb8] sm:$0xff]  ;;  %v11792_v18 = vcombine.low %v625_v39, %v629_v20  ;;  %v17252_v20 = vld [vmem:[#allocation15_spill] sm:$0xff] }
 0x3ca   :  { %9750 = vmatprep.subr.bf16.mxu0 %v11417_v29  ;;  %9752 = vmatprep.mubr.bf16.mxu0 %v17249_v48  ;;  %v8924_v44 = vpop.f32.mrf.mxu0  ;;  %v11657_v19 = vcombine.high %v489_v59, %v493_v37 }
 0x3cb   :  { %9865 = vmatprep.mubr.bf16.mxu1 %v17250_v32  ;;  %v15143_v47 = vadd.f32 %v9035_v55, %v8923_v26  ;;  %v8925_v25 = vadd.f32 %v8924_v44, %v14999_v34  ;;  %v9037_v12 = vpop.f32.mrf.mxu1  ;;  %v11785_v32 = vcombine.high %v617_v38, %v621_v16  ;;  %v485_v55 = vld [vmem:[#allocation5 + $0x978] sm:$0xff] }
 0x3cc   :  { %9864 = vmatpush2.bf16.msra.mxu1 %v11544_v22  ;;  %v8926_v29 = vpop.f32.mrf.mxu0  ;;  %v609_v44 = vld [vmem:[#allocation5 + $0xd58] sm:$0xff]  ;;  %v11784_v22 = vcombine.low %v617_v38, %v621_v16 }
 0x3cd   :  { %9751 = vmatpush2.bf16.msra.mxu0 %v11416_v11  ;;  %v15146_v24 = vadd.f32 %v9037_v12, %v8925_v25  ;;  %v8927_v35 = vadd.f32 %v8926_v29, %v15009_v52  ;;  %v9039_v48 = vpop.f32.mrf.mxu1  ;;  %10059 = vmatprep.subr.bf16.mxu1 %v11793_v31  ;;  %v613_v34 = vld [vmem:[#allocation5 + $0xd78] sm:$0xff]  ;;  %v11656_v11 = vcombine.low %v489_v59, %v493_v37  ;;  %v17253_v12 = vld [vmem:[#allocation16_spill] sm:$0xff] }
 0x3ce   :  { %9946 = vmatprep.subr.bf16.mxu0 %v11665_v33  ;;  %v9076_v26 = vpop.f32.mrf.mxu0  ;;  %v11649_v33 = vcombine.high %v481_v57, %v485_v55  ;;  %v11777_v29 = vcombine.high %v609_v44, %v613_v34  ;;  %v601_v37 = vld [vmem:[#allocation5 + $0xd18] sm:$0xff] }
 0x3cf   :  { %v15150_v10 = vadd.f32 %v9039_v48, %v8927_v35  ;;  %v9077_v60 = vadd.f32 %v9076_v26, %v15025_v50  ;;  %v9189_v39 = vpop.f32.mrf.mxu1  ;;  %9866 = vmatmul.mubr.bf16.vlgmr.msra.gmra.mxu1 %v17252_v20  ;;  %v473_v50 = vld [vmem:[#allocation5 + $0x918] sm:$0xff]  ;;  %v17254_v26 = vld [vmem:[#allocation17_spill] sm:$0xff] }
 0x3d0   :  { %9753 = vmatmul.mubr.bf16.vlgmr.msra.gmra.mxu0 %v17251_v0  ;;  %10060 = vmatpush1.bf16.msra.mxu1 %v11792_v18  ;;  %v9078_v52 = vpop.f32.mrf.mxu0  ;;  %v477_v35 = vld [vmem:[#allocation5 + $0x938] sm:$0xff]  ;;  %v11648_v18 = vcombine.low %v481_v57, %v485_v55 }
 0x3d1   :  { %9947 = vmatpush1.bf16.msra.mxu0 %v11664_v61  ;;  %v15154_v31 = vadd.f32 %v9189_v39, %v9077_v60  ;;  %v9079_v0 = vadd.f32 %v9078_v52, %v15030_v41  ;;  %v9191_v25 = vpop.f32.mrf.mxu1  ;;  %10061 = vmatprep.subr.bf16.mxu1 %v11785_v32  ;;  %v605_v59 = vld [vmem:[#allocation5 + $0xd38] sm:$0xff]  ;;  %v11641_v32 = vcombine.high %v473_v50, %v477_v35 }
 0x3d2   :  { %9948 = vmatprep.subr.bf16.mxu0 %v11657_v19  ;;  %9762 = vmatprep.mubr.bf16.mxu0 %v17253_v12  ;;  %v9080_v48 = vpop.f32.mrf.mxu0  ;;  %v11776_v19 = vcombine.low %v609_v44, %v613_v34  ;;  %v11769_v52 = vcombine.high %v601_v37, %v605_v59  ;;  %v465_v12 = vld [vmem:[#allocation5 + $0x8d8] sm:$0xff]  ;;  %v17256_v34 = vld [vmem:[#allocation19_spill] sm:$0xff] }
 0x3d3   :  { %9875 = vmatprep.mubr.bf16.mxu1 %v17254_v26  ;;  %v15159_v61 = vadd.f32 %v9191_v25, %v9079_v0  ;;  %v9081_v38 = vadd.f32 %v9080_v48, %v15034_v1  ;;  %v9193_v16 = vpop.f32.mrf.mxu1  ;;  %v469_v0 = vld [vmem:[#allocation5 + $0x8f8] sm:$0xff] }
 0x3d4   :  { %10062 = vmatpush1.bf16.msra.mxu1 %v11784_v22  ;;  %v9082_v41 = vpop.f32.mrf.mxu0  ;;  %v17255_v26 = vld [vmem:[#allocation18_spill] sm:$0xff]  ;;  %v11640_v22 = vcombine.low %v473_v50, %v477_v35 }
 0x3d5   :  { %9949 = vmatpush1.bf16.msra.mxu0 %v11656_v11  ;;  %v15162_v60 = vadd.f32 %v9193_v16, %v9081_v38  ;;  %v9083_v39 = vadd.f32 %v9082_v41, %v15038_v2  ;;  %v9195_v20 = vpop.f32.mrf.mxu1  ;;  %10063 = vmatprep.subr.bf16.mxu1 %v11777_v29  ;;  %v593_v1 = vld [vmem:[#allocation5 + $0xcd8] sm:$0xff]  ;;  %v11633_v29 = vcombine.high %v465_v12, %v469_v0  ;;  %v17257_v41 = vld [vmem:[#allocation20_spill] sm:$0xff] }
 0x3d6   :  { %9950 = vmatprep.subr.bf16.mxu0 %v11649_v33  ;;  %v9086_v25 = vpop.f32.mrf.mxu0  ;;  %v597_v11 = vld [vmem:[#allocation5 + $0xcf8] sm:$0xff]  ;;  %v11768_v33 = vcombine.low %v601_v37, %v605_v59 }
 0x3d7   :  { %v15166_v57 = vadd.f32 %v9195_v20, %v9083_v39  ;;  %v9087_v55 = vadd.f32 %v9086_v25, %v15042_v7  ;;  %v9199_v44 = vpop.f32.mrf.mxu1  ;;  %9876 = vmatmul.mubr.bf16.gmra.mxu1 %v17256_v34  ;;  %v11761_v39 = vcombine.high %v593_v1, %v597_v11  ;;  %v457_v7 = vld [vmem:[#allocation5 + $0x898] sm:$0xff] }
 0x3d8   :  { %9763 = vmatmul.mubr.bf16.gmra.mxu0 %v17255_v26  ;;  %10064 = vmatpush1.bf16.msra.mxu1 %v11776_v19  ;;  %v9088_v2 = vpop.f32.mrf.mxu0  ;;  %v461_v20 = vld [vmem:[#allocation5 + $0x8b8] sm:$0xff]  ;;  %v17258_v26 = vld [vmem:[#allocation21_spill] sm:$0xff]  ;;  %v11632_v19 = vcombine.low %v465_v12, %v469_v0 }
 0x3d9   :  { %9951 = vmatpush1.bf16.msra.mxu0 %v11648_v18  ;;  %v15170_v48 = vadd.f32 %v9199_v44, %v9087_v55  ;;  %v9089_v38 = vadd.f32 %v9088_v2, %v15047_v40  ;;  %v9201_v16 = vpop.f32.mrf.mxu1  ;;  %10065 = vmatprep.subr.bf16.mxu1 %v11769_v52  ;;  %v585_v50 = vld [vmem:[#allocation5 + $0xc98] sm:$0xff]  ;;  %v11625_v52 = vcombine.high %v457_v7, %v461_v20 }
 0x3da   :  { %9952 = vmatprep.subr.bf16.mxu0 %v11641_v32  ;;  %9772 = vmatprep.mubr.bf16.mxu0 %v17257_v41  ;;  %v9090_v25 = vpop.f32.mrf.mxu0  ;;  %v589_v35 = vld [vmem:[#allocation5 + $0xcb8] sm:$0xff]  ;;  %v11760_v32 = vcombine.low %v593_v1, %v597_v11  ;;  %v17260_v11 = vld [vmem:[#allocation23_spill] sm:$0xff] }
 0x3db   :  { %9885 = vmatprep.mubr.bf16.mxu1 %v17258_v26  ;;  %v15175_v18 = vadd.f32 %v9201_v16, %v9089_v38  ;;  %v9091_v37 = vadd.f32 %v9090_v25, %v15050_v51  ;;  %v9203_v59 = vpop.f32.mrf.mxu1  ;;  %v11753_v2 = vcombine.high %v585_v50, %v589_v35  ;;  %v449_v41 = vld [vmem:[#allocation5 + $0x858] sm:$0xff] }
 0x3dc   :  { %10066 = vmatpush1.bf16.msra.mxu1 %v11768_v33  ;;  %v9092_v40 = vpop.f32.mrf.mxu0  ;;  %v453_v38 = vld [vmem:[#allocation5 + $0x878] sm:$0xff]  ;;  %v11624_v33 = vcombine.low %v457_v7, %v461_v20 }
 0x3dd   :  { %9953 = vmatpush1.bf16.msra.mxu0 %v11640_v22  ;;  %v15178_v55 = vadd.f32 %v9203_v59, %v9091_v37  ;;  %v9093_v44 = vadd.f32 %v9092_v40, %v15054_v21  ;;  %v9205_v34 = vpop.f32.mrf.mxu1  ;;  %10067 = vmatprep.subr.bf16.mxu1 %v11761_v39  ;;  %v17259_v26 = vld [vmem:[#allocation22_spill] sm:$0xff]  ;;  %v11617_v39 = vcombine.high %v449_v41, %v453_v38  ;;  %v17261_v40 = vld [vmem:[#allocation24_spill] sm:$0xff] }
 0x3de   :  { %9954 = vmatprep.subr.bf16.mxu0 %v11633_v29  ;;  %v9096_v16 = vpop.f32.mrf.mxu0  ;;  %v577_v51 = vld [vmem:[#allocation5 + $0xc58] sm:$0xff]  ;;  %v11752_v29 = vcombine.low %v585_v50, %v589_v35 }
 0x3df   :  { %v581_v22 = vld [vmem:[#allocation5 + $0xc78] sm:$0xff]  ;;  %v15182_v12 = vadd.f32 %v9205_v34, %v9093_v44  ;;  %v9097_v0 = vadd.f32 %v9096_v16, %v15058_v8  ;;  %v9209_v1 = vpop.f32.mrf.mxu1  ;;  %9886 = vmatmul.mubr.bf16.gmra.mxu1 %v17260_v11 }
 0x3e0   :  { %9773 = vmatmul.mubr.bf16.gmra.mxu0 %v17259_v26  ;;  %10068 = vmatpush1.bf16.msra.mxu1 %v11760_v32  ;;  %v9098_v21 = vpop.f32.mrf.mxu0  ;;  %v11745_v44 = vcombine.high %v577_v51, %v581_v22  ;;  %v441_v8 = vld [vmem:[#allocation5 + $0x818] sm:$0xff]  ;;  %v17262_v26 = vld [vmem:[#allocation25_spill] sm:$0xff]  ;;  %v11616_v32 = vcombine.low %v449_v41, %v453_v38 }
 0x3e1   :  { %9955 = vmatpush1.bf16.msra.mxu0 %v11632_v19  ;;  %v15186_v25 = vadd.f32 %v9209_v1, %v9097_v0  ;;  %v9099_v37 = vadd.f32 %v9098_v21, %v15063_v36  ;;  %v9211_v59 = vpop.f32.mrf.mxu1  ;;  %10069 = vmatprep.subr.bf16.mxu1 %v11753_v2  ;;  %v445_v34 = vld [vmem:[#allocation5 + $0x838] sm:$0xff] }
 0x3e2   :  { %9956 = vmatprep.subr.bf16.mxu0 %v11625_v52  ;;  %9782 = vmatprep.mubr.bf16.mxu0 %v17261_v40  ;;  %v9100_v16 = vpop.f32.mrf.mxu0  ;;  %v569_v7 = vld [vmem:[#allocation5 + $0xc18] sm:$0xff]  ;;  %v11744_v52 = vcombine.low %v577_v51, %v581_v22  ;;  %v11609_v2 = vcombine.high %v441_v8, %v445_v34  ;;  %v17264_v22 = vld [vmem:[#allocation27_spill] sm:$0xff] }
 0x3e3   :  { %9895 = vmatprep.mubr.bf16.mxu1 %v17262_v26  ;;  %v573_v20 = vld [vmem:[#allocation5 + $0xc38] sm:$0xff]  ;;  %v15191_v19 = vadd.f32 %v9211_v59, %v9099_v37  ;;  %v9101_v50 = vadd.f32 %v9100_v16, %v15066_v3  ;;  %v9213_v35 = vpop.f32.mrf.mxu1 }
 0x3e4   :  { %10070 = vmatpush1.bf16.msra.mxu1 %v11752_v29  ;;  %v9102_v36 = vpop.f32.mrf.mxu0  ;;  %v11737_v21 = vcombine.high %v569_v7, %v573_v20  ;;  %v561_v40 = vld [vmem:[#allocation5 + $0xbd8] sm:$0xff]  ;;  %v11608_v29 = vcombine.low %v441_v8, %v445_v34 }
 0x3e5   :  { %9957 = vmatpush1.bf16.msra.mxu0 %v11624_v33  ;;  %v15194_v0 = vadd.f32 %v9213_v35, %v9101_v50  ;;  %v9103_v1 = vadd.f32 %v9102_v36, %v15070_v54  ;;  %v9215_v11 = vpop.f32.mrf.mxu1  ;;  %10071 = vmatprep.subr.bf16.mxu1 %v11745_v44  ;;  %v565_v37 = vld [vmem:[#allocation5 + $0xbf8] sm:$0xff]  ;;  %v17266_v36 = vld [vmem:[#allocation28_spill] sm:$0xff] }
 0x3e6   :  { %9958 = vmatprep.subr.bf16.mxu0 %v11617_v39  ;;  %v9106_v59 = vpop.f32.mrf.mxu0  ;;  %v17263_v26 = vld [vmem:[#allocation26_spill] sm:$0xff]  ;;  %v11736_v39 = vcombine.low %v569_v7, %v573_v20  ;;  %v11729_v44 = vcombine.high %v561_v40, %v565_v37 }
 0x3e7   :  { %v689_v3 = vld [vmem:[#allocation5 + $0xfd8] sm:$0xff]  ;;  %v15198_v41 = vadd.f32 %v9215_v11, %v9103_v1  ;;  %v9107_v38 = vadd.f32 %v9106_v59, %v15074_v27  ;;  %v9219_v51 = vpop.f32.mrf.mxu1  ;;  %9896 = vmatmul.mubr.bf16.gmra.mxu1 %v17264_v22 }
 0x3e8   :  { %9783 = vmatmul.mubr.bf16.gmra.mxu0 %v17263_v26  ;;  %v693_v33 = vld [vmem:[#allocation5 + $0xff8] sm:$0xff]  ;;  %10072 = vmatpush1.bf16.msra.mxu1 %v11744_v52  ;;  %v9108_v54 = vpop.f32.mrf.mxu0  ;;  %v17267_v26 = vld [vmem:[#allocation29_spill] sm:$0xff]  ;;  %v11728_v52 = vcombine.low %v561_v40, %v565_v37 }
 0x3e9   :  { %9959 = vmatpush1.bf16.msra.mxu0 %v11616_v32  ;;  %v15202_v16 = vadd.f32 %v9219_v51, %v9107_v38  ;;  %v9109_v50 = vadd.f32 %v9108_v54, %v15079_v28  ;;  %v9221_v35 = vpop.f32.mrf.mxu1  ;;  %10073 = vmatprep.subr.bf16.mxu1 %v11737_v21  ;;  %v11857_v1 = vcombine.high %v689_v3, %v693_v33  ;;  %v553_v27 = vld [vmem:[#allocation5 + $0xb98] sm:$0xff] }
 0x3ea   :  { %9960 = vmatprep.subr.bf16.mxu0 %v11609_v2  ;;  %9792 = vmatprep.mubr.bf16.mxu0 %v17266_v36  ;;  %v557_v11 = vld [vmem:[#allocation5 + $0xbb8] sm:$0xff]  ;;  %v9110_v59 = vpop.f32.mrf.mxu0  ;;  %v11856_v2 = vcombine.low %v689_v3, %v693_v33  ;;  %v17272_v33 = vld [vmem:[#allocation31_spill] sm:$0xff] }
 0x3eb   :  { %17265 = vst [vmem:[#allocation79_spill] sm:$0xff] %v15202_v16  ;;  %9905 = vmatprep.mubr.bf16.mxu1 %v17267_v26  ;;  %v681_v8 = vld [vmem:[#allocation5 + $0xf98] sm:$0xff]  ;;  %v15207_v32 = vadd.f32 %v9221_v35, %v9109_v50  ;;  %v9111_v7 = vadd.f32 %v9110_v59, %v15082_v15  ;;  %v9223_v20 = vpop.f32.mrf.mxu1  ;;  %v11721_v21 = vcombine.high %v553_v27, %v557_v11 }
 0x3ec   :  { %v685_v34 = vld [vmem:[#allocation5 + $0xfb8] sm:$0xff]  ;;  %10074 = vmatpush1.bf16.msra.mxu1 %v11736_v39  ;;  %v9112_v28 = vpop.f32.mrf.mxu0  ;;  %v11720_v39 = vcombine.low %v553_v27, %v557_v11 }
 0x3ed   :  { %17268 = vst [vmem:[#allocation80_spill] sm:$0xff] %v15207_v32  ;;  %9961 = vmatpush1.bf16.msra.mxu0 %v11608_v29  ;;  %v15210_v38 = vadd.f32 %v9223_v20, %v9111_v7  ;;  %v9113_v51 = vadd.f32 %v9112_v28, %v15086_v30  ;;  %v9225_v22 = vpop.f32.mrf.mxu1  ;;  %10075 = vmatprep.subr.bf16.mxu1 %v11857_v1  ;;  %v545_v36 = vld [vmem:[#allocation5 + $0xb58] sm:$0xff]  ;;  %v17274_v28 = vld [vmem:[#allocation32_spill] sm:$0xff] }
 0x3ee   :  { %9962 = vmatprep.subr.bf16.mxu0 %v11729_v44  ;;  %v11849_v54 = vcombine.high %v681_v8, %v685_v34  ;;  %v549_v50 = vld [vmem:[#allocation5 + $0xb78] sm:$0xff]  ;;  %v9116_v35 = vpop.f32.mrf.mxu0  ;;  %v11848_v44 = vcombine.low %v681_v8, %v685_v34 }
 0x3ef   :  { %17269 = vst [vmem:[#allocation171_spill] sm:$0xff] %v15210_v38  ;;  %v17270_v26 = vld [vmem:[#allocation30_spill] sm:$0xff]  ;;  %v15214_v40 = vadd.f32 %v9225_v22, %v9113_v51  ;;  %v9117_v37 = vadd.f32 %v9116_v35, %v15090_v58  ;;  %v9229_v3 = vpop.f32.mrf.mxu1  ;;  %9906 = vmatmul.mubr.bf16.gmra.mxu1 %v17272_v33  ;;  %v11713_v1 = vcombine.high %v545_v36, %v549_v50 }
 0x3f0   :  { %9793 = vmatmul.mubr.bf16.gmra.mxu0 %v17270_v26  ;;  %v673_v15 = vld [vmem:[#allocation5 + $0xf58] sm:$0xff]  ;;  %10076 = vmatpush2.bf16.msra.mxu1 %v11856_v2  ;;  %v9118_v30 = vpop.f32.mrf.mxu0  ;;  %v17275_v26 = vld [vmem:[#allocation33_spill] sm:$0xff]  ;;  %v11712_v2 = vcombine.low %v545_v36, %v549_v50 }
 0x3f1   :  { %v677_v29 = vld [vmem:[#allocation5 + $0xf78] sm:$0xff]  ;;  %17271 = vst [vmem:[#allocation81_spill] sm:$0xff] %v15214_v40  ;;  %9963 = vmatpush2.bf16.msra.mxu0 %v11728_v52  ;;  %v15218_v59 = vadd.f32 %v9229_v3, %v9117_v37  ;;  %v9119_v7 = vadd.f32 %v9118_v30, %v15095_v42  ;;  %v9231_v20 = vpop.f32.mrf.mxu1  ;;  %10077 = vmatprep.subr.bf16.mxu1 %v11849_v54 }
 0x3f2   :  { %9964 = vmatprep.subr.bf16.mxu0 %v11721_v21  ;;  %9802 = vmatprep.mubr.bf16.mxu0 %v17274_v28  ;;  %v11841_v51 = vcombine.high %v673_v15, %v677_v29  ;;  %v537_v58 = vld [vmem:[#allocation5 + $0xb18] sm:$0xff]  ;;  %v9120_v35 = vpop.f32.mrf.mxu0  ;;  %v11840_v21 = vcombine.low %v673_v15, %v677_v29  ;;  %v17280_v29 = vld [vmem:[#allocation35_spill] sm:$0xff] }
 0x3f3   :  { %17273 = vst [vmem:[#allocation141_spill] sm:$0xff] %v15218_v59  ;;  %v541_v22 = vld [vmem:[#allocation5 + $0xb38] sm:$0xff]  ;;  %9915 = vmatprep.mubr.bf16.mxu1 %v17275_v26  ;;  %v15223_v52 = vadd.f32 %v9231_v20, %v9119_v7  ;;  %v9121_v8 = vadd.f32 %v9120_v35, %v15098_v17  ;;  %v9233_v34 = vpop.f32.mrf.mxu1 }
 0x3f4   :  { %v665_v27 = vld [vmem:[#allocation5 + $0xf18] sm:$0xff]  ;;  %10078 = vmatpush2.bf16.msra.mxu1 %v11848_v44  ;;  %v9122_v42 = vpop.f32.mrf.mxu0  ;;  %v11705_v54 = vcombine.high %v537_v58, %v541_v22  ;;  %v11704_v44 = vcombine.low %v537_v58, %v541_v22 }
 0x3f5   :  { %v669_v11 = vld [vmem:[#allocation5 + $0xf38] sm:$0xff]  ;;  %17276 = vst [vmem:[#allocation140_spill] sm:$0xff] %v15223_v52  ;;  %9965 = vmatpush2.bf16.msra.mxu0 %v11720_v39  ;;  %v15226_v37 = vadd.f32 %v9233_v34, %v9121_v8  ;;  %v9123_v3 = vadd.f32 %v9122_v42, %v15102_v9  ;;  %v9235_v33 = vpop.f32.mrf.mxu1  ;;  %10079 = vmatprep.subr.bf16.mxu1 %v11841_v51  ;;  %v17282_v42 = vld [vmem:[#allocation36_spill] sm:$0xff]  ;;  %v17314_v52 = vld [vmem:[#allocation57_spill] sm:$0xff] }
 0x3f6   :  { %9966 = vmatprep.subr.bf16.mxu0 %v11713_v1  ;;  %v11833_v30 = vcombine.high %v665_v27, %v669_v11  ;;  %v529_v28 = vld [vmem:[#allocation5 + $0xad8] sm:$0xff]  ;;  %v9126_v20 = vpop.f32.mrf.mxu0  ;;  %v11832_v1 = vcombine.low %v665_v27, %v669_v11 }
 0x3f7   :  { %17277 = vst [vmem:[#allocation170_spill] sm:$0xff] %v15226_v37  ;;  %v533_v7 = vld [vmem:[#allocation5 + $0xaf8] sm:$0xff]  ;;  %v15230_v36 = vadd.f32 %v9235_v33, %v9123_v3  ;;  %v9127_v50 = vadd.f32 %v9126_v20, %v15106_v56  ;;  %v9239_v15 = vpop.f32.mrf.mxu1  ;;  %9916 = vmatmul.mubr.bf16.gmra.mxu1 %v17280_v29 }
 0x3f8   :  { %v17278_v26 = vld [vmem:[#allocation34_spill] sm:$0xff]  ;;  %10080 = vmatpush2.bf16.msra.mxu1 %v11840_v21  ;;  %v9128_v9 = vpop.f32.mrf.mxu0  ;;  %v11697_v51 = vcombine.high %v529_v28, %v533_v7  ;;  %v11696_v21 = vcombine.low %v529_v28, %v533_v7 }
 0x3f9   :  { %9803 = vmatmul.mubr.bf16.gmra.mxu0 %v17278_v26  ;;  %v657_v17 = vld [vmem:[#allocation5 + $0xed8] sm:$0xff]  ;;  %17279 = vst [vmem:[#allocation82_spill] sm:$0xff] %v15230_v36  ;;  %v15234_v35 = vadd.f32 %v9239_v15, %v9127_v50  ;;  %v9129_v8 = vadd.f32 %v9128_v9, %v15111_v46  ;;  %v9241_v34 = vpop.f32.mrf.mxu1  ;;  %10081 = vmatprep.subr.bf16.mxu1 %v11833_v30  ;;  %v17283_v26 = vld [vmem:[#allocation37_spill] sm:$0xff] }
 0x3fa   :  { %v661_v39 = vld [vmem:[#allocation5 + $0xef8] sm:$0xff]  ;;  %9967 = vmatpush2.bf16.msra.mxu0 %v11712_v2  ;;  %9812 = vmatprep.mubr.bf16.mxu0 %v17282_v42  ;;  %v9130_v20 = vpop.f32.mrf.mxu0 }
 0x3fb   :  { %9968 = vmatprep.subr.bf16.mxu0 %v11705_v54  ;;  %17281 = vst [vmem:[#allocation143_spill] sm:$0xff] %v15234_v35  ;;  %v11825_v3 = vcombine.high %v657_v17, %v661_v39  ;;  %v521_v56 = vld [vmem:[#allocation5 + $0xa98] sm:$0xff]  ;;  %9925 = vmatprep.mubr.bf16.mxu1 %v17283_v26  ;;  %v15239_v2 = vadd.f32 %v9241_v34, %v9129_v8  ;;  %v9243_v11 = vpop.f32.mrf.mxu1 }
 0x3fc   :  { %v525_v33 = vld [vmem:[#allocation5 + $0xab8] sm:$0xff]  ;;  %v9131_v27 = vadd.f32 %v9130_v20, %v15114_v5  ;;  %10082 = vmatpush2.bf16.msra.mxu1 %v11832_v1  ;;  %v9132_v46 = vpop.f32.mrf.mxu0  ;;  %v11824_v54 = vcombine.low %v657_v17, %v661_v39  ;;  %v17288_v39 = vld [vmem:[#allocation39_spill] sm:$0xff] }
 0x3fd   :  { %v649_v58 = vld [vmem:[#allocation5 + $0xe98] sm:$0xff]  ;;  %17284 = vst [vmem:[#allocation173_spill] sm:$0xff] %v15239_v2  ;;  %v11689_v30 = vcombine.high %v521_v56, %v525_v33  ;;  %v9133_v15 = vadd.f32 %v9132_v46, %v15118_v53  ;;  %v9245_v29 = vpop.f32.mrf.mxu1  ;;  %10083 = vmatprep.subr.bf16.mxu1 %v11825_v3  ;;  %v11688_v1 = vcombine.low %v521_v56, %v525_v33  ;;  %v17290_v46 = vld [vmem:[#allocation40_spill] sm:$0xff] }
 0x3fe   :  { %v653_v22 = vld [vmem:[#allocation5 + $0xeb8] sm:$0xff]  ;;  %9969 = vmatpush2.bf16.msra.mxu0 %v11704_v44  ;;  %v15242_v50 = vadd.f32 %v9243_v11, %v9131_v27  ;;  %v9136_v34 = vpop.f32.mrf.mxu0 }
 0x3ff   :  { %9970 = vmatprep.subr.bf16.mxu0 %v11697_v51  ;;  %v11817_v9 = vcombine.high %v649_v58, %v653_v22  ;;  %v513_v42 = vld [vmem:[#allocation5 + $0xa58] sm:$0xff]  ;;  %v15246_v28 = vadd.f32 %v9245_v29, %v9133_v15  ;;  %v9137_v7 = vadd.f32 %v9136_v34, %v15122_v62  ;;  %v9249_v17 = vpop.f32.mrf.mxu1  ;;  %9926 = vmatmul.mubr.bf16.gmra.mxu1 %v17288_v39 }
 0x400   :  { %17285 = vst [vmem:[#allocation83_spill] sm:$0xff] %v15242_v50  ;;  %v517_v8 = vld [vmem:[#allocation5 + $0xa78] sm:$0xff]  ;;  %10084 = vmatpush2.bf16.msra.mxu1 %v11824_v54  ;;  %v9138_v53 = vpop.f32.mrf.mxu0  ;;  %v11816_v51 = vcombine.low %v649_v58, %v653_v22 }
 0x401   :  { %v17286_v26 = vld [vmem:[#allocation38_spill] sm:$0xff]  ;;  %17287 = vst [vmem:[#allocation172_spill] sm:$0xff] %v15246_v28  ;;  %v11681_v3 = vcombine.high %v513_v42, %v517_v8  ;;  %v15250_v20 = vadd.f32 %v9249_v17, %v9137_v7  ;;  %v9139_v27 = vadd.f32 %v9138_v53, %v15127_v14  ;;  %v9251_v11 = vpop.f32.mrf.mxu1  ;;  %10085 = vmatprep.subr.bf16.mxu1 %v11817_v9 }
 0x402   :  { %9813 = vmatmul.mubr.bf16.gmra.mxu0 %v17286_v26  ;;  %v641_v5 = vld [vmem:[#allocation5 + $0xe58] sm:$0xff]  ;;  %v9140_v34 = vpop.f32.mrf.mxu0  ;;  %v17291_v26 = vld [vmem:[#allocation41_spill] sm:$0xff]  ;;  %v11680_v54 = vcombine.low %v513_v42, %v517_v8 }
 0x403   :  { %v645_v44 = vld [vmem:[#allocation5 + $0xe78] sm:$0xff]  ;;  %9971 = vmatpush2.bf16.msra.mxu0 %v11696_v21  ;;  %17289 = vst [vmem:[#allocation175_spill] sm:$0xff] %v15250_v20  ;;  %9822 = vmatprep.mubr.bf16.mxu0 %v17290_v46  ;;  %v15255_v21 = vadd.f32 %v9251_v11, %v9139_v27  ;;  %v9141_v58 = vadd.f32 %v9140_v34, %v15130_v13  ;;  %v9253_v22 = vpop.f32.mrf.mxu1 }
 0x404   :  { %9972 = vmatprep.subr.bf16.mxu0 %v11689_v30  ;;  %v11809_v15 = vcombine.high %v641_v5, %v645_v44  ;;  %v505_v62 = vld [vmem:[#allocation5 + $0xa18] sm:$0xff]  ;;  %9935 = vmatprep.mubr.bf16.mxu1 %v17291_v26  ;;  %v9142_v14 = vpop.f32.mrf.mxu0  ;;  %v11808_v30 = vcombine.low %v641_v5, %v645_v44  ;;  %v17296_v44 = vld [vmem:[#allocation43_spill] sm:$0xff] }
 0x405   :  { %v509_v29 = vld [vmem:[#allocation5 + $0xa38] sm:$0xff]  ;;  %17292 = vst [vmem:[#allocation159_spill] sm:$0xff] %v15255_v21  ;;  %10086 = vmatpush2.bf16.msra.mxu1 %v11816_v51  ;;  %v15258_v7 = vadd.f32 %v9253_v22, %v9141_v58  ;;  %v9143_v17 = vadd.f32 %v9142_v14, %v15134_v63  ;;  %v9255_v39 = vpop.f32.mrf.mxu1  ;;  %v17298_v14 = vld [vmem:[#allocation44_spill] sm:$0xff]  ;;  %v17310_v21 = vld [vmem:[#allocation53_spill] sm:$0xff] }
 0x406   :  { %v633_v56 = vld [vmem:[#allocation5 + $0xe18] sm:$0xff]  ;;  %v11673_v9 = vcombine.high %v505_v62, %v509_v29  ;;  %10087 = vmatprep.subr.bf16.mxu1 %v11809_v15  ;;  %v9146_v11 = vpop.f32.mrf.mxu0  ;;  %v11672_v51 = vcombine.low %v505_v62, %v509_v29 }
 0x407   :  { %v637_v33 = vld [vmem:[#allocation5 + $0xe38] sm:$0xff]  ;;  %9973 = vmatpush2.bf16.msra.mxu0 %v11688_v1  ;;  %17293 = vst [vmem:[#allocation145_spill] sm:$0xff] %v15258_v7  ;;  %v15262_v42 = vadd.f32 %v9255_v39, %v9143_v17  ;;  %v9147_v8 = vadd.f32 %v9146_v11, %v15138_v23  ;;  %v9259_v5 = vpop.f32.mrf.mxu1  ;;  %9936 = vmatmul.mubr.bf16.gmra.mxu1 %v17296_v44 }
 0x408   :  { %9974 = vmatprep.subr.bf16.mxu0 %v11681_v3  ;;  %v11801_v53 = vcombine.high %v633_v56, %v637_v33  ;;  %v753_v46 = vld [vmem:[#allocation5 + $0x11d8] sm:$0xff]  ;;  %v9148_v63 = vpop.f32.mrf.mxu0  ;;  %v11800_v3 = vcombine.low %v633_v56, %v637_v33 }
 0x409   :  { %v757_v27 = vld [vmem:[#allocation5 + $0x11f8] sm:$0xff]  ;;  %17295 = vst [vmem:[#allocation129_spill] sm:$0xff] %v15262_v42  ;;  %10088 = vmatpush2.bf16.msra.mxu1 %v11808_v30  ;;  %v15266_v34 = vadd.f32 %v9259_v5, %v9147_v8  ;;  %v9149_v58 = vadd.f32 %v9148_v63, %v15143_v47  ;;  %v9261_v22 = vpop.f32.mrf.mxu1 }
 0x40a   :  { %v17294_v26 = vld [vmem:[#allocation42_spill] sm:$0xff]  ;;  %v11921_v15 = vcombine.high %v753_v46, %v757_v27  ;;  %10089 = vmatprep.subr.bf16.mxu1 %v11801_v53  ;;  %v9150_v11 = vpop.f32.mrf.mxu0  ;;  %v11920_v30 = vcombine.low %v753_v46, %v757_v27 }
 0x40b   :  { %9823 = vmatmul.mubr.bf16.gmra.mxu0 %v17294_v26  ;;  %v881_v13 = vld [vmem:[#allocation5 + $0x15d8] sm:$0xff]  ;;  %17297 = vst [vmem:[#allocation176_spill] sm:$0xff] %v15266_v34  ;;  %v17299_v26 = vld [vmem:[#allocation45_spill] sm:$0xff]  ;;  %v9151_v56 = vadd.f32 %v9150_v11, %v15146_v24  ;;  %v9263_v33 = vpop.f32.mrf.mxu1 }
 0x40c   :  { %v885_v1 = vld [vmem:[#allocation5 + $0x15f8] sm:$0xff]  ;;  %9975 = vmatpush2.bf16.msra.mxu0 %v11680_v54  ;;  %9978 = vmatprep.mubr.bf16.mxu0 %v17298_v14  ;;  %v15271_v54 = vadd.f32 %v9261_v22, %v9149_v58  ;;  %v9152_v47 = vpop.f32.mrf.mxu0 }
 0x40d   :  { %9976 = vmatprep.subr.bf16.mxu0 %v11673_v9  ;;  %v12049_v17 = vcombine.high %v881_v13, %v885_v1  ;;  %v745_v23 = vld [vmem:[#allocation5 + $0x1198] sm:$0xff]  ;;  %10091 = vmatprep.mubr.bf16.mxu1 %v17299_v26  ;;  %v12048_v9 = vcombine.low %v881_v13, %v885_v1  ;;  %v15274_v8 = vadd.f32 %v9263_v33, %v9151_v56  ;;  %v9265_v44 = vpop.f32.mrf.mxu1  ;;  %v17304_v13 = vld [vmem:[#allocation47_spill] sm:$0xff]  ;;  %v17305_v26 = vld [vmem:[#allocation48_spill] sm:$0xff] }
 0x40e   :  { %v749_v39 = vld [vmem:[#allocation5 + $0x11b8] sm:$0xff]  ;;  %17300 = vst [vmem:[#allocation174_spill] sm:$0xff] %v15271_v54  ;;  %10090 = vmatpush2.bf16.msra.mxu1 %v11800_v3  ;;  %v9153_v5 = vadd.f32 %v9152_v47, %v15150_v10  ;;  %v15277_v22 = vpop.f32.mrf.mxu0 }
 0x40f   :  { %v873_v62 = vld [vmem:[#allocation5 + $0x1598] sm:$0xff]  ;;  %v11913_v53 = vcombine.high %v745_v23, %v749_v39  ;;  %17301 = vst [vmem:[#allocation177_spill] sm:$0xff] %v15274_v8  ;;  %10285 = vmatprep.subr.bf16.mxu1 %v12049_v17  ;;  %v15282_v3 = vpop.f32.mrf.mxu1  ;;  %v11912_v1 = vcombine.low %v745_v23, %v749_v39 }
 0x410   :  { %v877_v29 = vld [vmem:[#allocation5 + $0x15b8] sm:$0xff]  ;;  %9977 = vmatpush2.bf16.msra.mxu0 %v11672_v51  ;;  %v15280_v27 = vadd.f32 %v9265_v44, %v9153_v5  ;;  %v15285_v10 = vpop.f32.mrf.mxu0  ;;  %v17306_v44 = vld [vmem:[#allocation49_spill] sm:$0xff] }
 0x411   :  { %10172 = vmatprep.subr.bf16.mxu0 %v11921_v15  ;;  %v12041_v63 = vcombine.high %v873_v62, %v877_v29  ;;  %v737_v14 = vld [vmem:[#allocation5 + $0x1158] sm:$0xff]  ;;  %10092 = vmatmul.mubr.bf16.vlgmr.msra.gmra.mxu1 %v17304_v13  ;;  %v12040_v15 = vcombine.low %v873_v62, %v877_v29  ;;  %v15287_v11 = vpop.f32.mrf.mxu1 }
 0x412   :  { %v741_v58 = vld [vmem:[#allocation5 + $0x1178] sm:$0xff]  ;;  %17303 = vst [vmem:[#allocation161_spill] sm:$0xff] %v15280_v27  ;;  %10286 = vmatpush1.bf16.msra.mxu1 %v12048_v9  ;;  %v15290_v5 = vpop.f32.mrf.mxu0  ;;  %10101 = vmatprep.mubr.bf16.mxu1 %v17306_v44 }
 0x413   :  { %v17302_v24 = vld [vmem:[#allocation46_spill] sm:$0xff]  ;;  %v11905_v17 = vcombine.high %v737_v14, %v741_v58  ;;  %10287 = vmatprep.subr.bf16.mxu1 %v12041_v63  ;;  %v15293_v39 = vpop.f32.mrf.mxu1  ;;  %v11904_v9 = vcombine.low %v737_v14, %v741_v58  ;;  %v17308_v14 = vld [vmem:[#allocation51_spill] sm:$0xff] }
 0x414   :  { %9979 = vmatmul.mubr.bf16.vlgmr.msra.gmra.mxu0 %v17302_v24  ;;  %v865_v51 = vld [vmem:[#allocation5 + $0x1558] sm:$0xff]  ;;  %v15295_v62 = vpop.f32.mrf.mxu0 }
 0x415   :  { %v869_v46 = vld [vmem:[#allocation5 + $0x1578] sm:$0xff]  ;;  %10173 = vmatpush1.bf16.msra.mxu0 %v11920_v30  ;;  %9988 = vmatprep.mubr.bf16.mxu0 %v17305_v26  ;;  %v15297_v63 = vpop.f32.mrf.mxu1 }
 0x416   :  { %10174 = vmatprep.subr.bf16.mxu0 %v11913_v53  ;;  %v12033_v56 = vcombine.high %v865_v51, %v869_v46  ;;  %v729_v33 = vld [vmem:[#allocation5 + $0x1118] sm:$0xff]  ;;  %10288 = vmatpush1.bf16.msra.mxu1 %v12040_v15  ;;  %v12032_v29 = vcombine.low %v865_v51, %v869_v46  ;;  %v15299_v27 = vpop.f32.mrf.mxu0 }
 0x417   :  { %v733_v47 = vld [vmem:[#allocation5 + $0x1138] sm:$0xff] }
 0x418   :  { %v857_v30 = vld [vmem:[#allocation5 + $0x1518] sm:$0xff]  ;;  %v11897_v53 = vcombine.high %v729_v33, %v733_v47  ;;  %10289 = vmatprep.subr.bf16.mxu1 %v12033_v56  ;;  %v11896_v58 = vcombine.low %v729_v33, %v733_v47  ;;  %v15305_v51 = vpop.f32.mrf.mxu0  ;;  %v17309_v56 = vld [vmem:[#allocation52_spill] sm:$0xff] }
 0x419   :  { %v861_v23 = vld [vmem:[#allocation5 + $0x1538] sm:$0xff]  ;;  %10175 = vmatpush1.bf16.msra.mxu0 %v11912_v1  ;;  %v15302_v1 = vpop.f32.mrf.mxu1  ;;  %10102 = vmatmul.mubr.bf16.gmra.mxu1 %v17308_v14 }
 0x41a   :  { %10176 = vmatprep.subr.bf16.mxu0 %v11905_v17  ;;  %v12025_v24 = vcombine.high %v857_v30, %v861_v23  ;;  %v721_v13 = vld [vmem:[#allocation5 + $0x10d8] sm:$0xff]  ;;  %10290 = vmatpush1.bf16.msra.mxu1 %v12032_v29  ;;  %v12024_v46 = vcombine.low %v857_v30, %v861_v23  ;;  %v15310_v7 = vpop.f32.mrf.mxu0 }
 0x41b   :  { %v725_v26 = vld [vmem:[#allocation5 + $0x10f8] sm:$0xff]  ;;  %v15307_v17 = vpop.f32.mrf.mxu1  ;;  %10111 = vmatprep.mubr.bf16.mxu1 %v17310_v21 }
 0x41c   :  { %v17307_v44 = vld [vmem:[#allocation50_spill] sm:$0xff]  ;;  %v11889_v15 = vcombine.high %v721_v13, %v725_v26  ;;  %10291 = vmatprep.subr.bf16.mxu1 %v12025_v24  ;;  %v11888_v29 = vcombine.low %v721_v13, %v725_v26  ;;  %v15315_v30 = vpop.f32.mrf.mxu0  ;;  %v17312_v13 = vld [vmem:[#allocation55_spill] sm:$0xff] }
 0x41d   :  { %9989 = vmatmul.mubr.bf16.gmra.mxu0 %v17307_v44  ;;  %v849_v8 = vld [vmem:[#allocation5 + $0x14d8] sm:$0xff]  ;;  %v15313_v47 = vpop.f32.mrf.mxu1 }
 0x41e   :  { %v853_v54 = vld [vmem:[#allocation5 + $0x14f8] sm:$0xff]  ;;  %10177 = vmatpush1.bf16.msra.mxu0 %v11904_v9  ;;  %9998 = vmatprep.mubr.bf16.mxu0 %v17309_v56  ;;  %v15319_v28 = vpop.f32.mrf.mxu0 }
 0x41f   :  { %10178 = vmatprep.subr.bf16.mxu0 %v11897_v53  ;;  %v12017_v44 = vcombine.high %v849_v8, %v853_v54  ;;  %v713_v34 = vld [vmem:[#allocation5 + $0x1098] sm:$0xff]  ;;  %10292 = vmatpush1.bf16.msra.mxu1 %v12024_v46  ;;  %v12016_v23 = vcombine.low %v849_v8, %v853_v54  ;;  %v15317_v24 = vpop.f32.mrf.mxu1 }
 0x420   :  { %v717_v42 = vld [vmem:[#allocation5 + $0x10b8] sm:$0xff]  ;;  %v15325_v54 = vpop.f32.mrf.mxu0 }
 0x421   :  { %v841_v9 = vld [vmem:[#allocation5 + $0x1498] sm:$0xff]  ;;  %v11881_v53 = vcombine.high %v713_v34, %v717_v42  ;;  %10293 = vmatprep.subr.bf16.mxu1 %v12017_v44  ;;  %10112 = vmatmul.mubr.bf16.gmra.mxu1 %v17312_v13  ;;  %v11880_v26 = vcombine.low %v713_v34, %v717_v42  ;;  %v17313_v44 = vld [vmem:[#allocation56_spill] sm:$0xff] }
 0x422   :  { %v845_v33 = vld [vmem:[#allocation5 + $0x14b8] sm:$0xff]  ;;  %10179 = vmatpush1.bf16.msra.mxu0 %v11896_v58  ;;  %v15322_v58 = vpop.f32.mrf.mxu1  ;;  %v15330_v37 = vpop.f32.mrf.mxu0  ;;  %10121 = vmatprep.mubr.bf16.mxu1 %v17314_v52 }
 0x423   :  { %10180 = vmatprep.subr.bf16.mxu0 %v11889_v15  ;;  %v12009_v14 = vcombine.high %v841_v9, %v845_v33  ;;  %v705_v56 = vld [vmem:[#allocation5 + $0x1058] sm:$0xff]  ;;  %10294 = vmatpush1.bf16.msra.mxu1 %v12016_v23  ;;  %v12008_v8 = vcombine.low %v841_v9, %v845_v33 }
 0x424   :  { %v709_v20 = vld [vmem:[#allocation5 + $0x1078] sm:$0xff]  ;;  %v15327_v15 = vpop.f32.mrf.mxu1  ;;  %v15335_v9 = vpop.f32.mrf.mxu0 }
 0x425   :  { %v17311_v21 = vld [vmem:[#allocation54_spill] sm:$0xff]  ;;  %v11873_v46 = vcombine.high %v705_v56, %v709_v20  ;;  %10295 = vmatprep.subr.bf16.mxu1 %v12009_v14  ;;  %v11872_v23 = vcombine.low %v705_v56, %v709_v20  ;;  %v17319_v20 = vld [vmem:[#allocation59_spill] sm:$0xff] }
 0x426   :  { %9999 = vmatmul.mubr.bf16.gmra.mxu0 %v17311_v21  ;;  %v833_v50 = vld [vmem:[#allocation5 + $0x1458] sm:$0xff]  ;;  %v15333_v34 = vpop.f32.mrf.mxu1  ;;  %v15339_v40 = vpop.f32.mrf.mxu0 }
 0x427   :  { %v837_v2 = vld [vmem:[#allocation5 + $0x1478] sm:$0xff]  ;;  %10181 = vmatpush1.bf16.msra.mxu0 %v11888_v29  ;;  %10008 = vmatprep.mubr.bf16.mxu0 %v17313_v44  ;;  %17316 = vst [vmem:[#allocation150_spill] sm:$0xff] %v15339_v40 }
 0x428   :  { %10182 = vmatprep.subr.bf16.mxu0 %v11881_v53  ;;  %v12001_v21 = vcombine.high %v833_v50, %v837_v2  ;;  %v697_v35 = vld [vmem:[#allocation5 + $0x1018] sm:$0xff]  ;;  %10296 = vmatpush1.bf16.msra.mxu1 %v12008_v8  ;;  %v12000_v33 = vcombine.low %v833_v50, %v837_v2  ;;  %v15337_v14 = vpop.f32.mrf.mxu1  ;;  %v15345_v2 = vpop.f32.mrf.mxu0 }
 0x429   :  { %v701_v36 = vld [vmem:[#allocation5 + $0x1038] sm:$0xff]  ;;  %17315 = vst [vmem:[#allocation179_spill] sm:$0xff] %v15337_v14  ;;  %10122 = vmatmul.mubr.bf16.gmra.mxu1 %v17319_v20  ;;  %17320 = vst [vmem:[#allocation151_spill] sm:$0xff] %v15345_v2 }
 0x42a   :  { %v825_v29 = vld [vmem:[#allocation5 + $0x1418] sm:$0xff]  ;;  %v11865_v53 = vcombine.high %v697_v35, %v701_v36  ;;  %10297 = vmatprep.subr.bf16.mxu1 %v12001_v21  ;;  %v11864_v56 = vcombine.low %v697_v35, %v701_v36  ;;  %v17322_v21 = vld [vmem:[#allocation60_spill] sm:$0xff]  ;;  %v15350_v16 = vpop.f32.mrf.mxu0 }
 0x42b   :  { %v829_v42 = vld [vmem:[#allocation5 + $0x1438] sm:$0xff]  ;;  %10183 = vmatpush1.bf16.msra.mxu0 %v11880_v26  ;;  %v15342_v26 = vpop.f32.mrf.mxu1  ;;  %17323 = vst [vmem:[#allocation132_spill] sm:$0xff] %v15350_v16 }
 0x42c   :  { %10184 = vmatprep.subr.bf16.mxu0 %v11873_v46  ;;  %v11993_v13 = vcombine.high %v825_v29, %v829_v42  ;;  %v817_v44 = vld [vmem:[#allocation5 + $0x13d8] sm:$0xff]  ;;  %17318 = vst [vmem:[#allocation160_spill] sm:$0xff] %v15342_v26  ;;  %10298 = vmatpush1.bf16.msra.mxu1 %v12000_v33  ;;  %v11992_v50 = vcombine.low %v825_v29, %v829_v42  ;;  %v17324_v26 = vld [vmem:[#allocation61_spill] sm:$0xff]  ;;  %v15355_v29 = vpop.f32.mrf.mxu0 }
 0x42d   :  { %v821_v59 = vld [vmem:[#allocation5 + $0x13f8] sm:$0xff]  ;;  %v15347_v46 = vpop.f32.mrf.mxu1  ;;  %10131 = vmatprep.mubr.bf16.mxu1 %v17324_v26  ;;  %17326 = vst [vmem:[#allocation163_spill] sm:$0xff] %v15355_v29 }
 0x42e   :  { %v17317_v52 = vld [vmem:[#allocation58_spill] sm:$0xff]  ;;  %v11985_v8 = vcombine.high %v817_v44, %v821_v59  ;;  %17321 = vst [vmem:[#allocation178_spill] sm:$0xff] %v15347_v46  ;;  %10299 = vmatprep.subr.bf16.mxu1 %v11993_v13  ;;  %v11984_v33 = vcombine.low %v817_v44, %v821_v59  ;;  %v15359_v16 = vpop.f32.mrf.mxu0  ;;  %v17331_v59 = vld [vmem:[#allocation63_spill] sm:$0xff] }
 0x42f   :  { %10009 = vmatmul.mubr.bf16.gmra.mxu0 %v17317_v52  ;;  %v945_v38 = vld [vmem:[#allocation5 + $0x17d8] sm:$0xff]  ;;  %v15353_v35 = vpop.f32.mrf.mxu1  ;;  %17328 = vst [vmem:[#allocation181_spill] sm:$0xff] %v15359_v16 }
 0x430   :  { %v949_v32 = vld [vmem:[#allocation5 + $0x17f8] sm:$0xff]  ;;  %10185 = vmatpush1.bf16.msra.mxu0 %v11872_v23  ;;  %10018 = vmatprep.mubr.bf16.mxu0 %v17322_v21  ;;  %17325 = vst [vmem:[#allocation152_spill] sm:$0xff] %v15353_v35 }
 0x431   :  { %10186 = vmatprep.subr.bf16.mxu0 %v11865_v53  ;;  %v12113_v52 = vcombine.high %v945_v38, %v949_v32  ;;  %v809_v14 = vld [vmem:[#allocation5 + $0x1398] sm:$0xff]  ;;  %10300 = vmatpush1.bf16.msra.mxu1 %v11992_v50  ;;  %v12112_v42 = vcombine.low %v945_v38, %v949_v32  ;;  %v15357_v13 = vpop.f32.mrf.mxu1  ;;  %v15365_v32 = vpop.f32.mrf.mxu0 }
 0x432   :  { %v813_v40 = vld [vmem:[#allocation5 + $0x13b8] sm:$0xff]  ;;  %17327 = vst [vmem:[#allocation180_spill] sm:$0xff] %v15357_v13  ;;  %10132 = vmatmul.mubr.bf16.gmra.mxu1 %v17331_v59  ;;  %17332 = vst [vmem:[#allocation162_spill] sm:$0xff] %v15365_v32 }
 0x433   :  { %v937_v23 = vld [vmem:[#allocation5 + $0x1798] sm:$0xff]  ;;  %v11977_v53 = vcombine.high %v809_v14, %v813_v40  ;;  %10301 = vmatprep.subr.bf16.mxu1 %v12113_v52  ;;  %v11976_v44 = vcombine.low %v809_v14, %v813_v40  ;;  %v17334_v52 = vld [vmem:[#allocation64_spill] sm:$0xff]  ;;  %v15370_v29 = vpop.f32.mrf.mxu0 }
 0x434   :  { %v941_v36 = vld [vmem:[#allocation5 + $0x17b8] sm:$0xff]  ;;  %10187 = vmatpush1.bf16.msra.mxu0 %v11864_v56  ;;  %v15362_v56 = vpop.f32.mrf.mxu1  ;;  %17335 = vst [vmem:[#allocation182_spill] sm:$0xff] %v15370_v29 }
 0x435   :  { %10188 = vmatprep.subr.bf16.mxu0 %v11985_v8  ;;  %v12105_v20 = vcombine.high %v937_v23, %v941_v36  ;;  %v801_v21 = vld [vmem:[#allocation5 + $0x1358] sm:$0xff]  ;;  %17330 = vst [vmem:[#allocation183_spill] sm:$0xff] %v15362_v56  ;;  %10302 = vmatpush2.bf16.msra.mxu1 %v12112_v42  ;;  %v12104_v38 = vcombine.low %v937_v23, %v941_v36  ;;  %v17336_v56 = vld [vmem:[#allocation65_spill] sm:$0xff]  ;;  %v15375_v23 = vpop.f32.mrf.mxu0 }
 0x436   :  { %v805_v46 = vld [vmem:[#allocation5 + $0x1378] sm:$0xff]  ;;  %v15367_v8 = vpop.f32.mrf.mxu1  ;;  %10141 = vmatprep.mubr.bf16.mxu1 %v17336_v56  ;;  %17338 = vst [vmem:[#allocation184_spill] sm:$0xff] %v15375_v23 }
 0x437   :  { %v17329_v26 = vld [vmem:[#allocation62_spill] sm:$0xff]  ;;  %v11969_v50 = vcombine.high %v801_v21, %v805_v46  ;;  %17333 = vst [vmem:[#allocation153_spill] sm:$0xff] %v15367_v8  ;;  %10303 = vmatprep.subr.bf16.mxu1 %v12105_v20  ;;  %v11968_v42 = vcombine.low %v801_v21, %v805_v46  ;;  %v15379_v29 = vpop.f32.mrf.mxu0  ;;  %v17343_v46 = vld [vmem:[#allocation67_spill] sm:$0xff] }
 0x438   :  { %10019 = vmatmul.mubr.bf16.gmra.mxu0 %v17329_v26  ;;  %v929_v2 = vld [vmem:[#allocation5 + $0x1758] sm:$0xff]  ;;  %v15373_v14 = vpop.f32.mrf.mxu1  ;;  %17340 = vst [vmem:[#allocation165_spill] sm:$0xff] %v15379_v29 }
 0x439   :  { %v933_v35 = vld [vmem:[#allocation5 + $0x1778] sm:$0xff]  ;;  %10189 = vmatpush2.bf16.msra.mxu0 %v11984_v33  ;;  %10028 = vmatprep.mubr.bf16.mxu0 %v17334_v52  ;;  %17337 = vst [vmem:[#allocation133_spill] sm:$0xff] %v15373_v14 }
 0x43a   :  { %10190 = vmatprep.subr.bf16.mxu0 %v11977_v53  ;;  %v12097_v26 = vcombine.high %v929_v2, %v933_v35  ;;  %v793_v13 = vld [vmem:[#allocation5 + $0x1318] sm:$0xff]  ;;  %10304 = vmatpush2.bf16.msra.mxu1 %v12104_v38  ;;  %v12096_v36 = vcombine.low %v929_v2, %v933_v35  ;;  %v15377_v20 = vpop.f32.mrf.mxu1  ;;  %v15385_v2 = vpop.f32.mrf.mxu0 }
 0x43b   :  { %v797_v16 = vld [vmem:[#allocation5 + $0x1338] sm:$0xff]  ;;  %17339 = vst [vmem:[#allocation185_spill] sm:$0xff] %v15377_v20  ;;  %10142 = vmatmul.mubr.bf16.gmra.mxu1 %v17343_v46  ;;  %17344 = vst [vmem:[#allocation135_spill] sm:$0xff] %v15385_v2 }
 0x43c   :  { %v921_v33 = vld [vmem:[#allocation5 + $0x1718] sm:$0xff]  ;;  %v11961_v53 = vcombine.high %v793_v13, %v797_v16  ;;  %10305 = vmatprep.subr.bf16.mxu1 %v12097_v26  ;;  %v11960_v21 = vcombine.low %v793_v13, %v797_v16  ;;  %v17346_v26 = vld [vmem:[#allocation68_spill] sm:$0xff]  ;;  %v15390_v23 = vpop.f32.mrf.mxu0 }
 0x43d   :  { %v925_v40 = vld [vmem:[#allocation5 + $0x1738] sm:$0xff]  ;;  %10191 = vmatpush2.bf16.msra.mxu0 %v11976_v44  ;;  %v15382_v44 = vpop.f32.mrf.mxu1  ;;  %17347 = vst [vmem:[#allocation154_spill] sm:$0xff] %v15390_v23 }
 0x43e   :  { %10192 = vmatprep.subr.bf16.mxu0 %v11969_v50  ;;  %v12089_v59 = vcombine.high %v921_v33, %v925_v40  ;;  %v785_v52 = vld [vmem:[#allocation5 + $0x12d8] sm:$0xff]  ;;  %17342 = vst [vmem:[#allocation187_spill] sm:$0xff] %v15382_v44  ;;  %10306 = vmatpush2.bf16.msra.mxu1 %v12096_v36  ;;  %v12088_v35 = vcombine.low %v921_v33, %v925_v40  ;;  %v17348_v44 = vld [vmem:[#allocation69_spill] sm:$0xff]  ;;  %v15395_v33 = vpop.f32.mrf.mxu0 }
 0x43f   :  { %v789_v8 = vld [vmem:[#allocation5 + $0x12f8] sm:$0xff]  ;;  %v15387_v50 = vpop.f32.mrf.mxu1  ;;  %10151 = vmatprep.mubr.bf16.mxu1 %v17348_v44  ;;  %17350 = vst [vmem:[#allocation167_spill] sm:$0xff] %v15395_v33 }
 0x440   :  { %v17341_v56 = vld [vmem:[#allocation66_spill] sm:$0xff]  ;;  %v11953_v38 = vcombine.high %v785_v52, %v789_v8  ;;  %17345 = vst [vmem:[#allocation155_spill] sm:$0xff] %v15387_v50  ;;  %10307 = vmatprep.subr.bf16.mxu1 %v12089_v59  ;;  %v11952_v36 = vcombine.low %v785_v52, %v789_v8  ;;  %v15399_v23 = vpop.f32.mrf.mxu0  ;;  %v17355_v8 = vld [vmem:[#allocation71_spill] sm:$0xff] }
 0x441   :  { %10029 = vmatmul.mubr.bf16.gmra.mxu0 %v17341_v56  ;;  %v913_v32 = vld [vmem:[#allocation5 + $0x16d8] sm:$0xff]  ;;  %v15393_v13 = vpop.f32.mrf.mxu1  ;;  %17352 = vst [vmem:[#allocation189_spill] sm:$0xff] %v15399_v23 }
 0x442   :  { %v917_v14 = vld [vmem:[#allocation5 + $0x16f8] sm:$0xff]  ;;  %10193 = vmatpush2.bf16.msra.mxu0 %v11968_v42  ;;  %10038 = vmatprep.mubr.bf16.mxu0 %v17346_v26  ;;  %17349 = vst [vmem:[#allocation186_spill] sm:$0xff] %v15393_v13 }
 0x443   :  { %10194 = vmatprep.subr.bf16.mxu0 %v11961_v53  ;;  %v12081_v56 = vcombine.high %v913_v32, %v917_v14  ;;  %v777_v20 = vld [vmem:[#allocation5 + $0x1298] sm:$0xff]  ;;  %10308 = vmatpush2.bf16.msra.mxu1 %v12088_v35  ;;  %v12080_v40 = vcombine.low %v913_v32, %v917_v14  ;;  %v15397_v59 = vpop.f32.mrf.mxu1  ;;  %v15405_v32 = vpop.f32.mrf.mxu0 }
 0x444   :  { %v781_v29 = vld [vmem:[#allocation5 + $0x12b8] sm:$0xff]  ;;  %17351 = vst [vmem:[#allocation156_spill] sm:$0xff] %v15397_v59  ;;  %10152 = vmatmul.mubr.bf16.gmra.mxu1 %v17355_v8  ;;  %17356 = vst [vmem:[#allocation188_spill] sm:$0xff] %v15405_v32 }
 0x445   :  { %v905_v42 = vld [vmem:[#allocation5 + $0x1698] sm:$0xff]  ;;  %v11945_v53 = vcombine.high %v777_v20, %v781_v29  ;;  %10309 = vmatprep.subr.bf16.mxu1 %v12081_v56  ;;  %v11944_v52 = vcombine.low %v777_v20, %v781_v29  ;;  %v17358_v56 = vld [vmem:[#allocation72_spill] sm:$0xff]  ;;  %v15410_v33 = vpop.f32.mrf.mxu0 }
 0x446   :  { %v909_v16 = vld [vmem:[#allocation5 + $0x16b8] sm:$0xff]  ;;  %10195 = vmatpush2.bf16.msra.mxu0 %v11960_v21  ;;  %v15402_v21 = vpop.f32.mrf.mxu1  ;;  %17359 = vst [vmem:[#allocation166_spill] sm:$0xff] %v15410_v33 }
 0x447   :  { %10196 = vmatprep.subr.bf16.mxu0 %v11953_v38  ;;  %v12073_v46 = vcombine.high %v905_v42, %v909_v16  ;;  %v769_v26 = vld [vmem:[#allocation5 + $0x1258] sm:$0xff]  ;;  %17354 = vst [vmem:[#allocation164_spill] sm:$0xff] %v15402_v21  ;;  %10310 = vmatpush2.bf16.msra.mxu1 %v12080_v40  ;;  %v12072_v14 = vcombine.low %v905_v42, %v909_v16  ;;  %v17360_v21 = vld [vmem:[#allocation73_spill] sm:$0xff]  ;;  %v15415_v42 = vpop.f32.mrf.mxu0 }
 0x448   :  { %v773_v50 = vld [vmem:[#allocation5 + $0x1278] sm:$0xff]  ;;  %v15407_v38 = vpop.f32.mrf.mxu1  ;;  %10161 = vmatprep.mubr.bf16.mxu1 %v17360_v21 }
 0x449   :  { %v17353_v44 = vld [vmem:[#allocation70_spill] sm:$0xff]  ;;  %v11937_v35 = vcombine.high %v769_v26, %v773_v50  ;;  %17357 = vst [vmem:[#allocation191_spill] sm:$0xff] %v15407_v38  ;;  %10311 = vmatprep.subr.bf16.mxu1 %v12073_v46  ;;  %v11936_v40 = vcombine.low %v769_v26, %v773_v50  ;;  %v15419_v33 = vpop.f32.mrf.mxu0  ;;  %v17366_v50 = vld [vmem:[#allocation75_spill] sm:$0xff] }
 0x44a   :  { %10039 = vmatmul.mubr.bf16.gmra.mxu0 %v17353_v44  ;;  %v897_v2 = vld [vmem:[#allocation5 + $0x1658] sm:$0xff]  ;;  %v15413_v20 = vpop.f32.mrf.mxu1  ;;  %17363 = vst [vmem:[#allocation192_spill] sm:$0xff] %v15419_v33 }
 0x44b   :  { %v901_v13 = vld [vmem:[#allocation5 + $0x1678] sm:$0xff]  ;;  %10197 = vmatpush2.bf16.msra.mxu0 %v11952_v36  ;;  %10048 = vmatprep.mubr.bf16.mxu0 %v17358_v56  ;;  %17361 = vst [vmem:[#allocation157_spill] sm:$0xff] %v15413_v20 }
 0x44c   :  { %10198 = vmatprep.subr.bf16.mxu0 %v11945_v53  ;;  %v12065_v44 = vcombine.high %v897_v2, %v901_v13  ;;  %v761_v59 = vld [vmem:[#allocation5 + $0x1218] sm:$0xff]  ;;  %10312 = vmatpush2.bf16.msra.mxu1 %v12072_v14  ;;  %v12064_v16 = vcombine.low %v897_v2, %v901_v13  ;;  %v15417_v46 = vpop.f32.mrf.mxu1  ;;  %v15425_v2 = vpop.f32.mrf.mxu0 }
 0x44d   :  { %v765_v23 = vld [vmem:[#allocation5 + $0x1238] sm:$0xff]  ;;  %17362 = vst [vmem:[#allocation137_spill] sm:$0xff] %v15417_v46  ;;  %10162 = vmatmul.mubr.bf16.gmra.mxu1 %v17366_v50  ;;  %17367 = vst [vmem:[#allocation193_spill] sm:$0xff] %v15425_v2  ;;  %v17369_v46 = vld [vmem:[#allocation76_spill] sm:$0xff] }
 0x44e   :  { %v889_v36 = vld [vmem:[#allocation5 + $0x1618] sm:$0xff]  ;;  %v11929_v53 = vcombine.high %v761_v59, %v765_v23  ;;  %10313 = vmatprep.subr.bf16.mxu1 %v12065_v44  ;;  %v11928_v26 = vcombine.low %v761_v59, %v765_v23  ;;  %v9303_v44 = vadd.f32 %v15277_v22, %v15154_v31  ;;  %v9305_v22 = vadd.f32 %v15285_v10, %v15159_v61 }
 0x44f   :  { %v893_v29 = vld [vmem:[#allocation5 + $0x1638] sm:$0xff]  ;;  %10199 = vmatpush2.bf16.msra.mxu0 %v11944_v52  ;;  %v15422_v52 = vpop.f32.mrf.mxu1 }
 0x450   :  { %10200 = vmatprep.subr.bf16.mxu0 %v11937_v35  ;;  %v12057_v8 = vcombine.high %v889_v36, %v893_v29  ;;  %v1009_v56 = vld [vmem:[#allocation5 + $0x19d8] sm:$0xff]  ;;  %17365 = vst [vmem:[#allocation190_spill] sm:$0xff] %v15422_v52  ;;  %10314 = vmatpush2.bf16.msra.mxu1 %v12064_v16  ;;  %v12056_v13 = vcombine.low %v889_v36, %v893_v29  ;;  %v17371_v36 = vld [vmem:[#allocation77_spill] sm:$0xff] }
 0x451   :  { %v1013_v38 = vld [vmem:[#allocation5 + $0x19f8] sm:$0xff]  ;;  %10317 = vmatprep.mubr.bf16.mxu1 %v17371_v36 }
 0x452   :  { %v17364_v21 = vld [vmem:[#allocation74_spill] sm:$0xff]  ;;  %v12177_v14 = vcombine.high %v1009_v56, %v1013_v38  ;;  %10315 = vmatprep.subr.bf16.mxu1 %v12057_v8 }
 0x453   :  { %10049 = vmatmul.mubr.bf16.gmra.mxu0 %v17364_v21  ;;  %v1137_v32 = vld [vmem:[#allocation5 + $0x1dd8] sm:$0xff]  ;;  %v15431_v21 = vpop.f32.mrf.mxu1 }
 0x454   :  { %v1141_v20 = vld [vmem:[#allocation5 + $0x1df8] sm:$0xff]  ;;  %10201 = vmatpush2.bf16.msra.mxu0 %v11936_v40  ;;  %17368 = vst [vmem:[#allocation169_spill] sm:$0xff] %v15431_v21  ;;  %10204 = vmatprep.mubr.bf16.mxu0 %v17369_v46  ;;  %v15440_v40 = vpop.f32.mrf.mxu0  ;;  %v12176_v46 = vcombine.low %v1009_v56, %v1013_v38  ;;  %v9307_v38 = vadd.f32 %v15290_v5, %v15162_v60 }
 0x455   :  { %10202 = vmatprep.subr.bf16.mxu0 %v11929_v53  ;;  %v15427_v35 = vld [vmem:[#allocation5 + $0x1998] sm:$0xff]  ;;  %v12305_v52 = vcombine.high %v1137_v32, %v1141_v20  ;;  %17370 = vst [vmem:[#allocation195_spill] sm:$0xff] %v15440_v40  ;;  %v15451_v53 = vpop.f32.mrf.mxu1  ;;  %v12304_v8 = vcombine.low %v1137_v32, %v1141_v20  ;;  %10316 = vmatpush2.bf16.msra.mxu1 %v12056_v13 }
 0x456   :  { %v15434_v50 = vld [vmem:[#allocation5 + $0x19b8] sm:$0xff]  ;;  %17372 = vst [vmem:[#allocation158_spill] sm:$0xff] %v15451_v53  ;;  %v15459_v36 = vpop.f32.mrf.mxu0  ;;  %v9416_v32 = vadd.f32 %v15282_v3, %v9303_v44  ;;  %v9418_v44 = vadd.f32 %v15287_v11, %v9305_v22  ;;  %v9313_v60 = vadd.f32 %v15299_v27, %v15170_v48  ;;  %v9420_v22 = vadd.f32 %v15293_v39, %v9307_v38 }
 0x457   :  { %v15436_v23 = vld [vmem:[#allocation5 + $0x1d98] sm:$0xff]  ;;  %v12168_v33 = vcombine.low %v15427_v35, %v15434_v50  ;;  %v12169_v61 = vcombine.high %v15427_v35, %v15434_v50  ;;  %v15470_v20 = vpop.f32.mrf.mxu1  ;;  %10511 = vmatprep.subr.bf16.mxu1 %v12305_v52  ;;  %v9315_v48 = vadd.f32 %v15305_v51, %v15175_v18 }
 0x458   :  { %v15438_v59 = vld [vmem:[#allocation5 + $0x1db8] sm:$0xff]  ;;  %10203 = vmatpush2.bf16.msra.mxu0 %v11928_v26  ;;  %17373 = vst [vmem:[#allocation168_spill] sm:$0xff] %v15470_v20  ;;  %v9528_v35 = vpop.f32.mrf.mxu0  ;;  %10318 = vmatmul.mubr.bf16.vlgmr.msra.gmra.mxu1 %v17117_v6 }
 0x459   :  { %v15443_v29 = vld [vmem:[#allocation5 + $0x1958] sm:$0xff]  ;;  %10398 = vmatprep.subr.bf16.mxu0 %v12177_v14  ;;  %v12296_v10 = vcombine.low %v15436_v23, %v15438_v59  ;;  %v12297_v56 = vcombine.high %v15436_v23, %v15438_v59  ;;  %v9309_v23 = vadd.f32 %v15295_v62, %v15166_v57  ;;  %v9529_v59 = vadd.f32 %v9528_v35, %v9416_v32  ;;  %v9641_v20 = vpop.f32.mrf.mxu1 }
 0x45a   :  { %v15445_v16 = vld [vmem:[#allocation5 + $0x1978] sm:$0xff]  ;;  %10512 = vmatpush1.bf16.msra.mxu1 %v12304_v8  ;;  %v9530_v53 = vpop.f32.mrf.mxu0  ;;  %10327 = vmatprep.mubr.bf16.mxu1 %v16860_v49 }
 0x45b   :  { %v15447_v31 = vld [vmem:[#allocation5 + $0x1d58] sm:$0xff]  ;;  %v12161_v26 = vcombine.high %v15443_v29, %v15445_v16  ;;  %v9531_v32 = vadd.f32 %v9530_v53, %v9418_v44  ;;  %v9643_v35 = vpop.f32.mrf.mxu1  ;;  %10513 = vmatprep.subr.bf16.mxu1 %v12297_v56  ;;  %v9422_v53 = vadd.f32 %v15297_v63, %v9309_v23  ;;  %v9426_v56 = vadd.f32 %v15302_v1, %v9313_v60 }
 0x45c   :  { %v15453_v21 = vld [vmem:[#allocation5 + $0x1d78] sm:$0xff]  ;;  %v9532_v27 = vpop.f32.mrf.mxu0  ;;  %v9317_v44 = vadd.f32 %v15310_v7, %v15178_v55  ;;  %v9428_v1 = vadd.f32 %v15307_v17, %v9315_v48  ;;  %v9319_v55 = vadd.f32 %v15315_v30, %v15182_v12  ;;  %v17375_v17 = vcombine.low %v15443_v29, %v15445_v16 }
 0x45d   :  { %v15455_v2 = vld [vmem:[#allocation5 + $0x1918] sm:$0xff]  ;;  %v12289_v5 = vcombine.high %v15447_v31, %v15453_v21  ;;  %v9644_v38 = vadd.f32 %v9643_v35, %v9531_v32  ;;  %v9323_v48 = vadd.f32 %v15319_v28, %v15186_v25  ;;  %v17377_v25 = vld [vmem:[#allocation84_spill] sm:$0xff] }
 0x45e   :  { %v15457_v40 = vld [vmem:[#allocation5 + $0x1938] sm:$0xff]  ;;  %10514 = vmatpush1.bf16.msra.mxu1 %v12296_v10 }
 0x45f   :  { %v15476_v13 = vld [vmem:[#allocation5 + $0x1d18] sm:$0xff]  ;;  %v12153_v52 = vcombine.high %v15455_v2, %v15457_v40  ;;  %v12152_v11 = vcombine.low %v15455_v2, %v15457_v40  ;;  %10515 = vmatprep.subr.bf16.mxu1 %v12289_v5 }
 0x460   :  { %v15478_v14 = vld [vmem:[#allocation5 + $0x1d38] sm:$0xff]  ;;  %10328 = vmatmul.mubr.bf16.gmra.mxu1 %v16862_v4 }
 0x461   :  { %v17374_v50 = vld [vmem:[#allocation78_spill] sm:$0xff]  ;;  %v12280_v57 = vcombine.low %v15476_v13, %v15478_v14  ;;  %v12281_v8 = vcombine.high %v15476_v13, %v15478_v14 }
 0x462   :  { %10205 = vmatmul.mubr.bf16.vlgmr.msra.gmra.mxu0 %v17374_v50  ;;  %v15493_v50 = vld [vmem:[#allocation5 + $0x18d8] sm:$0xff] }
 0x463   :  { %10399 = vmatpush1.bf16.msra.mxu0 %v12176_v46  ;;  %v15495_v3 = vld [vmem:[#allocation5 + $0x18f8] sm:$0xff]  ;;  %v9642_v46 = vadd.f32 %v9641_v20, %v9529_v59  ;;  %10214 = vmatprep.mubr.bf16.mxu0 %v16859_v45  ;;  %v9533_v20 = vadd.f32 %v9532_v27, %v9420_v22  ;;  %v9645_v45 = vpop.f32.mrf.mxu1  ;;  %v9534_v59 = vpop.f32.mrf.mxu0 }
 0x464   :  { %10400 = vmatprep.subr.bf16.mxu0 %v12169_v61  ;;  %v15503_v62 = vld [vmem:[#allocation5 + $0x1cd8] sm:$0xff]  ;;  %v12144_v61 = vcombine.low %v15493_v50, %v15495_v3  ;;  %v12145_v39 = vcombine.high %v15493_v50, %v15495_v3  ;;  %v9535_v32 = vadd.f32 %v9534_v59, %v9422_v53 }
 0x465   :  { %v15505_v6 = vld [vmem:[#allocation5 + $0x1cf8] sm:$0xff]  ;;  %v10628_v23 = vmax.f32 %v9642_v46, 0.0  ;;  %v9646_v22 = vadd.f32 %v9645_v45, %v9533_v20  ;;  %v9647_v35 = vpop.f32.mrf.mxu1  ;;  %v9538_v7 = vpop.f32.mrf.mxu0 }
 0x466   :  { %v15521_v51 = vld [vmem:[#allocation5 + $0x1898] sm:$0xff]  ;;  %v12273_v63 = vcombine.high %v15503_v62, %v15505_v6  ;;  %v9648_v5 = vadd.f32 %v9647_v35, %v9535_v32  ;;  %v9539_v46 = vadd.f32 %v9538_v7, %v9426_v56  ;;  %v9436_v7 = vadd.f32 %v15322_v58, %v9323_v48  ;;  %v17380_v48 = vld [vmem:[#allocation87_spill] sm:$0xff] }
 0x467   :  { %10401 = vmatpush1.bf16.msra.mxu0 %v12168_v33  ;;  %v15523_v49 = vld [vmem:[#allocation5 + $0x18b8] sm:$0xff]  ;;  %v10629_v33 = vmax.f32 %v9644_v38, 0.0  ;;  %v9651_v53 = vpop.f32.mrf.mxu1  ;;  %v17376_v38 = vcombine.low %v15447_v31, %v15453_v21  ;;  %v9540_v20 = vpop.f32.mrf.mxu0  ;;  %v10636_v29 = vmax.f32 %v9646_v22, 0.0  ;;  %v9325_v31 = vadd.f32 %v15325_v54, %v15191_v19 }
 0x468   :  { %10402 = vmatprep.subr.bf16.mxu0 %v12161_v26  ;;  %v15530_v27 = vld [vmem:[#allocation5 + $0x1c98] sm:$0xff]  ;;  %v12136_v10 = vcombine.low %v15521_v51, %v15523_v49  ;;  %v12137_v26 = vcombine.high %v15521_v51, %v15523_v49  ;;  %v10637_v16 = vmax.f32 %v9648_v5, 0.0  ;;  %v9652_v45 = vadd.f32 %v9651_v53, %v9539_v46 }
 0x469   :  { %v15532_v18 = vld [vmem:[#allocation5 + $0x1cb8] sm:$0xff]  ;;  %v12436_v60 = vpack.c.bf16 %v10629_v33, %v10628_v23  ;;  %10516 = vmatpush1.bf16.msra.mxu1 %v17376_v38  ;;  %v9653_v56 = vpop.f32.mrf.mxu1  ;;  %v9432_v33 = vadd.f32 %v15317_v24, %v9319_v55 }
 0x46a   :  { %10215 = vmatmul.mubr.bf16.gmra.mxu0 %v16861_v43  ;;  %v15546_v12 = vld [vmem:[#allocation5 + $0x1858] sm:$0xff]  ;;  %v9430_v43 = vadd.f32 %v15313_v47, %v9317_v44  ;;  %v12264_v4 = vcombine.low %v15530_v27, %v15532_v18  ;;  %v9541_v47 = vadd.f32 %v9540_v20, %v9428_v1  ;;  %10517 = vmatprep.subr.bf16.mxu1 %v12281_v8  ;;  %v17378_v44 = vld [vmem:[#allocation85_spill] sm:$0xff]  ;;  %v10644_v40 = vmax.f32 %v9652_v45, 0.0  ;;  %v17381_v20 = vld [vmem:[#allocation79_spill] sm:$0xff] }
 0x46b   :  { %10403 = vmatpush1.bf16.msra.mxu0 %v17375_v17  ;;  %v15548_v30 = vld [vmem:[#allocation5 + $0x1878] sm:$0xff]  ;;  %11138 = vst [vmem:[#allocation8 + $0x10] sm:$0xff] %v12436_v60  ;;  %10224 = vmatprep.mubr.bf16.mxu0 %v17377_v25  ;;  %v12265_v59 = vcombine.high %v15530_v27, %v15532_v18  ;;  %v12440_v22 = vpack.c.bf16 %v10637_v16, %v10636_v29  ;;  %v9655_v1 = vpop.f32.mrf.mxu1 }
 0x46c   :  { %10404 = vmatprep.subr.bf16.mxu0 %v12153_v52  ;;  %v15562_v28 = vld [vmem:[#allocation5 + $0x1c58] sm:$0xff]  ;;  %v9542_v52 = vpop.f32.mrf.mxu0  ;;  %10337 = vmatprep.mubr.bf16.mxu1 %v17378_v44  ;;  %v12128_v23 = vcombine.low %v15546_v12, %v15548_v30  ;;  %v12129_v8 = vcombine.high %v15546_v12, %v15548_v30  ;;  %v9654_v32 = vadd.f32 %v9653_v56, %v9541_v47 }
 0x46d   :  { %v15564_v21 = vld [vmem:[#allocation5 + $0x1c78] sm:$0xff]  ;;  %v9543_v35 = vadd.f32 %v9542_v52, %v9430_v43  ;;  %v9327_v60 = vadd.f32 %v15330_v37, %v15194_v0  ;;  %10518 = vmatpush1.bf16.msra.mxu1 %v12280_v57  ;;  %11142 = vst [vmem:[#allocation8 + $0x30] sm:$0xff] %v12440_v22  ;;  %v9657_v5 = vpop.f32.mrf.mxu1  ;;  %v9438_v0 = vadd.f32 %v15327_v15, %v9325_v31  ;;  %v17384_v31 = vld [vmem:[#allocation88_spill] sm:$0xff] }
 0x46e   :  { %v15579_v19 = vld [vmem:[#allocation5 + $0x1818] sm:$0xff]  ;;  %v9544_v24 = vpop.f32.mrf.mxu0  ;;  %v12256_v2 = vcombine.low %v15562_v28, %v15564_v21  ;;  %10519 = vmatprep.subr.bf16.mxu1 %v12273_v63  ;;  %v9329_v37 = vadd.f32 %v15335_v9, %v15198_v41  ;;  %v12257_v57 = vcombine.high %v15562_v28, %v15564_v21  ;;  %10338 = vmatmul.mubr.bf16.gmra.mxu1 %v17380_v48  ;;  %v17385_v52 = vld [vmem:[#allocation80_spill] sm:$0xff]  ;;  %v17394_v48 = vld [vmem:[#allocation163_spill] sm:$0xff] }
 0x46f   :  { %10405 = vmatpush1.bf16.msra.mxu0 %v12152_v11  ;;  %v15581_v54 = vld [vmem:[#allocation5 + $0x1838] sm:$0xff]  ;;  %v10645_v11 = vmax.f32 %v9654_v32, 0.0  ;;  %v9656_v55 = vadd.f32 %v9655_v1, %v9543_v35  ;;  %v9545_v58 = vadd.f32 %v9544_v24, %v9432_v33  ;;  %v9661_v63 = vpop.f32.mrf.mxu1  ;;  %v9440_v38 = vadd.f32 %v15333_v34, %v9327_v60  ;;  %v17387_v33 = vld [vmem:[#allocation89_spill] sm:$0xff]  ;;  %v17388_v35 = vld [vmem:[#allocation179_spill] sm:$0xff] }
 0x470   :  { %10406 = vmatprep.subr.bf16.mxu0 %v12145_v39  ;;  %v9548_v13 = vpop.f32.mrf.mxu0  ;;  %v17379_v14 = vld [vmem:[#allocation86_spill] sm:$0xff]  ;;  %v12121_v39 = vcombine.high %v15579_v19, %v15581_v54  ;;  %v17383_v45 = vcombine.low %v15503_v62, %v15505_v6  ;;  %v12120_v3 = vcombine.low %v15579_v19, %v15581_v54  ;;  %v17386_v62 = vld [vmem:[#allocation151_spill] sm:$0xff]  ;;  %10347 = vmatprep.mubr.bf16.mxu1 %v17387_v33  ;;  %v17401_v21 = vld [vmem:[#allocation140_spill] sm:$0xff] }
 0x471   :  { %v15605_v46 = vld [vmem:[#allocation5 + $0x1c18] sm:$0xff]  ;;  %v12444_v53 = vpack.c.bf16 %v10645_v11, %v10644_v40  ;;  %v9658_v17 = vadd.f32 %v9657_v5, %v9545_v58  ;;  %v9549_v43 = vadd.f32 %v9548_v13, %v9436_v7  ;;  %v10652_v50 = vmax.f32 %v9656_v55, 0.0  ;;  %v9663_v25 = vpop.f32.mrf.mxu1  ;;  %v17389_v55 = vld [vmem:[#allocation160_spill] sm:$0xff]  ;;  %v17390_v5 = vld [vmem:[#allocation171_spill] sm:$0xff] }
 0x472   :  { %10225 = vmatmul.mubr.bf16.gmra.mxu0 %v17379_v14  ;;  %v15611_v41 = vld [vmem:[#allocation5 + $0x1c38] sm:$0xff]  ;;  %10520 = vmatpush1.bf16.msra.mxu1 %v17383_v45  ;;  %v9550_v47 = vpop.f32.mrf.mxu0  ;;  %v9335_v6 = vadd.f32 %v17386_v62, %v17385_v52  ;;  %v9442_v1 = vadd.f32 %v17388_v35, %v9329_v37  ;;  %v17398_v52 = vld [vmem:[#allocation141_spill] sm:$0xff] }
 0x473   :  { %10407 = vmatpush1.bf16.msra.mxu0 %v12144_v61  ;;  %v15613_v15 = vld [vmem:[#allocation5 + $0x1bd8] sm:$0xff]  ;;  %11146 = vst [vmem:[#allocation8 + $0x50] sm:$0xff] %v12444_v53  ;;  %v10653_v61 = vmax.f32 %v9658_v17, 0.0  ;;  %v9662_v56 = vadd.f32 %v9661_v63, %v9549_v43  ;;  %v9551_v34 = vadd.f32 %v9550_v47, %v9438_v0  ;;  %10521 = vmatprep.subr.bf16.mxu1 %v12265_v59  ;;  %v9665_v24 = vpop.f32.mrf.mxu1  ;;  %v17391_v0 = vld [vmem:[#allocation132_spill] sm:$0xff]  ;;  %v17399_v62 = vld [vmem:[#allocation181_spill] sm:$0xff] }
 0x474   :  { %v15615_v9 = vld [vmem:[#allocation5 + $0x1bf8] sm:$0xff]  ;;  %10408 = vmatprep.subr.bf16.mxu0 %v12137_v26  ;;  %10234 = vmatprep.mubr.bf16.mxu0 %v17384_v31  ;;  %v9552_v44 = vpop.f32.mrf.mxu0  ;;  %v12248_v26 = vcombine.low %v15605_v46, %v15611_v41  ;;  %v12249_v22 = vcombine.high %v15605_v46, %v15611_v41  ;;  %v9337_v13 = vadd.f32 %v17391_v0, %v17390_v5  ;;  %v17404_v5 = vld [vmem:[#allocation180_spill] sm:$0xff] }
 0x475   :  { %v17382_v29 = vld [vmem:[#allocation150_spill] sm:$0xff]  ;;  %v12241_v32 = vcombine.high %v15613_v15, %v15615_v9  ;;  %v12448_v59 = vpack.c.bf16 %v10653_v61, %v10652_v50  ;;  %v9664_v7 = vadd.f32 %v9663_v25, %v9551_v34  ;;  %v9553_v60 = vadd.f32 %v9552_v44, %v9440_v38  ;;  %v9667_v17 = vpop.f32.mrf.mxu1  ;;  %v17396_v61 = vld [vmem:[#allocation91_spill] sm:$0xff]  ;;  %v17397_v25 = vld [vmem:[#allocation152_spill] sm:$0xff] }
 0x476   :  { %v9333_v16 = vadd.f32 %v17382_v29, %v17381_v20  ;;  %v15642_v40 = vld [vmem:[#allocation5 + $0x1fd8] sm:$0xff]  ;;  %10522 = vmatpush1.bf16.msra.mxu1 %v12264_v4  ;;  %v9554_v37 = vpop.f32.mrf.mxu0  ;;  %v12240_v51 = vcombine.low %v15613_v15, %v15615_v9  ;;  %v10660_v49 = vmax.f32 %v9662_v56, 0.0  ;;  %v17393_v4 = vld [vmem:[#allocation81_spill] sm:$0xff]  ;;  %v9450_v31 = vadd.f32 %v17397_v25, %v9337_v13  ;;  %v17410_v46 = vld [vmem:[#allocation184_spill] sm:$0xff] }
 0x477   :  { %10409 = vmatpush1.bf16.msra.mxu0 %v12136_v10  ;;  %v15644_v11 = vld [vmem:[#allocation5 + $0x1ff8] sm:$0xff]  ;;  %11150 = vst [vmem:[#allocation8 + $0x70] sm:$0xff] %v12448_v59  ;;  %v10661_v10 = vmax.f32 %v9664_v7, 0.0  ;;  %v9666_v14 = vadd.f32 %v9665_v24, %v9553_v60  ;;  %v9555_v53 = vadd.f32 %v9554_v37, %v9442_v1  ;;  %10523 = vmatprep.subr.bf16.mxu1 %v12257_v57  ;;  %v9671_v50 = vpop.f32.mrf.mxu1  ;;  %v17400_v59 = vld [vmem:[#allocation92_spill] sm:$0xff]  ;;  %v17403_v24 = vld [vmem:[#allocation93_spill] sm:$0xff] }
 0x478   :  { %v9446_v58 = vadd.f32 %v17389_v55, %v9333_v16  ;;  %10410 = vmatprep.subr.bf16.mxu0 %v12129_v8  ;;  %v15657_v43 = vld [vmem:[#allocation5 + $0x1b98] sm:$0xff]  ;;  %v9339_v38 = vadd.f32 %v17394_v48, %v17393_v4  ;;  %v9558_v8 = vpop.f32.mrf.mxu0  ;;  %v12368_v29 = vcombine.low %v15642_v40, %v15644_v11  ;;  %v12369_v16 = vcombine.high %v15642_v40, %v15644_v11  ;;  %v17419_v40 = vld [vmem:[#allocation97_spill] sm:$0xff] }
 0x479   :  { %v15659_v63 = vld [vmem:[#allocation5 + $0x1bb8] sm:$0xff]  ;;  %v12452_v45 = vpack.c.bf16 %v10661_v10, %v10660_v49  ;;  %v9668_v57 = vadd.f32 %v9667_v17, %v9555_v53  ;;  %10348 = vmatmul.mubr.bf16.gmra.mxu1 %v17396_v61  ;;  %v10668_v30 = vmax.f32 %v9666_v14, 0.0  ;;  %v9673_v1 = vpop.f32.mrf.mxu1  ;;  %v17405_v17 = vld [vmem:[#allocation183_spill] sm:$0xff] }
 0x47a   :  { %v17392_v18 = vld [vmem:[#allocation178_spill] sm:$0xff]  ;;  %v9559_v47 = vadd.f32 %v9558_v8, %v9446_v58  ;;  %10524 = vmatpush1.bf16.msra.mxu1 %v12256_v2  ;;  %v9560_v44 = vpop.f32.mrf.mxu0  ;;  %v12233_v12 = vcombine.high %v15657_v43, %v15659_v63  ;;  %10357 = vmatprep.mubr.bf16.mxu1 %v17403_v24  ;;  %v12232_v55 = vcombine.low %v15657_v43, %v15659_v63 }
 0x47b   :  { %v9448_v27 = vadd.f32 %v17392_v18, %v9335_v6  ;;  %v17395_v20 = vld [vmem:[#allocation90_spill] sm:$0xff]  ;;  %10411 = vmatpush1.bf16.msra.mxu0 %v12128_v23  ;;  %v9343_v6 = vadd.f32 %v17399_v62, %v17398_v52  ;;  %11154 = vst [vmem:[#allocation8 + $0x90] sm:$0xff] %v12452_v45  ;;  %v10669_v23 = vmax.f32 %v9668_v57, 0.0  ;;  %10525 = vmatprep.subr.bf16.mxu1 %v12249_v22  ;;  %v9675_v10 = vpop.f32.mrf.mxu1  ;;  %v17408_v57 = vld [vmem:[#allocation153_spill] sm:$0xff] }
 0x47c   :  { %10235 = vmatmul.mubr.bf16.gmra.mxu0 %v17395_v20  ;;  %v15673_v56 = vld [vmem:[#allocation5 + $0x1f98] sm:$0xff]  ;;  %10412 = vmatprep.subr.bf16.mxu0 %v12121_v39  ;;  %v9672_v33 = vadd.f32 %v9671_v50, %v9559_v47  ;;  %v9562_v39 = vpop.f32.mrf.mxu0  ;;  %v9452_v0 = vadd.f32 %v17404_v5, %v9339_v38 }
 0x47d   :  { %v15675_v34 = vld [vmem:[#allocation5 + $0x1fb8] sm:$0xff]  ;;  %v9561_v35 = vadd.f32 %v9560_v44, %v9448_v27  ;;  %10244 = vmatprep.mubr.bf16.mxu0 %v17400_v59  ;;  %v12456_v13 = vpack.c.bf16 %v10669_v23, %v10668_v30  ;;  %v9563_v49 = vadd.f32 %v9562_v39, %v9450_v31  ;;  %v9456_v18 = vadd.f32 %v17405_v17, %v9343_v6  ;;  %v9677_v45 = vpop.f32.mrf.mxu1  ;;  %v17412_v44 = vld [vmem:[#allocation95_spill] sm:$0xff]  ;;  %v17420_v17 = vld [vmem:[#allocation185_spill] sm:$0xff] }
 0x47e   :  { %v15689_v7 = vld [vmem:[#allocation5 + $0x1b58] sm:$0xff]  ;;  %v12360_v58 = vcombine.low %v15673_v56, %v15675_v34  ;;  %v12361_v22 = vcombine.high %v15673_v56, %v15675_v34  ;;  %10526 = vmatpush1.bf16.msra.mxu1 %v12248_v26  ;;  %v9564_v38 = vpop.f32.mrf.mxu0  ;;  %v10676_v54 = vmax.f32 %v9672_v33, 0.0  ;;  %v17414_v59 = vld [vmem:[#allocation143_spill] sm:$0xff]  ;;  %v17425_v56 = vld [vmem:[#allocation172_spill] sm:$0xff] }
 0x47f   :  { %v15691_v28 = vld [vmem:[#allocation5 + $0x1b78] sm:$0xff]  ;;  %v9674_v37 = vadd.f32 %v9673_v1, %v9561_v35  ;;  %10413 = vmatpush1.bf16.msra.mxu0 %v12120_v3  ;;  %11158 = vst [vmem:[#allocation8 + $0xb0] sm:$0xff] %v12456_v13  ;;  %v9676_v8 = vadd.f32 %v9675_v10, %v9563_v49  ;;  %v9565_v20 = vadd.f32 %v9564_v38, %v9452_v0  ;;  %v17413_v35 = vld [vmem:[#allocation133_spill] sm:$0xff]  ;;  %v17416_v0 = vld [vmem:[#allocation96_spill] sm:$0xff] }
 0x480   :  { %v17402_v2 = vld [vmem:[#allocation162_spill] sm:$0xff]  ;;  %10414 = vmatprep.subr.bf16.mxu0 %v12241_v32  ;;  %v12225_v19 = vcombine.high %v15689_v7, %v15691_v28  ;;  %10527 = vmatprep.subr.bf16.mxu1 %v12369_v16  ;;  %v9568_v26 = vpop.f32.mrf.mxu0  ;;  %v12224_v32 = vcombine.low %v15689_v7, %v15691_v28  ;;  %v9681_v16 = vpop.f32.mrf.mxu1  ;;  %v17417_v13 = vld [vmem:[#allocation173_spill] sm:$0xff]  ;;  %v17426_v34 = vld [vmem:[#allocation167_spill] sm:$0xff] }
 0x481   :  { %v9345_v60 = vadd.f32 %v17402_v2, %v17401_v21  ;;  %v15706_v14 = vld [vmem:[#allocation5 + $0x1f58] sm:$0xff]  ;;  %v10677_v3 = vmax.f32 %v9674_v37, 0.0  ;;  %v9678_v62 = vadd.f32 %v9677_v45, %v9565_v20  ;;  %v9569_v6 = vadd.f32 %v9568_v26, %v9456_v18  ;;  %10358 = vmatmul.mubr.bf16.gmra.mxu1 %v17412_v44  ;;  %v17415_v21 = vld [vmem:[#allocation165_spill] sm:$0xff]  ;;  %v17418_v37 = vld [vmem:[#allocation135_spill] sm:$0xff] }
 0x482   :  { %v15708_v53 = vld [vmem:[#allocation5 + $0x1f78] sm:$0xff]  ;;  %v9353_v2 = vadd.f32 %v17415_v21, %v17414_v59  ;;  %10528 = vmatpush2.bf16.msra.mxu1 %v12368_v29  ;;  %v10684_v9 = vmax.f32 %v9676_v8, 0.0  ;;  %v9683_v5 = vpop.f32.mrf.mxu1  ;;  %v9355_v49 = vadd.f32 %v17418_v37, %v17417_v13  ;;  %10367 = vmatprep.mubr.bf16.mxu1 %v17419_v40  ;;  %v17422_v20 = vld [vmem:[#allocation83_spill] sm:$0xff] }
 0x483   :  { %v17406_v27 = vld [vmem:[#allocation170_spill] sm:$0xff]  ;;  %v9458_v47 = vadd.f32 %v17408_v57, %v9345_v60  ;;  %v12352_v25 = vcombine.low %v15706_v14, %v15708_v53  ;;  %v12460_v52 = vpack.c.bf16 %v10677_v3, %v10676_v54  ;;  %10415 = vmatpush2.bf16.msra.mxu0 %v12240_v51  ;;  %v9570_v60 = vpop.f32.mrf.mxu0  ;;  %v12353_v15 = vcombine.high %v15706_v14, %v15708_v53  ;;  %v17421_v3 = vld [vmem:[#allocation187_spill] sm:$0xff]  ;;  %v17434_v53 = vld [vmem:[#allocation188_spill] sm:$0xff] }
 0x484   :  { %v17407_v4 = vld [vmem:[#allocation182_spill] sm:$0xff]  ;;  %10416 = vmatprep.subr.bf16.mxu0 %v12233_v12  ;;  %v10685_v51 = vmax.f32 %v9678_v62, 0.0  ;;  %v9682_v39 = vadd.f32 %v9681_v16, %v9569_v6  ;;  %10529 = vmatprep.subr.bf16.mxu1 %v12361_v22  ;;  %v9466_v8 = vadd.f32 %v17421_v3, %v9353_v2  ;;  %v17428_v2 = vld [vmem:[#allocation99_spill] sm:$0xff] }
 0x485   :  { %v9347_v48 = vadd.f32 %v17407_v4, %v17406_v27  ;;  %v17409_v50 = vld [vmem:[#allocation82_spill] sm:$0xff]  ;;  %11162 = vst [vmem:[#allocation8 + $0xd0] sm:$0xff] %v12460_v52  ;;  %v9571_v24 = vadd.f32 %v9570_v60, %v9458_v47  ;;  %v9572_v10 = vpop.f32.mrf.mxu0  ;;  %v17424_v52 = vld [vmem:[#allocation155_spill] sm:$0xff] }
 0x486   :  { %v9349_v41 = vadd.f32 %v17410_v46, %v17409_v50  ;;  %v17411_v61 = vld [vmem:[#allocation94_spill] sm:$0xff]  ;;  %v12464_v22 = vpack.c.bf16 %v10685_v51, %v10684_v9  ;;  %10530 = vmatpush2.bf16.msra.mxu1 %v12360_v58  ;;  %v10692_v43 = vmax.f32 %v9682_v39, 0.0  ;;  %v9468_v62 = vadd.f32 %v17424_v52, %v9355_v49  ;;  %v17430_v39 = vld [vmem:[#allocation175_spill] sm:$0xff] }
 0x487   :  { %10245 = vmatmul.mubr.bf16.gmra.mxu0 %v17411_v61  ;;  %v15729_v31 = vld [vmem:[#allocation5 + $0x1b18] sm:$0xff]  ;;  %v9460_v1 = vadd.f32 %v17413_v35, %v9347_v48  ;;  %v9684_v27 = vadd.f32 %v9683_v5, %v9571_v24  ;;  %v9685_v48 = vpop.f32.mrf.mxu1  ;;  %v9574_v47 = vpop.f32.mrf.mxu0  ;;  %10531 = vmatprep.subr.bf16.mxu1 %v12353_v15  ;;  %v9359_v58 = vadd.f32 %v17426_v34, %v17425_v56  ;;  %v17431_v24 = vld [vmem:[#allocation189_spill] sm:$0xff]  ;;  %v17433_v14 = vld [vmem:[#allocation159_spill] sm:$0xff] }
 0x488   :  { %v15735_v30 = vld [vmem:[#allocation5 + $0x1b38] sm:$0xff]  ;;  %10254 = vmatprep.mubr.bf16.mxu0 %v17416_v0  ;;  %v9462_v18 = vadd.f32 %v17420_v17, %v9349_v41  ;;  %10417 = vmatpush2.bf16.msra.mxu0 %v12232_v55  ;;  %11166 = vst [vmem:[#allocation8 + $0xf0] sm:$0xff] %v12464_v22  ;;  %v9363_v5 = vadd.f32 %v17431_v24, %v17430_v39  ;;  %v17444_v39 = vld [vmem:[#allocation157_spill] sm:$0xff] }
 0x489   :  { %v15737_v23 = vld [vmem:[#allocation5 + $0x1f18] sm:$0xff]  ;;  %v12216_v11 = vcombine.low %v15729_v31, %v15735_v30  ;;  %v12217_v29 = vcombine.high %v15729_v31, %v15735_v30  ;;  %v9573_v4 = vadd.f32 %v9572_v10, %v9460_v1  ;;  %10418 = vmatprep.subr.bf16.mxu0 %v12225_v19  ;;  %v10693_v63 = vmax.f32 %v9684_v27, 0.0  ;;  %v9687_v41 = vpop.f32.mrf.mxu1  ;;  %v9578_v19 = vpop.f32.mrf.mxu0  ;;  %10368 = vmatmul.mubr.bf16.gmra.mxu1 %v17428_v2  ;;  %v17432_v10 = vld [vmem:[#allocation100_spill] sm:$0xff] }
 0x48a   :  { %v15739_v33 = vld [vmem:[#allocation5 + $0x1f38] sm:$0xff]  ;;  %v9575_v46 = vadd.f32 %v9574_v47, %v9462_v18  ;;  %v9579_v59 = vadd.f32 %v9578_v19, %v9466_v8  ;;  %10532 = vmatpush2.bf16.msra.mxu1 %v12352_v25  ;;  %v9365_v25 = vadd.f32 %v17434_v53, %v17433_v14  ;;  %v17435_v18 = vld [vmem:[#allocation101_spill] sm:$0xff] }
 0x48b   :  { %v12344_v12 = vcombine.low %v15737_v23, %v15739_v33  ;;  %v15763_v38 = vld [vmem:[#allocation5 + $0x1ad8] sm:$0xff]  ;;  %v12345_v50 = vcombine.high %v15737_v23, %v15739_v33  ;;  %v9686_v55 = vadd.f32 %v9685_v48, %v9573_v4  ;;  %v12468_v35 = vpack.c.bf16 %v10693_v63, %v10692_v43  ;;  %v9691_v21 = vpop.f32.mrf.mxu1  ;;  %v9580_v0 = vpop.f32.mrf.mxu0  ;;  %10377 = vmatprep.mubr.bf16.mxu1 %v17435_v18  ;;  %v17436_v48 = vld [vmem:[#allocation156_spill] sm:$0xff]  ;;  %v17441_v23 = vld [vmem:[#allocation129_spill] sm:$0xff] }
 0x48c   :  { %v15765_v54 = vld [vmem:[#allocation5 + $0x1af8] sm:$0xff]  ;;  %v9688_v1 = vadd.f32 %v9687_v41, %v9575_v46  ;;  %10419 = vmatpush2.bf16.msra.mxu0 %v12224_v32  ;;  %v9692_v32 = vadd.f32 %v9691_v21, %v9579_v59  ;;  %v9581_v37 = vadd.f32 %v9580_v0, %v9468_v62  ;;  %v9472_v3 = vadd.f32 %v17436_v48, %v9359_v58  ;;  %v17437_v43 = vld [vmem:[#allocation164_spill] sm:$0xff]  ;;  %v17440_v58 = vld [vmem:[#allocation191_spill] sm:$0xff] }
 0x48d   :  { %v17423_v45 = vld [vmem:[#allocation154_spill] sm:$0xff]  ;;  %v12208_v16 = vcombine.low %v15763_v38, %v15765_v54  ;;  %v12209_v44 = vcombine.high %v15763_v38, %v15765_v54  ;;  %10420 = vmatprep.subr.bf16.mxu0 %v12217_v29  ;;  %11170 = vst [vmem:[#allocation8 + $0x110] sm:$0xff] %v12468_v35  ;;  %v10700_v7 = vmax.f32 %v9686_v55, 0.0  ;;  %v9693_v49 = vpop.f32.mrf.mxu1  ;;  %10533 = vmatprep.subr.bf16.mxu1 %v12345_v50  ;;  %v9582_v29 = vpop.f32.mrf.mxu0  ;;  %v17438_v55 = vld [vmem:[#allocation145_spill] sm:$0xff]  ;;  %v17446_v0 = vld [vmem:[#allocation192_spill] sm:$0xff] }
 0x48e   :  { %v9357_v57 = vadd.f32 %v17423_v45, %v17422_v20  ;;  %v15775_v26 = vld [vmem:[#allocation5 + $0x1ed8] sm:$0xff]  ;;  %v10701_v28 = vmax.f32 %v9688_v1, 0.0  ;;  %v9694_v20 = vadd.f32 %v9693_v49, %v9581_v37  ;;  %v9476_v63 = vadd.f32 %v17437_v43, %v9363_v5  ;;  %10534 = vmatpush2.bf16.msra.mxu1 %v12344_v12  ;;  %v17445_v5 = vld [vmem:[#allocation176_spill] sm:$0xff]  ;;  %v17449_v14 = vld [vmem:[#allocation193_spill] sm:$0xff] }
 0x48f   :  { %v15777_v61 = vld [vmem:[#allocation5 + $0x1ef8] sm:$0xff]  ;;  %v10708_v31 = vmax.f32 %v9692_v32, 0.0  ;;  %v9478_v19 = vadd.f32 %v17440_v58, %v9365_v25  ;;  %v9369_v33 = vadd.f32 %v15415_v42, %v17441_v23  ;;  %v17447_v49 = vld [vmem:[#allocation104_spill] sm:$0xff]  ;;  %v17451_v48 = vld [vmem:[#allocation137_spill] sm:$0xff] }
 0x490   :  { %v17427_v6 = vld [vmem:[#allocation98_spill] sm:$0xff]  ;;  %v12337_v13 = vcombine.high %v15775_v26, %v15777_v61  ;;  %v12336_v22 = vcombine.low %v15775_v26, %v15777_v61  ;;  %v12472_v8 = vpack.c.bf16 %v10701_v28, %v10700_v7  ;;  %10421 = vmatpush2.bf16.msra.mxu0 %v12216_v11  ;;  %v9584_v26 = vpop.f32.mrf.mxu0  ;;  %v10709_v30 = vmax.f32 %v9694_v20, 0.0  ;;  %v17458_v58 = vld [vmem:[#allocation108_spill] sm:$0xff] }
 0x491   :  { %10255 = vmatmul.mubr.bf16.gmra.mxu0 %v17427_v6  ;;  %v15791_v60 = vld [vmem:[#allocation5 + $0x1a98] sm:$0xff]  ;;  %10422 = vmatprep.subr.bf16.mxu0 %v12209_v44  ;;  %v9585_v52 = vadd.f32 %v9584_v26, %v9472_v3  ;;  %v9482_v3 = vadd.f32 %v17451_v48, %v9369_v33 }
 0x492   :  { %v15793_v15 = vld [vmem:[#allocation5 + $0x1ab8] sm:$0xff]  ;;  %10264 = vmatprep.mubr.bf16.mxu0 %v17432_v10  ;;  %11174 = vst [vmem:[#allocation8 + $0x130] sm:$0xff] %v12472_v8  ;;  %10535 = vmatprep.subr.bf16.mxu1 %v12337_v13  ;;  %v9588_v12 = vpop.f32.mrf.mxu0  ;;  %v12476_v1 = vpack.c.bf16 %v10709_v30, %v10708_v31  ;;  %v9373_v13 = vadd.f32 %v17446_v0, %v17445_v5 }
 0x493   :  { %v17429_v9 = vld [vmem:[#allocation186_spill] sm:$0xff]  ;;  %v12200_v27 = vcombine.low %v15791_v60, %v15793_v15  ;;  %v12201_v4 = vcombine.high %v15791_v60, %v15793_v15  ;;  %v9589_v21 = vadd.f32 %v9588_v12, %v9476_v63  ;;  %10536 = vmatpush2.bf16.msra.mxu1 %v12336_v22  ;;  %v17456_v15 = vld [vmem:[#allocation161_spill] sm:$0xff] }
 0x494   :  { %v9470_v51 = vadd.f32 %v17429_v9, %v9357_v57  ;;  %v15804_v40 = vld [vmem:[#allocation5 + $0x1e98] sm:$0xff]  ;;  %v9695_v57 = vpop.f32.mrf.mxu1  ;;  %v17443_v9 = vld [vmem:[#allocation103_spill] sm:$0xff]  ;;  %10423 = vmatpush2.bf16.msra.mxu0 %v12208_v16  ;;  %v9590_v7 = vpop.f32.mrf.mxu0  ;;  %11178 = vst [vmem:[#allocation8 + $0x150] sm:$0xff] %v12476_v1 }
 0x495   :  { %v15806_v17 = vld [vmem:[#allocation5 + $0x1eb8] sm:$0xff]  ;;  %10378 = vmatmul.mubr.bf16.gmra.mxu1 %v17443_v9  ;;  %10424 = vmatprep.subr.bf16.mxu0 %v12201_v4  ;;  %v9591_v54 = vadd.f32 %v9590_v7, %v9478_v19  ;;  %v1234_v19 = vsub.s32 6, %v17458_v58 }
 0x496   :  { %v9583_v45 = vadd.f32 %v9582_v29, %v9470_v51  ;;  %v15821_v47 = vld [vmem:[#allocation5 + $0x1a58] sm:$0xff]  ;;  %v12329_v61 = vcombine.high %v15804_v40, %v15806_v17  ;;  %v9697_v62 = vpop.f32.mrf.mxu1  ;;  %v12328_v44 = vcombine.low %v15804_v40, %v15806_v17  ;;  %v9592_v25 = vpop.f32.mrf.mxu0  ;;  %v17450_v29 = vld [vmem:[#allocation105_spill] sm:$0xff] }
 0x497   :  { %v15823_v50 = vld [vmem:[#allocation5 + $0x1a78] sm:$0xff]  ;;  %v9698_v59 = vadd.f32 %v9697_v62, %v9585_v52  ;;  %10387 = vmatprep.mubr.bf16.mxu1 %v17450_v29  ;;  %v17455_v52 = vld [vmem:[#allocation169_spill] sm:$0xff] }
 0x498   :  { %v17439_v46 = vld [vmem:[#allocation166_spill] sm:$0xff]  ;;  %v9696_v11 = vadd.f32 %v9695_v57, %v9583_v45  ;;  %v12193_v35 = vcombine.high %v15821_v47, %v15823_v50  ;;  %v9701_v2 = vpop.f32.mrf.mxu1  ;;  %10537 = vmatprep.subr.bf16.mxu1 %v12329_v61  ;;  %v12192_v18 = vcombine.low %v15821_v47, %v15823_v50  ;;  %10425 = vmatpush2.bf16.msra.mxu0 %v12200_v27  ;;  %v17454_v47 = vld [vmem:[#allocation195_spill] sm:$0xff] }
 0x499   :  { %v9367_v41 = vadd.f32 %v17439_v46, %v17438_v55  ;;  %v15833_v56 = vld [vmem:[#allocation5 + $0x1e58] sm:$0xff]  ;;  %v10717_v37 = vmax.f32 %v9698_v59, 0.0  ;;  %v9702_v38 = vadd.f32 %v9701_v2, %v9589_v21  ;;  %v17453_v55 = vld [vmem:[#allocation177_spill] sm:$0xff]  ;;  %10538 = vmatpush2.bf16.msra.mxu1 %v12328_v44  ;;  %v9594_v46 = vpop.f32.mrf.mxu0  ;;  %v9379_v27 = vadd.f32 %v15459_v36, %v17456_v15  ;;  %v17459_v44 = vld [vmem:[#allocation107_spill] sm:$0xff] }
 0x49a   :  { %v15835_v34 = vld [vmem:[#allocation5 + $0x1e78] sm:$0xff]  ;;  %v10716_v32 = vmax.f32 %v9696_v11, 0.0  ;;  %v9703_v16 = vpop.f32.mrf.mxu1  ;;  %v9377_v50 = vadd.f32 %v17454_v47, %v17453_v55  ;;  %10426 = vmatprep.subr.bf16.mxu0 %v12193_v35  ;;  %v9595_v30 = vadd.f32 %v9594_v46, %v9482_v3  ;;  %v1238_v21 = vsub.s32 7, %v17458_v58  ;;  %v17469_v58 = vld [vmem:[#allocation116_spill] sm:$0xff] }
 0x49b   :  { %v17442_v6 = vld [vmem:[#allocation102_spill] sm:$0xff]  ;;  %v9480_v24 = vadd.f32 %v17444_v39, %v9367_v41  ;;  %v12321_v28 = vcombine.high %v15833_v56, %v15835_v34  ;;  %v12320_v22 = vcombine.low %v15833_v56, %v15835_v34  ;;  %v9704_v20 = vadd.f32 %v9703_v16, %v9591_v54  ;;  %v9598_v62 = vpop.f32.mrf.mxu0 }
 0x49c   :  { %10265 = vmatmul.mubr.bf16.gmra.mxu0 %v17442_v6  ;;  %v15849_v42 = vld [vmem:[#allocation5 + $0x1a18] sm:$0xff]  ;;  %v12480_v8 = vpack.c.bf16 %v10717_v37, %v10716_v32  ;;  %v9705_v57 = vpop.f32.mrf.mxu1  ;;  %v10724_v26 = vmax.f32 %v9702_v38, 0.0 }
 0x49d   :  { %v15851_v51 = vld [vmem:[#allocation5 + $0x1a38] sm:$0xff]  ;;  %10274 = vmatprep.mubr.bf16.mxu0 %v17447_v49  ;;  %v9593_v45 = vadd.f32 %v9592_v25, %v9480_v24  ;;  %v10725_v61 = vmax.f32 %v9704_v20, 0.0  ;;  %10539 = vmatprep.subr.bf16.mxu1 %v12321_v28  ;;  %v9600_v59 = vpop.f32.mrf.mxu0  ;;  %v17461_v24 = vld [vmem:[#allocation109_spill] sm:$0xff]  ;;  %v17463_v28 = vld [vmem:[#allocation168_spill] sm:$0xff] }
 0x49e   :  { %v15859_v10 = vld [vmem:[#allocation5 + $0x1e18] sm:$0xff]  ;;  %v12185_v4 = vcombine.high %v15849_v42, %v15851_v51  ;;  %11182 = vst [vmem:[#allocation8 + $0x170] sm:$0xff] %v12480_v8  ;;  %v9707_v11 = vpop.f32.mrf.mxu1  ;;  %v12184_v34 = vcombine.low %v15849_v42, %v15851_v51  ;;  %10388 = vmatmul.mubr.bf16.gmra.mxu1 %v17459_v44  ;;  %10427 = vmatpush2.bf16.msra.mxu0 %v12192_v18  ;;  %v17464_v18 = vld [vmem:[#allocation111_spill] sm:$0xff]  ;;  %v17465_v8 = vld [vmem:[#allocation112_spill] sm:$0xff] }
 0x49f   :  { %v1149_v40 = vld [vmem:[#allocation5 + $0x1e38] sm:$0xff]  ;;  %v9706_v31 = vadd.f32 %v9705_v57, %v9593_v45  ;;  %v12484_v23 = vpack.c.bf16 %v10725_v61, %v10724_v26  ;;  %v9708_v33 = vadd.f32 %v9707_v11, %v9595_v30  ;;  %10540 = vmatpush2.bf16.msra.mxu1 %v12320_v22  ;;  %v9602_v5 = vpop.f32.mrf.mxu0  ;;  %v9492_v32 = vadd.f32 %v17463_v28, %v9379_v27  ;;  %v17466_v20 = vld [vmem:[#allocation113_spill] sm:$0xff]  ;;  %v17468_v27 = vld [vmem:[#allocation115_spill] sm:$0xff] }
 0x4a0   :  { %v17448_v17 = vld [vmem:[#allocation174_spill] sm:$0xff]  ;;  %v12313_v41 = vcombine.high %v15859_v10, %v1149_v40  ;;  %v9711_v6 = vpop.f32.mrf.mxu1  ;;  %10428 = vmatprep.subr.bf16.mxu0 %v12185_v4  ;;  %v12312_v36 = vcombine.low %v15859_v10, %v1149_v40  ;;  %v17474_v28 = vld [vmem:[#allocation121_spill] sm:$0xff] }
 0x4a1   :  { %v9375_v53 = vadd.f32 %v17449_v14, %v17448_v17  ;;  %v17452_v43 = vld [vmem:[#allocation190_spill] sm:$0xff]  ;;  %11186 = vst [vmem:[#allocation8 + $0x190] sm:$0xff] %v12484_v23  ;;  %v10732_v2 = vmax.f32 %v9706_v31, 0.0  ;;  %v10733_v9 = vmax.f32 %v9708_v33, 0.0  ;;  %v9604_v49 = vpop.f32.mrf.mxu0 }
 0x4a2   :  { %v9486_v63 = vadd.f32 %v17452_v43, %v9373_v13  ;;  %v17457_v56 = vld [vmem:[#allocation106_spill] sm:$0xff]  ;;  %v9713_v39 = vpop.f32.mrf.mxu1  ;;  %10541 = vmatprep.subr.bf16.mxu1 %v12313_v41  ;;  %v12508_v13 = vld [vmem:[#allocation7] sm:$0xff]  ;;  %10429 = vmatpush2.bf16.msra.mxu0 %v12184_v34 }
 0x4a3   :  { %v9488_v60 = vadd.f32 %v17455_v52, %v9375_v53  ;;  %v17460_v35 = vld [vmem:[#allocation158_spill] sm:$0xff]  ;;  %v15891_v7 = vrot.slane %v12508_v13, %v1234_v19  ;;  %v12488_v37 = vpack.c.bf16 %v10733_v9, %v10732_v2  ;;  %10542 = vmatpush2.bf16.msra.mxu1 %v12312_v36  ;;  %v15894_v10 = vrot.slane %v12508_v13, %v1238_v21  ;;  %v9754_v29 = vpop.f32.mrf.mxu0  ;;  %v17470_v19 = vld [vmem:[#allocation117_spill] sm:$0xff]  ;;  %v17473_v13 = vld [vmem:[#allocation120_spill] sm:$0xff] }
 0x4a4   :  { %10275 = vmatmul.mubr.bf16.gmra.mxu0 %v17457_v56  ;;  %v9599_v12 = vadd.f32 %v9598_v62, %v9486_v63  ;;  %v9490_v1 = vadd.f32 %v17460_v35, %v9377_v50  ;;  %v17462_v0 = vld [vmem:[#allocation110_spill] sm:$0xff]  ;;  %v9715_v16 = vpop.f32.mrf.mxu1  ;;  %v9605_v53 = vadd.f32 %v9604_v49, %v9492_v32 }
 0x4a5   :  { %v9601_v51 = vadd.f32 %v9600_v59, %v9488_v60  ;;  %10430 = vmatprep.mubr.bf16.mxu0 %v17461_v24  ;;  %10543 = vmatprep.mubr.bf16.mxu1 %v17462_v0  ;;  %11190 = vst [vmem:[#allocation8 + $0x1b0] sm:$0xff] %v12488_v37  ;;  %v9755_v48 = vadd.f32 %v9754_v29, %v15891_v7  ;;  %v9756_v45 = vpop.f32.mrf.mxu0  ;;  %v17467_v57 = vld [vmem:[#allocation114_spill] sm:$0xff] }
 0x4a6   :  { %v9712_v42 = vadd.f32 %v9711_v6, %v9599_v12  ;;  %v9603_v54 = vadd.f32 %v9602_v5, %v9490_v1  ;;  %v9717_v25 = vpop.f32.mrf.mxu1  ;;  %10544 = vmatmul.mubr.bf16.vlgmr.msra.gmra.mxu1 %v17465_v8  ;;  %v9757_v47 = vadd.f32 %v9756_v45, %v15894_v10  ;;  %v17471_v33 = vld [vmem:[#allocation118_spill] sm:$0xff]  ;;  %v17478_v45 = vld [vmem:[#allocation125_spill] sm:$0xff] }
 0x4a7   :  { %v9714_v38 = vadd.f32 %v9713_v39, %v9601_v51  ;;  %v9718_v4 = vadd.f32 %v9717_v25, %v9605_v53  ;;  %10553 = vmatprep.mubr.bf16.mxu1 %v17467_v57  ;;  %v9758_v46 = vpop.f32.mrf.mxu0  ;;  %v17472_v39 = vld [vmem:[#allocation119_spill] sm:$0xff]  ;;  %v17475_v37 = vld [vmem:[#allocation122_spill] sm:$0xff] }
 0x4a8   :  { %v10740_v40 = vmax.f32 %v9712_v42, 0.0  ;;  %v9716_v14 = vadd.f32 %v9715_v16, %v9603_v54  ;;  %v9867_v3 = vpop.f32.mrf.mxu1  ;;  %v9759_v61 = vadd.f32 %v9758_v46, %v15891_v7 }
 0x4a9   :  { %v10741_v17 = vmax.f32 %v9714_v38, 0.0  ;;  %v10749_v63 = vmax.f32 %v9718_v4, 0.0  ;;  %v15901_v55 = vadd.f32 %v9867_v3, %v9755_v48  ;;  %v9760_v30 = vpop.f32.mrf.mxu0  ;;  %v17476_v4 = vld [vmem:[#allocation123_spill] sm:$0xff] }
 0x4aa   :  { %v10748_v43 = vmax.f32 %v9716_v14, 0.0  ;;  %v9869_v50 = vpop.f32.mrf.mxu1  ;;  %v9761_v52 = vadd.f32 %v9760_v30, %v15894_v10 }
 0x4ab   :  { %v12492_v22 = vpack.c.bf16 %v10741_v17, %v10740_v40  ;;  %v15904_v26 = vadd.f32 %v9869_v50, %v9757_v47  ;;  %v9764_v15 = vpop.f32.mrf.mxu0 }
 0x4ac   :  { %10431 = vmatmul.mubr.bf16.vlgmr.msra.gmra.mxu0 %v17464_v18  ;;  %v12496_v41 = vpack.c.bf16 %v10749_v63, %v10748_v43  ;;  %v9871_v31 = vpop.f32.mrf.mxu1  ;;  %v9765_v56 = vadd.f32 %v9764_v15, %v15891_v7  ;;  %v17479_v43 = vld [vmem:[#allocation126_spill] sm:$0xff] }
 0x4ad   :  { %10440 = vmatprep.mubr.bf16.mxu0 %v17466_v20  ;;  %11194 = vst [vmem:[#allocation8 + $0x1d0] sm:$0xff] %v12492_v22  ;;  %v15907_v11 = vadd.f32 %v9871_v31, %v9759_v61  ;;  %v9766_v23 = vpop.f32.mrf.mxu0  ;;  %v17477_v20 = vld [vmem:[#allocation124_spill] sm:$0xff] }
 0x4ae   :  { %11198 = vst [vmem:[#allocation8 + $0x1f0] sm:$0xff] %v12496_v41  ;;  %v9873_v60 = vpop.f32.mrf.mxu1  ;;  %10554 = vmatmul.mubr.bf16.gmra.mxu1 %v17469_v58  ;;  %v9767_v6 = vadd.f32 %v9766_v23, %v15894_v10  ;;  %v17481_v23 = vld [vmem:[#allocation128_spill] sm:$0xff] }
 0x4af   :  { %v15911_v62 = vadd.f32 %v9873_v60, %v9761_v52  ;;  %10563 = vmatprep.mubr.bf16.mxu1 %v17471_v33  ;;  %v9768_v35 = vpop.f32.mrf.mxu0  ;;  %v17482_v33 = vld [vmem:[#allocation130_spill] sm:$0xff] }
 0x4b0   :  { %v9877_v34 = vpop.f32.mrf.mxu1  ;;  %v9769_v59 = vadd.f32 %v9768_v35, %v15891_v7 }
 0x4b1   :  { %v15917_v12 = vadd.f32 %v9877_v34, %v9765_v56  ;;  %v9770_v21 = vpop.f32.mrf.mxu0  ;;  %v17480_v56 = vld [vmem:[#allocation127_spill] sm:$0xff] }
 0x4b2   :  { %v9879_v44 = vpop.f32.mrf.mxu1  ;;  %v9771_v9 = vadd.f32 %v9770_v21, %v15894_v10 }
 0x4b3   :  { %v15920_v1 = vadd.f32 %v9879_v44, %v9767_v6  ;;  %v9774_v51 = vpop.f32.mrf.mxu0  ;;  %v17483_v44 = vld [vmem:[#allocation131_spill] sm:$0xff] }
 0x4b4   :  { %10441 = vmatmul.mubr.bf16.gmra.mxu0 %v17468_v27  ;;  %v9881_v36 = vpop.f32.mrf.mxu1  ;;  %v9775_v5 = vadd.f32 %v9774_v51, %v15891_v7 }
 0x4b5   :  { %10450 = vmatprep.mubr.bf16.mxu0 %v17470_v19  ;;  %v15923_v2 = vadd.f32 %v9881_v36, %v9769_v59  ;;  %v9776_v32 = vpop.f32.mrf.mxu0 }
 0x4b6   :  { %v9883_v42 = vpop.f32.mrf.mxu1  ;;  %10564 = vmatmul.mubr.bf16.gmra.mxu1 %v17473_v13  ;;  %v9777_v54 = vadd.f32 %v9776_v32, %v15894_v10  ;;  %v17484_v32 = vld [vmem:[#allocation134_spill] sm:$0xff] }
 0x4b7   :  { %v15927_v24 = vadd.f32 %v9883_v42, %v9771_v9  ;;  %10573 = vmatprep.mubr.bf16.mxu1 %v17475_v37  ;;  %v9778_v49 = vpop.f32.mrf.mxu0 }
 0x4b8   :  { %v9887_v0 = vpop.f32.mrf.mxu1  ;;  %v9779_v17 = vadd.f32 %v9778_v49, %v15891_v7  ;;  %v17485_v49 = vld [vmem:[#allocation136_spill] sm:$0xff] }
 0x4b9   :  { %v15933_v38 = vadd.f32 %v9887_v0, %v9775_v5  ;;  %v9780_v53 = vpop.f32.mrf.mxu0 }
 0x4ba   :  { %v9889_v16 = vpop.f32.mrf.mxu1  ;;  %v9781_v29 = vadd.f32 %v9780_v53, %v15894_v10  ;;  %v17487_v53 = vld [vmem:[#allocation139_spill] sm:$0xff] }
 0x4bb   :  { %v15936_v40 = vadd.f32 %v9889_v16, %v9777_v54  ;;  %v9784_v22 = vpop.f32.mrf.mxu0 }
 0x4bc   :  { %10451 = vmatmul.mubr.bf16.gmra.mxu0 %v17472_v39  ;;  %v9891_v14 = vpop.f32.mrf.mxu1  ;;  %v9785_v3 = vadd.f32 %v9784_v22, %v15891_v7 }
 0x4bd   :  { %10460 = vmatprep.mubr.bf16.mxu0 %v17474_v28  ;;  %v15939_v25 = vadd.f32 %v9891_v14, %v9779_v17  ;;  %v9786_v57 = vpop.f32.mrf.mxu0  ;;  %v17486_v17 = vld [vmem:[#allocation138_spill] sm:$0xff] }
 0x4be   :  { %v9893_v18 = vpop.f32.mrf.mxu1  ;;  %10574 = vmatmul.mubr.bf16.gmra.mxu1 %v17477_v20  ;;  %v9787_v47 = vadd.f32 %v9786_v57, %v15894_v10 }
 0x4bf   :  { %v15943_v48 = vadd.f32 %v9893_v18, %v9781_v29  ;;  %10583 = vmatprep.mubr.bf16.mxu1 %v17479_v43  ;;  %v9788_v46 = vpop.f32.mrf.mxu0 }
 0x4c0   :  { %v9897_v8 = vpop.f32.mrf.mxu1  ;;  %v9789_v61 = vadd.f32 %v9788_v46, %v15891_v7  ;;  %v17488_v46 = vld [vmem:[#allocation142_spill] sm:$0xff] }
 0x4c1   :  { %v15949_v63 = vadd.f32 %v9897_v8, %v9785_v3  ;;  %v9790_v30 = vpop.f32.mrf.mxu0 }
 0x4c2   :  { %v9899_v50 = vpop.f32.mrf.mxu1  ;;  %v9791_v60 = vadd.f32 %v9790_v30, %v15894_v10 }
 0x4c3   :  { %v15952_v41 = vadd.f32 %v9899_v50, %v9787_v47  ;;  %v9794_v27 = vpop.f32.mrf.mxu0 }
 0x4c4   :  { %10461 = vmatmul.mubr.bf16.gmra.mxu0 %v17476_v4  ;;  %v9901_v31 = vpop.f32.mrf.mxu1  ;;  %v9795_v58 = vadd.f32 %v9794_v27, %v15891_v7 }
 0x4c5   :  { %10470 = vmatprep.mubr.bf16.mxu0 %v17478_v45  ;;  %v15955_v52 = vadd.f32 %v9901_v31, %v9789_v61  ;;  %v9796_v6 = vpop.f32.mrf.mxu0 }
 0x4c6   :  { %v9903_v15 = vpop.f32.mrf.mxu1  ;;  %10584 = vmatmul.mubr.bf16.gmra.mxu1 %v17481_v23  ;;  %v9797_v59 = vadd.f32 %v9796_v6, %v15894_v10 }
 0x4c7   :  { %v15959_v34 = vadd.f32 %v9903_v15, %v9791_v60  ;;  %10593 = vmatprep.mubr.bf16.mxu1 %v17483_v44  ;;  %v9798_v21 = vpop.f32.mrf.mxu0  ;;  %v17489_v60 = vld [vmem:[#allocation144_spill] sm:$0xff]  ;;  %v17490_v15 = vld [vmem:[#allocation146_spill] sm:$0xff] }
 0x4c8   :  { %v9907_v19 = vpop.f32.mrf.mxu1  ;;  %v9799_v42 = vadd.f32 %v9798_v21, %v15891_v7 }
 0x4c9   :  { %v15965_v35 = vadd.f32 %v9907_v19, %v9795_v58  ;;  %v9800_v39 = vpop.f32.mrf.mxu0 }
 0x4ca   :  { %v9909_v36 = vpop.f32.mrf.mxu1  ;;  %v9801_v0 = vadd.f32 %v9800_v39, %v15894_v10 }
 0x4cb   :  { %v15968_v9 = vadd.f32 %v9909_v36, %v9797_v59  ;;  %v9804_v28 = vpop.f32.mrf.mxu0 }
 0x4cc   :  { %10471 = vmatmul.mubr.bf16.gmra.mxu0 %v17480_v56  ;;  %v9911_v51 = vpop.f32.mrf.mxu1  ;;  %v9805_v54 = vadd.f32 %v9804_v28, %v15891_v7  ;;  %v17491_v56 = vld [vmem:[#allocation147_spill] sm:$0xff] }
 0x4cd   :  { %10480 = vmatprep.mubr.bf16.mxu0 %v17482_v33  ;;  %v15971_v5 = vadd.f32 %v9911_v51, %v9799_v42  ;;  %v9806_v14 = vpop.f32.mrf.mxu0 }
 0x4ce   :  { %v9913_v13 = vpop.f32.mrf.mxu1  ;;  %10594 = vmatmul.mubr.bf16.gmra.mxu1 %v17485_v49  ;;  %v9807_v18 = vadd.f32 %v9806_v14, %v15894_v10 }
 0x4cf   :  { %v15975_v37 = vadd.f32 %v9913_v13, %v9801_v0  ;;  %10603 = vmatprep.mubr.bf16.mxu1 %v17487_v53  ;;  %v9808_v4 = vpop.f32.mrf.mxu0  ;;  %v17492_v0 = vld [vmem:[#allocation148_spill] sm:$0xff] }
 0x4d0   :  { %v9917_v16 = vpop.f32.mrf.mxu1  ;;  %v9809_v8 = vadd.f32 %v9808_v4, %v15891_v7 }
 0x4d1   :  { %v15981_v29 = vadd.f32 %v9917_v16, %v9805_v54  ;;  %v9810_v45 = vpop.f32.mrf.mxu0  ;;  %v17493_v54 = vld [vmem:[#allocation149_spill] sm:$0xff] }
 0x4d2   :  { %v9919_v22 = vpop.f32.mrf.mxu1  ;;  %v9811_v43 = vadd.f32 %v9810_v45, %v15894_v10 }
 0x4d3   :  { %v15984_v3 = vadd.f32 %v9919_v22, %v9807_v18  ;;  %v9814_v50 = vpop.f32.mrf.mxu0 }
 0x4d4   :  { %10481 = vmatmul.mubr.bf16.gmra.mxu0 %v17484_v32  ;;  %v9921_v20 = vpop.f32.mrf.mxu1  ;;  %v9815_v31 = vadd.f32 %v9814_v50, %v15891_v7 }
 0x4d5   :  { %10490 = vmatprep.mubr.bf16.mxu0 %v17486_v17  ;;  %v15987_v57 = vadd.f32 %v9921_v20, %v9809_v8  ;;  %v9816_v27 = vpop.f32.mrf.mxu0 }
 0x4d6   :  { %v9923_v47 = vpop.f32.mrf.mxu1  ;;  %10604 = vmatmul.mubr.bf16.gmra.mxu1 %v17489_v60  ;;  %v9817_v19 = vadd.f32 %v9816_v27, %v15894_v10 }
 0x4d7   :  { %v15991_v61 = vadd.f32 %v9923_v47, %v9811_v43  ;;  %10613 = vmatprep.mubr.bf16.mxu1 %v17491_v56  ;;  %v9818_v33 = vpop.f32.mrf.mxu0 }
 0x4d8   :  { %v9927_v30 = vpop.f32.mrf.mxu1  ;;  %v9819_v44 = vadd.f32 %v9818_v33, %v15891_v7 }
 0x4d9   :  { %v15997_v58 = vadd.f32 %v9927_v30, %v9815_v31  ;;  %v9820_v36 = vpop.f32.mrf.mxu0 }
 0x4da   :  { %v9929_v23 = vpop.f32.mrf.mxu1  ;;  %v9821_v42 = vadd.f32 %v9820_v36, %v15894_v10 }
 0x4db   :  { %v16000_v6 = vadd.f32 %v9929_v23, %v9817_v19  ;;  %v9824_v39 = vpop.f32.mrf.mxu0 }
 0x4dc   :  { %10491 = vmatmul.mubr.bf16.gmra.mxu0 %v17488_v46  ;;  %v9931_v59 = vpop.f32.mrf.mxu1  ;;  %v9825_v28 = vadd.f32 %v9824_v39, %v15891_v7 }
 0x4dd   :  { %10500 = vmatprep.mubr.bf16.mxu0 %v17490_v15  ;;  %v16003_v21 = vadd.f32 %v9931_v59, %v9819_v44  ;;  %v9826_v16 = vpop.f32.mrf.mxu0 }
 0x4de   :  { %v9933_v51 = vpop.f32.mrf.mxu1  ;;  %10614 = vmatmul.mubr.bf16.gmra.mxu1 %v17493_v54  ;;  %v9827_v17 = vadd.f32 %v9826_v16, %v15894_v10 }
 0x4df   :  { %v16007_v13 = vadd.f32 %v9933_v51, %v9821_v42  ;;  %v9828_v53 = vpop.f32.mrf.mxu0 }
 0x4e0   :  { %v9937_v32 = vpop.f32.mrf.mxu1  ;;  %v9829_v22 = vadd.f32 %v9828_v53, %v15891_v7 }
 0x4e1   :  { %v16011_v49 = vadd.f32 %v9937_v32, %v9825_v28  ;;  %v9830_v8 = vpop.f32.mrf.mxu0 }
 0x4e2   :  { %v9939_v14 = vpop.f32.mrf.mxu1  ;;  %v9831_v45 = vadd.f32 %v9830_v8, %v15894_v10 }
 0x4e3   :  { %v16014_v18 = vadd.f32 %v9939_v14, %v9827_v17  ;;  %v9980_v47 = vpop.f32.mrf.mxu0 }
 0x4e4   :  { %10501 = vmatmul.mubr.bf16.gmra.mxu0 %v17492_v0  ;;  %v9941_v4 = vpop.f32.mrf.mxu1  ;;  %v9981_v46 = vadd.f32 %v9980_v47, %v15901_v55 }
 0x4e5   :  { %v16017_v20 = vadd.f32 %v9941_v4, %v9829_v22  ;;  %v9982_v30 = vpop.f32.mrf.mxu0 }
 0x4e6   :  { %v9943_v43 = vpop.f32.mrf.mxu1  ;;  %v9983_v15 = vadd.f32 %v9982_v30, %v15904_v26 }
 0x4e7   :  { %v16020_v50 = vadd.f32 %v9943_v43, %v9831_v45  ;;  %v9984_v7 = vpop.f32.mrf.mxu0 }
 0x4e8   :  { %v10093_v31 = vpop.f32.mrf.mxu1  ;;  %v9985_v19 = vadd.f32 %v9984_v7, %v15907_v11 }
 0x4e9   :  { %v16023_v60 = vadd.f32 %v10093_v31, %v9981_v46  ;;  %v9986_v10 = vpop.f32.mrf.mxu0 }
 0x4ea   :  { %v10095_v27 = vpop.f32.mrf.mxu1  ;;  %v9987_v44 = vadd.f32 %v9986_v10, %v15911_v62 }
 0x4eb   :  { %v16026_v56 = vadd.f32 %v10095_v27, %v9983_v15  ;;  %v9990_v55 = vpop.f32.mrf.mxu0 }
 0x4ec   :  { %v10097_v23 = vpop.f32.mrf.mxu1  ;;  %v9991_v42 = vadd.f32 %v9990_v55, %v15917_v12 }
 0x4ed   :  { %v16029_v33 = vadd.f32 %v10097_v23, %v9985_v19  ;;  %v9992_v26 = vpop.f32.mrf.mxu0 }
 0x4ee   :  { %v10099_v59 = vpop.f32.mrf.mxu1  ;;  %v9993_v0 = vadd.f32 %v9992_v26, %v15920_v1 }
 0x4ef   :  { %v16032_v36 = vadd.f32 %v10099_v59, %v9987_v44  ;;  %v9994_v11 = vpop.f32.mrf.mxu0 }
 0x4f0   :  { %v10103_v51 = vpop.f32.mrf.mxu1  ;;  %v9995_v54 = vadd.f32 %v9994_v11, %v15923_v2 }
 0x4f1   :  { %v16035_v39 = vadd.f32 %v10103_v51, %v9991_v42  ;;  %v9996_v62 = vpop.f32.mrf.mxu0 }
 0x4f2   :  { %v10105_v28 = vpop.f32.mrf.mxu1  ;;  %v9997_v14 = vadd.f32 %v9996_v62, %v15927_v24 }
 0x4f3   :  { %v16038_v32 = vadd.f32 %v10105_v28, %v9993_v0  ;;  %v10000_v12 = vpop.f32.mrf.mxu0 }
 0x4f4   :  { %v10107_v16 = vpop.f32.mrf.mxu1  ;;  %v10001_v4 = vadd.f32 %v10000_v12, %v15933_v38 }
 0x4f5   :  { %v16041_v17 = vadd.f32 %v10107_v16, %v9995_v54  ;;  %v10002_v1 = vpop.f32.mrf.mxu0 }
 0x4f6   :  { %v10109_v53 = vpop.f32.mrf.mxu1  ;;  %v10003_v43 = vadd.f32 %v10002_v1, %v15936_v40 }
 0x4f7   :  { %v16044_v22 = vadd.f32 %v10109_v53, %v9997_v14  ;;  %v10004_v2 = vpop.f32.mrf.mxu0 }
 0x4f8   :  { %v10113_v8 = vpop.f32.mrf.mxu1  ;;  %v10005_v31 = vadd.f32 %v10004_v2, %v15939_v25 }
 0x4f9   :  { %v16047_v45 = vadd.f32 %v10113_v8, %v10001_v4  ;;  %v10006_v24 = vpop.f32.mrf.mxu0 }
 0x4fa   :  { %v10115_v47 = vpop.f32.mrf.mxu1  ;;  %v10007_v27 = vadd.f32 %v10006_v24, %v15943_v48 }
 0x4fb   :  { %v16050_v46 = vadd.f32 %v10115_v47, %v10003_v43  ;;  %v10010_v38 = vpop.f32.mrf.mxu0 }
 0x4fc   :  { %v10117_v30 = vpop.f32.mrf.mxu1  ;;  %v10011_v23 = vadd.f32 %v10010_v38, %v15949_v63 }
 0x4fd   :  { %v16053_v15 = vadd.f32 %v10117_v30, %v10005_v31  ;;  %v10012_v40 = vpop.f32.mrf.mxu0 }
 0x4fe   :  { %v10119_v7 = vpop.f32.mrf.mxu1  ;;  %v10013_v59 = vadd.f32 %v10012_v40, %v15952_v41 }
 0x4ff   :  { %v16056_v19 = vadd.f32 %v10119_v7, %v10007_v27  ;;  %v10014_v25 = vpop.f32.mrf.mxu0 }
 0x500   :  { %v10123_v10 = vpop.f32.mrf.mxu1  ;;  %v10015_v51 = vadd.f32 %v10014_v25, %v15955_v52 }
 0x501   :  { %v16059_v44 = vadd.f32 %v10123_v10, %v10011_v23  ;;  %v10016_v48 = vpop.f32.mrf.mxu0 }
 0x502   :  { %v10125_v55 = vpop.f32.mrf.mxu1  ;;  %v10017_v28 = vadd.f32 %v10016_v48, %v15959_v34 }
 0x503   :  { %v16062_v42 = vadd.f32 %v10125_v55, %v10013_v59  ;;  %v10020_v63 = vpop.f32.mrf.mxu0 }
 0x504   :  { %v10127_v26 = vpop.f32.mrf.mxu1  ;;  %v10021_v16 = vadd.f32 %v10020_v63, %v15965_v35 }
 0x505   :  { %v16065_v0 = vadd.f32 %v10127_v26, %v10015_v51  ;;  %v10022_v41 = vpop.f32.mrf.mxu0 }
 0x506   :  { %v10129_v11 = vpop.f32.mrf.mxu1  ;;  %v10023_v53 = vadd.f32 %v10022_v41, %v15968_v9 }
 0x507   :  { %v16068_v54 = vadd.f32 %v10129_v11, %v10017_v28  ;;  %v10024_v52 = vpop.f32.mrf.mxu0 }
 0x508   :  { %v10133_v62 = vpop.f32.mrf.mxu1  ;;  %v10025_v8 = vadd.f32 %v10024_v52, %v15971_v5 }
 0x509   :  { %v16071_v14 = vadd.f32 %v10133_v62, %v10021_v16  ;;  %v10026_v34 = vpop.f32.mrf.mxu0 }
 0x50a   :  { %v10135_v12 = vpop.f32.mrf.mxu1  ;;  %v10027_v47 = vadd.f32 %v10026_v34, %v15975_v37 }
 0x50b   :  { %v16074_v4 = vadd.f32 %v10135_v12, %v10023_v53  ;;  %v10030_v35 = vpop.f32.mrf.mxu0 }
 0x50c   :  { %v10137_v1 = vpop.f32.mrf.mxu1  ;;  %v10031_v30 = vadd.f32 %v10030_v35, %v15981_v29 }
 0x50d   :  { %v16077_v43 = vadd.f32 %v10137_v1, %v10025_v8  ;;  %v10032_v9 = vpop.f32.mrf.mxu0 }
 0x50e   :  { %v10139_v2 = vpop.f32.mrf.mxu1  ;;  %v10033_v7 = vadd.f32 %v10032_v9, %v15984_v3 }
 0x50f   :  { %17494 = vst [vmem:[#allocation196_spill] sm:$0xff] %v16077_v43  ;;  %v16080_v31 = vadd.f32 %v10139_v2, %v10027_v47  ;;  %v10034_v5 = vpop.f32.mrf.mxu0 }
 0x510   :  { %v10143_v24 = vpop.f32.mrf.mxu1  ;;  %v10035_v10 = vadd.f32 %v10034_v5, %v15987_v57 }
 0x511   :  { %17495 = vst [vmem:[#allocation194_spill] sm:$0xff] %v16080_v31  ;;  %v16083_v27 = vadd.f32 %v10143_v24, %v10031_v30  ;;  %v10036_v37 = vpop.f32.mrf.mxu0 }
 0x512   :  { %v10145_v38 = vpop.f32.mrf.mxu1  ;;  %v10037_v55 = vadd.f32 %v10036_v37, %v15991_v61 }
 0x513   :  { %17496 = vst [vmem:[#allocation197_spill] sm:$0xff] %v16083_v27  ;;  %v16086_v23 = vadd.f32 %v10145_v38, %v10033_v7  ;;  %v10040_v29 = vpop.f32.mrf.mxu0 }
 0x514   :  { %v10147_v40 = vpop.f32.mrf.mxu1  ;;  %v10041_v26 = vadd.f32 %v10040_v29, %v15997_v58 }
 0x515   :  { %17497 = vst [vmem:[#allocation12_spill] sm:$0xff] %v16086_v23  ;;  %v16089_v59 = vadd.f32 %v10147_v40, %v10035_v10  ;;  %v10042_v3 = vpop.f32.mrf.mxu0 }
 0x516   :  { %v10149_v25 = vpop.f32.mrf.mxu1  ;;  %v10043_v11 = vadd.f32 %v10042_v3, %v16000_v6 }
 0x517   :  { %17498 = vst [vmem:[#allocation13_spill] sm:$0xff] %v16089_v59  ;;  %v16092_v51 = vadd.f32 %v10149_v25, %v10037_v55  ;;  %v10044_v57 = vpop.f32.mrf.mxu0 }
 0x518   :  { %v10153_v48 = vpop.f32.mrf.mxu1  ;;  %v10045_v62 = vadd.f32 %v10044_v57, %v16003_v21 }
 0x519   :  { %17499 = vst [vmem:[#allocation14_spill] sm:$0xff] %v16092_v51  ;;  %v16095_v28 = vadd.f32 %v10153_v48, %v10041_v26  ;;  %v10046_v61 = vpop.f32.mrf.mxu0 }
 0x51a   :  { %v10155_v63 = vpop.f32.mrf.mxu1  ;;  %v10047_v12 = vadd.f32 %v10046_v61, %v16007_v13 }
 0x51b   :  { %17500 = vst [vmem:[#allocation15_spill] sm:$0xff] %v16095_v28  ;;  %v16098_v16 = vadd.f32 %v10155_v63, %v10043_v11  ;;  %v10050_v58 = vpop.f32.mrf.mxu0 }
 0x51c   :  { %v10157_v41 = vpop.f32.mrf.mxu1  ;;  %v10051_v1 = vadd.f32 %v10050_v58, %v16011_v49 }
 0x51d   :  { %17501 = vst [vmem:[#allocation16_spill] sm:$0xff] %v16098_v16  ;;  %v16101_v53 = vadd.f32 %v10157_v41, %v10045_v62  ;;  %v10052_v6 = vpop.f32.mrf.mxu0 }
 0x51e   :  { %v10159_v52 = vpop.f32.mrf.mxu1  ;;  %v10053_v2 = vadd.f32 %v10052_v6, %v16014_v18 }
 0x51f   :  { %17502 = vst [vmem:[#allocation17_spill] sm:$0xff] %v16101_v53  ;;  %v16104_v8 = vadd.f32 %v10159_v52, %v10047_v12  ;;  %v10054_v21 = vpop.f32.mrf.mxu0 }
 0x520   :  { %v10163_v34 = vpop.f32.mrf.mxu1  ;;  %v10055_v24 = vadd.f32 %v10054_v21, %v16017_v20 }
 0x521   :  { %17503 = vst [vmem:[#allocation18_spill] sm:$0xff] %v16104_v8  ;;  %v16107_v47 = vadd.f32 %v10163_v34, %v10051_v1  ;;  %v10056_v13 = vpop.f32.mrf.mxu0 }
 0x522   :  { %v10165_v35 = vpop.f32.mrf.mxu1  ;;  %v10057_v38 = vadd.f32 %v10056_v13, %v16020_v50 }
 0x523   :  { %17504 = vst [vmem:[#allocation19_spill] sm:$0xff] %v16107_v47  ;;  %v16110_v30 = vadd.f32 %v10165_v35, %v10053_v2  ;;  %v10206_v49 = vpop.f32.mrf.mxu0 }
 0x524   :  { %v10167_v9 = vpop.f32.mrf.mxu1 }
 0x525   :  { %17505 = vst [vmem:[#allocation20_spill] sm:$0xff] %v16110_v30  ;;  %v16113_v7 = vadd.f32 %v10167_v9, %v10055_v24  ;;  %v10208_v37 = vpop.f32.mrf.mxu0 }
 0x526   :  { %v10169_v5 = vpop.f32.mrf.mxu1 }
 0x527   :  { %17506 = vst [vmem:[#allocation21_spill] sm:$0xff] %v16113_v7  ;;  %v16116_v10 = vadd.f32 %v10169_v5, %v10057_v38  ;;  %v10210_v55 = vpop.f32.mrf.mxu0 }
 0x528   :  { %v16118_v40 = vpop.f32.mrf.mxu1 }
 0x529   :  { %17507 = vst [vmem:[#allocation22_spill] sm:$0xff] %v16116_v10  ;;  %v16124_v29 = vpop.f32.mrf.mxu0 }
 0x52a   :  { %v16120_v18 = vpop.f32.mrf.mxu1 }
 0x52b   :  { %v16128_v26 = vpop.f32.mrf.mxu0 }
 0x52c   :  { %v16122_v25 = vpop.f32.mrf.mxu1 }
 0x52d   :  { %v16132_v50 = vpop.f32.mrf.mxu0 }
 0x52e   :  { %v16126_v20 = vpop.f32.mrf.mxu1 }
 0x52f   :  { %v16136_v11 = vpop.f32.mrf.mxu0 }
 0x530   :  { %v16130_v48 = vpop.f32.mrf.mxu1 }
 0x531   :  { %v16140_v57 = vpop.f32.mrf.mxu0 }
 0x532   :  { %v16134_v3 = vpop.f32.mrf.mxu1 }
 0x533   :  { %v16144_v41 = vpop.f32.mrf.mxu0 }
 0x534   :  { %v16138_v63 = vpop.f32.mrf.mxu1 }
 0x535   :  { %v16148_v12 = vpop.f32.mrf.mxu0 }
 0x536   :  { %v16142_v62 = vpop.f32.mrf.mxu1 }
 0x537   :  { %v16152_v58 = vpop.f32.mrf.mxu0 }
 0x538   :  { %v16146_v61 = vpop.f32.mrf.mxu1 }
 0x539   :  { %v16156_v34 = vpop.f32.mrf.mxu0 }
 0x53a   :  { %v16150_v52 = vpop.f32.mrf.mxu1 }
 0x53c   :  { %v16154_v1 = vpop.f32.mrf.mxu1  ;;  %v16160_v2 = vpop.f32.mrf.mxu0 }
 0x53e   :  { %v16158_v6 = vpop.f32.mrf.mxu1  ;;  %v16164_v21 = vpop.f32.mrf.mxu0 }
 0x540   :  { %v16162_v35 = vpop.f32.mrf.mxu1  ;;  %v16168_v9 = vpop.f32.mrf.mxu0 }
 0x542   :  { %v16166_v24 = vpop.f32.mrf.mxu1  ;;  %v16172_v38 = vpop.f32.mrf.mxu0 }
 0x544   :  { %v16170_v13 = vpop.f32.mrf.mxu1 }
 0x546   :  { %v16174_v5 = vpop.f32.mrf.mxu1 }
 0x547   :  { %v16176_v10 = vpop.f32.mrf.mxu0 }
 0x548   :  { %v16178_v7 = vpop.f32.mrf.mxu1 }
 0x549   :  { %v16180_v30 = vpop.f32.mrf.mxu0 }
 0x54a   :  { %v16182_v47 = vpop.f32.mrf.mxu1 }
 0x54b   :  { %17508 = vst [vmem:[#allocation23_spill] sm:$0xff] %v16182_v47  ;;  %v16184_v8 = vpop.f32.mrf.mxu0 }
 0x54c   :  { %17509 = vst [vmem:[#allocation24_spill] sm:$0xff] %v16184_v8  ;;  %v16186_v53 = vpop.f32.mrf.mxu1 }
 0x54d   :  { %17510 = vst [vmem:[#allocation25_spill] sm:$0xff] %v16186_v53  ;;  %v16188_v16 = vpop.f32.mrf.mxu0 }
 0x54e   :  { %17511 = vst [vmem:[#allocation26_spill] sm:$0xff] %v16188_v16  ;;  %v16190_v28 = vpop.f32.mrf.mxu1 }
 0x54f   :  { %17512 = vst [vmem:[#allocation27_spill] sm:$0xff] %v16190_v28 }
 0x550   :  { %v16194_v59 = vpop.f32.mrf.mxu1 }
 0x551   :  { %v16192_v51 = vpop.f32.mrf.mxu0  ;;  %17514 = vst [vmem:[#allocation29_spill] sm:$0xff] %v16194_v59 }
 0x552   :  { %17513 = vst [vmem:[#allocation28_spill] sm:$0xff] %v16192_v51  ;;  %v16198_v27 = vpop.f32.mrf.mxu1 }
 0x553   :  { %v16196_v23 = vpop.f32.mrf.mxu0  ;;  %17516 = vst [vmem:[#allocation31_spill] sm:$0xff] %v16198_v27 }
 0x554   :  { %17515 = vst [vmem:[#allocation30_spill] sm:$0xff] %v16196_v23  ;;  %v16202_v43 = vpop.f32.mrf.mxu1 }
 0x555   :  { %v16200_v31 = vpop.f32.mrf.mxu0  ;;  %17518 = vst [vmem:[#allocation33_spill] sm:$0xff] %v16202_v43 }
 0x556   :  { %17517 = vst [vmem:[#allocation32_spill] sm:$0xff] %v16200_v31  ;;  %v16206_v8 = vpop.f32.mrf.mxu1 }
 0x557   :  { %v16204_v47 = vpop.f32.mrf.mxu0  ;;  %17520 = vst [vmem:[#allocation35_spill] sm:$0xff] %v16206_v8 }
 0x558   :  { %17519 = vst [vmem:[#allocation34_spill] sm:$0xff] %v16204_v47  ;;  %v16210_v16 = vpop.f32.mrf.mxu1 }
 0x559   :  { %17522 = vst [vmem:[#allocation37_spill] sm:$0xff] %v16210_v16  ;;  %v10207_v16 = vadd.f32 %v10206_v49, %v16023_v60  ;;  %v10213_v60 = vadd.f32 %v16124_v29, %v16032_v36 }
 0x55a   :  { %v16214_v51 = vpop.f32.mrf.mxu1 }
 0x55b   :  { %17524 = vst [vmem:[#allocation39_spill] sm:$0xff] %v16214_v51  ;;  %v10209_v51 = vadd.f32 %v10208_v37, %v16026_v56  ;;  %v10217_v56 = vadd.f32 %v16128_v26, %v16035_v39  ;;  %v10221_v39 = vadd.f32 %v16136_v11, %v16041_v17  ;;  %v10227_v17 = vadd.f32 %v16144_v41, %v16047_v45 }
 0x55c   :  { %v16208_v53 = vpop.f32.mrf.mxu0  ;;  %v16218_v23 = vpop.f32.mrf.mxu1  ;;  %v10231_v45 = vadd.f32 %v16152_v58, %v16053_v15  ;;  %v10237_v15 = vadd.f32 %v16160_v2, %v16059_v44  ;;  %v10241_v44 = vadd.f32 %v16168_v9, %v16065_v0  ;;  %v10247_v0 = vadd.f32 %v16176_v10, %v16071_v14  ;;  %v17536_v14 = vld [vmem:[#allocation196_spill] sm:$0xff] }
 0x55d   :  { %17521 = vst [vmem:[#allocation36_spill] sm:$0xff] %v16208_v53  ;;  %17526 = vst [vmem:[#allocation41_spill] sm:$0xff] %v16218_v23  ;;  %v17537_v10 = vld [vmem:[#allocation24_spill] sm:$0xff] }
 0x55e   :  { %v16212_v28 = vpop.f32.mrf.mxu0  ;;  %v16222_v31 = vpop.f32.mrf.mxu1 }
 0x55f   :  { %17523 = vst [vmem:[#allocation38_spill] sm:$0xff] %v16212_v28  ;;  %17528 = vst [vmem:[#allocation43_spill] sm:$0xff] %v16222_v31  ;;  %v10320_v31 = vadd.f32 %v16118_v40, %v10207_v16 }
 0x560   :  { %v16216_v59 = vpop.f32.mrf.mxu0  ;;  %v16226_v47 = vpop.f32.mrf.mxu1 }
 0x561   :  { %17525 = vst [vmem:[#allocation40_spill] sm:$0xff] %v16216_v59  ;;  %17530 = vst [vmem:[#allocation45_spill] sm:$0xff] %v16226_v47 }
 0x562   :  { %v16220_v27 = vpop.f32.mrf.mxu0  ;;  %v16231_v53 = vpop.f32.mrf.mxu1 }
 0x563   :  { %17527 = vst [vmem:[#allocation42_spill] sm:$0xff] %v16220_v27  ;;  %17532 = vst [vmem:[#allocation47_spill] sm:$0xff] %v16231_v53 }
 0x564   :  { %v16224_v43 = vpop.f32.mrf.mxu0  ;;  %v16236_v59 = vpop.f32.mrf.mxu1 }
 0x565   :  { %17529 = vst [vmem:[#allocation44_spill] sm:$0xff] %v16224_v43  ;;  %17533 = vst [vmem:[#allocation48_spill] sm:$0xff] %v16236_v59  ;;  %v10211_v43 = vadd.f32 %v10210_v55, %v16029_v33  ;;  %v10219_v33 = vadd.f32 %v16132_v50, %v16038_v32 }
 0x566   :  { %v16228_v8 = vpop.f32.mrf.mxu0  ;;  %v16242_v27 = vpop.f32.mrf.mxu1 }
 0x567   :  { %17531 = vst [vmem:[#allocation46_spill] sm:$0xff] %v16228_v8  ;;  %17535 = vst [vmem:[#allocation50_spill] sm:$0xff] %v16242_v27  ;;  %v10322_v8 = vadd.f32 %v16120_v18, %v10209_v51  ;;  %v10324_v59 = vadd.f32 %v16122_v25, %v10211_v43  ;;  %v10326_v51 = vadd.f32 %v16126_v20, %v10213_v60 }
 0x568   :  { %v16233_v28 = vpop.f32.mrf.mxu0  ;;  %v10545_v53 = vpop.f32.mrf.mxu1  ;;  %v10332_v26 = vadd.f32 %v16134_v3, %v10219_v33  ;;  %v10223_v20 = vadd.f32 %v16140_v57, %v16044_v22 }
 0x56a   :  { %v16238_v23 = vpop.f32.mrf.mxu0  ;;  %v10547_v40 = vpop.f32.mrf.mxu1  ;;  %v10336_v57 = vadd.f32 %v16142_v62, %v10223_v20  ;;  %v10233_v62 = vadd.f32 %v16156_v34, %v16056_v19 }
 0x56b   :  { %17534 = vst [vmem:[#allocation49_spill] sm:$0xff] %v16238_v23 }
 0x56c   :  { %v10432_v47 = vpop.f32.mrf.mxu0  ;;  %v10549_v36 = vpop.f32.mrf.mxu1  ;;  %v10346_v34 = vadd.f32 %v16158_v6, %v10233_v62  ;;  %v10243_v6 = vadd.f32 %v16172_v38, %v16068_v54 }
 0x56d   :  { %v10433_v49 = vadd.f32 %v10432_v47, %v10320_v31  ;;  %v10330_v31 = vadd.f32 %v16130_v48, %v10217_v56  ;;  %v10334_v48 = vadd.f32 %v16138_v63, %v10221_v39 }
 0x56e   :  { %v10434_v37 = vpop.f32.mrf.mxu0  ;;  %v10551_v25 = vpop.f32.mrf.mxu1  ;;  %v10356_v38 = vadd.f32 %v16174_v5, %v10243_v6  ;;  %v17539_v5 = vld [vmem:[#allocation194_spill] sm:$0xff]  ;;  %v17548_v6 = vld [vmem:[#allocation13_spill] sm:$0xff] }
 0x56f   :  { %v10546_v23 = vadd.f32 %v10545_v53, %v10433_v49  ;;  %v10435_v16 = vadd.f32 %v10434_v37, %v10322_v8 }
 0x570   :  { %v10436_v55 = vpop.f32.mrf.mxu0  ;;  %v10555_v49 = vpop.f32.mrf.mxu1 }
 0x571   :  { %v10548_v18 = vadd.f32 %v10547_v40, %v10435_v16  ;;  %v10437_v27 = vadd.f32 %v10436_v55, %v10324_v59  ;;  %v10630_v29 = vmax.f32 %v10546_v23, 0.0  ;;  %v10229_v16 = vadd.f32 %v16148_v12, %v16050_v46 }
 0x572   :  { %v10438_v47 = vpop.f32.mrf.mxu0  ;;  %v10557_v3 = vpop.f32.mrf.mxu1 }
 0x573   :  { %v10631_v43 = vmax.f32 %v10548_v18, 0.0  ;;  %v10550_v53 = vadd.f32 %v10549_v36, %v10437_v27  ;;  %v10439_v8 = vadd.f32 %v10438_v47, %v10326_v51  ;;  %v10340_v51 = vadd.f32 %v16146_v61, %v10227_v17 }
 0x574   :  { %v10442_v32 = vpop.f32.mrf.mxu0  ;;  %v10559_v63 = vpop.f32.mrf.mxu1  ;;  %v10342_v46 = vadd.f32 %v16150_v52, %v10229_v16 }
 0x575   :  { %v12437_v50 = vpack.c.bf16 %v10631_v43, %v10630_v29  ;;  %v10552_v59 = vadd.f32 %v10551_v25, %v10439_v8  ;;  %v10443_v60 = vadd.f32 %v10442_v32, %v10330_v31  ;;  %v10638_v27 = vmax.f32 %v10550_v53, 0.0 }
 0x576   :  { %v10444_v23 = vpop.f32.mrf.mxu0  ;;  %v10561_v47 = vpop.f32.mrf.mxu1  ;;  %v10344_v8 = vadd.f32 %v16154_v1, %v10231_v45 }
 0x577   :  { %11139 = vst [vmem:[#allocation8 + $0x18] sm:$0xff] %v12437_v50  ;;  %v10639_v11 = vmax.f32 %v10552_v59, 0.0  ;;  %v10556_v56 = vadd.f32 %v10555_v49, %v10443_v60  ;;  %v10445_v37 = vadd.f32 %v10444_v23, %v10332_v26  ;;  %v10239_v50 = vadd.f32 %v16164_v21, %v16062_v42 }
 0x578   :  { %v10446_v22 = vpop.f32.mrf.mxu0  ;;  %v10565_v61 = vpop.f32.mrf.mxu1 }
 0x579   :  { %v12441_v40 = vpack.c.bf16 %v10639_v11, %v10638_v27  ;;  %v10558_v33 = vadd.f32 %v10557_v3, %v10445_v37  ;;  %v10447_v55 = vadd.f32 %v10446_v22, %v10334_v48  ;;  %v10646_v18 = vmax.f32 %v10556_v56, 0.0 }
 0x57a   :  { %v10448_v41 = vpop.f32.mrf.mxu0  ;;  %v10567_v52 = vpop.f32.mrf.mxu1  ;;  %v10350_v48 = vadd.f32 %v16162_v35, %v10237_v15  ;;  %v10352_v42 = vadd.f32 %v16166_v24, %v10239_v50  ;;  %v10354_v22 = vadd.f32 %v16170_v13, %v10241_v44 }
 0x57b   :  { %11143 = vst [vmem:[#allocation8 + $0x38] sm:$0xff] %v12441_v40  ;;  %v10647_v36 = vmax.f32 %v10558_v33, 0.0  ;;  %v10560_v31 = vadd.f32 %v10559_v63, %v10447_v55  ;;  %v10449_v39 = vadd.f32 %v10448_v41, %v10336_v57  ;;  %v10249_v63 = vadd.f32 %v16180_v30, %v16074_v4  ;;  %v17538_v4 = vld [vmem:[#allocation23_spill] sm:$0xff] }
 0x57c   :  { %v10452_v12 = vpop.f32.mrf.mxu0  ;;  %v10569_v1 = vpop.f32.mrf.mxu1 }
 0x57d   :  { %v12445_v29 = vpack.c.bf16 %v10647_v36, %v10646_v18  ;;  %v10562_v43 = vadd.f32 %v10561_v47, %v10449_v39  ;;  %v10453_v53 = vadd.f32 %v10452_v12, %v10340_v51  ;;  %v10654_v25 = vmax.f32 %v10560_v31, 0.0 }
 0x57e   :  { %v10454_v58 = vpop.f32.mrf.mxu0  ;;  %v10571_v56 = vpop.f32.mrf.mxu1  ;;  %v10360_v18 = vadd.f32 %v16178_v7, %v10247_v0  ;;  %v10251_v36 = vadd.f32 %v17537_v10, %v17536_v14  ;;  %v10362_v30 = vadd.f32 %v17538_v4, %v10249_v63  ;;  %v17552_v63 = vld [vmem:[#allocation34_spill] sm:$0xff]  ;;  %v17554_v14 = vld [vmem:[#allocation15_spill] sm:$0xff]  ;;  %v17555_v10 = vld [vmem:[#allocation36_spill] sm:$0xff] }
 0x57f   :  { %11147 = vst [vmem:[#allocation8 + $0x58] sm:$0xff] %v12445_v29  ;;  %v10655_v26 = vmax.f32 %v10562_v43, 0.0  ;;  %v10566_v32 = vadd.f32 %v10565_v61, %v10453_v53  ;;  %v10455_v20 = vadd.f32 %v10454_v58, %v10342_v46  ;;  %v17540_v43 = vld [vmem:[#allocation26_spill] sm:$0xff]  ;;  %v17541_v58 = vld [vmem:[#allocation25_spill] sm:$0xff]  ;;  %v17556_v4 = vld [vmem:[#allocation16_spill] sm:$0xff] }
 0x580   :  { %v10456_v19 = vpop.f32.mrf.mxu0  ;;  %v10575_v35 = vpop.f32.mrf.mxu1  ;;  %v10253_v53 = vadd.f32 %v17540_v43, %v17539_v5  ;;  %v17558_v43 = vld [vmem:[#allocation35_spill] sm:$0xff] }
 0x581   :  { %v12449_v59 = vpack.c.bf16 %v10655_v26, %v10654_v25  ;;  %v10568_v60 = vadd.f32 %v10567_v52, %v10455_v20  ;;  %v10457_v49 = vadd.f32 %v10456_v19, %v10344_v8  ;;  %v10662_v17 = vmax.f32 %v10566_v32, 0.0  ;;  %v17542_v26 = vld [vmem:[#allocation197_spill] sm:$0xff]  ;;  %v17543_v32 = vld [vmem:[#allocation28_spill] sm:$0xff] }
 0x582   :  { %v10458_v2 = vpop.f32.mrf.mxu0  ;;  %v10577_v24 = vpop.f32.mrf.mxu1  ;;  %v10364_v25 = vadd.f32 %v17541_v58, %v10251_v36  ;;  %v10257_v20 = vadd.f32 %v17543_v32, %v17542_v26  ;;  %v10267_v36 = vadd.f32 %v17555_v10, %v17554_v14  ;;  %v17559_v58 = vld [vmem:[#allocation37_spill] sm:$0xff]  ;;  %v17561_v32 = vld [vmem:[#allocation40_spill] sm:$0xff] }
 0x583   :  { %11151 = vst [vmem:[#allocation8 + $0x78] sm:$0xff] %v12449_v59  ;;  %v10663_v23 = vmax.f32 %v10568_v60, 0.0  ;;  %v10570_v27 = vadd.f32 %v10569_v1, %v10457_v49  ;;  %v10459_v11 = vadd.f32 %v10458_v2, %v10346_v34  ;;  %v17544_v49 = vld [vmem:[#allocation12_spill] sm:$0xff]  ;;  %v17545_v1 = vld [vmem:[#allocation30_spill] sm:$0xff]  ;;  %v17546_v2 = vld [vmem:[#allocation27_spill] sm:$0xff] }
 0x584   :  { %v10462_v21 = vpop.f32.mrf.mxu0  ;;  %v10579_v13 = vpop.f32.mrf.mxu1  ;;  %v17560_v26 = vld [vmem:[#allocation17_spill] sm:$0xff] }
 0x585   :  { %v12453_v37 = vpack.c.bf16 %v10663_v23, %v10662_v17  ;;  %v10572_v3 = vadd.f32 %v10571_v56, %v10459_v11  ;;  %v10463_v16 = vadd.f32 %v10462_v21, %v10350_v48  ;;  %v10670_v57 = vmax.f32 %v10570_v27, 0.0  ;;  %v17572_v14 = vld [vmem:[#allocation21_spill] sm:$0xff] }
 0x586   :  { %v10464_v9 = vpop.f32.mrf.mxu0  ;;  %v10581_v62 = vpop.f32.mrf.mxu1  ;;  %v10259_v48 = vadd.f32 %v17545_v1, %v17544_v49  ;;  %v10366_v17 = vadd.f32 %v17546_v2, %v10253_v53  ;;  %v17562_v49 = vld [vmem:[#allocation39_spill] sm:$0xff]  ;;  %v17564_v2 = vld [vmem:[#allocation42_spill] sm:$0xff]  ;;  %v10281_v10 = vadd.f32 %v16233_v28, %v17572_v14 }
 0x587   :  { %11155 = vst [vmem:[#allocation8 + $0x98] sm:$0xff] %v12453_v37  ;;  %v10671_v40 = vmax.f32 %v10572_v3, 0.0  ;;  %v10576_v33 = vadd.f32 %v10575_v35, %v10463_v16  ;;  %v10465_v55 = vadd.f32 %v10464_v9, %v10352_v42  ;;  %v17547_v42 = vld [vmem:[#allocation29_spill] sm:$0xff]  ;;  %v17549_v37 = vld [vmem:[#allocation32_spill] sm:$0xff] }
 0x588   :  { %v10466_v54 = vpop.f32.mrf.mxu0  ;;  %v10585_v7 = vpop.f32.mrf.mxu1  ;;  %v10370_v21 = vadd.f32 %v17547_v42, %v10257_v20  ;;  %v10261_v3 = vadd.f32 %v17549_v37, %v17548_v6  ;;  %v10271_v20 = vadd.f32 %v17561_v32, %v17560_v26  ;;  %v17565_v42 = vld [vmem:[#allocation41_spill] sm:$0xff]  ;;  %v17566_v6 = vld [vmem:[#allocation19_spill] sm:$0xff]  ;;  %v17567_v37 = vld [vmem:[#allocation44_spill] sm:$0xff] }
 0x589   :  { %v12457_v51 = vpack.c.bf16 %v10671_v40, %v10670_v57  ;;  %v10578_v45 = vadd.f32 %v10577_v24, %v10465_v55  ;;  %v10467_v41 = vadd.f32 %v10466_v54, %v10354_v22  ;;  %v10678_v39 = vmax.f32 %v10576_v33, 0.0  ;;  %v17550_v40 = vld [vmem:[#allocation31_spill] sm:$0xff]  ;;  %v17551_v24 = vld [vmem:[#allocation14_spill] sm:$0xff] }
 0x58a   :  { %v10468_v31 = vpop.f32.mrf.mxu0  ;;  %v10587_v60 = vpop.f32.mrf.mxu1  ;;  %v10372_v33 = vadd.f32 %v17550_v40, %v10259_v48  ;;  %v10263_v54 = vadd.f32 %v17552_v63, %v17551_v24  ;;  %v17568_v40 = vld [vmem:[#allocation20_spill] sm:$0xff]  ;;  %v17570_v63 = vld [vmem:[#allocation43_spill] sm:$0xff] }
 0x58b   :  { %11159 = vst [vmem:[#allocation8 + $0xb8] sm:$0xff] %v12457_v51  ;;  %v10679_v47 = vmax.f32 %v10578_v45, 0.0  ;;  %v10580_v46 = vadd.f32 %v10579_v13, %v10467_v41  ;;  %v10469_v12 = vadd.f32 %v10468_v31, %v10356_v38  ;;  %v17553_v13 = vld [vmem:[#allocation33_spill] sm:$0xff] }
 0x58c   :  { %v10472_v29 = vpop.f32.mrf.mxu0  ;;  %v10589_v56 = vpop.f32.mrf.mxu1  ;;  %v10376_v53 = vadd.f32 %v17558_v43, %v10263_v54 }
 0x58d   :  { %v12461_v61 = vpack.c.bf16 %v10679_v47, %v10678_v39  ;;  %v10582_v8 = vadd.f32 %v10581_v62, %v10469_v12  ;;  %v10473_v15 = vadd.f32 %v10472_v29, %v10360_v18  ;;  %v10686_v50 = vmax.f32 %v10580_v46, 0.0 }
 0x58e   :  { %v10474_v52 = vpop.f32.mrf.mxu0  ;;  %v10591_v57 = vpop.f32.mrf.mxu1  ;;  %v10374_v18 = vadd.f32 %v17553_v13, %v10261_v3  ;;  %v10277_v3 = vadd.f32 %v17567_v37, %v17566_v6  ;;  %v17571_v13 = vld [vmem:[#allocation45_spill] sm:$0xff] }
 0x58f   :  { %11163 = vst [vmem:[#allocation8 + $0xd8] sm:$0xff] %v12461_v61  ;;  %v10687_v19 = vmax.f32 %v10582_v8, 0.0  ;;  %v10586_v34 = vadd.f32 %v10585_v7, %v10473_v15  ;;  %v10475_v59 = vadd.f32 %v10474_v52, %v10362_v30  ;;  %v17557_v30 = vld [vmem:[#allocation38_spill] sm:$0xff] }
 0x590   :  { %v10476_v44 = vpop.f32.mrf.mxu0  ;;  %v10595_v41 = vpop.f32.mrf.mxu1  ;;  %v10269_v29 = vadd.f32 %v17557_v30, %v17556_v4 }
 0x591   :  { %v12465_v23 = vpack.c.bf16 %v10687_v19, %v10686_v50  ;;  %v10588_v27 = vadd.f32 %v10587_v60, %v10475_v59  ;;  %v10477_v11 = vadd.f32 %v10476_v44, %v10364_v25  ;;  %v10694_v35 = vmax.f32 %v10586_v34, 0.0  ;;  %v17563_v44 = vld [vmem:[#allocation18_spill] sm:$0xff] }
 0x592   :  { %v10478_v16 = vpop.f32.mrf.mxu0  ;;  %v10597_v62 = vpop.f32.mrf.mxu1  ;;  %v10380_v25 = vadd.f32 %v17559_v58, %v10267_v36  ;;  %v10382_v1 = vadd.f32 %v17562_v49, %v10269_v29  ;;  %v17574_v29 = vld [vmem:[#allocation22_spill] sm:$0xff] }
 0x593   :  { %11167 = vst [vmem:[#allocation8 + $0xf8] sm:$0xff] %v12465_v23  ;;  %v10695_v22 = vmax.f32 %v10588_v27, 0.0  ;;  %v10590_v0 = vadd.f32 %v10589_v56, %v10477_v11  ;;  %v10479_v9 = vadd.f32 %v10478_v16, %v10366_v17  ;;  %v10273_v17 = vadd.f32 %v17564_v2, %v17563_v44 }
 0x594   :  { %v10482_v55 = vpop.f32.mrf.mxu0  ;;  %v10599_v7 = vpop.f32.mrf.mxu1 }
 0x595   :  { %v12469_v38 = vpack.c.bf16 %v10695_v22, %v10694_v35  ;;  %v10592_v51 = vadd.f32 %v10591_v57, %v10479_v9  ;;  %v10483_v45 = vadd.f32 %v10482_v55, %v10370_v21  ;;  %v10702_v39 = vmax.f32 %v10590_v0, 0.0 }
 0x596   :  { %v10484_v31 = vpop.f32.mrf.mxu0  ;;  %v10601_v60 = vpop.f32.mrf.mxu1  ;;  %v10384_v21 = vadd.f32 %v17565_v42, %v10271_v20  ;;  %v10386_v54 = vadd.f32 %v17570_v63, %v10273_v17 }
 0x597   :  { %11171 = vst [vmem:[#allocation8 + $0x118] sm:$0xff] %v12469_v38  ;;  %v10703_v47 = vmax.f32 %v10592_v51, 0.0  ;;  %v10596_v46 = vadd.f32 %v10595_v41, %v10483_v45  ;;  %v10485_v12 = vadd.f32 %v10484_v31, %v10372_v33  ;;  %v17569_v33 = vld [vmem:[#allocation46_spill] sm:$0xff] }
 0x598   :  { %v10486_v5 = vpop.f32.mrf.mxu0  ;;  %v10605_v56 = vpop.f32.mrf.mxu1  ;;  %v10279_v55 = vadd.f32 %v17569_v33, %v17568_v40 }
 0x599   :  { %v12473_v61 = vpack.c.bf16 %v10703_v47, %v10702_v39  ;;  %v10598_v8 = vadd.f32 %v10597_v62, %v10485_v12  ;;  %v10487_v15 = vadd.f32 %v10486_v5, %v10374_v18  ;;  %v10710_v50 = vmax.f32 %v10596_v46, 0.0  ;;  %v17573_v62 = vld [vmem:[#allocation47_spill] sm:$0xff]  ;;  %v17575_v5 = vld [vmem:[#allocation49_spill] sm:$0xff] }
 0x59a   :  { %v10488_v52 = vpop.f32.mrf.mxu0  ;;  %v10607_v57 = vpop.f32.mrf.mxu1  ;;  %v10390_v18 = vadd.f32 %v17571_v13, %v10277_v3  ;;  %v10392_v4 = vadd.f32 %v17573_v62, %v10279_v55  ;;  %v10283_v43 = vadd.f32 %v17575_v5, %v17574_v29 }
 0x59b   :  { %11175 = vst [vmem:[#allocation8 + $0x138] sm:$0xff] %v12473_v61  ;;  %v10711_v19 = vmax.f32 %v10598_v8, 0.0  ;;  %v10600_v34 = vadd.f32 %v10599_v7, %v10487_v15  ;;  %v10489_v59 = vadd.f32 %v10488_v52, %v10376_v53  ;;  %v17576_v7 = vld [vmem:[#allocation48_spill] sm:$0xff] }
 0x59c   :  { %v10492_v48 = vpop.f32.mrf.mxu0  ;;  %v10609_v41 = vpop.f32.mrf.mxu1  ;;  %v10394_v58 = vadd.f32 %v17576_v7, %v10281_v10 }
 0x59d   :  { %v12477_v23 = vpack.c.bf16 %v10711_v19, %v10710_v50  ;;  %v10602_v27 = vadd.f32 %v10601_v60, %v10489_v59  ;;  %v10493_v11 = vadd.f32 %v10492_v48, %v10380_v25  ;;  %v10718_v35 = vmax.f32 %v10600_v34, 0.0  ;;  %v17577_v19 = vld [vmem:[#allocation50_spill] sm:$0xff] }
 0x59e   :  { %v10494_v16 = vpop.f32.mrf.mxu0  ;;  %v10611_v12 = vpop.f32.mrf.mxu1  ;;  %v10396_v34 = vadd.f32 %v17577_v19, %v10283_v43 }
 0x59f   :  { %11179 = vst [vmem:[#allocation8 + $0x158] sm:$0xff] %v12477_v23  ;;  %v10719_v22 = vmax.f32 %v10602_v27, 0.0  ;;  %v10606_v0 = vadd.f32 %v10605_v56, %v10493_v11  ;;  %v10495_v9 = vadd.f32 %v10494_v16, %v10382_v1 }
 0x5a0   :  { %v10496_v24 = vpop.f32.mrf.mxu0  ;;  %v10615_v15 = vpop.f32.mrf.mxu1 }
 0x5a1   :  { %v12481_v38 = vpack.c.bf16 %v10719_v22, %v10718_v35  ;;  %v10608_v51 = vadd.f32 %v10607_v57, %v10495_v9  ;;  %v10497_v45 = vadd.f32 %v10496_v24, %v10384_v21  ;;  %v10726_v31 = vmax.f32 %v10606_v0, 0.0 }
 0x5a2   :  { %v10498_v36 = vpop.f32.mrf.mxu0  ;;  %v10617_v52 = vpop.f32.mrf.mxu1 }
 0x5a3   :  { %11183 = vst [vmem:[#allocation8 + $0x178] sm:$0xff] %v12481_v38  ;;  %v10727_v39 = vmax.f32 %v10608_v51, 0.0  ;;  %v10610_v47 = vadd.f32 %v10609_v41, %v10497_v45  ;;  %v10499_v46 = vadd.f32 %v10498_v36, %v10386_v54 }
 0x5a4   :  { %v10502_v30 = vpop.f32.mrf.mxu0  ;;  %v10619_v1 = vpop.f32.mrf.mxu1 }
 0x5a5   :  { %v12485_v53 = vpack.c.bf16 %v10727_v39, %v10726_v31  ;;  %v10612_v61 = vadd.f32 %v10611_v12, %v10499_v46  ;;  %v10503_v8 = vadd.f32 %v10502_v30, %v10390_v18  ;;  %v10734_v25 = vmax.f32 %v10610_v47, 0.0 }
 0x5a6   :  { %v10504_v28 = vpop.f32.mrf.mxu0  ;;  %v10621_v27 = vpop.f32.mrf.mxu1 }
 0x5a7   :  { %11187 = vst [vmem:[#allocation8 + $0x198] sm:$0xff] %v12485_v53  ;;  %v10735_v26 = vmax.f32 %v10612_v61, 0.0  ;;  %v10616_v32 = vadd.f32 %v10615_v15, %v10503_v8  ;;  %v10505_v20 = vadd.f32 %v10504_v28, %v10392_v4 }
 0x5a8   :  { %v10506_v50 = vpop.f32.mrf.mxu0 }
 0x5a9   :  { %v12489_v59 = vpack.c.bf16 %v10735_v26, %v10734_v25  ;;  %v10618_v60 = vadd.f32 %v10617_v52, %v10505_v20  ;;  %v10507_v49 = vadd.f32 %v10506_v50, %v10394_v58  ;;  %v10742_v44 = vmax.f32 %v10616_v32, 0.0 }
 0x5aa   :  { %v10508_v48 = vpop.f32.mrf.mxu0 }
 0x5ab   :  { %11191 = vst [vmem:[#allocation8 + $0x1b8] sm:$0xff] %v12489_v59  ;;  %v10743_v2 = vmax.f32 %v10618_v60, 0.0  ;;  %v10620_v17 = vadd.f32 %v10619_v1, %v10507_v49  ;;  %v10509_v23 = vadd.f32 %v10508_v48, %v10396_v34 }
 0x5ad   :  { %v12493_v11 = vpack.c.bf16 %v10743_v2, %v10742_v44  ;;  %v10622_v56 = vadd.f32 %v10621_v27, %v10509_v23  ;;  %v10750_v42 = vmax.f32 %v10620_v17, 0.0 }
 0x5af   :  { %11195 = vst [vmem:[#allocation8 + $0x1d8] sm:$0xff] %v12493_v11  ;;  %v10751_v21 = vmax.f32 %v10622_v56, 0.0 }
 0x5b1   :  { %v12497_v6 = vpack.c.bf16 %v10751_v21, %v10750_v42 }
 0x5b3   :  { %11199 = vst [vmem:[#allocation8 + $0x1f8] sm:$0xff] %v12497_v6 }
 0x5b4   :  { %12580 = shalt.err (!%p12577_p5)
}
 0x5b5   :  { %11211 = dma.vmem_to_hbm [thread:$0]  %s11206_s2, 8192, %s16342_s3, [#allocation4], %s12596_s15, %s12596_s15, %s12597_s16  }
 0x5b6   :  { %12593 = dma.done.wait [#allocation4], 8192  }
 0x5b7   :  { %12594 = vsyncadd [#allocation4], 4294959104 }
 0x5b8   :  { %11215 = vsyncpa [#allocation3], 1 }
 0x5b9   :  { %11216 = vsyncpa [#allocation6], 1 }
 0x5ba   :  { %11217 = vsyncpa [#allocation4], 1 }

</bundles_post_ra>
